<compile_context>
chip_gen: v5e
topology: v5e:2x2
jax: 0.10.0
libtpu: 0.0.40
codegen_flags: <defaults>
</compile_context>

<pallas_src>
import jax
import jax.numpy as jnp
import numpy as np
from jax.experimental import pallas as pl
from jax.experimental.pallas import tpu as pltpu


def ffm_forward(x, params):
    N, Cin, V = x.shape
    w1, w2, w3 = params["w1"], params["w2"], params["w3"]
    b1, b2, b3 = params["b1"], params["b2"], params["b3"]
    fc_w, fc_b = params["fc_w"], params["fc_b"]
    Cout = w1.shape[0]
    node = fc_w.shape[0]

    # Constraints inherited from the PyTorch module's reshapes / einsum.
    assert node == V, "einsum 'btcn,nk' silently requires node_num == V"
    assert N % V == 0, "y2.reshape(V, -1) must split whole samples per row"
    assert (N * Cin) % (128 * 5 * Cout) == 0, "x.reshape(-1, 128*5, C, V)"

    NV = N * V
    NC = N // V                # samples per y2_mat row
    CN = Cout * node
    f32 = jnp.float32
    pow2 = lambda k: (k & (k - 1)) == 0

    # ----------------- wrapper glue: small XLA relayouts of the operands -----------------
    # x channels-major, flattened over (n, v), zero padded by 2 lanes each side.
    xt = jnp.transpose(x, (1, 0, 2)).reshape(Cin, NV).astype(f32)
    pad_hi = 2 + ((-(NV + 4)) % 128)
    xtp = jnp.pad(xt, ((0, 0), (2, pad_hi)))                          # (Cin, >= NV+4)

    # Three conv kernels zero-embedded on a common 5-tap grid, transposed, + bias column.
    def embed_T(w):
        K = w.shape[2]
        off = 2 - K // 2
        wt = jnp.transpose(w, (0, 2, 1)).reshape(Cout, K * Cin).astype(f32)
        blk = jnp.zeros((Cout, 5 * Cin), f32)
        return blk.at[:, off * Cin:(off + K) * Cin].set(wt)

    wcat = jnp.concatenate([embed_T(w1), embed_T(w2), embed_T(w3)], axis=0)  # (3Cout, 5Cin)
    bcat = jnp.concatenate([b1, b2, b3]).reshape(3 * Cout, 1).astype(f32)
    wb = jnp.concatenate([wcat, bcat], axis=1)                               # (3Cout, 5Cin+1)

    # fc1 weight permuted so its row axis matches the kernel's (n', v) lane order.
    fcw_wide = (fc_w.astype(f32)
                .reshape(node, NC, Cout, V)
                .transpose(1, 3, 2, 0)
                .reshape(NC * V, CN))                                        # (N, Cout*node)
    fcw_red = fcw_wide.reshape(NC, V, CN).sum(axis=0)                        # (V, Cout*node)
    fcb_row = fc_b.reshape(1, node).astype(f32)

    # x again, as (V, N*Cin) so the final einsum writes a lane-dense (V, N*Cin) result.
    x2dt = jnp.transpose(x, (2, 0, 1)).reshape(V, N * Cin).astype(f32)

    # --------------------------------- fused kernel ---------------------------------
    def kernel(xtp_ref, wb_ref, fcww_ref, fcwr_ref, fcb_ref, x2dt_ref, out_ref):
        wb_v = wb_ref[...]
        wcat_v = wb_v[:, :5 * Cin]                      # (3Cout, 5Cin)
        bias = wb_v[:, 5 * Cin:5 * Cin + 1]             # (3Cout, 1)
        xall = xtp_ref[...]                             # (Cin, padded)

        # position-within-sample (v) for every lane of the flattened (n, v) axis
        lane = jax.lax.broadcasted_iota(jnp.int32, (1, NV), 1)
        vpos = jnp.bitwise_and(lane, V - 1) if pow2(V) else lane % V

        # ---- conv1/2/3 fused: 5 shifted taps x one concatenated weight, transposed ----
        acc = None
        for t in range(5):
            d = t - 2
            tap = xall[:, 2 + d:2 + d + NV]             # (Cin, NV) shifted view
            if d != 0:
                ok = jnp.logical_and(vpos + d >= 0, vpos + d <= V - 1)
                tap = jnp.where(ok, tap, 0.0)           # zero the cross-sample leakage
            part = jnp.dot(wcat_v[:, t * Cin:(t + 1) * Cin], tap,
                           preferred_element_type=jnp.float32)
            acc = part if acc is None else acc + part
        g_all = jnp.maximum(acc + bias, 0.0)            # (3Cout, NV), lane-dense

        g1 = g_all[0:Cout, :]                                              # == x_l
        y3 = g1 + g_all[Cout:2 * Cout, :] + g_all[2 * Cout:3 * Cout, :]    # (Cout, NV)

        # ---- batch sum over n: (Cout, NV) -> (Cout, V) via lane folding + tiny selector ----
        tl = y3
        L = NV
        while L > 1024 and (L // 2) % 128 == 0 and (L // 2) % V == 0:
            h = L // 2
            tl = tl[:, :h] + tl[:, h:]
            L = h
        li = jax.lax.broadcasted_iota(jnp.int32, (L, V), 0)
        vi = jax.lax.broadcasted_iota(jnp.int32, (L, V), 1)
        lim = jnp.bitwise_and(li, V - 1) if pow2(V) else li % V
        sel = jnp.where(lim == vi, 1.0, 0.0)
        ysum = jnp.dot(tl, sel, preferred_element_type=jnp.float32)        # (Cout, V)

        # ---- fc1 + bias.  Linearity: logits = fc1(g1 per row) + fc1_reduced(ysum) + b ----
        fcww = fcww_ref[...]                            # (N, Cout*node)
        fcwr = fcwr_ref[...]                            # (V, Cout*node)

        o_i = jax.lax.broadcasted_iota(jnp.int32, (Cout, CN), 0)
        j_i = jax.lax.broadcasted_iota(jnp.int32, (Cout, CN), 1)
        bdmask = jnp.where(
            jnp.logical_and(j_i >= o_i * node, j_i < (o_i + 1) * node), 1.0, 0.0)

        f_i = jax.lax.broadcasted_iota(jnp.int32, (CN, node), 0)
        m_i = jax.lax.broadcasted_iota(jnp.int32, (CN, node), 1)
        fim = jnp.bitwise_and(f_i, node - 1) if pow2(node) else f_i % node
        fold = jnp.where(fim == m_i, 1.0, 0.0)

        def blockdiag_row(prod):                        # (Cout, Cout*node) -> (1, node)
            s = jnp.sum(prod * bdmask, axis=0, keepdims=True)
            return jnp.dot(s, fold, preferred_element_type=jnp.float32)

        ys_row = blockdiag_row(
            jnp.dot(ysum, fcwr, preferred_element_type=jnp.float32))       # (1, node)

        row_ids = jax.lax.broadcasted_iota(jnp.int32, (V, node), 0)
        logits_g1 = jnp.zeros((V, node), jnp.float32)
        for r in range(V):
            ch = g1[:, r * N:(r + 1) * N]               # (Cout, N) = y2_mat row r's samples
            pr = jnp.dot(ch, fcww, preferred_element_type=jnp.float32)     # (Cout, CN)
            logits_g1 = logits_g1 + jnp.where(row_ids == r, blockdiag_row(pr), 0.0)

        logits = logits_g1 + ys_row + fcb_ref[...]                         # (V, node)

        # numerically-stable logistic (== the module's numpy sigmoid)
        z1 = 0.5 * (jnp.tanh(0.5 * logits) + 1.0)

        # ---- final einsum 'btcn,nk->btck' as one lane-dense matmul ----
        out_ref[...] = jnp.dot(z1, x2dt_ref[...], preferred_element_type=jnp.float32)

    vm = pl.BlockSpec(memory_space=pltpu.MemorySpace.VMEM)
    out_t = pl.pallas_call(
        kernel,
        out_shape=jax.ShapeDtypeStruct((V, N * Cin), jnp.float32),
        in_specs=[vm] * 6,
        out_specs=vm,
    )(xtp, wb, fcw_wide, fcw_red, fcb_row, x2dt)

    # cheap wrapper transpose back to the module's output layout
    return jnp.transpose(out_t).reshape(-1, 128 * 5, Cout, V)


# ---------------------------------------------------------------------------------
# Pure-JAX reference (direct transcription of the PyTorch forward)
# ---------------------------------------------------------------------------------
def ffm_reference(x, params):
    hp = jax.lax.Precision.HIGHEST

    def conv_relu(w, b, pad):
        out = jax.lax.conv_general_dilated(
            x, w, window_strides=(1,), padding=[(pad, pad)],
            dimension_numbers=("NCH", "OIH", "NCH"), precision=hp)
        return jnp.maximum(out + b[None, :, None], 0.0)

    g1 = conv_relu(params["w1"], params["b1"], 0)
    g2 = conv_relu(params["w2"], params["b2"], 1)
    g3 = conv_relu(params["w3"], params["b3"], 2)
    y = jnp.transpose(g1 + g2 + g3, (1, 0, 2))            # (C, NT, V)
    C, NT, V = y.shape
    ysum = jnp.sum(y, axis=1)                             # (C, V)
    y1 = jnp.broadcast_to(ysum[None], (NT, C, V))
    y2 = (y1 + g1).reshape(V, -1)                         # (V, NT*C)
    logits = jnp.dot(y2, params["fc_w"].T, precision=hp) + params["fc_b"]
    z1t = jax.nn.sigmoid(logits).T                        # (node_num, V)
    xr = x.reshape(-1, 128 * 5, C, V)
    return jnp.einsum("btcn,nk->btck", xr, z1t, precision=hp)


if __name__ == "__main__":
    # Shapes consistent with the module's hard-coded constraints:
    #   N * C_in must be a multiple of 640 * C_out, and node_num == V.
    N, Cin, Cout, V = 640, 4, 4, 8
    node_num = V

    key = jax.random.PRNGKey(0)
    kx, k1, k2, k3, k4, k5, k6, k7, k8 = jax.random.split(key, 9)
    x = jax.random.normal(kx, (N, Cin, V), jnp.float32)
    params = dict(
        w1=jax.random.normal(k1, (Cout, Cin, 1), jnp.float32) * 0.10,
        b1=jax.random.normal(k2, (Cout,), jnp.float32) * 0.10,
        w2=jax.random.normal(k3, (Cout, Cin, 3), jnp.float32) * 0.10,
        b2=jax.random.normal(k4, (Cout,), jnp.float32) * 0.10,
        w3=jax.random.normal(k5, (Cout, Cin, 5), jnp.float32) * 0.10,
        b3=jax.random.normal(k6, (Cout,), jnp.float32) * 0.10,
        # fc1 is re-created inside forward() in PyTorch; fixed deterministically here.
        fc_w=jax.random.normal(k7, (node_num, N * Cout), jnp.float32) * 3e-4,
        fc_b=jax.random.normal(k8, (node_num,), jnp.float32) * 0.10,
    )

    out = jax.jit(ffm_forward)(x, params)
    out = jax.block_until_ready(out)

    ref = ffm_reference(x, params)
    assert out.shape == ((N * Cin) // (128 * 5 * Cout), 128 * 5, Cout, V)
    np.testing.assert_allclose(np.asarray(out), np.asarray(ref),
                               rtol=5e-2, atol=5e-2)
    print("KERNEL_OK")
</pallas_src>

<mosaic_0001>
module attributes {stable_mosaic.version = 11 : i64} {
  func.func @kernel(%arg0: memref<4x5248xf32, #tpu.memory_space<vmem>>, %arg1: memref<12x21xf32, #tpu.memory_space<vmem>>, %arg2: memref<640x32xf32, #tpu.memory_space<vmem>>, %arg3: memref<8x32xf32, #tpu.memory_space<vmem>>, %arg4: memref<1x8xf32, #tpu.memory_space<vmem>>, %arg5: memref<8x2560xf32, #tpu.memory_space<vmem>>, %arg6: memref<8x2560xf32, #tpu.memory_space<vmem>>) attributes {dimension_semantics = [], scalar_prefetch = 0 : i64, scratch_operands = 0 : i64, tpu.core_type = #tpu.core_type<tc>} {
    %c0 = arith.constant 0 : index
    %c0_0 = arith.constant 0 : index
    %0 = vector.load %arg1[%c0, %c0_0] : memref<12x21xf32, #tpu.memory_space<vmem>>, vector<12x21xf32>
    %1 = vector.extract_strided_slice %0 {offsets = [0, 0], sizes = [12, 20], strides = [1, 1]} : vector<12x21xf32> to vector<12x20xf32>
    %2 = vector.extract_strided_slice %0 {offsets = [0, 20], sizes = [12, 1], strides = [1, 1]} : vector<12x21xf32> to vector<12x1xf32>
    %c0_1 = arith.constant 0 : index
    %c0_2 = arith.constant 0 : index
    %3 = vector.load %arg0[%c0_1, %c0_2] : memref<4x5248xf32, #tpu.memory_space<vmem>>, vector<4x5248xf32>
    %4 = tpu.iota {dimensions = array<i32: 1>} : vector<1x5120xi32>
    %c7_i32 = arith.constant 7 : i32
    %5 = vector.broadcast %c7_i32 : i32 to vector<1x5120xi32>
    %6 = arith.andi %4, %5 : vector<1x5120xi32>
    %7 = vector.extract_strided_slice %3 {offsets = [0, 0], sizes = [4, 5120], strides = [1, 1]} : vector<4x5248xf32> to vector<4x5120xf32>
    %c-2_i32 = arith.constant -2 : i32
    %8 = vector.broadcast %c-2_i32 : i32 to vector<1x5120xi32>
    %9 = arith.addi %6, %8 : vector<1x5120xi32>
    %c0_i32 = arith.constant 0 : i32
    %10 = vector.broadcast %c0_i32 : i32 to vector<1x5120xi32>
    %11 = arith.cmpi sge, %9, %10 : vector<1x5120xi32>
    %c-2_i32_3 = arith.constant -2 : i32
    %12 = vector.broadcast %c-2_i32_3 : i32 to vector<1x5120xi32>
    %13 = arith.addi %6, %12 : vector<1x5120xi32>
    %c7_i32_4 = arith.constant 7 : i32
    %14 = vector.broadcast %c7_i32_4 : i32 to vector<1x5120xi32>
    %15 = arith.cmpi sle, %13, %14 : vector<1x5120xi32>
    %16 = arith.andi %11, %15 : vector<1x5120xi1>
    %cst = arith.constant 0.000000e+00 : f32
    %17 = vector.shape_cast %16 : vector<1x5120xi1> to vector<1x5120xi1>
    %18 = vector.broadcast %17 : vector<1x5120xi1> to vector<4x5120xi1>
    %19 = vector.broadcast %cst : f32 to vector<4x5120xf32>
    %20 = arith.select %18, %7, %19 : vector<4x5120xi1>, vector<4x5120xf32>
    %21 = vector.extract_strided_slice %1 {offsets = [0, 0], sizes = [12, 4], strides = [1, 1]} : vector<12x20xf32> to vector<12x4xf32>
    %cst_5 = arith.constant dense<0.000000e+00> : vector<12x5120xf32>
    %22 = tpu.matmul %21, %20, %cst_5 {dimension_numbers = #tpu.dot_dimension_numbers<[1], [0], [0], [1], [0, 0, 1, 1], [], []>} : vector<12x4xf32>, vector<4x5120xf32>, vector<12x5120xf32> -> vector<12x5120xf32>
    %23 = vector.extract_strided_slice %3 {offsets = [0, 1], sizes = [4, 5120], strides = [1, 1]} : vector<4x5248xf32> to vector<4x5120xf32>
    %c-1_i32 = arith.constant -1 : i32
    %24 = vector.broadcast %c-1_i32 : i32 to vector<1x5120xi32>
    %25 = arith.addi %6, %24 : vector<1x5120xi32>
    %c0_i32_6 = arith.constant 0 : i32
    %26 = vector.broadcast %c0_i32_6 : i32 to vector<1x5120xi32>
    %27 = arith.cmpi sge, %25, %26 : vector<1x5120xi32>
    %c-1_i32_7 = arith.constant -1 : i32
    %28 = vector.broadcast %c-1_i32_7 : i32 to vector<1x5120xi32>
    %29 = arith.addi %6, %28 : vector<1x5120xi32>
    %c7_i32_8 = arith.constant 7 : i32
    %30 = vector.broadcast %c7_i32_8 : i32 to vector<1x5120xi32>
    %31 = arith.cmpi sle, %29, %30 : vector<1x5120xi32>
    %32 = arith.andi %27, %31 : vector<1x5120xi1>
    %cst_9 = arith.constant 0.000000e+00 : f32
    %33 = vector.shape_cast %32 : vector<1x5120xi1> to vector<1x5120xi1>
    %34 = vector.broadcast %33 : vector<1x5120xi1> to vector<4x5120xi1>
    %35 = vector.broadcast %cst_9 : f32 to vector<4x5120xf32>
    %36 = arith.select %34, %23, %35 : vector<4x5120xi1>, vector<4x5120xf32>
    %37 = vector.extract_strided_slice %1 {offsets = [0, 4], sizes = [12, 4], strides = [1, 1]} : vector<12x20xf32> to vector<12x4xf32>
    %cst_10 = arith.constant dense<0.000000e+00> : vector<12x5120xf32>
    %38 = tpu.matmul %37, %36, %cst_10 {dimension_numbers = #tpu.dot_dimension_numbers<[1], [0], [0], [1], [0, 0, 1, 1], [], []>} : vector<12x4xf32>, vector<4x5120xf32>, vector<12x5120xf32> -> vector<12x5120xf32>
    %39 = arith.addf %22, %38 : vector<12x5120xf32>
    %40 = vector.extract_strided_slice %3 {offsets = [0, 2], sizes = [4, 5120], strides = [1, 1]} : vector<4x5248xf32> to vector<4x5120xf32>
    %41 = vector.extract_strided_slice %1 {offsets = [0, 8], sizes = [12, 4], strides = [1, 1]} : vector<12x20xf32> to vector<12x4xf32>
    %cst_11 = arith.constant dense<0.000000e+00> : vector<12x5120xf32>
    %42 = tpu.matmul %41, %40, %cst_11 {dimension_numbers = #tpu.dot_dimension_numbers<[1], [0], [0], [1], [0, 0, 1, 1], [], []>} : vector<12x4xf32>, vector<4x5120xf32>, vector<12x5120xf32> -> vector<12x5120xf32>
    %43 = arith.addf %39, %42 : vector<12x5120xf32>
    %44 = vector.extract_strided_slice %3 {offsets = [0, 3], sizes = [4, 5120], strides = [1, 1]} : vector<4x5248xf32> to vector<4x5120xf32>
    %c1_i32 = arith.constant 1 : i32
    %45 = vector.broadcast %c1_i32 : i32 to vector<1x5120xi32>
    %46 = arith.addi %6, %45 : vector<1x5120xi32>
    %c0_i32_12 = arith.constant 0 : i32
    %47 = vector.broadcast %c0_i32_12 : i32 to vector<1x5120xi32>
    %48 = arith.cmpi sge, %46, %47 : vector<1x5120xi32>
    %c1_i32_13 = arith.constant 1 : i32
    %49 = vector.broadcast %c1_i32_13 : i32 to vector<1x5120xi32>
    %50 = arith.addi %6, %49 : vector<1x5120xi32>
    %c7_i32_14 = arith.constant 7 : i32
    %51 = vector.broadcast %c7_i32_14 : i32 to vector<1x5120xi32>
    %52 = arith.cmpi sle, %50, %51 : vector<1x5120xi32>
    %53 = arith.andi %48, %52 : vector<1x5120xi1>
    %cst_15 = arith.constant 0.000000e+00 : f32
    %54 = vector.shape_cast %53 : vector<1x5120xi1> to vector<1x5120xi1>
    %55 = vector.broadcast %54 : vector<1x5120xi1> to vector<4x5120xi1>
    %56 = vector.broadcast %cst_15 : f32 to vector<4x5120xf32>
    %57 = arith.select %55, %44, %56 : vector<4x5120xi1>, vector<4x5120xf32>
    %58 = vector.extract_strided_slice %1 {offsets = [0, 12], sizes = [12, 4], strides = [1, 1]} : vector<12x20xf32> to vector<12x4xf32>
    %cst_16 = arith.constant dense<0.000000e+00> : vector<12x5120xf32>
    %59 = tpu.matmul %58, %57, %cst_16 {dimension_numbers = #tpu.dot_dimension_numbers<[1], [0], [0], [1], [0, 0, 1, 1], [], []>} : vector<12x4xf32>, vector<4x5120xf32>, vector<12x5120xf32> -> vector<12x5120xf32>
    %60 = arith.addf %43, %59 : vector<12x5120xf32>
    %61 = vector.extract_strided_slice %3 {offsets = [0, 4], sizes = [4, 5120], strides = [1, 1]} : vector<4x5248xf32> to vector<4x5120xf32>
    %c2_i32 = arith.constant 2 : i32
    %62 = vector.broadcast %c2_i32 : i32 to vector<1x5120xi32>
    %63 = arith.addi %6, %62 : vector<1x5120xi32>
    %c0_i32_17 = arith.constant 0 : i32
    %64 = vector.broadcast %c0_i32_17 : i32 to vector<1x5120xi32>
    %65 = arith.cmpi sge, %63, %64 : vector<1x5120xi32>
    %c2_i32_18 = arith.constant 2 : i32
    %66 = vector.broadcast %c2_i32_18 : i32 to vector<1x5120xi32>
    %67 = arith.addi %6, %66 : vector<1x5120xi32>
    %c7_i32_19 = arith.constant 7 : i32
    %68 = vector.broadcast %c7_i32_19 : i32 to vector<1x5120xi32>
    %69 = arith.cmpi sle, %67, %68 : vector<1x5120xi32>
    %70 = arith.andi %65, %69 : vector<1x5120xi1>
    %cst_20 = arith.constant 0.000000e+00 : f32
    %71 = vector.shape_cast %70 : vector<1x5120xi1> to vector<1x5120xi1>
    %72 = vector.broadcast %71 : vector<1x5120xi1> to vector<4x5120xi1>
    %73 = vector.broadcast %cst_20 : f32 to vector<4x5120xf32>
    %74 = arith.select %72, %61, %73 : vector<4x5120xi1>, vector<4x5120xf32>
    %75 = vector.extract_strided_slice %1 {offsets = [0, 16], sizes = [12, 4], strides = [1, 1]} : vector<12x20xf32> to vector<12x4xf32>
    %cst_21 = arith.constant dense<0.000000e+00> : vector<12x5120xf32>
    %76 = tpu.matmul %75, %74, %cst_21 {dimension_numbers = #tpu.dot_dimension_numbers<[1], [0], [0], [1], [0, 0, 1, 1], [], []>} : vector<12x4xf32>, vector<4x5120xf32>, vector<12x5120xf32> -> vector<12x5120xf32>
    %77 = arith.addf %60, %76 : vector<12x5120xf32>
    %78 = vector.broadcast %2 : vector<12x1xf32> to vector<12x5120xf32>
    %79 = arith.addf %77, %78 : vector<12x5120xf32>
    %cst_22 = arith.constant 0.000000e+00 : f32
    %80 = vector.broadcast %cst_22 : f32 to vector<12x5120xf32>
    %81 = arith.maximumf %79, %80 : vector<12x5120xf32>
    %82 = vector.extract_strided_slice %81 {offsets = [0, 0], sizes = [4, 5120], strides = [1, 1]} : vector<12x5120xf32> to vector<4x5120xf32>
    %83 = vector.extract_strided_slice %81 {offsets = [4, 0], sizes = [4, 5120], strides = [1, 1]} : vector<12x5120xf32> to vector<4x5120xf32>
    %84 = arith.addf %82, %83 : vector<4x5120xf32>
    %85 = vector.extract_strided_slice %81 {offsets = [8, 0], sizes = [4, 5120], strides = [1, 1]} : vector<12x5120xf32> to vector<4x5120xf32>
    %86 = arith.addf %84, %85 : vector<4x5120xf32>
    %87 = vector.extract_strided_slice %86 {offsets = [0, 0], sizes = [4, 2560], strides = [1, 1]} : vector<4x5120xf32> to vector<4x2560xf32>
    %88 = vector.extract_strided_slice %86 {offsets = [0, 2560], sizes = [4, 2560], strides = [1, 1]} : vector<4x5120xf32> to vector<4x2560xf32>
    %89 = arith.addf %87, %88 : vector<4x2560xf32>
    %90 = vector.extract_strided_slice %89 {offsets = [0, 0], sizes = [4, 1280], strides = [1, 1]} : vector<4x2560xf32> to vector<4x1280xf32>
    %91 = vector.extract_strided_slice %89 {offsets = [0, 1280], sizes = [4, 1280], strides = [1, 1]} : vector<4x2560xf32> to vector<4x1280xf32>
    %92 = arith.addf %90, %91 : vector<4x1280xf32>
    %93 = vector.extract_strided_slice %92 {offsets = [0, 0], sizes = [4, 640], strides = [1, 1]} : vector<4x1280xf32> to vector<4x640xf32>
    %94 = vector.extract_strided_slice %92 {offsets = [0, 640], sizes = [4, 640], strides = [1, 1]} : vector<4x1280xf32> to vector<4x640xf32>
    %95 = arith.addf %93, %94 : vector<4x640xf32>
    %96 = tpu.iota {dimensions = array<i32: 0>} : vector<640x8xi32>
    %97 = tpu.iota {dimensions = array<i32: 1>} : vector<640x8xi32>
    %c7_i32_23 = arith.constant 7 : i32
    %98 = vector.broadcast %c7_i32_23 : i32 to vector<640x8xi32>
    %99 = arith.andi %96, %98 : vector<640x8xi32>
    %100 = arith.cmpi eq, %99, %97 : vector<640x8xi32>
    %cst_24 = arith.constant 1.000000e+00 : f32
    %cst_25 = arith.constant 0.000000e+00 : f32
    %101 = vector.broadcast %cst_24 : f32 to vector<640x8xf32>
    %102 = vector.broadcast %cst_25 : f32 to vector<640x8xf32>
    %103 = arith.select %100, %101, %102 : vector<640x8xi1>, vector<640x8xf32>
    %cst_26 = arith.constant dense<0.000000e+00> : vector<4x8xf32>
    %104 = tpu.matmul %95, %103, %cst_26 {dimension_numbers = #tpu.dot_dimension_numbers<[1], [0], [0], [1], [0, 0, 1, 1], [], []>} : vector<4x640xf32>, vector<640x8xf32>, vector<4x8xf32> -> vector<4x8xf32>
    %c0_27 = arith.constant 0 : index
    %c0_28 = arith.constant 0 : index
    %105 = vector.load %arg2[%c0_27, %c0_28] : memref<640x32xf32, #tpu.memory_space<vmem>>, vector<640x32xf32>
    %c0_29 = arith.constant 0 : index
    %c0_30 = arith.constant 0 : index
    %106 = vector.load %arg3[%c0_29, %c0_30] : memref<8x32xf32, #tpu.memory_space<vmem>>, vector<8x32xf32>
    %107 = tpu.iota {dimensions = array<i32: 0>} : vector<4x32xi32>
    %108 = tpu.iota {dimensions = array<i32: 1>} : vector<4x32xi32>
    %c8_i32 = arith.constant 8 : i32
    %109 = vector.broadcast %c8_i32 : i32 to vector<4x32xi32>
    %110 = arith.muli %107, %109 : vector<4x32xi32>
    %111 = arith.cmpi sge, %108, %110 : vector<4x32xi32>
    %c1_i32_31 = arith.constant 1 : i32
    %112 = vector.broadcast %c1_i32_31 : i32 to vector<4x32xi32>
    %113 = arith.addi %107, %112 : vector<4x32xi32>
    %c8_i32_32 = arith.constant 8 : i32
    %114 = vector.broadcast %c8_i32_32 : i32 to vector<4x32xi32>
    %115 = arith.muli %113, %114 : vector<4x32xi32>
    %116 = arith.cmpi slt, %108, %115 : vector<4x32xi32>
    %117 = arith.andi %111, %116 : vector<4x32xi1>
    %cst_33 = arith.constant 1.000000e+00 : f32
    %cst_34 = arith.constant 0.000000e+00 : f32
    %118 = vector.broadcast %cst_33 : f32 to vector<4x32xf32>
    %119 = vector.broadcast %cst_34 : f32 to vector<4x32xf32>
    %120 = arith.select %117, %118, %119 : vector<4x32xi1>, vector<4x32xf32>
    %121 = tpu.iota {dimensions = array<i32: 0>} : vector<32x8xi32>
    %122 = tpu.iota {dimensions = array<i32: 1>} : vector<32x8xi32>
    %c7_i32_35 = arith.constant 7 : i32
    %123 = vector.broadcast %c7_i32_35 : i32 to vector<32x8xi32>
    %124 = arith.andi %121, %123 : vector<32x8xi32>
    %125 = arith.cmpi eq, %124, %122 : vector<32x8xi32>
    %cst_36 = arith.constant 1.000000e+00 : f32
    %cst_37 = arith.constant 0.000000e+00 : f32
    %126 = vector.broadcast %cst_36 : f32 to vector<32x8xf32>
    %127 = vector.broadcast %cst_37 : f32 to vector<32x8xf32>
    %128 = arith.select %125, %126, %127 : vector<32x8xi1>, vector<32x8xf32>
    %cst_38 = arith.constant dense<0.000000e+00> : vector<4x32xf32>
    %129 = tpu.matmul %104, %106, %cst_38 {dimension_numbers = #tpu.dot_dimension_numbers<[1], [0], [0], [1], [0, 0, 1, 1], [], []>} : vector<4x8xf32>, vector<8x32xf32>, vector<4x32xf32> -> vector<4x32xf32>
    %130 = arith.mulf %129, %120 : vector<4x32xf32>
    %cst_39 = arith.constant dense<0.000000e+00> : vector<32xf32>
    %131 = vector.multi_reduction <add>, %130, %cst_39 [0] : vector<4x32xf32> to vector<32xf32>
    %132 = vector.shape_cast %131 : vector<32xf32> to vector<1x32xf32>
    %cst_40 = arith.constant dense<0.000000e+00> : vector<1x8xf32>
    %133 = tpu.matmul %132, %128, %cst_40 {dimension_numbers = #tpu.dot_dimension_numbers<[1], [0], [0], [1], [0, 0, 1, 1], [], []>} : vector<1x32xf32>, vector<32x8xf32>, vector<1x8xf32> -> vector<1x8xf32>
    %134 = tpu.iota {dimensions = array<i32: 0>} : vector<8x8xi32>
    %cst_41 = arith.constant 0.000000e+00 : f32
    %135 = vector.broadcast %cst_41 : f32 to vector<8x8xf32>
    %136 = vector.extract_strided_slice %82 {offsets = [0, 0], sizes = [4, 640], strides = [1, 1]} : vector<4x5120xf32> to vector<4x640xf32>
    %cst_42 = arith.constant dense<0.000000e+00> : vector<4x32xf32>
    %137 = tpu.matmul %136, %105, %cst_42 {dimension_numbers = #tpu.dot_dimension_numbers<[1], [0], [0], [1], [0, 0, 1, 1], [], []>} : vector<4x640xf32>, vector<640x32xf32>, vector<4x32xf32> -> vector<4x32xf32>
    %c0_i32_43 = arith.constant 0 : i32
    %138 = vector.broadcast %c0_i32_43 : i32 to vector<8x8xi32>
    %139 = arith.cmpi eq, %134, %138 : vector<8x8xi32>
    %140 = arith.mulf %137, %120 : vector<4x32xf32>
    %cst_44 = arith.constant dense<0.000000e+00> : vector<32xf32>
    %141 = vector.multi_reduction <add>, %140, %cst_44 [0] : vector<4x32xf32> to vector<32xf32>
    %142 = vector.shape_cast %141 : vector<32xf32> to vector<1x32xf32>
    %cst_45 = arith.constant dense<0.000000e+00> : vector<1x8xf32>
    %143 = tpu.matmul %142, %128, %cst_45 {dimension_numbers = #tpu.dot_dimension_numbers<[1], [0], [0], [1], [0, 0, 1, 1], [], []>} : vector<1x32xf32>, vector<32x8xf32>, vector<1x8xf32> -> vector<1x8xf32>
    %cst_46 = arith.constant 0.000000e+00 : f32
    %144 = vector.shape_cast %143 : vector<1x8xf32> to vector<1x8xf32>
    %145 = vector.broadcast %144 : vector<1x8xf32> to vector<8x8xf32>
    %146 = vector.broadcast %cst_46 : f32 to vector<8x8xf32>
    %147 = arith.select %139, %145, %146 : vector<8x8xi1>, vector<8x8xf32>
    %148 = arith.addf %135, %147 : vector<8x8xf32>
    %149 = vector.extract_strided_slice %82 {offsets = [0, 640], sizes = [4, 640], strides = [1, 1]} : vector<4x5120xf32> to vector<4x640xf32>
    %cst_47 = arith.constant dense<0.000000e+00> : vector<4x32xf32>
    %150 = tpu.matmul %149, %105, %cst_47 {dimension_numbers = #tpu.dot_dimension_numbers<[1], [0], [0], [1], [0, 0, 1, 1], [], []>} : vector<4x640xf32>, vector<640x32xf32>, vector<4x32xf32> -> vector<4x32xf32>
    %c1_i32_48 = arith.constant 1 : i32
    %151 = vector.broadcast %c1_i32_48 : i32 to vector<8x8xi32>
    %152 = arith.cmpi eq, %134, %151 : vector<8x8xi32>
    %153 = arith.mulf %150, %120 : vector<4x32xf32>
    %cst_49 = arith.constant dense<0.000000e+00> : vector<32xf32>
    %154 = vector.multi_reduction <add>, %153, %cst_49 [0] : vector<4x32xf32> to vector<32xf32>
    %155 = vector.shape_cast %154 : vector<32xf32> to vector<1x32xf32>
    %cst_50 = arith.constant dense<0.000000e+00> : vector<1x8xf32>
    %156 = tpu.matmul %155, %128, %cst_50 {dimension_numbers = #tpu.dot_dimension_numbers<[1], [0], [0], [1], [0, 0, 1, 1], [], []>} : vector<1x32xf32>, vector<32x8xf32>, vector<1x8xf32> -> vector<1x8xf32>
    %cst_51 = arith.constant 0.000000e+00 : f32
    %157 = vector.shape_cast %156 : vector<1x8xf32> to vector<1x8xf32>
    %158 = vector.broadcast %157 : vector<1x8xf32> to vector<8x8xf32>
    %159 = vector.broadcast %cst_51 : f32 to vector<8x8xf32>
    %160 = arith.select %152, %158, %159 : vector<8x8xi1>, vector<8x8xf32>
    %161 = arith.addf %148, %160 : vector<8x8xf32>
    %162 = vector.extract_strided_slice %82 {offsets = [0, 1280], sizes = [4, 640], strides = [1, 1]} : vector<4x5120xf32> to vector<4x640xf32>
    %cst_52 = arith.constant dense<0.000000e+00> : vector<4x32xf32>
    %163 = tpu.matmul %162, %105, %cst_52 {dimension_numbers = #tpu.dot_dimension_numbers<[1], [0], [0], [1], [0, 0, 1, 1], [], []>} : vector<4x640xf32>, vector<640x32xf32>, vector<4x32xf32> -> vector<4x32xf32>
    %c2_i32_53 = arith.constant 2 : i32
    %164 = vector.broadcast %c2_i32_53 : i32 to vector<8x8xi32>
    %165 = arith.cmpi eq, %134, %164 : vector<8x8xi32>
    %166 = arith.mulf %163, %120 : vector<4x32xf32>
    %cst_54 = arith.constant dense<0.000000e+00> : vector<32xf32>
    %167 = vector.multi_reduction <add>, %166, %cst_54 [0] : vector<4x32xf32> to vector<32xf32>
    %168 = vector.shape_cast %167 : vector<32xf32> to vector<1x32xf32>
    %cst_55 = arith.constant dense<0.000000e+00> : vector<1x8xf32>
    %169 = tpu.matmul %168, %128, %cst_55 {dimension_numbers = #tpu.dot_dimension_numbers<[1], [0], [0], [1], [0, 0, 1, 1], [], []>} : vector<1x32xf32>, vector<32x8xf32>, vector<1x8xf32> -> vector<1x8xf32>
    %cst_56 = arith.constant 0.000000e+00 : f32
    %170 = vector.shape_cast %169 : vector<1x8xf32> to vector<1x8xf32>
    %171 = vector.broadcast %170 : vector<1x8xf32> to vector<8x8xf32>
    %172 = vector.broadcast %cst_56 : f32 to vector<8x8xf32>
    %173 = arith.select %165, %171, %172 : vector<8x8xi1>, vector<8x8xf32>
    %174 = arith.addf %161, %173 : vector<8x8xf32>
    %175 = vector.extract_strided_slice %82 {offsets = [0, 1920], sizes = [4, 640], strides = [1, 1]} : vector<4x5120xf32> to vector<4x640xf32>
    %cst_57 = arith.constant dense<0.000000e+00> : vector<4x32xf32>
    %176 = tpu.matmul %175, %105, %cst_57 {dimension_numbers = #tpu.dot_dimension_numbers<[1], [0], [0], [1], [0, 0, 1, 1], [], []>} : vector<4x640xf32>, vector<640x32xf32>, vector<4x32xf32> -> vector<4x32xf32>
    %c3_i32 = arith.constant 3 : i32
    %177 = vector.broadcast %c3_i32 : i32 to vector<8x8xi32>
    %178 = arith.cmpi eq, %134, %177 : vector<8x8xi32>
    %179 = arith.mulf %176, %120 : vector<4x32xf32>
    %cst_58 = arith.constant dense<0.000000e+00> : vector<32xf32>
    %180 = vector.multi_reduction <add>, %179, %cst_58 [0] : vector<4x32xf32> to vector<32xf32>
    %181 = vector.shape_cast %180 : vector<32xf32> to vector<1x32xf32>
    %cst_59 = arith.constant dense<0.000000e+00> : vector<1x8xf32>
    %182 = tpu.matmul %181, %128, %cst_59 {dimension_numbers = #tpu.dot_dimension_numbers<[1], [0], [0], [1], [0, 0, 1, 1], [], []>} : vector<1x32xf32>, vector<32x8xf32>, vector<1x8xf32> -> vector<1x8xf32>
    %cst_60 = arith.constant 0.000000e+00 : f32
    %183 = vector.shape_cast %182 : vector<1x8xf32> to vector<1x8xf32>
    %184 = vector.broadcast %183 : vector<1x8xf32> to vector<8x8xf32>
    %185 = vector.broadcast %cst_60 : f32 to vector<8x8xf32>
    %186 = arith.select %178, %184, %185 : vector<8x8xi1>, vector<8x8xf32>
    %187 = arith.addf %174, %186 : vector<8x8xf32>
    %188 = vector.extract_strided_slice %82 {offsets = [0, 2560], sizes = [4, 640], strides = [1, 1]} : vector<4x5120xf32> to vector<4x640xf32>
    %cst_61 = arith.constant dense<0.000000e+00> : vector<4x32xf32>
    %189 = tpu.matmul %188, %105, %cst_61 {dimension_numbers = #tpu.dot_dimension_numbers<[1], [0], [0], [1], [0, 0, 1, 1], [], []>} : vector<4x640xf32>, vector<640x32xf32>, vector<4x32xf32> -> vector<4x32xf32>
    %c4_i32 = arith.constant 4 : i32
    %190 = vector.broadcast %c4_i32 : i32 to vector<8x8xi32>
    %191 = arith.cmpi eq, %134, %190 : vector<8x8xi32>
    %192 = arith.mulf %189, %120 : vector<4x32xf32>
    %cst_62 = arith.constant dense<0.000000e+00> : vector<32xf32>
    %193 = vector.multi_reduction <add>, %192, %cst_62 [0] : vector<4x32xf32> to vector<32xf32>
    %194 = vector.shape_cast %193 : vector<32xf32> to vector<1x32xf32>
    %cst_63 = arith.constant dense<0.000000e+00> : vector<1x8xf32>
    %195 = tpu.matmul %194, %128, %cst_63 {dimension_numbers = #tpu.dot_dimension_numbers<[1], [0], [0], [1], [0, 0, 1, 1], [], []>} : vector<1x32xf32>, vector<32x8xf32>, vector<1x8xf32> -> vector<1x8xf32>
    %cst_64 = arith.constant 0.000000e+00 : f32
    %196 = vector.shape_cast %195 : vector<1x8xf32> to vector<1x8xf32>
    %197 = vector.broadcast %196 : vector<1x8xf32> to vector<8x8xf32>
    %198 = vector.broadcast %cst_64 : f32 to vector<8x8xf32>
    %199 = arith.select %191, %197, %198 : vector<8x8xi1>, vector<8x8xf32>
    %200 = arith.addf %187, %199 : vector<8x8xf32>
    %201 = vector.extract_strided_slice %82 {offsets = [0, 3200], sizes = [4, 640], strides = [1, 1]} : vector<4x5120xf32> to vector<4x640xf32>
    %cst_65 = arith.constant dense<0.000000e+00> : vector<4x32xf32>
    %202 = tpu.matmul %201, %105, %cst_65 {dimension_numbers = #tpu.dot_dimension_numbers<[1], [0], [0], [1], [0, 0, 1, 1], [], []>} : vector<4x640xf32>, vector<640x32xf32>, vector<4x32xf32> -> vector<4x32xf32>
    %c5_i32 = arith.constant 5 : i32
    %203 = vector.broadcast %c5_i32 : i32 to vector<8x8xi32>
    %204 = arith.cmpi eq, %134, %203 : vector<8x8xi32>
    %205 = arith.mulf %202, %120 : vector<4x32xf32>
    %cst_66 = arith.constant dense<0.000000e+00> : vector<32xf32>
    %206 = vector.multi_reduction <add>, %205, %cst_66 [0] : vector<4x32xf32> to vector<32xf32>
    %207 = vector.shape_cast %206 : vector<32xf32> to vector<1x32xf32>
    %cst_67 = arith.constant dense<0.000000e+00> : vector<1x8xf32>
    %208 = tpu.matmul %207, %128, %cst_67 {dimension_numbers = #tpu.dot_dimension_numbers<[1], [0], [0], [1], [0, 0, 1, 1], [], []>} : vector<1x32xf32>, vector<32x8xf32>, vector<1x8xf32> -> vector<1x8xf32>
    %cst_68 = arith.constant 0.000000e+00 : f32
    %209 = vector.shape_cast %208 : vector<1x8xf32> to vector<1x8xf32>
    %210 = vector.broadcast %209 : vector<1x8xf32> to vector<8x8xf32>
    %211 = vector.broadcast %cst_68 : f32 to vector<8x8xf32>
    %212 = arith.select %204, %210, %211 : vector<8x8xi1>, vector<8x8xf32>
    %213 = arith.addf %200, %212 : vector<8x8xf32>
    %214 = vector.extract_strided_slice %82 {offsets = [0, 3840], sizes = [4, 640], strides = [1, 1]} : vector<4x5120xf32> to vector<4x640xf32>
    %cst_69 = arith.constant dense<0.000000e+00> : vector<4x32xf32>
    %215 = tpu.matmul %214, %105, %cst_69 {dimension_numbers = #tpu.dot_dimension_numbers<[1], [0], [0], [1], [0, 0, 1, 1], [], []>} : vector<4x640xf32>, vector<640x32xf32>, vector<4x32xf32> -> vector<4x32xf32>
    %c6_i32 = arith.constant 6 : i32
    %216 = vector.broadcast %c6_i32 : i32 to vector<8x8xi32>
    %217 = arith.cmpi eq, %134, %216 : vector<8x8xi32>
    %218 = arith.mulf %215, %120 : vector<4x32xf32>
    %cst_70 = arith.constant dense<0.000000e+00> : vector<32xf32>
    %219 = vector.multi_reduction <add>, %218, %cst_70 [0] : vector<4x32xf32> to vector<32xf32>
    %220 = vector.shape_cast %219 : vector<32xf32> to vector<1x32xf32>
    %cst_71 = arith.constant dense<0.000000e+00> : vector<1x8xf32>
    %221 = tpu.matmul %220, %128, %cst_71 {dimension_numbers = #tpu.dot_dimension_numbers<[1], [0], [0], [1], [0, 0, 1, 1], [], []>} : vector<1x32xf32>, vector<32x8xf32>, vector<1x8xf32> -> vector<1x8xf32>
    %cst_72 = arith.constant 0.000000e+00 : f32
    %222 = vector.shape_cast %221 : vector<1x8xf32> to vector<1x8xf32>
    %223 = vector.broadcast %222 : vector<1x8xf32> to vector<8x8xf32>
    %224 = vector.broadcast %cst_72 : f32 to vector<8x8xf32>
    %225 = arith.select %217, %223, %224 : vector<8x8xi1>, vector<8x8xf32>
    %226 = arith.addf %213, %225 : vector<8x8xf32>
    %227 = vector.extract_strided_slice %82 {offsets = [0, 4480], sizes = [4, 640], strides = [1, 1]} : vector<4x5120xf32> to vector<4x640xf32>
    %cst_73 = arith.constant dense<0.000000e+00> : vector<4x32xf32>
    %228 = tpu.matmul %227, %105, %cst_73 {dimension_numbers = #tpu.dot_dimension_numbers<[1], [0], [0], [1], [0, 0, 1, 1], [], []>} : vector<4x640xf32>, vector<640x32xf32>, vector<4x32xf32> -> vector<4x32xf32>
    %c7_i32_74 = arith.constant 7 : i32
    %229 = vector.broadcast %c7_i32_74 : i32 to vector<8x8xi32>
    %230 = arith.cmpi eq, %134, %229 : vector<8x8xi32>
    %231 = arith.mulf %228, %120 : vector<4x32xf32>
    %cst_75 = arith.constant dense<0.000000e+00> : vector<32xf32>
    %232 = vector.multi_reduction <add>, %231, %cst_75 [0] : vector<4x32xf32> to vector<32xf32>
    %233 = vector.shape_cast %232 : vector<32xf32> to vector<1x32xf32>
    %cst_76 = arith.constant dense<0.000000e+00> : vector<1x8xf32>
    %234 = tpu.matmul %233, %128, %cst_76 {dimension_numbers = #tpu.dot_dimension_numbers<[1], [0], [0], [1], [0, 0, 1, 1], [], []>} : vector<1x32xf32>, vector<32x8xf32>, vector<1x8xf32> -> vector<1x8xf32>
    %cst_77 = arith.constant 0.000000e+00 : f32
    %235 = vector.shape_cast %234 : vector<1x8xf32> to vector<1x8xf32>
    %236 = vector.broadcast %235 : vector<1x8xf32> to vector<8x8xf32>
    %237 = vector.broadcast %cst_77 : f32 to vector<8x8xf32>
    %238 = arith.select %230, %236, %237 : vector<8x8xi1>, vector<8x8xf32>
    %239 = arith.addf %226, %238 : vector<8x8xf32>
    %240 = vector.broadcast %133 : vector<1x8xf32> to vector<8x8xf32>
    %241 = arith.addf %239, %240 : vector<8x8xf32>
    %c0_78 = arith.constant 0 : index
    %c0_79 = arith.constant 0 : index
    %242 = vector.load %arg4[%c0_78, %c0_79] : memref<1x8xf32, #tpu.memory_space<vmem>>, vector<1x8xf32>
    %243 = vector.broadcast %242 : vector<1x8xf32> to vector<8x8xf32>
    %244 = arith.addf %241, %243 : vector<8x8xf32>
    %cst_80 = arith.constant 5.000000e-01 : f32
    %245 = vector.broadcast %cst_80 : f32 to vector<8x8xf32>
    %246 = arith.mulf %245, %244 : vector<8x8xf32>
    %247 = math.tanh %246 : vector<8x8xf32>
    %cst_81 = arith.constant 1.000000e+00 : f32
    %248 = vector.broadcast %cst_81 : f32 to vector<8x8xf32>
    %249 = arith.addf %247, %248 : vector<8x8xf32>
    %cst_82 = arith.constant 5.000000e-01 : f32
    %250 = vector.broadcast %cst_82 : f32 to vector<8x8xf32>
    %251 = arith.mulf %250, %249 : vector<8x8xf32>
    %c0_83 = arith.constant 0 : index
    %c0_84 = arith.constant 0 : index
    %252 = vector.load %arg5[%c0_83, %c0_84] : memref<8x2560xf32, #tpu.memory_space<vmem>>, vector<8x2560xf32>
    %cst_85 = arith.constant dense<0.000000e+00> : vector<8x2560xf32>
    %253 = tpu.matmul %251, %252, %cst_85 {dimension_numbers = #tpu.dot_dimension_numbers<[1], [0], [0], [1], [0, 0, 1, 1], [], []>} : vector<8x8xf32>, vector<8x2560xf32>, vector<8x2560xf32> -> vector<8x2560xf32>
    %c0_86 = arith.constant 0 : index
    %c0_87 = arith.constant 0 : index
    %254 = vector.load %arg6[%c0_86, %c0_87] : memref<8x2560xf32, #tpu.memory_space<vmem>>, vector<8x2560xf32>
    tpu.vector_store %arg6[%c0_86, %c0_87], %253 {strides = array<i32>} : memref<8x2560xf32, #tpu.memory_space<vmem>>, vector<8x2560xf32>,
    return
  }
}

</mosaic_0001>

<bundles_post_ra>
// kernel: ffm_forward.1
= control target key start
LH: loop header
LB: loop body
LE: loop exit
PB: predicated region body
PF: predicated region fallthrough
CT: control target
= control target key end

     0   :  { %s11037_s25 = smov 124   ;;  %s11038_s17 = smov 127   ;;  %vm918_vm0 = vcmask 1039360   ;;  %vm1050_vm3 = vcmask 1043456   ;;  %vm1045_vm4 = vcmask 31744   ;;  %s16727_s1 = inlined_call_operand.vmem [shape: f32[12,21], index: 1, kind: input, shape index: {}]   ;;  %s16728_s0 = inlined_call_operand.vmem [shape: f32[4,5248], index: 0, kind: input, shape index: {}]   ;;  %s16729_s2 = inlined_call_operand.vmem [shape: f32[640,32], index: 2, kind: input, shape index: {}]   ;;  %s16730_s3 = inlined_call_operand.vmem [shape: f32[8,32], index: 3, kind: input, shape index: {}]   ;;  %s16731_s4 = inlined_call_operand.vmem [shape: f32[1,8], index: 4, kind: input, shape index: {}]   ;;  %s16732_s5 = inlined_call_operand.vmem [shape: f32[8,2560], index: 5, kind: input, shape index: {}]   ;;  %s16733_s6 = inlined_call_operand.vmem [shape: f32[8,2560], index: 6, kind: output, shape index: {}]  }
   0x1   :  { %v11085_v0 = vld [vmem:[%s16727_s1] sm:$0xff]  ;;  %v11090_v1 = vld [vmem:[%s16728_s0 + $0x8] sm:$0xff]  ;;  %v11104_v3 = vld [vmem:[%s16728_s0 + $0x18] sm:$0xff]  ;;  %s11040_s22 = smov 126   ;;  %s11041_s28 = smov 125  }
   0x2   :  { %17004 = vst [vmem:[#allocation2_spill] sm:$0xff] %v11090_v1  ;;  %1041 = vrot.lane.b32.xlu1 %v11085_v0, %s11037_s25  ;;  %v11098_v2 = vld [vmem:[%s16728_s0] sm:$0xff]  ;;  %v11110_v4 = vld [vmem:[%s16728_s0 + $0x10] sm:$0xff]  ;;  %v11116_v5 = vld [vmem:[%s16728_s0 + $0x28] sm:$0xff]  ;;  %s11042_s29 = smov 116   ;;  %s11043_s8 = smov 112  }
   0x3   :  { %389 = vst [vmem:[#allocation1 + $0x10] ss:$2 sm:$0xff] %v11090_v1  ;;  %v11121_v6 = vld [vmem:[%s16728_s0 + $0x20] sm:$0xff]  ;;  %v11131_v9 = vld [vmem:[%s16728_s0 + $0x38] sm:$0xff]  ;;  %v11145_v14 = vld [vmem:[%s16728_s0 + $0x30] sm:$0xff] }
   0x4   :  { %17005 = vst [vmem:[#allocation3_spill] sm:$0xff] %v11098_v2  ;;  %v11153_v16 = vld [vmem:[%s16728_s0 + $0x48] sm:$0xff]  ;;  %v11160_v18 = vld [vmem:[%s16728_s0 + $0x40] sm:$0xff]  ;;  %v11171_v21 = vld [vmem:[%s16728_s0 + $0x58] sm:$0xff] }
   0x5   :  { %387 = vst [vmem:[#allocation1] ss:$2 sm:$0xff] %v11098_v2  ;;  %v11181_v24 = vld [vmem:[%s16728_s0 + $0x50] sm:$0xff]  ;;  %v11190_v27 = vld [vmem:[%s16728_s0 + $0x68] sm:$0xff]  ;;  %v11200_v30 = vld [vmem:[%s16728_s0 + $0x60] sm:$0xff] }
   0x6   :  { %17006 = vst [vmem:[#allocation4_spill] sm:$0xff] %v11104_v3  ;;  %v11211_v33 = vld [vmem:[%s16728_s0 + $0x78] sm:$0xff]  ;;  %v11221_v36 = vld [vmem:[%s16728_s0 + $0x70] sm:$0xff]  ;;  %v11230_v39 = vld [vmem:[%s16728_s0 + $0x88] sm:$0xff] }
   0x7   :  { %393 = vst [vmem:[#allocation1 + $0x30] ss:$2 sm:$0xff] %v11104_v3  ;;  %v11240_v42 = vld [vmem:[%s16728_s0 + $0x80] sm:$0xff]  ;;  %v11251_v45 = vld [vmem:[%s16728_s0 + $0x98] sm:$0xff]  ;;  %v11261_v48 = vld [vmem:[%s16728_s0 + $0x90] sm:$0xff] }
   0x8   :  { %17007 = vst [vmem:[#allocation5_spill] sm:$0xff] %v11110_v4 }
   0x9   :  { %391 = vst [vmem:[#allocation1 + $0x20] ss:$2 sm:$0xff] %v11110_v4 }
   0xa   :  { %v11123_v7 = vld.sshfl [vmem:[#allocation1 + $0x10] sm:$0xff pattern:$0x75316420]  ;;  %v11125_v8 = vld.sshfl [vmem:[#allocation1 + $0x18] sm:$0xff pattern:$0x75316420] }
   0xb   :  { %403 = vst [vmem:[#allocation1 + $0x10] ss:$2 sm:$0xff] %v11116_v5 }
   0xc   :  { %17008 = vst [vmem:[#allocation6_spill] sm:$0xff] %v11131_v9  ;;  %v11133_v10 = vld.sshfl [vmem:[#allocation1] sm:$0xff pattern:$0x75316420] }
   0xd   :  { %v11135_v11 = vld.sshfl [vmem:[#allocation1 + $0x8] sm:$0xff pattern:$0x75316420]  ;;  %17009 = vst [vmem:[#allocation7_spill] sm:$0xff] %v11145_v14 }
   0xe   :  { %402 = vst [vmem:[#allocation1] ss:$2 sm:$0xff] %v11121_v6  ;;  %v11138_v12 = vld.sshfl [vmem:[#allocation1 + $0x30] sm:$0xff pattern:$0x75316420] }
   0xf   :  { %v11140_v13 = vld.sshfl [vmem:[#allocation1 + $0x38] sm:$0xff pattern:$0x75316420]  ;;  %17010 = vst [vmem:[#allocation8_spill] sm:$0xff] %v11153_v16 }
  0x10   :  { %405 = vst [vmem:[#allocation1 + $0x30] ss:$2 sm:$0xff] %v11131_v9  ;;  %v11148_v15 = vld.sshfl [vmem:[#allocation1 + $0x20] sm:$0xff pattern:$0x75316420] }
  0x11   :  { %v11155_v17 = vld.sshfl [vmem:[#allocation1 + $0x28] sm:$0xff pattern:$0x75316420]  ;;  %17011 = vst [vmem:[#allocation9_spill] sm:$0xff] %v11160_v18 }
  0x12   :  { %404 = vst [vmem:[#allocation1 + $0x20] ss:$2 sm:$0xff] %v11145_v14  ;;  %v11163_v19 = vld.sshfl [vmem:[#allocation1 + $0x10] sm:$0xff pattern:$0x75316420] }
  0x13   :  { %v11165_v20 = vld.sshfl [vmem:[#allocation1 + $0x18] sm:$0xff pattern:$0x75316420]  ;;  %17012 = vst [vmem:[#allocation10_spill] sm:$0xff] %v11171_v21 }
  0x14   :  { %415 = vst [vmem:[#allocation1 + $0x10] ss:$2 sm:$0xff] %v11153_v16 }
  0x15   :  { %v11173_v22 = vld.sshfl [vmem:[#allocation1] sm:$0xff pattern:$0x75316420]  ;;  %v11175_v23 = vld.sshfl [vmem:[#allocation1 + $0x8] sm:$0xff pattern:$0x75316420] }
  0x16   :  { %414 = vst [vmem:[#allocation1] ss:$2 sm:$0xff] %v11160_v18 }
  0x17   :  { %17013 = vst [vmem:[#allocation11_spill] sm:$0xff] %v11181_v24  ;;  %v11183_v25 = vld.sshfl [vmem:[#allocation1 + $0x30] sm:$0xff pattern:$0x75316420] }
  0x18   :  { %v11185_v26 = vld.sshfl [vmem:[#allocation1 + $0x38] sm:$0xff pattern:$0x75316420]  ;;  %17014 = vst [vmem:[#allocation12_spill] sm:$0xff] %v11190_v27 }
  0x19   :  { %417 = vst [vmem:[#allocation1 + $0x30] ss:$2 sm:$0xff] %v11171_v21  ;;  %v11193_v28 = vld.sshfl [vmem:[#allocation1 + $0x20] sm:$0xff pattern:$0x75316420] }
  0x1a   :  { %v11195_v29 = vld.sshfl [vmem:[#allocation1 + $0x28] sm:$0xff pattern:$0x75316420]  ;;  %17015 = vst [vmem:[#allocation13_spill] sm:$0xff] %v11200_v30 }
  0x1b   :  { %416 = vst [vmem:[#allocation1 + $0x20] ss:$2 sm:$0xff] %v11181_v24  ;;  %v11203_v31 = vld.sshfl [vmem:[#allocation1 + $0x10] sm:$0xff pattern:$0x75316420] }
  0x1c   :  { %v11205_v32 = vld.sshfl [vmem:[#allocation1 + $0x18] sm:$0xff pattern:$0x75316420]  ;;  %17017 = vst [vmem:[#allocation15_spill] sm:$0xff] %v11211_v33 }
  0x1d   :  { %17016 = vst [vmem:[#allocation14_spill] sm:$0xff] %v11205_v32  ;;  %v11213_v34 = vld.sshfl [vmem:[#allocation1] sm:$0xff pattern:$0x75316420] }
  0x1e   :  { %427 = vst [vmem:[#allocation1 + $0x10] ss:$2 sm:$0xff] %v11190_v27  ;;  %v11215_v35 = vld.sshfl [vmem:[#allocation1 + $0x8] sm:$0xff pattern:$0x75316420] }
  0x1f   :  { %17018 = vst [vmem:[#allocation16_spill] sm:$0xff] %v11215_v35 }
  0x20   :  { %426 = vst [vmem:[#allocation1] ss:$2 sm:$0xff] %v11200_v30  ;;  %v11223_v37 = vld.sshfl [vmem:[#allocation1 + $0x30] sm:$0xff pattern:$0x75316420] }
  0x21   :  { %17019 = vst [vmem:[#allocation17_spill] sm:$0xff] %v11221_v36  ;;  %v11225_v38 = vld.sshfl [vmem:[#allocation1 + $0x38] sm:$0xff pattern:$0x75316420] }
  0x22   :  { %17020 = vst [vmem:[#allocation18_spill] sm:$0xff] %v11223_v37  ;;  %v11233_v40 = vld.sshfl [vmem:[#allocation1 + $0x20] sm:$0xff pattern:$0x75316420] }
  0x23   :  { %17021 = vst [vmem:[#allocation19_spill] sm:$0xff] %v11225_v38  ;;  %v11235_v41 = vld.sshfl [vmem:[#allocation1 + $0x28] sm:$0xff pattern:$0x75316420] }
  0x24   :  { %17022 = vst [vmem:[#allocation20_spill] sm:$0xff] %v11230_v39 }
  0x25   :  { %429 = vst [vmem:[#allocation1 + $0x30] ss:$2 sm:$0xff] %v11211_v33  ;;  %v11243_v43 = vld.sshfl [vmem:[#allocation1 + $0x10] sm:$0xff pattern:$0x75316420] }
  0x26   :  { %17023 = vst [vmem:[#allocation21_spill] sm:$0xff] %v11233_v40  ;;  %v11245_v44 = vld.sshfl [vmem:[#allocation1 + $0x18] sm:$0xff pattern:$0x75316420] }
  0x27   :  { %17024 = vst [vmem:[#allocation22_spill] sm:$0xff] %v11235_v41  ;;  %v11253_v46 = vld.sshfl [vmem:[#allocation1] sm:$0xff pattern:$0x75316420] }
  0x28   :  { %17025 = vst [vmem:[#allocation23_spill] sm:$0xff] %v11240_v42  ;;  %v11255_v47 = vld.sshfl [vmem:[#allocation1 + $0x8] sm:$0xff pattern:$0x75316420] }
  0x29   :  { %428 = vst [vmem:[#allocation1 + $0x20] ss:$2 sm:$0xff] %v11221_v36 }
  0x2a   :  { %17026 = vst [vmem:[#allocation24_spill] sm:$0xff] %v11243_v43 }
  0x2b   :  { %17027 = vst [vmem:[#allocation25_spill] sm:$0xff] %v11245_v44 }
  0x2c   :  { %439 = vst [vmem:[#allocation1 + $0x10] ss:$2 sm:$0xff] %v11230_v39  ;;  %v11263_v49 = vld.sshfl [vmem:[#allocation1 + $0x30] sm:$0xff pattern:$0x75316420] }
  0x2d   :  { %17028 = vst [vmem:[#allocation26_spill] sm:$0xff] %v11251_v45  ;;  %v11265_v50 = vld.sshfl [vmem:[#allocation1 + $0x38] sm:$0xff pattern:$0x75316420] }
  0x2e   :  { %17029 = vst [vmem:[#allocation27_spill] sm:$0xff] %v11253_v46 }
  0x2f   :  { %17030 = vst [vmem:[#allocation28_spill] sm:$0xff] %v11255_v47 }
  0x30   :  { %438 = vst [vmem:[#allocation1] ss:$2 sm:$0xff] %v11240_v42  ;;  %v11268_v51 = vld.sshfl [vmem:[#allocation1 + $0x20] sm:$0xff pattern:$0x75316420] }
  0x31   :  { %17031 = vst [vmem:[#allocation29_spill] sm:$0xff] %v11261_v48  ;;  %v11270_v52 = vld.sshfl [vmem:[#allocation1 + $0x28] sm:$0xff pattern:$0x75316420] }
  0x32   :  { %17032 = vst [vmem:[#allocation30_spill] sm:$0xff] %v11263_v49 }
  0x33   :  { %17033 = vst [vmem:[#allocation31_spill] sm:$0xff] %v11265_v50  ;;  %v11273_v53 = vld.sshfl [vmem:[#allocation1 + $0x10] sm:$0xff pattern:$0x75316420]  ;;  %v24_v50 = vld [vmem:[%s16727_s1 + $0x8] sm:$0xf] }
  0x34   :  { %441 = vst [vmem:[#allocation1 + $0x30] ss:$2 sm:$0xff] %v11251_v45  ;;  %v11275_v54 = vld.sshfl [vmem:[#allocation1 + $0x18] sm:$0xff pattern:$0x75316420] }
  0x35   :  { %17034 = vst [vmem:[#allocation32_spill] sm:$0xff] %v11268_v51 }
  0x36   :  { %17035 = vst [vmem:[#allocation33_spill] sm:$0xff] %v11270_v52 }
  0x37   :  { %440 = vst [vmem:[#allocation1 + $0x20] ss:$2 sm:$0xff] %v11261_v48  ;;  %v11278_v55 = vld.sshfl [vmem:[#allocation1] sm:$0xff pattern:$0x75316420] }
  0x38   :  { %17036 = vst [vmem:[#allocation34_spill] sm:$0xff] %v11273_v53  ;;  %v11280_v56 = vld.sshfl [vmem:[#allocation1 + $0x8] sm:$0xff pattern:$0x75316420] }
  0x39   :  { %17037 = vst [vmem:[#allocation35_spill] sm:$0xff] %v11275_v54 }
  0x3a   :  { %773 = vst [vmem:[#allocation1 + $0x10] ss:$2 sm:$0xff] %v11090_v1 }
  0x3b   :  { %17038 = vst [vmem:[#allocation36_spill] sm:$0xff] %v11278_v55  ;;  %v11283_v57 = vld.sshfl [vmem:[#allocation1 + $0x30] sm:$0xff pattern:$0x75316420] }
  0x3c   :  { %17039 = vst [vmem:[#allocation37_spill] sm:$0xff] %v11280_v56  ;;  %v11285_v58 = vld.sshfl [vmem:[#allocation1 + $0x38] sm:$0xff pattern:$0x75316420] }
  0x3d   :  { %771 = vst [vmem:[#allocation1] ss:$2 sm:$0xff] %v11098_v2 }
  0x3e   :  { %17040 = vst [vmem:[#allocation38_spill] sm:$0xff] %v11283_v57  ;;  %v11288_v59 = vld.sshfl [vmem:[#allocation1 + $0x20] sm:$0xff pattern:$0x75316420] }
  0x3f   :  { %17041 = vst [vmem:[#allocation39_spill] sm:$0xff] %v11285_v58  ;;  %v11290_v60 = vld.sshfl [vmem:[#allocation1 + $0x28] sm:$0xff pattern:$0x75316420] }
  0x40   :  { %777 = vst [vmem:[#allocation1 + $0x30] ss:$2 sm:$0xff] %v11104_v3 }
  0x41   :  { %17042 = vst [vmem:[#allocation40_spill] sm:$0xff] %v11288_v59  ;;  %v780_v61 = vld.sshfl [vmem:[#allocation1 + $0x10] sm:$0xff pattern:$0x75316420] }
  0x42   :  { %17043 = vst [vmem:[#allocation41_spill] sm:$0xff] %v11290_v60  ;;  %v781_v62 = vld.sshfl [vmem:[#allocation1 + $0x18] sm:$0xff pattern:$0x75316420]  ;;  %840 = vrot.lane.b32.xlu0 %v780_v61, %s11038_s17 }
  0x43   :  { %775 = vst [vmem:[#allocation1 + $0x20] ss:$2 sm:$0xff] %v11110_v4 }
  0x44   :  { %787 = vst [vmem:[#allocation1 + $0x10] ss:$2 sm:$0xff] %v11116_v5  ;;  %v779_v63 = vld.sshfl [vmem:[#allocation1 + $0x8] sm:$0xff pattern:$0x75316420] }
  0x45   :  { %v778_v55 = vld.sshfl [vmem:[#allocation1] sm:$0xff pattern:$0x75316420]  ;;  %838 = vrot.lane.b32.xlu1 %v779_v63, %s11038_s17 }
  0x46   :  { %786 = vst [vmem:[#allocation1] ss:$2 sm:$0xff] %v11121_v6  ;;  %836 = vrot.lane.b32.xlu2 %v778_v55, %s11038_s17 }
  0x47   :  { %v784_v59 = vld.sshfl [vmem:[#allocation1 + $0x30] sm:$0xff pattern:$0x75316420]  ;;  %v785_v58 = vld.sshfl [vmem:[#allocation1 + $0x38] sm:$0xff pattern:$0x75316420] }
  0x48   :  { %789 = vst [vmem:[#allocation1 + $0x30] ss:$2 sm:$0xff] %v11131_v9 }
  0x4a   :  { %v783_v60 = vld.sshfl [vmem:[#allocation1 + $0x28] sm:$0xff pattern:$0x75316420]  ;;  %v782_v57 = vld.sshfl [vmem:[#allocation1 + $0x20] sm:$0xff pattern:$0x75316420]  ;;  %842 = vrot.lane.b32.xlu0 %v781_v62, %s11038_s17 }
  0x4b   :  { %788 = vst [vmem:[#allocation1 + $0x20] ss:$2 sm:$0xff] %v11145_v14  ;;  %v792_v61 = vld.sshfl [vmem:[#allocation1 + $0x10] sm:$0xff pattern:$0x75316420] }
  0x4c   :  { %v793_v55 = vld.sshfl [vmem:[#allocation1 + $0x18] sm:$0xff pattern:$0x75316420] }
  0x4d   :  { %v790_v54 = vld.sshfl [vmem:[#allocation1] sm:$0xff pattern:$0x75316420]  ;;  %v791_v56 = vld.sshfl [vmem:[#allocation1 + $0x8] sm:$0xff pattern:$0x75316420]  ;;  %848 = vrot.lane.b32.xlu1 %v784_v59, %s11038_s17 }
  0x4e   :  { %798 = vst [vmem:[#allocation1] ss:$2 sm:$0xff] %v11160_v18  ;;  %844 = vrot.lane.b32.xlu2 %v782_v57, %s11038_s17 }
  0x4f   :  { %799 = vst [vmem:[#allocation1 + $0x10] ss:$2 sm:$0xff] %v11153_v16  ;;  %v796_v63 = vld.sshfl [vmem:[#allocation1 + $0x30] sm:$0xff pattern:$0x75316420] }
  0x50   :  { %v797_v53 = vld.sshfl [vmem:[#allocation1 + $0x38] sm:$0xff pattern:$0x75316420] }
  0x51   :  { %801 = vst [vmem:[#allocation1 + $0x30] ss:$2 sm:$0xff] %v11171_v21 }
  0x52   :  { %1043 = vrot.lane.b32.xlu0 %v24_v50, %s11037_s25  ;;  %v794_v57 = vld.sshfl [vmem:[#allocation1 + $0x20] sm:$0xff pattern:$0x75316420]  ;;  %v795_v59 = vld.sshfl [vmem:[#allocation1 + $0x28] sm:$0xff pattern:$0x75316420] }
  0x53   :  { %800 = vst [vmem:[#allocation1 + $0x20] ss:$2 sm:$0xff] %v11181_v24 }
  0x55   :  { %v802_v62 = vld.sshfl [vmem:[#allocation1] sm:$0xff pattern:$0x75316420]  ;;  %v803_v52 = vld.sshfl [vmem:[#allocation1 + $0x8] sm:$0xff pattern:$0x75316420]  ;;  %852 = vrot.lane.b32.xlu1 %v790_v54, %s11038_s17 }
  0x56   :  { %850 = vrot.lane.b32.xlu2 %v785_v58, %s11038_s17  ;;  %810 = vst [vmem:[#allocation1] ss:$2 sm:$0xff] %v11200_v30  ;;  %v804_v51 = vld.sshfl [vmem:[#allocation1 + $0x10] sm:$0xff pattern:$0x75316420] }
  0x57   :  { %v805_v54 = vld.sshfl [vmem:[#allocation1 + $0x18] sm:$0xff pattern:$0x75316420] }
  0x58   :  { %811 = vst [vmem:[#allocation1 + $0x10] ss:$2 sm:$0xff] %v11190_v27  ;;  %v809_v58 = vld.sshfl [vmem:[#allocation1 + $0x38] sm:$0xff pattern:$0x75316420] }
  0x5a   :  { %846 = vrot.lane.b32.xlu0 %v783_v60, %s11038_s17  ;;  %v806_v50 = vld.sshfl [vmem:[#allocation1 + $0x20] sm:$0xff pattern:$0x75316420]  ;;  %v807_v49 = vld.sshfl [vmem:[#allocation1 + $0x28] sm:$0xff pattern:$0x75316420] }
  0x5b   :  { %812 = vst [vmem:[#allocation1 + $0x20] ss:$2 sm:$0xff] %v11221_v36 }
  0x5d   :  { %854 = vrot.lane.b32.xlu1 %v791_v56, %s11038_s17  ;;  %v808_v56 = vld.sshfl [vmem:[#allocation1 + $0x30] sm:$0xff pattern:$0x75316420] }
  0x5e   :  { %856 = vrot.lane.b32.xlu2 %v792_v61, %s11038_s17  ;;  %813 = vst [vmem:[#allocation1 + $0x30] ss:$2 sm:$0xff] %v11211_v33 }
  0x5f   :  { %v816_v60 = vld.sshfl [vmem:[#allocation1 + $0x10] sm:$0xff pattern:$0x75316420]  ;;  %v817_v61 = vld.sshfl [vmem:[#allocation1 + $0x18] sm:$0xff pattern:$0x75316420] }
  0x60   :  { %823 = vst [vmem:[#allocation1 + $0x10] ss:$2 sm:$0xff] %v11230_v39 }
  0x62   :  { %858 = vrot.lane.b32.xlu0 %v793_v55, %s11038_s17  ;;  %v818_v55 = vld.sshfl [vmem:[#allocation1 + $0x20] sm:$0xff pattern:$0x75316420] }
  0x65   :  { %866 = vrot.lane.b32.xlu1 %v797_v53, %s11038_s17  ;;  %v820_v53 = vld.sshfl [vmem:[#allocation1 + $0x30] sm:$0xff pattern:$0x75316420] }
  0x66   :  { %860 = vrot.lane.b32.xlu2 %v794_v57, %s11038_s17  ;;  %v821_v57 = vld.sshfl [vmem:[#allocation1 + $0x38] sm:$0xff pattern:$0x75316420] }
  0x67   :  { %825 = vst [vmem:[#allocation1 + $0x30] ss:$2 sm:$0xff] %v11251_v45 }
  0x6a   :  { %864 = vrot.lane.b32.xlu0 %v796_v63, %s11038_s17  ;;  %v819_v63 = vld.sshfl [vmem:[#allocation1 + $0x28] sm:$0xff pattern:$0x75316420] }
  0x6b   :  { %824 = vst [vmem:[#allocation1 + $0x20] ss:$2 sm:$0xff] %v11261_v48 }
  0x6d   :  { %872 = vrot.lane.b32.xlu1 %v804_v51, %s11038_s17  ;;  %v814_v51 = vld.sshfl [vmem:[#allocation1] sm:$0xff pattern:$0x75316420] }
  0x6e   :  { %862 = vrot.lane.b32.xlu2 %v795_v59, %s11038_s17  ;;  %v16734_v59 = vlaneseq }
  0x72   :  { %868 = vrot.lane.b32.xlu0 %v802_v62, %s11038_s17  ;;  %v815_v62 = vld.sshfl [vmem:[#allocation1 + $0x8] sm:$0xff pattern:$0x75316420] }
  0x73   :  { %822 = vst [vmem:[#allocation1] ss:$2 sm:$0xff] %v11240_v42 }
  0x75   :  { %876 = vrot.lane.b32.xlu1 %v806_v50, %s11038_s17 }
  0x76   :  { %874 = vrot.lane.b32.xlu2 %v805_v54, %s11038_s17  ;;  %v11348_v54 = vand.u32 127, %v16734_v59  ;;  %v828_v59 = vld.sshfl [vmem:[#allocation1 + $0x10] sm:$0xff pattern:$0x75316420] }
  0x78   :  { %17044 = vst [vmem:[#allocation42_spill] sm:$0xff] %v11348_v54 }
  0x7a   :  { %870 = vrot.lane.b32.xlu0 %v803_v52, %s11038_s17  ;;  %v827_v50 = vld.sshfl [vmem:[#allocation1 + $0x8] sm:$0xff pattern:$0x75316420] }
  0x7d   :  { %878 = vrot.lane.b32.xlu1 %v807_v49, %s11038_s17  ;;  %v826_v49 = vld.sshfl [vmem:[#allocation1] sm:$0xff pattern:$0x75316420] }
  0x7e   :  { %880 = vrot.lane.b32.xlu2 %v808_v56, %s11038_s17 }
  0x82   :  { %882 = vrot.lane.b32.xlu0 %v809_v58, %s11038_s17  ;;  %v829_v58 = vld.sshfl [vmem:[#allocation1 + $0x18] sm:$0xff pattern:$0x75316420] }
  0x83   :  { %3141 = vst [vmem:[#allocation1 + $0x10] ss:$2 sm:$0xff] %v11090_v1 }
  0x85   :  { %890 = vrot.lane.b32.xlu1 %v817_v61, %s11038_s17  ;;  %v11354_v61 = vpop.permute.xlu1 %1041 }
  0x86   :  { %884 = vrot.lane.b32.xlu2 %v814_v51, %s11038_s17  ;;  %v49_v51 = vadd.s32 256, %v11348_v54 }
  0x88   :  { %v11369_v45 = vand.u32 7, %v49_v51 }
  0x8a   :  { %888 = vrot.lane.b32.xlu0 %v816_v60, %s11038_s17  ;;  %v48_v60 = vadd.s32 128, %v11348_v54  ;;  %17047 = vst [vmem:[#allocation45_spill] sm:$0xff] %v11369_v45  ;;  %v532_v36 = vadd.s32 4294967295, %v11369_v45 }
  0x8c   :  { %vm572_vm5 = vcmp.ge.s32.totalorder %v532_v36, 0 }
  0x8d   :  { %896 = vrot.lane.b32.xlu1 %v820_v53, %s11038_s17  ;;  %v11356_v53 = vand.u32 7, %v48_v60  ;;  %v833_v60 = vld.sshfl [vmem:[#allocation1 + $0x38] sm:$0xff pattern:$0x75316420] }
  0x8e   :  { %886 = vrot.lane.b32.xlu2 %v815_v62, %s11038_s17  ;;  %v50_v62 = vadd.s32 384, %v11348_v54 }
  0x8f   :  { %17045 = vst [vmem:[#allocation43_spill] sm:$0xff] %v11356_v53 }
  0x90   :  { %v11371_v39 = vand.u32 7, %v50_v62 }
  0x92   :  { %892 = vrot.lane.b32.xlu0 %v818_v55, %s11038_s17  ;;  %v832_v55 = vld.sshfl [vmem:[#allocation1 + $0x30] sm:$0xff pattern:$0x75316420]  ;;  %17048 = vst [vmem:[#allocation46_spill] sm:$0xff] %v11371_v39  ;;  %v533_v42 = vadd.s32 4294967295, %v11371_v39 }
  0x93   :  { %3145 = vst [vmem:[#allocation1 + $0x30] ss:$2 sm:$0xff] %v11104_v3 }
  0x94   :  { %vm573_vm6 = vcmp.ge.s32.totalorder %v533_v42, 0 }
  0x95   :  { %900 = vrot.lane.b32.xlu1 %v826_v49, %s11038_s17  ;;  %v531_v49 = vadd.s32 4294967295, %v11356_v53 }
  0x96   :  { %898 = vrot.lane.b32.xlu2 %v821_v57, %s11038_s17  ;;  %v11359_v57 = vand.u32 7, %v11348_v54 }
  0x97   :  { %vm571_vm1 = vcmp.ge.s32.totalorder %v531_v49, 0 }
  0x98   :  { %17046 = vst [vmem:[#allocation44_spill] sm:$0xff] %v11359_v57 }
  0x9a   :  { %894 = vrot.lane.b32.xlu0 %v819_v63, %s11038_s17 }
  0x9d   :  { %902 = vrot.lane.b32.xlu1 %v827_v50, %s11038_s17  ;;  %v530_v50 = vadd.s32 4294967295, %v11359_v57 }
  0x9e   :  { %904 = vrot.lane.b32.xlu2 %v828_v59, %s11038_s17 }
  0x9f   :  { %vm570_vm2 = vcmp.ge.s32.totalorder %v530_v50, 0 }
  0xa0   :  { %v837_v52 = vpop.permute.xlu2 %836 }
  0xa2   :  { %906 = vrot.lane.b32.xlu0 %v829_v58, %s11038_s17  ;;  %v53_v58 = vadd.s32 768, %v11348_v54 }
  0xa4   :  { %v11382_v51 = vand.u32 7, %v53_v58  ;;  %v54_v58 = vadd.s32 896, %v11348_v54 }
  0xa5   :  { %914 = vrot.lane.b32.xlu1 %v833_v60, %s11038_s17 }
  0xa6   :  { %v536_v50 = vadd.s32 4294967295, %v11382_v51 }
  0xa8   :  { %v11350_v56 = vpop.permute.xlu2 %844  ;;  %vm576_vm7 = vcmp.ge.s32.totalorder %v536_v50, 0 }
  0xaa   :  { %912 = vrot.lane.b32.xlu0 %v832_v55, %s11038_s17  ;;  %v11379_v55 = vld [vmem:[%s16728_s0 + $0xa0] sm:$0xf]  ;;  %s11039_s0 = smov 120  }
  0xab   :  { %17049 = vst [vmem:[#allocation47_spill] sm:$0xff] %v11379_v55 }
  0xac   :  { %834 = vst [vmem:[#allocation1] ss:$2 sm:$0xff] %v11379_v55  ;;  %v830_v55 = vld.sshfl [vmem:[#allocation1 + $0x20] sm:$0xff pattern:$0x75316420] }
  0xad   :  { %908 = vrot.lane.b32.xlu2 %v830_v55, %s11038_s17  ;;  %v52_v55 = vadd.s32 640, %v11348_v54 }
  0xb0   :  { %v11361_v63 = vpop.permute.xlu2 %850 }
  0xb4   :  { %v841_v48 = vpop.permute.xlu0 %840 }
  0xb7   :  { %v839_v59 = vpop.permute.xlu1 %838 }
  0xb8   :  { %v11385_v62 = vpop.permute.xlu2 %856  ;;  %v920_v60 = vsel %vm918_vm0, %v839_v59, %v841_v48  ;;  %v919_v1 = vsel %vm918_vm0, %v837_v52, %v839_v59  ;;  %v835_v52 = vld.sshfl [vmem:[#allocation1] sm:$0xff pattern:$0x75316420] }
  0xb9   :  { %v1000_v3 = vsel %vm571_vm1, %v920_v60, 0.0  ;;  %v999_v49 = vsel %vm570_vm2, %v919_v1, 0.0  ;;  %v11403_v60 = vand.u32 7, %v54_v58  ;;  %916 = vrot.lane.b32.xlu0 %v835_v52, %s11038_s17  ;;  %3139 = vst [vmem:[#allocation1] ss:$2 sm:$0xff] %v11098_v2  ;;  %v55_v58 = vadd.s32 1024, %v11348_v54 }
  0xba   :  { %10193 = vmatpush.msk.msra.mxu1 %vm1050_vm3, %v1000_v3  ;;  %10190 = vmatpush.msk.msra.mxu0 %vm1050_vm3, %v999_v49  ;;  %v11427_v2 = vand.u32 7, %v52_v55  ;;  %v57_v55 = vadd.s32 1280, %v11348_v54 }
  0xbb   :  { %10191 = vmatmul.msk.f32.vlgmr.msra.gmra.mxu0 %vm1045_vm4, %v11354_v61  ;;  %10194 = vmatmul.msk.f32.vlgmr.msra.gmra.mxu1 %vm1045_vm4, %v11354_v61  ;;  %v11432_v27 = vand.u32 7, %v55_v58 }
  0xbc   :  { %v843_v1 = vpop.permute.xlu0 %842 }
  0xbd   :  { %v921_v3 = vsel %vm918_vm0, %v841_v48, %v843_v1  ;;  %v922_v59 = vsel %vm918_vm0, %v843_v1, %v11350_v56  ;;  %v51_v48 = vadd.s32 512, %v11348_v54  ;;  %v56_v1 = vadd.s32 1152, %v11348_v54 }
  0xbe   :  { %v1001_v49 = vsel %vm572_vm5, %v921_v3, 0.0  ;;  %v1002_v33 = vsel %vm573_vm6, %v922_v59, 0.0  ;;  %v59_v3 = vadd.s32 1536, %v11348_v54  ;;  %v831_v59 = vld.sshfl [vmem:[#allocation1 + $0x28] sm:$0xff pattern:$0x75316420] }
  0xbf   :  { %v849_v36 = vpop.permute.xlu1 %848  ;;  %10196 = vmatpush.msk.msra.mxu2 %vm1050_vm3, %v1001_v49  ;;  %10199 = vmatpush.msk.msra.mxu3 %vm1050_vm3, %v1002_v33  ;;  %v537_v33 = vadd.s32 4294967295, %v11403_v60  ;;  %3143 = vst [vmem:[#allocation1 + $0x20] ss:$2 sm:$0xff] %v11110_v4  ;;  %v11425_v49 = vand.u32 7, %v51_v48  ;;  %v11434_v44 = vand.u32 7, %v56_v1  ;;  %v535_v4 = vadd.s32 4294967295, %v11427_v2 }
  0xc0   :  { %v925_v42 = vsel %vm918_vm0, %v849_v36, %v11361_v63  ;;  %10197 = vmatmul.msk.f32.vlgmr.msra.gmra.mxu2 %vm1045_vm4, %v11354_v61  ;;  %10200 = vmatmul.msk.f32.vlgmr.msra.gmra.mxu3 %vm1045_vm4, %v11354_v61  ;;  %v11419_v52 = vpop.permute.xlu2 %860 }
  0xc1   :  { %v1005_v50 = vsel %vm576_vm7, %v925_v42, 0.0  ;;  %910 = vrot.lane.b32.xlu2 %v831_v59, %s11038_s17  ;;  %vm577_vm8 = vcmp.ge.s32.totalorder %v537_v33, 0  ;;  %v58_v59 = vadd.s32 1408, %v11348_v54  ;;  %v534_v1 = vadd.s32 4294967295, %v11425_v49  ;;  %3135 = vrot.lane.b32.xlu0 %v11085_v0, %s11039_s0 }
  0xc2   :  { %10208 = vmatpush.msk.msrb.mxu2 %vm1050_vm3, %v1005_v50  ;;  %v11440_v50 = vand.u32 7, %v59_v3  ;;  %v538_v3 = vadd.s32 4294967295, %v11432_v27  ;;  %v539_v47 = vadd.s32 4294967295, %v11434_v44  ;;  %vm575_vm10 = vcmp.ge.s32.totalorder %v535_v4, 0 }
  0xc3   :  { %v11458_v43 = vand.u32 7, %v58_v59  ;;  %vm574_vm9 = vcmp.ge.s32.totalorder %v534_v1, 0  ;;  %v76_v0 = vadd.s32 3712, %v11348_v54 }
  0xc4   :  { %v11430_v42 = vpop.permute.xlu0 %1043  ;;  %17050 = vst [vmem:[#allocation48_spill] sm:$0xff] %v11440_v50  ;;  %v542_v46 = vadd.s32 4294967295, %v11440_v50  ;;  %vm578_vm11 = vcmp.ge.s32.totalorder %v538_v3, 0  ;;  %vm579_vm12 = vcmp.ge.s32.totalorder %v539_v47, 0 }
  0xc5   :  { %10192 = vmatmul.msk.f32.gmra.mxu0 %vm1045_vm4, %v11430_v42  ;;  %10195 = vmatmul.msk.f32.gmra.mxu1 %vm1045_vm4, %v11430_v42  ;;  %v541_v1 = vadd.s32 4294967295, %v11458_v43 }
  0xc6   :  { %vm582_vm13 = vcmp.ge.s32.totalorder %v542_v46, 0 }
  0xc7   :  { %v853_v48 = vpop.permute.xlu1 %852  ;;  %vm581_vm15 = vcmp.ge.s32.totalorder %v541_v1, 0 }
  0xc8   :  { %v926_v58 = vsel %vm918_vm0, %v11361_v63, %v853_v48  ;;  %10198 = vmatmul.msk.f32.gmra.mxu2 %vm1045_vm4, %v11430_v42  ;;  %10201 = vmatmul.msk.f32.gmra.mxu3 %vm1045_vm4, %v11430_v42  ;;  %v11456_v63 = vand.u32 7, %v57_v55  ;;  %v863_v30 = vpop.permute.xlu2 %862 }
  0xc9   :  { %v1006_v33 = vsel %vm577_vm8, %v926_v58, 0.0 }
  0xca   :  { %10211 = vmatpush.msk.msrb.mxu3 %vm1050_vm3, %v1006_v33  ;;  %v931_v33 = vsel %vm918_vm0, %v11419_v52, %v863_v30  ;;  %v540_v59 = vadd.s32 4294967295, %v11456_v63 }
  0xcc   :  { %v847_v18 = vpop.permute.xlu0 %846  ;;  %vm580_vm14 = vcmp.ge.s32.totalorder %v540_v59, 0 }
  0xcd   :  { %v923_v58 = vsel %vm918_vm0, %v11350_v56, %v847_v18  ;;  %v924_v21 = vsel %vm918_vm0, %v847_v18, %v849_v36  ;;  %v60_v56 = vadd.s32 1664, %v11348_v54  ;;  %v61_v36 = vadd.s32 1792, %v11348_v54 }
  0xce   :  { %v1003_v38 = vsel %vm574_vm9, %v923_v58, 0.0  ;;  %v1004_v55 = vsel %vm575_vm10, %v924_v21, 0.0  ;;  %v1011_v58 = vsel %vm582_vm13, %v931_v33, 0.0 }
  0xcf   :  { %v855_v41 = vpop.permute.xlu1 %854  ;;  %10202 = vmatpush.msk.msrb.mxu0 %vm1050_vm3, %v1003_v38  ;;  %10205 = vmatpush.msk.msrb.mxu1 %vm1050_vm3, %v1004_v55  ;;  %v11491_v46 = vand.u32 7, %v61_v36 }
  0xd0   :  { %v927_v4 = vsel %vm918_vm0, %v853_v48, %v855_v41  ;;  %v928_v18 = vsel %vm918_vm0, %v855_v41, %v11385_v62  ;;  %10203 = vmatmul.msk.f32.vlgmr.msrb.gmra.mxu0 %vm1045_vm4, %v11354_v61  ;;  %10206 = vmatmul.msk.f32.vlgmr.msrb.gmra.mxu1 %vm1045_vm4, %v11354_v61  ;;  %v65_v41 = vadd.s32 2304, %v11348_v54  ;;  %v11488_v48 = vand.u32 7, %v60_v56 }
  0xd1   :  { %v1007_v21 = vsel %vm578_vm11, %v927_v4, 0.0  ;;  %v1008_v38 = vsel %vm579_vm12, %v928_v18, 0.0  ;;  %10209 = vmatmul.msk.f32.vlgmr.msrb.gmra.mxu2 %vm1045_vm4, %v11354_v61  ;;  %10212 = vmatmul.msk.f32.vlgmr.msrb.gmra.mxu3 %vm1045_vm4, %v11354_v61  ;;  %17052 = vst [vmem:[#allocation50_spill] sm:$0xff] %v11491_v46  ;;  %v544_v1 = vadd.s32 4294967295, %v11491_v46  ;;  %v62_v56 = vadd.s32 1920, %v11348_v54 }
  0xd2   :  { %10214 = vmatpush.msk.msra.mxu0 %vm1050_vm3, %v1007_v21  ;;  %10217 = vmatpush.msk.msra.mxu1 %vm1050_vm3, %v1008_v38  ;;  %17051 = vst [vmem:[#allocation49_spill] sm:$0xff] %v11488_v48  ;;  %v11497_v55 = vand.u32 7, %v65_v41  ;;  %v543_v59 = vadd.s32 4294967295, %v11488_v48  ;;  %v875_v38 = vpop.permute.xlu2 %874 }
  0xd3   :  { %vm584_vm2 = vcmp.ge.s32.totalorder %v544_v1, 0  ;;  %v11514_v36 = vand.u32 7, %v62_v56  ;;  %v64_v1 = vadd.s32 2176, %v11348_v54 }
  0xd4   :  { %10226 = vmatpush.msk.msrb.mxu0 %vm1050_vm3, %v1011_v58  ;;  %v859_v47 = vpop.permute.xlu0 %858  ;;  %17053 = vst [vmem:[#allocation51_spill] sm:$0xff] %v11497_v55  ;;  %vm583_vm1 = vcmp.ge.s32.totalorder %v543_v59, 0  ;;  %v63_v59 = vadd.s32 2048, %v11348_v54 }
  0xd5   :  { %v929_v3 = vsel %vm918_vm0, %v11385_v62, %v859_v47  ;;  %v930_v33 = vsel %vm918_vm0, %v859_v47, %v11419_v52  ;;  %v548_v62 = vadd.s32 4294967295, %v11497_v55  ;;  %v66_v52 = vadd.s32 2432, %v11348_v54  ;;  %17054 = vst [vmem:[#allocation52_spill] sm:$0xff] %v11514_v36 }
  0xd6   :  { %v1009_v4 = vsel %vm580_vm14, %v929_v3, 0.0  ;;  %v1010_v18 = vsel %vm581_vm15, %v930_v33, 0.0  ;;  %v545_v40 = vadd.s32 4294967295, %v11514_v36 }
  0xd7   :  { %v867_v21 = vpop.permute.xlu1 %866  ;;  %10220 = vmatpush.msk.msra.mxu2 %vm1050_vm3, %v1009_v4  ;;  %10223 = vmatpush.msk.msra.mxu3 %vm1050_vm3, %v1010_v18  ;;  %vm588_vm5 = vcmp.ge.s32.totalorder %v548_v62, 0  ;;  %v11518_v3 = vand.u32 7, %v66_v52  ;;  %v67_v52 = vadd.s32 2560, %v11348_v54 }
  0xd8   :  { %10204 = vmatmul.msk.f32.gmra.mxu0 %vm1045_vm4, %v11430_v42  ;;  %10207 = vmatmul.msk.f32.gmra.mxu1 %vm1045_vm4, %v11430_v42  ;;  %vm585_vm6 = vcmp.ge.s32.totalorder %v545_v40, 0 }
  0xd9   :  { %10210 = vmatmul.msk.f32.gmra.mxu2 %vm1045_vm4, %v11430_v42  ;;  %10213 = vmatmul.msk.f32.gmra.mxu3 %vm1045_vm4, %v11430_v42  ;;  %17055 = vst [vmem:[#allocation53_spill] sm:$0xff] %v11518_v3  ;;  %v549_v62 = vadd.s32 4294967295, %v11518_v3  ;;  %v11543_v37 = vand.u32 7, %v67_v52 }
  0xdb   :  { %vm589_vm7 = vcmp.ge.s32.totalorder %v549_v62, 0  ;;  %17058 = vst [vmem:[#allocation56_spill] sm:$0xff] %v11543_v37  ;;  %v69_v62 = vadd.s32 2816, %v11348_v54 }
  0xdc   :  { %v865_v58 = vpop.permute.xlu0 %864 }
  0xdd   :  { %v932_v41 = vsel %vm918_vm0, %v863_v30, %v865_v58  ;;  %v933_v47 = vsel %vm918_vm0, %v865_v58, %v867_v21  ;;  %v68_v58 = vadd.s32 2688, %v11348_v54  ;;  %v11564_v52 = vand.u32 7, %v69_v62 }
  0xde   :  { %v1012_v33 = vsel %vm583_vm1, %v932_v41, 0.0  ;;  %v1013_v4 = vsel %vm584_vm2, %v933_v47, 0.0  ;;  %v11538_v41 = vand.u32 7, %v63_v59  ;;  %v11540_v47 = vand.u32 7, %v64_v1 }
  0xdf   :  { %v873_v18 = vpop.permute.xlu1 %872  ;;  %10229 = vmatpush.msk.msrb.mxu1 %vm1050_vm3, %v1012_v33  ;;  %10232 = vmatpush.msk.msrb.mxu2 %vm1050_vm3, %v1013_v4  ;;  %v11545_v24 = vand.u32 7, %v68_v58  ;;  %17060 = vst [vmem:[#allocation58_spill] sm:$0xff] %v11564_v52 }
  0xe0   :  { %v937_v30 = vsel %vm918_vm0, %v873_v18, %v875_v38  ;;  %10215 = vmatmul.msk.f32.vlgmr.msra.gmra.mxu0 %vm1045_vm4, %v11354_v61  ;;  %10218 = vmatmul.msk.f32.vlgmr.msra.gmra.mxu1 %vm1045_vm4, %v11354_v61  ;;  %17056 = vst [vmem:[#allocation54_spill] sm:$0xff] %v11538_v41  ;;  %v547_v40 = vadd.s32 4294967295, %v11540_v47 }
  0xe1   :  { %v1017_v56 = vsel %vm588_vm5, %v937_v30, 0.0  ;;  %10221 = vmatmul.msk.f32.vlgmr.msra.gmra.mxu2 %vm1045_vm4, %v11354_v61  ;;  %10224 = vmatmul.msk.f32.vlgmr.msra.gmra.mxu3 %vm1045_vm4, %v11354_v61  ;;  %17057 = vst [vmem:[#allocation55_spill] sm:$0xff] %v11540_v47  ;;  %v881_v30 = vpop.permute.xlu2 %880  ;;  %v551_v1 = vadd.s32 4294967295, %v11545_v24 }
  0xe2   :  { %10244 = vmatpush.msk.msra.mxu2 %vm1050_vm3, %v1017_v56  ;;  %17059 = vst [vmem:[#allocation57_spill] sm:$0xff] %v11545_v24  ;;  %v546_v56 = vadd.s32 4294967295, %v11538_v41  ;;  %vm587_vm9 = vcmp.ge.s32.totalorder %v547_v40, 0 }
  0xe3   :  { %vm591_vm11 = vcmp.ge.s32.totalorder %v551_v1, 0 }
  0xe4   :  { %v869_v33 = vpop.permute.xlu0 %868  ;;  %vm586_vm8 = vcmp.ge.s32.totalorder %v546_v56, 0 }
  0xe5   :  { %v934_v4 = vsel %vm918_vm0, %v867_v21, %v869_v33 }
  0xe6   :  { %v1014_v9 = vsel %vm585_vm6, %v934_v4, 0.0 }
  0xe7   :  { %v877_v16 = vpop.permute.xlu1 %876  ;;  %10235 = vmatpush.msk.msrb.mxu3 %vm1050_vm3, %v1014_v9  ;;  %v550_v9 = vadd.s32 4294967295, %v11543_v37 }
  0xe8   :  { %v938_v59 = vsel %vm918_vm0, %v875_v38, %v877_v16  ;;  %10216 = vmatmul.msk.f32.gmra.mxu0 %vm1045_vm4, %v11430_v42  ;;  %10219 = vmatmul.msk.f32.gmra.mxu1 %vm1045_vm4, %v11430_v42  ;;  %v70_v38 = vadd.s32 2944, %v11348_v54 }
  0xe9   :  { %v1018_v21 = vsel %vm589_vm7, %v938_v59, 0.0  ;;  %10222 = vmatmul.msk.f32.gmra.mxu2 %vm1045_vm4, %v11430_v42  ;;  %10225 = vmatmul.msk.f32.gmra.mxu3 %vm1045_vm4, %v11430_v42  ;;  %vm590_vm10 = vcmp.ge.s32.totalorder %v550_v9, 0 }
  0xea   :  { %10247 = vmatpush.msk.msra.mxu3 %vm1050_vm3, %v1018_v21  ;;  %v11566_v58 = vand.u32 7, %v70_v38  ;;  %v552_v21 = vadd.s32 4294967295, %v11564_v52 }
  0xec   :  { %17061 = vst [vmem:[#allocation59_spill] sm:$0xff] %v11566_v58  ;;  %v871_v4 = vpop.permute.xlu0 %870  ;;  %v553_v62 = vadd.s32 4294967295, %v11566_v58  ;;  %vm592_vm12 = vcmp.ge.s32.totalorder %v552_v21, 0 }
  0xed   :  { %v935_v59 = vsel %vm918_vm0, %v869_v33, %v871_v4  ;;  %v936_v32 = vsel %vm918_vm0, %v871_v4, %v873_v18  ;;  %v885_v33 = vpop.permute.xlu2 %884 }
  0xee   :  { %v1015_v24 = vsel %vm586_vm8, %v935_v59, 0.0  ;;  %v1016_v37 = vsel %vm587_vm9, %v936_v32, 0.0  ;;  %vm593_vm13 = vcmp.ge.s32.totalorder %v553_v62, 0 }
  0xef   :  { %v879_v35 = vpop.permute.xlu1 %878  ;;  %10238 = vmatpush.msk.msra.mxu0 %vm1050_vm3, %v1015_v24  ;;  %10241 = vmatpush.msk.msra.mxu1 %vm1050_vm3, %v1016_v37  ;;  %v72_v24 = vadd.s32 3200, %v11348_v54 }
  0xf0   :  { %v939_v56 = vsel %vm918_vm0, %v877_v16, %v879_v35  ;;  %v940_v40 = vsel %vm918_vm0, %v879_v35, %v881_v30  ;;  %10227 = vmatmul.msk.f32.vlgmr.msrb.gmra.mxu0 %vm1045_vm4, %v11354_v61  ;;  %10230 = vmatmul.msk.f32.vlgmr.msrb.gmra.mxu1 %vm1045_vm4, %v11354_v61  ;;  %v71_v16 = vadd.s32 3072, %v11348_v54  ;;  %v73_v35 = vadd.s32 3328, %v11348_v54 }
  0xf1   :  { %v1019_v32 = vsel %vm590_vm10, %v939_v56, 0.0  ;;  %v1020_v18 = vsel %vm591_vm11, %v940_v40, 0.0  ;;  %10233 = vmatmul.msk.f32.vlgmr.msrb.gmra.mxu2 %vm1045_vm4, %v11354_v61  ;;  %10236 = vmatmul.msk.f32.vlgmr.msrb.gmra.mxu3 %vm1045_vm4, %v11354_v61  ;;  %v11591_v1 = vand.u32 7, %v72_v24 }
  0xf2   :  { %10250 = vmatpush.msk.msrb.mxu0 %vm1050_vm3, %v1019_v32  ;;  %10253 = vmatpush.msk.msrb.mxu1 %vm1050_vm3, %v1020_v18  ;;  %v11589_v9 = vand.u32 7, %v71_v16  ;;  %v11595_v59 = vand.u32 7, %v73_v35  ;;  %v74_v18 = vadd.s32 3456, %v11348_v54 }
  0xf3   :  { %17063 = vst [vmem:[#allocation61_spill] sm:$0xff] %v11591_v1 }
  0xf4   :  { %v883_v37 = vpop.permute.xlu0 %882  ;;  %17062 = vst [vmem:[#allocation60_spill] sm:$0xff] %v11589_v9  ;;  %v554_v21 = vadd.s32 4294967295, %v11589_v9  ;;  %v556_v32 = vadd.s32 4294967295, %v11595_v59  ;;  %v11611_v24 = vand.u32 7, %v74_v18  ;;  %v11634_v18 = vand.u32 7, %v76_v0 }
  0xf5   :  { %v941_v38 = vsel %vm918_vm0, %v881_v30, %v883_v37  ;;  %v942_v4 = vsel %vm918_vm0, %v883_v37, %v885_v33  ;;  %17064 = vst [vmem:[#allocation62_spill] sm:$0xff] %v11595_v59  ;;  %v555_v30 = vadd.s32 4294967295, %v11591_v1  ;;  %v887_v62 = vpop.permute.xlu2 %886 }
  0xf6   :  { %v1021_v56 = vsel %vm592_vm12, %v941_v38, 0.0  ;;  %v1022_v40 = vsel %vm593_vm13, %v942_v4, 0.0  ;;  %17065 = vst [vmem:[#allocation63_spill] sm:$0xff] %v11611_v24  ;;  %vm594_vm14 = vcmp.ge.s32.totalorder %v554_v21, 0  ;;  %v943_v37 = vsel %vm918_vm0, %v885_v33, %v887_v62 }
  0xf7   :  { %10256 = vmatpush.msk.msrb.mxu2 %vm1050_vm3, %v1021_v56  ;;  %10259 = vmatpush.msk.msrb.mxu3 %vm1050_vm3, %v1022_v40  ;;  %v891_v16 = vpop.permute.xlu1 %890  ;;  %vm595_vm15 = vcmp.ge.s32.totalorder %v555_v30, 0  ;;  %vm596_vm1 = vcmp.ge.s32.totalorder %v556_v32, 0  ;;  %v1023_v56 = vsel %vm594_vm14, %v943_v37, 0.0  ;;  %v557_v1 = vadd.s32 4294967295, %v11611_v24  ;;  %17067 = vst [vmem:[#allocation65_spill] sm:$0xff] %v11634_v18 }
  0xf8   :  { %10228 = vmatmul.msk.f32.gmra.mxu0 %vm1045_vm4, %v11430_v42  ;;  %10231 = vmatmul.msk.f32.gmra.mxu1 %vm1045_vm4, %v11430_v42  ;;  %v75_v21 = vadd.s32 3584, %v11348_v54 }
  0xf9   :  { %10234 = vmatmul.msk.f32.gmra.mxu2 %vm1045_vm4, %v11430_v42  ;;  %10237 = vmatmul.msk.f32.gmra.mxu3 %vm1045_vm4, %v11430_v42  ;;  %vm597_vm2 = vcmp.ge.s32.totalorder %v557_v1, 0  ;;  %v559_v1 = vadd.s32 4294967295, %v11634_v18 }
  0xfa   :  { %v11632_v30 = vand.u32 7, %v75_v21 }
  0xfb   :  { %vm599_vm6 = vcmp.ge.s32.totalorder %v559_v1, 0 }
  0xfc   :  { %v889_v35 = vpop.permute.xlu0 %888  ;;  %17066 = vst [vmem:[#allocation64_spill] sm:$0xff] %v11632_v30 }
  0xfd   :  { %v944_v38 = vsel %vm918_vm0, %v887_v62, %v889_v35  ;;  %v945_v4 = vsel %vm918_vm0, %v889_v35, %v891_v16 }
  0xfe   :  { %v1024_v40 = vsel %vm595_vm15, %v944_v38, 0.0  ;;  %v1025_v33 = vsel %vm596_vm1, %v945_v4, 0.0  ;;  %v558_v38 = vadd.s32 4294967295, %v11632_v30  ;;  %v899_v4 = vpop.permute.xlu2 %898 }
  0xff   :  { %v897_v32 = vpop.permute.xlu1 %896 }
 0x100   :  { %10239 = vmatmul.msk.f32.vlgmr.msra.gmra.mxu0 %vm1045_vm4, %v11354_v61  ;;  %10242 = vmatmul.msk.f32.vlgmr.msra.gmra.mxu1 %vm1045_vm4, %v11354_v61  ;;  %vm598_vm5 = vcmp.ge.s32.totalorder %v558_v38, 0  ;;  %v949_v0 = vsel %vm918_vm0, %v897_v32, %v899_v4 }
 0x101   :  { %10245 = vmatmul.msk.f32.vlgmr.msra.gmra.mxu2 %vm1045_vm4, %v11354_v61  ;;  %10248 = vmatmul.msk.f32.vlgmr.msra.gmra.mxu3 %vm1045_vm4, %v11354_v61 }
 0x102   :  { %10262 = vmatpush.msk.msra.mxu0 %vm1050_vm3, %v1023_v56  ;;  %10265 = vmatpush.msk.msra.mxu1 %vm1050_vm3, %v1024_v40  ;;  %v78_v56 = vadd.s32 3968, %v11348_v54 }
 0x103   :  { %10268 = vmatpush.msk.msra.mxu2 %vm1050_vm3, %v1025_v33 }
 0x104   :  { %v893_v62 = vpop.permute.xlu0 %892  ;;  %v11652_v33 = vand.u32 7, %v78_v56 }
 0x105   :  { %v946_v35 = vsel %vm918_vm0, %v891_v16, %v893_v62  ;;  %v77_v16 = vadd.s32 3840, %v11348_v54 }
 0x106   :  { %v1026_v37 = vsel %vm597_vm2, %v946_v35, 0.0  ;;  %17069 = vst [vmem:[#allocation67_spill] sm:$0xff] %v11652_v33  ;;  %v561_v30 = vadd.s32 4294967295, %v11652_v33 }
 0x107   :  { %10271 = vmatpush.msk.msra.mxu3 %vm1050_vm3, %v1026_v37  ;;  %v11650_v40 = vand.u32 7, %v77_v16  ;;  %v901_v9 = vpop.permute.xlu1 %900 }
 0x108   :  { %10240 = vmatmul.msk.f32.gmra.mxu0 %vm1045_vm4, %v11430_v42  ;;  %10243 = vmatmul.msk.f32.gmra.mxu1 %vm1045_vm4, %v11430_v42  ;;  %vm601_vm8 = vcmp.ge.s32.totalorder %v561_v30, 0  ;;  %v950_v38 = vsel %vm918_vm0, %v899_v4, %v901_v9  ;;  %v80_v30 = vadd.s32 4224, %v11348_v54 }
 0x109   :  { %10246 = vmatmul.msk.f32.gmra.mxu2 %vm1045_vm4, %v11430_v42  ;;  %10249 = vmatmul.msk.f32.gmra.mxu3 %vm1045_vm4, %v11430_v42  ;;  %17068 = vst [vmem:[#allocation66_spill] sm:$0xff] %v11650_v40  ;;  %v560_v18 = vadd.s32 4294967295, %v11650_v40  ;;  %v1030_v1 = vsel %vm601_vm8, %v950_v38, 0.0 }
 0x10a   :  { %v11676_v4 = vand.u32 7, %v80_v30 }
 0x10b   :  { %vm600_vm7 = vcmp.ge.s32.totalorder %v560_v18, 0  ;;  %v79_v18 = vadd.s32 4096, %v11348_v54 }
 0x10c   :  { %v895_v21 = vpop.permute.xlu0 %894  ;;  %17071 = vst [vmem:[#allocation69_spill] sm:$0xff] %v11676_v4 }
 0x10d   :  { %v947_v35 = vsel %vm918_vm0, %v893_v62, %v895_v21  ;;  %v948_v37 = vsel %vm918_vm0, %v895_v21, %v897_v32  ;;  %v1029_v62 = vsel %vm600_vm7, %v949_v0, 0.0  ;;  %v905_v32 = vpop.permute.xlu2 %904  ;;  %v11674_v16 = vand.u32 7, %v79_v18 }
 0x10e   :  { %v1027_v24 = vsel %vm598_vm5, %v947_v35, 0.0  ;;  %v1028_v59 = vsel %vm599_vm6, %v948_v37, 0.0  ;;  %v82_v0 = vadd.s32 4480, %v11348_v54 }
 0x10f   :  { %17070 = vst [vmem:[#allocation68_spill] sm:$0xff] %v11674_v16  ;;  %v562_v56 = vadd.s32 4294967295, %v11674_v16  ;;  %v903_v21 = vpop.permute.xlu1 %902 }
 0x110   :  { %10251 = vmatmul.msk.f32.vlgmr.msrb.gmra.mxu0 %vm1045_vm4, %v11354_v61  ;;  %10254 = vmatmul.msk.f32.vlgmr.msrb.gmra.mxu1 %vm1045_vm4, %v11354_v61  ;;  %v952_v18 = vsel %vm918_vm0, %v903_v21, %v905_v32 }
 0x111   :  { %10257 = vmatmul.msk.f32.vlgmr.msrb.gmra.mxu2 %vm1045_vm4, %v11354_v61  ;;  %10260 = vmatmul.msk.f32.vlgmr.msrb.gmra.mxu3 %vm1045_vm4, %v11354_v61  ;;  %vm602_vm9 = vcmp.ge.s32.totalorder %v562_v56, 0 }
 0x112   :  { %10274 = vmatpush.msk.msrb.mxu0 %vm1050_vm3, %v1027_v24  ;;  %10277 = vmatpush.msk.msrb.mxu1 %vm1050_vm3, %v1028_v59  ;;  %v563_v24 = vadd.s32 4294967295, %v11676_v4  ;;  %v81_v59 = vadd.s32 4352, %v11348_v54 }
 0x113   :  { %10280 = vmatpush.msk.msrb.mxu2 %vm1050_vm3, %v1029_v62  ;;  %10283 = vmatpush.msk.msrb.mxu3 %vm1050_vm3, %v1030_v1  ;;  %v11692_v62 = vand.u32 7, %v82_v0  ;;  %v951_v1 = vsel %vm918_vm0, %v901_v9, %v903_v21 }
 0x114   :  { %v11690_v35 = vand.u32 7, %v81_v59  ;;  %v907_v37 = vpop.permute.xlu0 %906  ;;  %vm603_vm10 = vcmp.ge.s32.totalorder %v563_v24, 0  ;;  %v1031_v59 = vsel %vm602_vm9, %v951_v1, 0.0  ;;  %v84_v24 = vadd.s32 4736, %v11348_v54 }
 0x115   :  { %v909_v38 = vpop.permute.xlu2 %908  ;;  %17073 = vst [vmem:[#allocation71_spill] sm:$0xff] %v11692_v62  ;;  %v953_v16 = vsel %vm918_vm0, %v905_v32, %v907_v37  ;;  %v565_v4 = vadd.s32 4294967295, %v11692_v62  ;;  %v1032_v40 = vsel %vm603_vm10, %v952_v18, 0.0  ;;  %v83_v32 = vadd.s32 4608, %v11348_v54 }
 0x116   :  { %17072 = vst [vmem:[#allocation70_spill] sm:$0xff] %v11690_v35  ;;  %v564_v30 = vadd.s32 4294967295, %v11690_v35  ;;  %v954_v33 = vsel %vm918_vm0, %v907_v37, %v909_v38  ;;  %v85_v37 = vadd.s32 4864, %v11348_v54  ;;  %v86_v1 = vadd.s32 4992, %v11348_v54 }
 0x117   :  { %vm605_vm12 = vcmp.ge.s32.totalorder %v565_v4, 0  ;;  %v915_v18 = vpop.permute.xlu1 %914  ;;  %v139_v54 = vadd.s32 4294967294, %v11440_v50 }
 0x118   :  { %10252 = vmatmul.msk.f32.gmra.mxu0 %vm1045_vm4, %v11430_v42  ;;  %10255 = vmatmul.msk.f32.gmra.mxu1 %vm1045_vm4, %v11430_v42  ;;  %vm604_vm11 = vcmp.ge.s32.totalorder %v564_v30, 0  ;;  %v1034_v56 = vsel %vm605_vm12, %v954_v33, 0.0  ;;  %v11716_v33 = vand.u32 7, %v84_v24  ;;  %v11730_v30 = vand.u32 7, %v85_v37 }
 0x119   :  { %10258 = vmatmul.msk.f32.gmra.mxu2 %vm1045_vm4, %v11430_v42  ;;  %10261 = vmatmul.msk.f32.gmra.mxu3 %vm1045_vm4, %v11430_v42  ;;  %v1033_v9 = vsel %vm604_vm11, %v953_v16, 0.0  ;;  %v11714_v16 = vand.u32 7, %v83_v32 }
 0x11a   :  { %17075 = vst [vmem:[#allocation73_spill] sm:$0xff] %v11716_v33  ;;  %v567_v0 = vadd.s32 4294967295, %v11716_v33  ;;  %v568_v32 = vadd.s32 4294967295, %v11730_v30 }
 0x11b   :  { %17074 = vst [vmem:[#allocation72_spill] sm:$0xff] %v11714_v16  ;;  %v566_v21 = vadd.s32 4294967295, %v11714_v16 }
 0x11c   :  { %v913_v4 = vpop.permute.xlu0 %912  ;;  %17076 = vst [vmem:[#allocation74_spill] sm:$0xff] %v11730_v30  ;;  %vm607_vm14 = vcmp.ge.s32.totalorder %v567_v0, 0  ;;  %vm608_vm15 = vcmp.ge.s32.totalorder %v568_v32, 0  ;;  %v127_v0 = vadd.s32 4294967294, %v11359_v57 }
 0x11d   :  { %vm606_vm13 = vcmp.ge.s32.totalorder %v566_v21, 0  ;;  %v957_v24 = vsel %vm918_vm0, %v913_v4, %v915_v18 }
 0x11e   :  { %vm167_vm2 = vcmp.ge.s32.totalorder %v127_v0, 0  ;;  %v132_v0 = vadd.s32 4294967294, %v11427_v2 }
 0x120   :  { %10263 = vmatmul.msk.f32.vlgmr.msra.gmra.mxu0 %vm1045_vm4, %v11354_v61  ;;  %10266 = vmatmul.msk.f32.vlgmr.msra.gmra.mxu1 %vm1045_vm4, %v11354_v61  ;;  %vm172_vm9 = vcmp.ge.s32.totalorder %v132_v0, 0 }
 0x121   :  { %10269 = vmatmul.msk.f32.vlgmr.msra.gmra.mxu2 %vm1045_vm4, %v11354_v61  ;;  %10272 = vmatmul.msk.f32.vlgmr.msra.gmra.mxu3 %vm1045_vm4, %v11354_v61 }
 0x122   :  { %10286 = vmatpush.msk.msra.mxu0 %vm1050_vm3, %v1031_v59  ;;  %10289 = vmatpush.msk.msra.mxu1 %vm1050_vm3, %v1032_v40  ;;  %v911_v40 = vpop.permute.xlu2 %910  ;;  %v11732_v59 = vand.u32 7, %v86_v1  ;;  %v130_v1 = vadd.s32 4294967294, %v11371_v39 }
 0x123   :  { %10292 = vmatpush.msk.msra.mxu2 %vm1050_vm3, %v1033_v9  ;;  %10295 = vmatpush.msk.msra.mxu3 %vm1050_vm3, %v1034_v56  ;;  %v955_v9 = vsel %vm918_vm0, %v909_v38, %v911_v40  ;;  %v956_v56 = vsel %vm918_vm0, %v911_v40, %v913_v4  ;;  %v1037_v38 = vsel %vm608_vm15, %v957_v24, 0.0  ;;  %v128_v40 = vadd.s32 4294967294, %v11356_v53 }
 0x124   :  { %17077 = vst [vmem:[#allocation75_spill] sm:$0xff] %v11732_v59  ;;  %v569_v16 = vadd.s32 4294967295, %v11732_v59  ;;  %v1035_v33 = vsel %vm606_vm13, %v955_v9, 0.0  ;;  %v1036_v62 = vsel %vm607_vm14, %v956_v56, 0.0  ;;  %vm170_vm6 = vcmp.ge.s32.totalorder %v130_v1, 0 }
 0x125   :  { %vm168_vm5 = vcmp.ge.s32.totalorder %v128_v40, 0  ;;  %v490_v9 = vsel %vm167_vm2, %v11133_v10, 0.0  ;;  %v493_v32 = vsel %vm170_vm6, %v11125_v8, 0.0  ;;  %v134_v40 = vadd.s32 4294967294, %v11403_v60 }
 0x126   :  { %vm609_vm1 = vcmp.ge.s32.totalorder %v569_v16, 0  ;;  %v491_v56 = vsel %vm168_vm5, %v11135_v11, 0.0 }
 0x127   :  { %vm174_vm10 = vcmp.ge.s32.totalorder %v134_v40, 0 }
 0x128   :  { %10264 = vmatmul.msk.f32.gmra.mxu0 %vm1045_vm4, %v11430_v42  ;;  %10267 = vmatmul.msk.f32.gmra.mxu1 %vm1045_vm4, %v11430_v42 }
 0x129   :  { %10270 = vmatmul.msk.f32.gmra.mxu2 %vm1045_vm4, %v11430_v42  ;;  %10273 = vmatmul.msk.f32.gmra.mxu3 %vm1045_vm4, %v11430_v42 }
 0x12b   :  { %v917_v37 = vpop.permute.xlu0 %916 }
 0x12c   :  { %v958_v21 = vsel %vm918_vm0, %v915_v18, %v917_v37 }
 0x12d   :  { %v1038_v4 = vsel %vm609_vm1, %v958_v21, 0.0  ;;  %vm179_vm1 = vcmp.ge.s32.totalorder %v139_v54, 0  ;;  %v3149_v54 = vld.sshfl [vmem:[#allocation1 + $0x18] sm:$0xff pattern:$0x75316420] }
 0x12e   :  { %3210 = vrot.lane.b32.xlu2 %v3149_v54, %s11040_s22  ;;  %v144_v54 = vadd.s32 4294967294, %v11540_v47 }
 0x130   :  { %10275 = vmatmul.msk.f32.vlgmr.msrb.gmra.mxu0 %vm1045_vm4, %v11354_v61  ;;  %10278 = vmatmul.msk.f32.vlgmr.msrb.gmra.mxu1 %vm1045_vm4, %v11354_v61 }
 0x131   :  { %10281 = vmatmul.msk.f32.vlgmr.msrb.gmra.mxu2 %vm1045_vm4, %v11354_v61  ;;  %10284 = vmatmul.msk.f32.vlgmr.msrb.gmra.mxu3 %vm1045_vm4, %v11354_v61 }
 0x132   :  { %10298 = vmatpush.msk.msrb.mxu0 %vm1050_vm3, %v1035_v33  ;;  %10301 = vmatpush.msk.msrb.mxu1 %vm1050_vm3, %v1036_v62  ;;  %v129_v62 = vadd.s32 4294967294, %v11369_v45 }
 0x133   :  { %10304 = vmatpush.msk.msrb.mxu2 %vm1050_vm3, %v1037_v38  ;;  %10307 = vmatpush.msk.msrb.mxu3 %vm1050_vm3, %v1038_v4  ;;  %v133_v38 = vadd.s32 4294967294, %v11382_v51 }
 0x134   :  { %vm169_vm0 = vcmp.ge.s32.totalorder %v129_v62, 0  ;;  %v131_v62 = vadd.s32 4294967294, %v11425_v49 }
 0x135   :  { %v492_v18 = vsel %vm169_vm0, %v11123_v7, 0.0  ;;  %vm173_vm7 = vcmp.ge.s32.totalorder %v133_v38, 0 }
 0x136   :  { %v496_v1 = vsel %vm173_vm7, %v11138_v12, 0.0  ;;  %vm171_vm8 = vcmp.ge.s32.totalorder %v131_v62, 0  ;;  %v137_v62 = vadd.s32 4294967294, %v11456_v63  ;;  %vm184_vm7 = vcmp.ge.s32.totalorder %v144_v54, 0 }
 0x138   :  { %10276 = vmatmul.msk.f32.gmra.mxu0 %vm1045_vm4, %v11430_v42  ;;  %10279 = vmatmul.msk.f32.gmra.mxu1 %vm1045_vm4, %v11430_v42  ;;  %v11760_v16 = vpop.f32.mrf.mxu0  ;;  %v11762_v33 = vpop.f32.mrf.mxu1  ;;  %vm177_vm11 = vcmp.ge.s32.totalorder %v137_v62, 0 }
 0x139   :  { %10282 = vmatmul.msk.f32.gmra.mxu2 %vm1045_vm4, %v11430_v42  ;;  %10285 = vmatmul.msk.f32.gmra.mxu3 %vm1045_vm4, %v11430_v42  ;;  %17078 = vst [vmem:[#allocation76_spill] sm:$0xff] %v11760_v16  ;;  %v17119_v16 = vld [vmem:[#allocation18_spill] sm:$0xff] }
 0x13a   :  { %17079 = vst [vmem:[#allocation77_spill] sm:$0xff] %v11762_v33 }
 0x140   :  { %10287 = vmatmul.msk.f32.vlgmr.msra.gmra.mxu0 %vm1045_vm4, %v11354_v61  ;;  %10290 = vmatmul.msk.f32.vlgmr.msra.gmra.mxu1 %vm1045_vm4, %v11354_v61 }
 0x141   :  { %10293 = vmatmul.msk.f32.vlgmr.msra.gmra.mxu2 %vm1045_vm4, %v11354_v61  ;;  %10296 = vmatmul.msk.f32.vlgmr.msra.gmra.mxu3 %vm1045_vm4, %v11354_v61 }
 0x142   :  { %v11780_v7 = vpop.f32.mrf.mxu0  ;;  %v11782_v24 = vpop.f32.mrf.mxu1  ;;  %10316 = vmatpush.msk.msra.mxu2 %vm1050_vm3, %v492_v18  ;;  %10310 = vmatpush.msk.msra.mxu0 %vm1050_vm3, %v490_v9  ;;  %v494_v18 = vsel %vm171_vm8, %v11148_v15, 0.0  ;;  %v495_v9 = vsel %vm172_vm9, %v11155_v17, 0.0 }
 0x143   :  { %17080 = vst [vmem:[#allocation78_spill] sm:$0xff] %v11780_v7  ;;  %v11786_v37 = vpop.f32.mrf.mxu2  ;;  %v11788_v10 = vpop.f32.mrf.mxu3  ;;  %10313 = vmatpush.msk.msra.mxu1 %vm1050_vm3, %v491_v56  ;;  %10319 = vmatpush.msk.msra.mxu3 %vm1050_vm3, %v493_v32  ;;  %v497_v56 = vsel %vm174_vm10, %v11140_v13, 0.0  ;;  %v3148_v32 = vld.sshfl [vmem:[#allocation1 + $0x10] sm:$0xff pattern:$0x75316420] }
 0x144   :  { %17081 = vst [vmem:[#allocation79_spill] sm:$0xff] %v11782_v24  ;;  %3208 = vrot.lane.b32.xlu1 %v3148_v32, %s11040_s22  ;;  %v11862_v32 = vld [vmem:[%s16727_s1] sm:$0xff]  ;;  %v150_v24 = vadd.s32 4294967294, %v11566_v58  ;;  %v17118_v7 = vld [vmem:[#allocation11_spill] sm:$0xff] }
 0x145   :  { %3155 = vst [vmem:[#allocation1 + $0x10] ss:$2 sm:$0xff] %v11116_v5 }
 0x148   :  { %10288 = vmatmul.msk.f32.gmra.mxu0 %vm1045_vm4, %v11430_v42  ;;  %10291 = vmatmul.msk.f32.gmra.mxu1 %vm1045_vm4, %v11430_v42 }
 0x149   :  { %10294 = vmatmul.msk.f32.gmra.mxu2 %vm1045_vm4, %v11430_v42  ;;  %10297 = vmatmul.msk.f32.gmra.mxu3 %vm1045_vm4, %v11430_v42 }
 0x14b   :  { %v11800_v8 = vpop.f32.mrf.mxu2  ;;  %v11802_v11 = vpop.f32.mrf.mxu3 }
 0x14d   :  { %v11805_v21 = vpop.f32.mrf.mxu0  ;;  %v11807_v4 = vpop.f32.mrf.mxu1 }
 0x14e   :  { %17082 = vst [vmem:[#allocation80_spill] sm:$0xff] %v11805_v21 }
 0x14f   :  { %17083 = vst [vmem:[#allocation81_spill] sm:$0xff] %v11807_v4 }
 0x150   :  { %10299 = vmatmul.msk.f32.vlgmr.msrb.gmra.mxu0 %vm1045_vm4, %v11354_v61  ;;  %10302 = vmatmul.msk.f32.vlgmr.msrb.gmra.mxu1 %vm1045_vm4, %v11354_v61 }
 0x151   :  { %10305 = vmatmul.msk.f32.vlgmr.msrb.gmra.mxu2 %vm1045_vm4, %v11354_v61  ;;  %10308 = vmatmul.msk.f32.vlgmr.msrb.gmra.mxu3 %vm1045_vm4, %v11354_v61 }
 0x152   :  { %10328 = vmatpush.msk.msrb.mxu2 %vm1050_vm3, %v496_v1  ;;  %10322 = vmatpush.msk.msrb.mxu0 %vm1050_vm3, %v494_v18  ;;  %v135_v1 = vadd.s32 4294967294, %v11432_v27  ;;  %v136_v18 = vadd.s32 4294967294, %v11434_v44 }
 0x153   :  { %10325 = vmatpush.msk.msrb.mxu1 %vm1050_vm3, %v495_v9  ;;  %10331 = vmatpush.msk.msrb.mxu3 %vm1050_vm3, %v497_v56  ;;  %v138_v9 = vadd.s32 4294967294, %v11458_v43  ;;  %v3147_v56 = vld.sshfl [vmem:[#allocation1 + $0x8] sm:$0xff pattern:$0x75316420] }
 0x154   :  { %v11828_v12 = vpop.f32.mrf.mxu2  ;;  %v11830_v15 = vpop.f32.mrf.mxu3  ;;  %3206 = vrot.lane.b32.xlu1 %v3147_v56, %s11040_s22  ;;  %vm175_vm12 = vcmp.ge.s32.totalorder %v135_v1, 0  ;;  %vm176_vm13 = vcmp.ge.s32.totalorder %v136_v18, 0  ;;  %v3150_v18 = vld.sshfl [vmem:[#allocation1 + $0x20] sm:$0xff pattern:$0x75316420] }
 0x155   :  { %v11832_v17 = vpop.f32.mrf.mxu0  ;;  %v11834_v13 = vpop.f32.mrf.mxu1  ;;  %vm178_vm14 = vcmp.ge.s32.totalorder %v138_v9, 0  ;;  %v498_v62 = vsel %vm175_vm12, %v11173_v22, 0.0  ;;  %v499_v56 = vsel %vm176_vm13, %v11175_v23, 0.0  ;;  %3212 = vrot.lane.b32.xlu0 %v3150_v18, %s11040_s22  ;;  %v11891_v9 = vld [vmem:[%s16727_s1 + $0x8] sm:$0xf]  ;;  %vm190_vm12 = vcmp.ge.s32.totalorder %v150_v24, 0 }
 0x156   :  { %17084 = vst [vmem:[#allocation82_spill] sm:$0xff] %v11832_v17 }
 0x157   :  { %17085 = vst [vmem:[#allocation83_spill] sm:$0xff] %v11834_v13 }
 0x158   :  { %10300 = vmatmul.msk.f32.gmra.mxu0 %vm1045_vm4, %v11430_v42  ;;  %10303 = vmatmul.msk.f32.gmra.mxu1 %vm1045_vm4, %v11430_v42 }
 0x159   :  { %10306 = vmatmul.msk.f32.gmra.mxu2 %vm1045_vm4, %v11430_v42  ;;  %10309 = vmatmul.msk.f32.gmra.mxu3 %vm1045_vm4, %v11430_v42  ;;  %v500_v42 = vsel %vm177_vm11, %v11163_v19, 0.0  ;;  %v501_v19 = vsel %vm178_vm14, %v11165_v20, 0.0 }
 0x15c   :  { %v11845_v61 = vpop.f32.mrf.mxu2  ;;  %v11847_v38 = vpop.f32.mrf.mxu3  ;;  %3137 = vrot.lane.b32.xlu1 %v11891_v9, %s11039_s0 }
 0x15d   :  { %v11850_v0 = vpop.f32.mrf.mxu0  ;;  %v11852_v40 = vpop.f32.mrf.mxu1 }
 0x15e   :  { %17086 = vst [vmem:[#allocation84_spill] sm:$0xff] %v11850_v0 }
 0x15f   :  { %17087 = vst [vmem:[#allocation85_spill] sm:$0xff] %v11852_v40  ;;  %v3151_v40 = vld.sshfl [vmem:[#allocation1 + $0x28] sm:$0xff pattern:$0x75316420] }
 0x160   :  { %10311 = vmatmul.msk.f32.vlgmr.msra.gmra.mxu0 %vm1045_vm4, %v11862_v32  ;;  %10314 = vmatmul.msk.f32.vlgmr.msra.gmra.mxu1 %vm1045_vm4, %v11862_v32  ;;  %3156 = vst [vmem:[#allocation1 + $0x20] ss:$2 sm:$0xff] %v11145_v14 }
 0x161   :  { %10317 = vmatmul.msk.f32.vlgmr.msra.gmra.mxu2 %vm1045_vm4, %v11862_v32  ;;  %10320 = vmatmul.msk.f32.vlgmr.msra.gmra.mxu3 %vm1045_vm4, %v11862_v32 }
 0x162   :  { %10340 = vmatpush.msk.msra.mxu2 %vm1050_vm3, %v500_v42  ;;  %10334 = vmatpush.msk.msra.mxu0 %vm1050_vm3, %v498_v62 }
 0x163   :  { %10337 = vmatpush.msk.msra.mxu1 %vm1050_vm3, %v499_v56  ;;  %10343 = vmatpush.msk.msra.mxu3 %vm1050_vm3, %v501_v19  ;;  %v141_v56 = vadd.s32 4294967294, %v11491_v46 }
 0x164   :  { %v11879_v1 = vpop.f32.mrf.mxu2  ;;  %v11881_v22 = vpop.f32.mrf.mxu3  ;;  %3214 = vrot.lane.b32.xlu1 %v3151_v40, %s11040_s22  ;;  %v3153_v40 = vld.sshfl [vmem:[#allocation1 + $0x38] sm:$0xff pattern:$0x75316420] }
 0x165   :  { %17088 = vst [vmem:[#allocation86_spill] sm:$0xff] %v11879_v1  ;;  %v11883_v23 = vpop.f32.mrf.mxu0  ;;  %v11885_v20 = vpop.f32.mrf.mxu1  ;;  %vm181_vm15 = vcmp.ge.s32.totalorder %v141_v56, 0  ;;  %3218 = vrot.lane.b32.xlu0 %v3153_v40, %s11040_s22  ;;  %v3160_v40 = vld.sshfl [vmem:[#allocation1 + $0x10] sm:$0xff pattern:$0x75316420] }
 0x166   :  { %17089 = vst [vmem:[#allocation87_spill] sm:$0xff] %v11881_v22  ;;  %v504_v0 = vsel %vm181_vm15, %v11183_v25, 0.0 }
 0x167   :  { %17090 = vst [vmem:[#allocation88_spill] sm:$0xff] %v11883_v23  ;;  %v142_v23 = vadd.s32 4294967294, %v11514_v36  ;;  %v3163_v21 = vld.sshfl [vmem:[#allocation1 + $0x28] sm:$0xff pattern:$0x75316420] }
 0x168   :  { %17091 = vst [vmem:[#allocation89_spill] sm:$0xff] %v11885_v20  ;;  %10312 = vmatmul.msk.f32.gmra.mxu0 %vm1045_vm4, %v11891_v9  ;;  %10315 = vmatmul.msk.f32.gmra.mxu1 %vm1045_vm4, %v11891_v9  ;;  %v140_v20 = vadd.s32 4294967294, %v11488_v48 }
 0x169   :  { %10318 = vmatmul.msk.f32.gmra.mxu2 %vm1045_vm4, %v11891_v9  ;;  %10321 = vmatmul.msk.f32.gmra.mxu3 %vm1045_vm4, %v11891_v9  ;;  %vm182_vm2 = vcmp.ge.s32.totalorder %v142_v23, 0 }
 0x16a   :  { %vm180_vm0 = vcmp.ge.s32.totalorder %v140_v20, 0  ;;  %v505_v56 = vsel %vm182_vm2, %v11185_v26, 0.0  ;;  %v145_v20 = vadd.s32 4294967294, %v11497_v55 }
 0x16c   :  { %v11903_v42 = vpop.f32.mrf.mxu2  ;;  %v11905_v62 = vpop.f32.mrf.mxu3  ;;  %vm185_vm5 = vcmp.ge.s32.totalorder %v145_v20, 0 }
 0x16d   :  { %17092 = vst [vmem:[#allocation90_spill] sm:$0xff] %v11903_v42  ;;  %v11908_v19 = vpop.f32.mrf.mxu0  ;;  %v11910_v18 = vpop.f32.mrf.mxu1  ;;  %3224 = vrot.lane.b32.xlu0 %v3160_v40, %s11040_s22  ;;  %v508_v13 = vsel %vm185_vm5, %v11203_v31, 0.0  ;;  %v17207_v42 = vld [vmem:[#allocation5_spill] sm:$0xff] }
 0x16e   :  { %17093 = vst [vmem:[#allocation91_spill] sm:$0xff] %v11905_v62 }
 0x16f   :  { %17094 = vst [vmem:[#allocation92_spill] sm:$0xff] %v11908_v19  ;;  %v503_v19 = vsel %vm180_vm0, %v11195_v29, 0.0 }
 0x170   :  { %17095 = vst [vmem:[#allocation93_spill] sm:$0xff] %v11910_v18  ;;  %10323 = vmatmul.msk.f32.vlgmr.msrb.gmra.mxu0 %vm1045_vm4, %v11862_v32  ;;  %10326 = vmatmul.msk.f32.vlgmr.msrb.gmra.mxu1 %vm1045_vm4, %v11862_v32  ;;  %v502_v18 = vsel %vm179_vm1, %v11193_v28, 0.0 }
 0x171   :  { %10329 = vmatmul.msk.f32.vlgmr.msrb.gmra.mxu2 %vm1045_vm4, %v11862_v32  ;;  %10332 = vmatmul.msk.f32.vlgmr.msrb.gmra.mxu3 %vm1045_vm4, %v11862_v32 }
 0x172   :  { %10352 = vmatpush.msk.msrb.mxu2 %vm1050_vm3, %v504_v0  ;;  %10346 = vmatpush.msk.msrb.mxu0 %vm1050_vm3, %v502_v18 }
 0x173   :  { %10349 = vmatpush.msk.msrb.mxu1 %vm1050_vm3, %v503_v19  ;;  %10355 = vmatpush.msk.msrb.mxu3 %vm1050_vm3, %v505_v56  ;;  %v143_v56 = vadd.s32 4294967294, %v11538_v41 }
 0x174   :  { %v11933_v25 = vpop.f32.mrf.mxu2  ;;  %v11935_v28 = vpop.f32.mrf.mxu3 }
 0x175   :  { %17096 = vst [vmem:[#allocation94_spill] sm:$0xff] %v11933_v25  ;;  %v11937_v29 = vpop.f32.mrf.mxu0  ;;  %v11939_v26 = vpop.f32.mrf.mxu1  ;;  %vm183_vm6 = vcmp.ge.s32.totalorder %v143_v56, 0  ;;  %v3152_v56 = vld.sshfl [vmem:[#allocation1 + $0x30] sm:$0xff pattern:$0x75316420] }
 0x176   :  { %17097 = vst [vmem:[#allocation95_spill] sm:$0xff] %v11935_v28  ;;  %v506_v20 = vsel %vm183_vm6, %v11213_v34, 0.0 }
 0x177   :  { %17098 = vst [vmem:[#allocation96_spill] sm:$0xff] %v11937_v29  ;;  %v3146_v29 = vld.sshfl [vmem:[#allocation1] sm:$0xff pattern:$0x75316420] }
 0x178   :  { %17099 = vst [vmem:[#allocation97_spill] sm:$0xff] %v11939_v26  ;;  %10324 = vmatmul.msk.f32.gmra.mxu0 %vm1045_vm4, %v11891_v9  ;;  %10327 = vmatmul.msk.f32.gmra.mxu1 %vm1045_vm4, %v11891_v9  ;;  %v146_v26 = vadd.s32 4294967294, %v11518_v3 }
 0x179   :  { %10330 = vmatmul.msk.f32.gmra.mxu2 %vm1045_vm4, %v11891_v9  ;;  %10333 = vmatmul.msk.f32.gmra.mxu3 %vm1045_vm4, %v11891_v9  ;;  %3154 = vst [vmem:[#allocation1] ss:$2 sm:$0xff] %v11121_v6 }
 0x17a   :  { %vm186_vm8 = vcmp.ge.s32.totalorder %v146_v26, 0  ;;  %3204 = vrot.lane.b32.xlu2 %v3146_v29, %s11040_s22 }
 0x17c   :  { %v11952_v0 = vpop.f32.mrf.mxu2  ;;  %v11954_v23 = vpop.f32.mrf.mxu3 }
 0x17d   :  { %17100 = vst [vmem:[#allocation98_spill] sm:$0xff] %v11952_v0  ;;  %v11957_v19 = vpop.f32.mrf.mxu0  ;;  %v11959_v18 = vpop.f32.mrf.mxu1 }
 0x17e   :  { %17101 = vst [vmem:[#allocation99_spill] sm:$0xff] %v11954_v23 }
 0x17f   :  { %17102 = vst [vmem:[#allocation100_spill] sm:$0xff] %v11957_v19  ;;  %v17105_v19 = vld [vmem:[#allocation14_spill] sm:$0xff] }
 0x180   :  { %17103 = vst [vmem:[#allocation101_spill] sm:$0xff] %v11959_v18  ;;  %10335 = vmatmul.msk.f32.vlgmr.msra.gmra.mxu0 %vm1045_vm4, %v11862_v32  ;;  %10338 = vmatmul.msk.f32.vlgmr.msra.gmra.mxu1 %vm1045_vm4, %v11862_v32  ;;  %v17104_v18 = vld [vmem:[#allocation16_spill] sm:$0xff]  ;;  %v509_v17 = vsel %vm186_vm8, %v17105_v19, 0.0  ;;  %v3162_v19 = vld.sshfl [vmem:[#allocation1 + $0x20] sm:$0xff pattern:$0x75316420] }
 0x181   :  { %v507_v40 = vsel %vm184_vm7, %v17104_v18, 0.0  ;;  %10341 = vmatmul.msk.f32.vlgmr.msra.gmra.mxu2 %vm1045_vm4, %v11862_v32  ;;  %10344 = vmatmul.msk.f32.vlgmr.msra.gmra.mxu3 %vm1045_vm4, %v11862_v32  ;;  %v3161_v18 = vld.sshfl [vmem:[#allocation1 + $0x18] sm:$0xff pattern:$0x75316420]  ;;  %3168 = vst [vmem:[#allocation1 + $0x20] ss:$2 sm:$0xff] %v17118_v7 }
 0x182   :  { %10364 = vmatpush.msk.msra.mxu2 %vm1050_vm3, %v508_v13  ;;  %10358 = vmatpush.msk.msra.mxu0 %vm1050_vm3, %v506_v20  ;;  %v17110_v13 = vld [vmem:[#allocation8_spill] sm:$0xff] }
 0x183   :  { %10361 = vmatpush.msk.msra.mxu1 %vm1050_vm3, %v507_v40  ;;  %10367 = vmatpush.msk.msra.mxu3 %vm1050_vm3, %v509_v17  ;;  %3167 = vst [vmem:[#allocation1 + $0x10] ss:$2 sm:$0xff] %v17110_v13  ;;  %v17111_v17 = vld [vmem:[#allocation6_spill] sm:$0xff]  ;;  %v149_v40 = vadd.s32 4294967294, %v11564_v52 }
 0x184   :  { %v11983_v31 = vpop.f32.mrf.mxu2  ;;  %v11985_v34 = vpop.f32.mrf.mxu3  ;;  %3228 = vrot.lane.b32.xlu0 %v3162_v19, %s11040_s22  ;;  %3226 = vrot.lane.b32.xlu1 %v3161_v18, %s11040_s22  ;;  %3157 = vst [vmem:[#allocation1 + $0x30] ss:$2 sm:$0xff] %v17111_v17 }
 0x185   :  { %17106 = vst [vmem:[#allocation16_spill] sm:$0xff] %v11983_v31  ;;  %v11987_v29 = vpop.f32.mrf.mxu0  ;;  %v11989_v26 = vpop.f32.mrf.mxu1  ;;  %3216 = vrot.lane.b32.xlu2 %v3152_v56, %s11040_s22  ;;  %v17116_v56 = vld [vmem:[#allocation56_spill] sm:$0xff]  ;;  %vm189_vm9 = vcmp.ge.s32.totalorder %v149_v40, 0 }
 0x186   :  { %17107 = vst [vmem:[#allocation14_spill] sm:$0xff] %v11985_v34  ;;  %v17136_v34 = vld [vmem:[#allocation63_spill] sm:$0xff] }
 0x187   :  { %17108 = vst [vmem:[#allocation102_spill] sm:$0xff] %v11987_v29  ;;  %v17117_v29 = vld [vmem:[#allocation57_spill] sm:$0xff]  ;;  %v154_v31 = vadd.s32 4294967294, %v17136_v34 }
 0x188   :  { %17109 = vst [vmem:[#allocation103_spill] sm:$0xff] %v11989_v26  ;;  %10336 = vmatmul.msk.f32.gmra.mxu0 %vm1045_vm4, %v11891_v9  ;;  %10339 = vmatmul.msk.f32.gmra.mxu1 %vm1045_vm4, %v11891_v9  ;;  %v147_v26 = vadd.s32 4294967294, %v17116_v56  ;;  %v148_v4 = vadd.s32 4294967294, %v17117_v29  ;;  %v17135_v29 = vld [vmem:[#allocation61_spill] sm:$0xff] }
 0x189   :  { %10342 = vmatmul.msk.f32.gmra.mxu2 %vm1045_vm4, %v11891_v9  ;;  %10345 = vmatmul.msk.f32.gmra.mxu3 %vm1045_vm4, %v11891_v9  ;;  %v152_v56 = vadd.s32 4294967294, %v17135_v29  ;;  %vm194_vm1 = vcmp.ge.s32.totalorder %v154_v31, 0  ;;  %v17141_v34 = vld [vmem:[#allocation25_spill] sm:$0xff] }
 0x18a   :  { %vm187_vm10 = vcmp.ge.s32.totalorder %v147_v26, 0  ;;  %vm188_vm11 = vcmp.ge.s32.totalorder %v148_v4, 0  ;;  %v3159_v26 = vld.sshfl [vmem:[#allocation1 + $0x8] sm:$0xff pattern:$0x75316420]  ;;  %v517_v29 = vsel %vm194_vm1, %v17141_v34, 0.0 }
 0x18b   :  { %v3164_v33 = vld.sshfl [vmem:[#allocation1 + $0x30] sm:$0xff pattern:$0x75316420]  ;;  %v3165_v52 = vld.sshfl [vmem:[#allocation1 + $0x38] sm:$0xff pattern:$0x75316420] }
 0x18c   :  { %v12004_v54 = vpop.f32.mrf.mxu2  ;;  %v12006_v20 = vpop.f32.mrf.mxu3  ;;  %3230 = vrot.lane.b32.xlu0 %v3163_v21, %s11040_s22  ;;  %3232 = vrot.lane.b32.xlu1 %v3164_v33, %s11040_s22  ;;  %v3158_v33 = vld.sshfl [vmem:[#allocation1] sm:$0xff pattern:$0x75316420]  ;;  %vm192_vm15 = vcmp.ge.s32.totalorder %v152_v56, 0  ;;  %vm4798_vm1 = vcmask 1022976  }
 0x18d   :  { %17112 = vst [vmem:[#allocation104_spill] sm:$0xff] %v12004_v54  ;;  %v12009_v19 = vpop.f32.mrf.mxu0  ;;  %v12011_v18 = vpop.f32.mrf.mxu1  ;;  %v17122_v54 = vld [vmem:[#allocation19_spill] sm:$0xff]  ;;  %3220 = vrot.lane.b32.xlu2 %v3158_v33, %s11040_s22 }
 0x18e   :  { %17113 = vst [vmem:[#allocation105_spill] sm:$0xff] %v12006_v20  ;;  %v512_v20 = vsel %vm189_vm9, %v17119_v16, 0.0  ;;  %v513_v58 = vsel %vm190_vm12, %v17122_v54, 0.0  ;;  %v17123_v16 = vld [vmem:[#allocation10_spill] sm:$0xff] }
 0x18f   :  { %17114 = vst [vmem:[#allocation106_spill] sm:$0xff] %v12009_v19  ;;  %v17121_v19 = vld [vmem:[#allocation22_spill] sm:$0xff] }
 0x190   :  { %17115 = vst [vmem:[#allocation107_spill] sm:$0xff] %v12011_v18  ;;  %10347 = vmatmul.msk.f32.vlgmr.msrb.gmra.mxu0 %vm1045_vm4, %v11862_v32  ;;  %10350 = vmatmul.msk.f32.vlgmr.msrb.gmra.mxu1 %vm1045_vm4, %v11862_v32  ;;  %v17120_v18 = vld [vmem:[#allocation21_spill] sm:$0xff]  ;;  %v511_v21 = vsel %vm188_vm11, %v17121_v19, 0.0 }
 0x191   :  { %v510_v40 = vsel %vm187_vm10, %v17120_v18, 0.0  ;;  %10353 = vmatmul.msk.f32.vlgmr.msrb.gmra.mxu2 %vm1045_vm4, %v11862_v32  ;;  %10356 = vmatmul.msk.f32.vlgmr.msrb.gmra.mxu3 %vm1045_vm4, %v11862_v32  ;;  %3169 = vst [vmem:[#allocation1 + $0x30] ss:$2 sm:$0xff] %v17123_v16  ;;  %v17128_v18 = vld [vmem:[#allocation9_spill] sm:$0xff] }
 0x192   :  { %10376 = vmatpush.msk.msrb.mxu2 %vm1050_vm3, %v512_v20  ;;  %10370 = vmatpush.msk.msrb.mxu0 %vm1050_vm3, %v510_v40  ;;  %3166 = vst [vmem:[#allocation1] ss:$2 sm:$0xff] %v17128_v18 }
 0x193   :  { %10373 = vmatpush.msk.msrb.mxu1 %vm1050_vm3, %v511_v21  ;;  %10379 = vmatpush.msk.msrb.mxu3 %vm1050_vm3, %v513_v58  ;;  %v17131_v21 = vld [vmem:[#allocation62_spill] sm:$0xff] }
 0x194   :  { %v12036_v24 = vpop.f32.mrf.mxu2  ;;  %v12038_v4 = vpop.f32.mrf.mxu3  ;;  %v153_v33 = vadd.s32 4294967294, %v17131_v21 }
 0x195   :  { %17124 = vst [vmem:[#allocation18_spill] sm:$0xff] %v12036_v24  ;;  %v12041_v54 = vpop.f32.mrf.mxu0  ;;  %v12043_v19 = vpop.f32.mrf.mxu1  ;;  %3222 = vrot.lane.b32.xlu2 %v3159_v26, %s11040_s22  ;;  %v17138_v26 = vld [vmem:[#allocation24_spill] sm:$0xff] }
 0x196   :  { %17125 = vst [vmem:[#allocation21_spill] sm:$0xff] %v12038_v4  ;;  %v17134_v4 = vld [vmem:[#allocation60_spill] sm:$0xff]  ;;  %vm193_vm13 = vcmp.ge.s32.totalorder %v153_v33, 0 }
 0x197   :  { %17126 = vst [vmem:[#allocation22_spill] sm:$0xff] %v12041_v54  ;;  %v151_v24 = vadd.s32 4294967294, %v17134_v4  ;;  %v516_v23 = vsel %vm193_vm13, %v17138_v26, 0.0  ;;  %v17151_v33 = vld [vmem:[#allocation64_spill] sm:$0xff]  ;;  %v17171_v4 = vld [vmem:[#allocation34_spill] sm:$0xff] }
 0x198   :  { %17127 = vst [vmem:[#allocation19_spill] sm:$0xff] %v12043_v19  ;;  %10348 = vmatmul.msk.f32.gmra.mxu0 %vm1045_vm4, %v11891_v9  ;;  %10351 = vmatmul.msk.f32.gmra.mxu1 %vm1045_vm4, %v11891_v9  ;;  %v155_v26 = vadd.s32 4294967294, %v17151_v33  ;;  %v3174_v33 = vld.sshfl [vmem:[#allocation1 + $0x20] sm:$0xff pattern:$0x75316420] }
 0x199   :  { %10354 = vmatmul.msk.f32.gmra.mxu2 %vm1045_vm4, %v11891_v9  ;;  %10357 = vmatmul.msk.f32.gmra.mxu3 %vm1045_vm4, %v11891_v9  ;;  %v3170_v40 = vld.sshfl [vmem:[#allocation1] sm:$0xff pattern:$0x75316420]  ;;  %vm191_vm14 = vcmp.ge.s32.totalorder %v151_v24, 0 }
 0x19a   :  { %3236 = vrot.lane.b32.xlu1 %v3170_v40, %s11040_s22  ;;  %v17139_v40 = vld [vmem:[#allocation27_spill] sm:$0xff]  ;;  %vm195_vm2 = vcmp.ge.s32.totalorder %v155_v26, 0  ;;  %v17162_v26 = vld [vmem:[#allocation12_spill] sm:$0xff] }
 0x19c   :  { %v12054_v58 = vpop.f32.mrf.mxu2  ;;  %v12056_v20 = vpop.f32.mrf.mxu3 }
 0x19d   :  { %17129 = vst [vmem:[#allocation9_spill] sm:$0xff] %v12054_v58  ;;  %v12060_v19 = vpop.f32.mrf.mxu0  ;;  %v12062_v54 = vpop.f32.mrf.mxu1  ;;  %v3171_v58 = vld.sshfl [vmem:[#allocation1 + $0x8] sm:$0xff pattern:$0x75316420]  ;;  %3234 = vrot.lane.b32.xlu2 %v3165_v52, %s11040_s22 }
 0x19e   :  { %17130 = vst [vmem:[#allocation108_spill] sm:$0xff] %v12056_v20  ;;  %v17137_v20 = vld [vmem:[#allocation13_spill] sm:$0xff] }
 0x19f   :  { %17132 = vst [vmem:[#allocation109_spill] sm:$0xff] %v12060_v19  ;;  %v17140_v19 = vld [vmem:[#allocation28_spill] sm:$0xff] }
 0x1a0   :  { %17133 = vst [vmem:[#allocation110_spill] sm:$0xff] %v12062_v54  ;;  %10359 = vmatmul.msk.f32.vlgmr.msra.gmra.mxu0 %vm1045_vm4, %v11862_v32  ;;  %10362 = vmatmul.msk.f32.vlgmr.msra.gmra.mxu1 %vm1045_vm4, %v11862_v32  ;;  %v514_v54 = vsel %vm191_vm14, %v17139_v40, 0.0  ;;  %v515_v21 = vsel %vm192_vm15, %v17140_v19, 0.0  ;;  %v3173_v19 = vld.sshfl [vmem:[#allocation1 + $0x18] sm:$0xff pattern:$0x75316420] }
 0x1a1   :  { %3178 = vst [vmem:[#allocation1] ss:$2 sm:$0xff] %v17137_v20  ;;  %10365 = vmatmul.msk.f32.vlgmr.msra.gmra.mxu2 %vm1045_vm4, %v11862_v32  ;;  %10368 = vmatmul.msk.f32.vlgmr.msra.gmra.mxu3 %vm1045_vm4, %v11862_v32  ;;  %v17152_v40 = vld [vmem:[#allocation65_spill] sm:$0xff]  ;;  %vm3286_vm15 = vcmask 1031168  }
 0x1a2   :  { %10388 = vmatpush.msk.msra.mxu2 %vm1050_vm3, %v516_v23  ;;  %10382 = vmatpush.msk.msra.mxu0 %vm1050_vm3, %v514_v54 }
 0x1a3   :  { %10385 = vmatpush.msk.msra.mxu1 %vm1050_vm3, %v515_v21  ;;  %10391 = vmatpush.msk.msra.mxu3 %vm1050_vm3, %v517_v29  ;;  %v17148_v29 = vld [vmem:[#allocation66_spill] sm:$0xff] }
 0x1a4   :  { %v12085_v31 = vpop.f32.mrf.mxu2  ;;  %v12087_v56 = vpop.f32.mrf.mxu3  ;;  %3238 = vrot.lane.b32.xlu1 %v3171_v58, %s11040_s22  ;;  %3242 = vrot.lane.b32.xlu0 %v3173_v19, %s11040_s22  ;;  %v157_v54 = vadd.s32 4294967294, %v17148_v29  ;;  %v156_v19 = vadd.s32 4294967294, %v17152_v40  ;;  %v17157_v40 = vld [vmem:[#allocation31_spill] sm:$0xff] }
 0x1a5   :  { %17142 = vst [vmem:[#allocation13_spill] sm:$0xff] %v12085_v31  ;;  %v12090_v34 = vpop.f32.mrf.mxu0  ;;  %v12092_v24 = vpop.f32.mrf.mxu1  ;;  %v17154_v31 = vld [vmem:[#allocation30_spill] sm:$0xff] }
 0x1a6   :  { %17143 = vst [vmem:[#allocation24_spill] sm:$0xff] %v12087_v56  ;;  %vm197_vm0 = vcmp.ge.s32.totalorder %v157_v54, 0  ;;  %vm196_vm5 = vcmp.ge.s32.totalorder %v156_v19, 0  ;;  %v3172_v54 = vld.sshfl [vmem:[#allocation1 + $0x10] sm:$0xff pattern:$0x75316420] }
 0x1a7   :  { %17144 = vst [vmem:[#allocation27_spill] sm:$0xff] %v12090_v34  ;;  %v17153_v34 = vld [vmem:[#allocation67_spill] sm:$0xff]  ;;  %3240 = vrot.lane.b32.xlu2 %v3172_v54, %s11040_s22 }
 0x1a8   :  { %17145 = vst [vmem:[#allocation28_spill] sm:$0xff] %v12092_v24  ;;  %10360 = vmatmul.msk.f32.gmra.mxu0 %vm1045_vm4, %v11891_v9  ;;  %10363 = vmatmul.msk.f32.gmra.mxu1 %vm1045_vm4, %v11891_v9  ;;  %v3176_v24 = vld.sshfl [vmem:[#allocation1 + $0x30] sm:$0xff pattern:$0x75316420]  ;;  %v158_v56 = vadd.s32 4294967294, %v17153_v34 }
 0x1a9   :  { %10366 = vmatmul.msk.f32.gmra.mxu2 %vm1045_vm4, %v11891_v9  ;;  %10369 = vmatmul.msk.f32.gmra.mxu3 %vm1045_vm4, %v11891_v9  ;;  %3179 = vst [vmem:[#allocation1 + $0x10] ss:$2 sm:$0xff] %v17162_v26 }
 0x1aa   :  { %vm198_vm6 = vcmp.ge.s32.totalorder %v158_v56, 0 }
 0x1ab   :  { %v521_v34 = vsel %vm198_vm6, %v17157_v40, 0.0  ;;  %v161_v40 = vadd.s32 4294967294, %v11690_v35  ;;  %v3183_v35 = vld.sshfl [vmem:[#allocation1 + $0x8] sm:$0xff pattern:$0x75316420] }
 0x1ac   :  { %v12104_v52 = vpop.f32.mrf.mxu2  ;;  %v12106_v23 = vpop.f32.mrf.mxu3  ;;  %3248 = vrot.lane.b32.xlu0 %v3176_v24, %s11040_s22 }
 0x1ad   :  { %17146 = vst [vmem:[#allocation25_spill] sm:$0xff] %v12104_v52  ;;  %v12109_v58 = vpop.f32.mrf.mxu0  ;;  %v12111_v21 = vpop.f32.mrf.mxu1  ;;  %v520_v52 = vsel %vm197_vm0, %v17154_v31, 0.0  ;;  %vm201_vm7 = vcmp.ge.s32.totalorder %v161_v40, 0  ;;  %v3175_v40 = vld.sshfl [vmem:[#allocation1 + $0x28] sm:$0xff pattern:$0x75316420] }
 0x1ae   :  { %17147 = vst [vmem:[#allocation111_spill] sm:$0xff] %v12106_v23  ;;  %v17156_v23 = vld [vmem:[#allocation33_spill] sm:$0xff]  ;;  %v524_v0 = vsel %vm201_vm7, %v17171_v4, 0.0  ;;  %v17174_v4 = vld [vmem:[#allocation23_spill] sm:$0xff] }
 0x1af   :  { %17149 = vst [vmem:[#allocation112_spill] sm:$0xff] %v12109_v58  ;;  %v519_v29 = vsel %vm196_vm5, %v17156_v23, 0.0  ;;  %3244 = vrot.lane.b32.xlu2 %v3174_v33, %s11040_s22  ;;  %v17175_v33 = vld [vmem:[#allocation36_spill] sm:$0xff] }
 0x1b0   :  { %17150 = vst [vmem:[#allocation113_spill] sm:$0xff] %v12111_v21  ;;  %10371 = vmatmul.msk.f32.vlgmr.msrb.gmra.mxu0 %vm1045_vm4, %v11862_v32  ;;  %10374 = vmatmul.msk.f32.vlgmr.msrb.gmra.mxu1 %vm1045_vm4, %v11862_v32  ;;  %v17155_v21 = vld [vmem:[#allocation32_spill] sm:$0xff] }
 0x1b1   :  { %v518_v58 = vsel %vm195_vm2, %v17155_v21, 0.0  ;;  %10377 = vmatmul.msk.f32.vlgmr.msrb.gmra.mxu2 %vm1045_vm4, %v11862_v32  ;;  %10380 = vmatmul.msk.f32.vlgmr.msrb.gmra.mxu3 %vm1045_vm4, %v11862_v32  ;;  %v3177_v21 = vld.sshfl [vmem:[#allocation1 + $0x38] sm:$0xff pattern:$0x75316420] }
 0x1b2   :  { %10400 = vmatpush.msk.msrb.mxu2 %vm1050_vm3, %v520_v52  ;;  %10394 = vmatpush.msk.msrb.mxu0 %vm1050_vm3, %v518_v58  ;;  %v3182_v52 = vld.sshfl [vmem:[#allocation1] sm:$0xff pattern:$0x75316420] }
 0x1b3   :  { %10397 = vmatpush.msk.msrb.mxu1 %vm1050_vm3, %v519_v29  ;;  %10403 = vmatpush.msk.msrb.mxu3 %vm1050_vm3, %v521_v34  ;;  %v17163_v29 = vld [vmem:[#allocation15_spill] sm:$0xff]  ;;  %3190 = vst [vmem:[#allocation1] ss:$2 sm:$0xff] %v17174_v4 }
 0x1b4   :  { %v12133_v31 = vpop.f32.mrf.mxu2  ;;  %v12135_v56 = vpop.f32.mrf.mxu3  ;;  %3250 = vrot.lane.b32.xlu1 %v3177_v21, %s11040_s22  ;;  %3181 = vst [vmem:[#allocation1 + $0x30] ss:$2 sm:$0xff] %v17163_v29  ;;  %3252 = vrot.lane.b32.xlu0 %v3182_v52, %s11040_s22  ;;  %v17168_v21 = vld [vmem:[#allocation69_spill] sm:$0xff] }
 0x1b5   :  { %17158 = vst [vmem:[#allocation30_spill] sm:$0xff] %v12133_v31  ;;  %v12137_v24 = vpop.f32.mrf.mxu0  ;;  %v12139_v23 = vpop.f32.mrf.mxu1  ;;  %v160_v52 = vadd.s32 4294967294, %v17168_v21 }
 0x1b6   :  { %17159 = vst [vmem:[#allocation32_spill] sm:$0xff] %v12135_v56  ;;  %v17170_v56 = vld [vmem:[#allocation68_spill] sm:$0xff] }
 0x1b7   :  { %17160 = vst [vmem:[#allocation33_spill] sm:$0xff] %v12137_v24  ;;  %v159_v31 = vadd.s32 4294967294, %v17170_v56  ;;  %vm200_vm8 = vcmp.ge.s32.totalorder %v160_v52, 0  ;;  %3246 = vrot.lane.b32.xlu2 %v3175_v40, %s11040_s22  ;;  %v165_v40 = vadd.s32 4294967294, %v11730_v30 }
 0x1b8   :  { %17161 = vst [vmem:[#allocation31_spill] sm:$0xff] %v12139_v23  ;;  %10372 = vmatmul.msk.f32.gmra.mxu0 %vm1045_vm4, %v11891_v9  ;;  %10375 = vmatmul.msk.f32.gmra.mxu1 %vm1045_vm4, %v11891_v9  ;;  %v17169_v23 = vld [vmem:[#allocation71_spill] sm:$0xff] }
 0x1b9   :  { %10378 = vmatmul.msk.f32.gmra.mxu2 %vm1045_vm4, %v11891_v9  ;;  %10381 = vmatmul.msk.f32.gmra.mxu3 %vm1045_vm4, %v11891_v9  ;;  %v162_v24 = vadd.s32 4294967294, %v17169_v23  ;;  %vm199_vm10 = vcmp.ge.s32.totalorder %v159_v31, 0  ;;  %vm205_vm11 = vcmp.ge.s32.totalorder %v165_v40, 0 }
 0x1ba   :  { %v3194_v28 = vld.sshfl [vmem:[#allocation1] sm:$0xff pattern:$0x75316420] }
 0x1bb   :  { %vm202_vm9 = vcmp.ge.s32.totalorder %v162_v24, 0  ;;  %v522_v24 = vsel %vm199_vm10, %v17175_v33, 0.0  ;;  %v3189_v40 = vld.sshfl [vmem:[#allocation1 + $0x38] sm:$0xff pattern:$0x75316420] }
 0x1bc   :  { %v12154_v34 = vpop.f32.mrf.mxu2  ;;  %v12156_v58 = vpop.f32.mrf.mxu3  ;;  %3254 = vrot.lane.b32.xlu0 %v3183_v35, %s11040_s22 }
 0x1bd   :  { %17164 = vst [vmem:[#allocation114_spill] sm:$0xff] %v12154_v34  ;;  %v12159_v19 = vpop.f32.mrf.mxu0  ;;  %v12161_v54 = vpop.f32.mrf.mxu1  ;;  %v17173_v34 = vld [vmem:[#allocation35_spill] sm:$0xff] }
 0x1be   :  { %17165 = vst [vmem:[#allocation115_spill] sm:$0xff] %v12156_v58  ;;  %v3184_v58 = vld.sshfl [vmem:[#allocation1 + $0x10] sm:$0xff pattern:$0x75316420]  ;;  %v525_v23 = vsel %vm202_vm9, %v17173_v34, 0.0  ;;  %v3209_v35 = vpop.permute.xlu1 %3208 }
 0x1bf   :  { %17166 = vst [vmem:[#allocation116_spill] sm:$0xff] %v12159_v19  ;;  %3256 = vrot.lane.b32.xlu1 %v3184_v58, %s11040_s22 }
 0x1c0   :  { %17167 = vst [vmem:[#allocation117_spill] sm:$0xff] %v12161_v54  ;;  %10383 = vmatmul.msk.f32.vlgmr.msra.gmra.mxu0 %vm1045_vm4, %v11862_v32  ;;  %10386 = vmatmul.msk.f32.vlgmr.msra.gmra.mxu1 %vm1045_vm4, %v11862_v32  ;;  %v17172_v54 = vld [vmem:[#allocation37_spill] sm:$0xff] }
 0x1c1   :  { %v523_v19 = vsel %vm200_vm8, %v17172_v54, 0.0  ;;  %10389 = vmatmul.msk.f32.vlgmr.msra.gmra.mxu2 %vm1045_vm4, %v11862_v32  ;;  %10392 = vmatmul.msk.f32.vlgmr.msra.gmra.mxu3 %vm1045_vm4, %v11862_v32 }
 0x1c2   :  { %10412 = vmatpush.msk.msra.mxu2 %vm1050_vm3, %v524_v0  ;;  %10409 = vmatpush.msk.msra.mxu1 %vm1050_vm3, %v523_v19  ;;  %v17180_v0 = vld [vmem:[#allocation17_spill] sm:$0xff] }
 0x1c3   :  { %10415 = vmatpush.msk.msra.mxu3 %vm1050_vm3, %v525_v23  ;;  %10406 = vmatpush.msk.msra.mxu0 %vm1050_vm3, %v522_v24  ;;  %3180 = vst [vmem:[#allocation1 + $0x20] ss:$2 sm:$0xff] %v17180_v0 }
 0x1c4   :  { %v12184_v34 = vpop.f32.mrf.mxu2  ;;  %v12186_v31 = vpop.f32.mrf.mxu3  ;;  %3266 = vrot.lane.b32.xlu0 %v3189_v40, %s11040_s22 }
 0x1c5   :  { %17176 = vst [vmem:[#allocation34_spill] sm:$0xff] %v12184_v34  ;;  %v12190_v54 = vpop.f32.mrf.mxu0  ;;  %v12192_v52 = vpop.f32.mrf.mxu1  ;;  %v17186_v34 = vld [vmem:[#allocation72_spill] sm:$0xff] }
 0x1c6   :  { %17177 = vst [vmem:[#allocation37_spill] sm:$0xff] %v12186_v31  ;;  %v166_v31 = vadd.s32 4294967294, %v11732_v59  ;;  %v163_v21 = vadd.s32 4294967294, %v17186_v34  ;;  %v17190_v59 = vld [vmem:[#allocation39_spill] sm:$0xff] }
 0x1c7   :  { %17178 = vst [vmem:[#allocation35_spill] sm:$0xff] %v12190_v54 }
 0x1c8   :  { %17179 = vst [vmem:[#allocation36_spill] sm:$0xff] %v12192_v52  ;;  %10384 = vmatmul.msk.f32.gmra.mxu0 %vm1045_vm4, %v11891_v9  ;;  %10387 = vmatmul.msk.f32.gmra.mxu1 %vm1045_vm4, %v11891_v9  ;;  %v17185_v52 = vld [vmem:[#allocation73_spill] sm:$0xff]  ;;  %vm206_vm13 = vcmp.ge.s32.totalorder %v166_v31, 0  ;;  %vm203_vm14 = vcmp.ge.s32.totalorder %v163_v21, 0  ;;  %v3211_v21 = vpop.permute.xlu2 %3210  ;;  %v12230_v31 = vpop.permute.xlu0 %3135 }
 0x1c9   :  { %10390 = vmatmul.msk.f32.gmra.mxu2 %vm1045_vm4, %v11891_v9  ;;  %10393 = vmatmul.msk.f32.gmra.mxu3 %vm1045_vm4, %v11891_v9  ;;  %v164_v54 = vadd.s32 4294967294, %v17185_v52  ;;  %v529_v30 = vsel %vm206_vm13, %v17190_v59, 0.0  ;;  %v17191_v52 = vld [vmem:[#allocation40_spill] sm:$0xff] }
 0x1ca   :  { %v3186_v19 = vld.sshfl [vmem:[#allocation1 + $0x20] sm:$0xff pattern:$0x75316420]  ;;  %v3187_v56 = vld.sshfl [vmem:[#allocation1 + $0x28] sm:$0xff pattern:$0x75316420] }
 0x1cb   :  { %3260 = vrot.lane.b32.xlu1 %v3186_v19, %s11040_s22  ;;  %vm204_vm12 = vcmp.ge.s32.totalorder %v164_v54, 0  ;;  %v17188_v19 = vld [vmem:[#allocation38_spill] sm:$0xff]  ;;  %v526_v34 = vsel %vm203_vm14, %v17191_v52, 0.0 }
 0x1cc   :  { %v12204_v23 = vpop.f32.mrf.mxu2  ;;  %v12206_v58 = vpop.f32.mrf.mxu3 }
 0x1cd   :  { %17181 = vst [vmem:[#allocation17_spill] sm:$0xff] %v12204_v23  ;;  %v12208_v33 = vpop.f32.mrf.mxu0  ;;  %v12210_v24 = vpop.f32.mrf.mxu1 }
 0x1ce   :  { %17182 = vst [vmem:[#allocation118_spill] sm:$0xff] %v12206_v58  ;;  %v17187_v58 = vld [vmem:[#allocation29_spill] sm:$0xff] }
 0x1cf   :  { %17183 = vst [vmem:[#allocation119_spill] sm:$0xff] %v12208_v33  ;;  %v17189_v33 = vld [vmem:[#allocation41_spill] sm:$0xff] }
 0x1d0   :  { %17184 = vst [vmem:[#allocation120_spill] sm:$0xff] %v12210_v24  ;;  %10395 = vmatmul.msk.f32.vlgmr.msrb.gmra.mxu0 %vm1045_vm4, %v11862_v32  ;;  %10398 = vmatmul.msk.f32.vlgmr.msrb.gmra.mxu1 %vm1045_vm4, %v11862_v32  ;;  %v528_v24 = vsel %vm205_vm11, %v17188_v19, 0.0  ;;  %v527_v23 = vsel %vm204_vm12, %v17189_v33, 0.0  ;;  %v3207_v19 = vpop.permute.xlu1 %3206 }
 0x1d1   :  { %3192 = vst [vmem:[#allocation1 + $0x20] ss:$2 sm:$0xff] %v17187_v58  ;;  %10401 = vmatmul.msk.f32.vlgmr.msrb.gmra.mxu2 %vm1045_vm4, %v11862_v32  ;;  %10404 = vmatmul.msk.f32.vlgmr.msrb.gmra.mxu3 %vm1045_vm4, %v11862_v32 }
 0x1d2   :  { %10424 = vmatpush.msk.msrb.mxu2 %vm1050_vm3, %v528_v24  ;;  %10421 = vmatpush.msk.msrb.mxu1 %vm1050_vm3, %v527_v23  ;;  %v3185_v24 = vld.sshfl [vmem:[#allocation1 + $0x18] sm:$0xff pattern:$0x75316420] }
 0x1d3   :  { %10427 = vmatpush.msk.msrb.mxu3 %vm1050_vm3, %v529_v30  ;;  %10418 = vmatpush.msk.msrb.mxu0 %vm1050_vm3, %v526_v34  ;;  %v3213_v34 = vpop.permute.xlu0 %3212 }
 0x1d4   :  { %v12236_v59 = vpop.f32.mrf.mxu2  ;;  %v12238_v54 = vpop.f32.mrf.mxu3  ;;  %3262 = vrot.lane.b32.xlu1 %v3187_v56, %s11040_s22  ;;  %3258 = vrot.lane.b32.xlu2 %v3185_v24, %s11040_s22 }
 0x1d5   :  { %17192 = vst [vmem:[#allocation29_spill] sm:$0xff] %v12236_v59  ;;  %v12240_v52 = vpop.f32.mrf.mxu0  ;;  %v12242_v33 = vpop.f32.mrf.mxu1  ;;  %v3288_v59 = vsel %vm3286_vm15, %v3207_v19, %v3209_v35 }
 0x1d6   :  { %17193 = vst [vmem:[#allocation38_spill] sm:$0xff] %v12238_v54  ;;  %v3205_v30 = vpop.permute.xlu2 %3204  ;;  %v3289_v54 = vsel %vm3286_vm15, %v3209_v35, %v3211_v21 }
 0x1d7   :  { %17194 = vst [vmem:[#allocation41_spill] sm:$0xff] %v12240_v52  ;;  %v17200_v52 = vld [vmem:[#allocation20_spill] sm:$0xff] }
 0x1d8   :  { %17195 = vst [vmem:[#allocation39_spill] sm:$0xff] %v12242_v33  ;;  %10396 = vmatmul.msk.f32.gmra.mxu0 %vm1045_vm4, %v11891_v9  ;;  %10399 = vmatmul.msk.f32.gmra.mxu1 %vm1045_vm4, %v11891_v9  ;;  %v12276_v24 = vpop.permute.xlu1 %3137  ;;  %v3199_v41 = vld.sshfl [vmem:[#allocation1 + $0x28] sm:$0xff pattern:$0x75316420] }
 0x1d9   :  { %10402 = vmatmul.msk.f32.gmra.mxu2 %vm1045_vm4, %v11891_v9  ;;  %10405 = vmatmul.msk.f32.gmra.mxu3 %vm1045_vm4, %v11891_v9  ;;  %3191 = vst [vmem:[#allocation1 + $0x10] ss:$2 sm:$0xff] %v17200_v52 }
 0x1dc   :  { %v12254_v23 = vpop.f32.mrf.mxu2  ;;  %v12256_v56 = vpop.f32.mrf.mxu3 }
 0x1dd   :  { %17196 = vst [vmem:[#allocation40_spill] sm:$0xff] %v12254_v23  ;;  %v12258_v40 = vpop.f32.mrf.mxu0  ;;  %v12260_v33 = vpop.f32.mrf.mxu1 }
 0x1de   :  { %17197 = vst [vmem:[#allocation121_spill] sm:$0xff] %v12256_v56  ;;  %v3290_v56 = vsel %vm3286_vm15, %v3211_v21, %v3213_v34 }
 0x1df   :  { %17198 = vst [vmem:[#allocation122_spill] sm:$0xff] %v12258_v40  ;;  %v3287_v40 = vsel %vm3286_vm15, %v3205_v30, %v3207_v19  ;;  %v3217_v35 = vpop.permute.xlu2 %3216 }
 0x1e0   :  { %17199 = vst [vmem:[#allocation123_spill] sm:$0xff] %v12260_v33  ;;  %10407 = vmatmul.msk.f32.vlgmr.msra.gmra.mxu0 %vm1045_vm4, %v11862_v32  ;;  %10410 = vmatmul.msk.f32.vlgmr.msra.gmra.mxu1 %vm1045_vm4, %v11862_v32  ;;  %v3196_v30 = vld.sshfl [vmem:[#allocation1 + $0x10] sm:$0xff pattern:$0x75316420] }
 0x1e1   :  { %10413 = vmatmul.msk.f32.vlgmr.msra.gmra.mxu2 %vm1045_vm4, %v11862_v32  ;;  %10416 = vmatmul.msk.f32.vlgmr.msra.gmra.mxu3 %vm1045_vm4, %v11862_v32  ;;  %v3197_v3 = vld.sshfl [vmem:[#allocation1 + $0x18] sm:$0xff pattern:$0x75316420] }
 0x1e2   :  { %10433 = vmatpush.msk.msra.mxu1 %vm1050_vm3, %v3288_v59  ;;  %10436 = vmatpush.msk.msra.mxu2 %vm1050_vm3, %v3289_v54  ;;  %v3188_v59 = vld.sshfl [vmem:[#allocation1 + $0x30] sm:$0xff pattern:$0x75316420]  ;;  %v17203_v54 = vld [vmem:[#allocation2_spill] sm:$0xff] }
 0x1e3   :  { %10439 = vmatpush.msk.msra.mxu3 %vm1050_vm3, %v3290_v56  ;;  %10430 = vmatpush.msk.msra.mxu0 %vm1050_vm3, %v3287_v40  ;;  %4653 = vst [vmem:[#allocation1 + $0x10] ss:$2 sm:$0xff] %v17203_v54  ;;  %v17204_v56 = vld [vmem:[#allocation26_spill] sm:$0xff]  ;;  %v3219_v40 = vpop.permute.xlu0 %3218 }
 0x1e4   :  { %v12282_v21 = vpop.f32.mrf.mxu2  ;;  %v12284_v19 = vpop.f32.mrf.mxu3  ;;  %3272 = vrot.lane.b32.xlu0 %v3196_v30, %s11040_s22  ;;  %3274 = vrot.lane.b32.xlu1 %v3197_v3, %s11040_s22  ;;  %3193 = vst [vmem:[#allocation1 + $0x30] ss:$2 sm:$0xff] %v17204_v56  ;;  %v3198_v3 = vld.sshfl [vmem:[#allocation1 + $0x20] sm:$0xff pattern:$0x75316420] }
 0x1e5   :  { %v12286_v33 = vpop.f32.mrf.mxu0  ;;  %v12288_v23 = vpop.f32.mrf.mxu1  ;;  %3264 = vrot.lane.b32.xlu2 %v3188_v59, %s11040_s22  ;;  %4655 = vst [vmem:[#allocation1 + $0x20] ss:$2 sm:$0xff] %v17207_v42 }
 0x1e6   :  { %17201 = vst [vmem:[#allocation124_spill] sm:$0xff] %v12286_v33  ;;  %v3215_v30 = vpop.permute.xlu1 %3214 }
 0x1e7   :  { %17202 = vst [vmem:[#allocation125_spill] sm:$0xff] %v12288_v23  ;;  %v3221_v47 = vpop.permute.xlu2 %3220  ;;  %v3291_v25 = vsel %vm3286_vm15, %v3213_v34, %v3215_v30  ;;  %v3292_v62 = vsel %vm3286_vm15, %v3215_v30, %v3217_v35  ;;  %v17208_v30 = vld [vmem:[#allocation47_spill] sm:$0xff] }
 0x1e8   :  { %10408 = vmatmul.msk.f32.gmra.mxu0 %vm1045_vm4, %v11891_v9  ;;  %10411 = vmatmul.msk.f32.gmra.mxu1 %vm1045_vm4, %v11891_v9 }
 0x1e9   :  { %10414 = vmatmul.msk.f32.gmra.mxu2 %vm1045_vm4, %v11891_v9  ;;  %10417 = vmatmul.msk.f32.gmra.mxu3 %vm1045_vm4, %v11891_v9 }
 0x1ea   :  { %v4661_v48 = vld.sshfl [vmem:[#allocation1 + $0x18] sm:$0xff pattern:$0x75316420] }
 0x1eb   :  { %v3200_v34 = vld.sshfl [vmem:[#allocation1 + $0x30] sm:$0xff pattern:$0x75316420] }
 0x1ec   :  { %v12303_v23 = vpop.f32.mrf.mxu2  ;;  %v12305_v59 = vpop.f32.mrf.mxu3  ;;  %3276 = vrot.lane.b32.xlu0 %v3198_v3, %s11040_s22  ;;  %v3294_v3 = vsel %vm3286_vm15, %v3219_v40, %v3221_v47  ;;  %3280 = vrot.lane.b32.xlu1 %v3200_v34, %s11040_s22 }
 0x1ed   :  { %v12307_v33 = vpop.f32.mrf.mxu0  ;;  %v12309_v55 = vpop.f32.mrf.mxu1  ;;  %3268 = vrot.lane.b32.xlu2 %v3194_v28, %s11040_s22 }
 0x1ee   :  { %17205 = vst [vmem:[#allocation2_spill] sm:$0xff] %v12307_v33  ;;  %v3195_v33 = vld.sshfl [vmem:[#allocation1 + $0x8] sm:$0xff pattern:$0x75316420]  ;;  %v3225_v28 = vpop.permute.xlu0 %3224 }
 0x1ef   :  { %17206 = vst [vmem:[#allocation126_spill] sm:$0xff] %v12309_v55  ;;  %v3293_v55 = vsel %vm3286_vm15, %v3217_v35, %v3219_v40 }
 0x1f0   :  { %10419 = vmatmul.msk.f32.vlgmr.msrb.gmra.mxu0 %vm1045_vm4, %v11862_v32  ;;  %10422 = vmatmul.msk.f32.vlgmr.msrb.gmra.mxu1 %vm1045_vm4, %v11862_v32  ;;  %3202 = vst [vmem:[#allocation1] ss:$2 sm:$0xff] %v17208_v30 }
 0x1f1   :  { %10425 = vmatmul.msk.f32.vlgmr.msrb.gmra.mxu2 %vm1045_vm4, %v11862_v32  ;;  %10428 = vmatmul.msk.f32.vlgmr.msrb.gmra.mxu3 %vm1045_vm4, %v11862_v32 }
 0x1f2   :  { %10442 = vmatpush.msk.msrb.mxu0 %vm1050_vm3, %v3291_v25  ;;  %10445 = vmatpush.msk.msrb.mxu1 %vm1050_vm3, %v3292_v62  ;;  %v17211_v62 = vld [vmem:[#allocation3_spill] sm:$0xff] }
 0x1f3   :  { %10448 = vmatpush.msk.msrb.mxu2 %vm1050_vm3, %v3293_v55  ;;  %10451 = vmatpush.msk.msrb.mxu3 %vm1050_vm3, %v3294_v3  ;;  %v3223_v3 = vpop.permute.xlu2 %3222 }
 0x1f4   :  { %v12331_v35 = vpop.f32.mrf.mxu2  ;;  %v12333_v40 = vpop.f32.mrf.mxu3  ;;  %3278 = vrot.lane.b32.xlu0 %v3199_v41, %s11040_s22  ;;  %v3295_v50 = vsel %vm3286_vm15, %v3221_v47, %v3223_v3  ;;  %v3296_v22 = vsel %vm3286_vm15, %v3223_v3, %v3225_v28 }
 0x1f5   :  { %v12336_v36 = vpop.f32.mrf.mxu0  ;;  %v12338_v46 = vpop.f32.mrf.mxu1  ;;  %3270 = vrot.lane.b32.xlu2 %v3195_v33, %s11040_s22 }
 0x1f6   :  { %17209 = vst [vmem:[#allocation5_spill] sm:$0xff] %v12336_v36  ;;  %v3227_v25 = vpop.permute.xlu1 %3226  ;;  %v3229_v41 = vpop.permute.xlu0 %3228 }
 0x1f7   :  { %17210 = vst [vmem:[#allocation47_spill] sm:$0xff] %v12338_v46  ;;  %v3203_v55 = vld.sshfl [vmem:[#allocation1] sm:$0xff pattern:$0x75316420] }
 0x1f8   :  { %10420 = vmatmul.msk.f32.gmra.mxu0 %vm1045_vm4, %v11891_v9  ;;  %10423 = vmatmul.msk.f32.gmra.mxu1 %vm1045_vm4, %v11891_v9  ;;  %4651 = vst [vmem:[#allocation1] ss:$2 sm:$0xff] %v17211_v62 }
 0x1f9   :  { %10426 = vmatmul.msk.f32.gmra.mxu2 %vm1045_vm4, %v11891_v9  ;;  %10429 = vmatmul.msk.f32.gmra.mxu3 %vm1045_vm4, %v11891_v9 }
 0x1fa   :  { %3284 = vrot.lane.b32.xlu1 %v3203_v55, %s11040_s22  ;;  %v3297_v55 = vsel %vm3286_vm15, %v3225_v28, %v3227_v25 }
 0x1fc   :  { %v12351_v34 = vpop.f32.mrf.mxu2  ;;  %v12353_v33 = vpop.f32.mrf.mxu3  ;;  %4722 = vrot.lane.b32.xlu0 %v4661_v48, %s11041_s28 }
 0x1fd   :  { %17212 = vst [vmem:[#allocation3_spill] sm:$0xff] %v12353_v33  ;;  %v12356_v46 = vpop.f32.mrf.mxu0  ;;  %v12358_v36 = vpop.f32.mrf.mxu1 }
 0x1fe   :  { %17213 = vst [vmem:[#allocation127_spill] sm:$0xff] %v12356_v46  ;;  %v3298_v46 = vsel %vm3286_vm15, %v3227_v25, %v3229_v41  ;;  %v3233_v48 = vpop.permute.xlu1 %3232 }
 0x1ff   :  { %17214 = vst [vmem:[#allocation128_spill] sm:$0xff] %v12358_v36  ;;  %v4662_v36 = vld.sshfl [vmem:[#allocation1 + $0x20] sm:$0xff pattern:$0x75316420] }
 0x200   :  { %10431 = vmatmul.msk.f32.vlgmr.msra.gmra.mxu0 %vm1045_vm4, %v12230_v31  ;;  %10434 = vmatmul.msk.f32.vlgmr.msra.gmra.mxu1 %vm1045_vm4, %v12230_v31 }
 0x201   :  { %10437 = vmatmul.msk.f32.vlgmr.msra.gmra.mxu2 %vm1045_vm4, %v12230_v31  ;;  %10440 = vmatmul.msk.f32.vlgmr.msra.gmra.mxu3 %vm1045_vm4, %v12230_v31 }
 0x202   :  { %10454 = vmatpush.msk.msra.mxu0 %vm1050_vm3, %v3295_v50  ;;  %10457 = vmatpush.msk.msra.mxu1 %vm1050_vm3, %v3296_v22  ;;  %v3201_v50 = vld.sshfl [vmem:[#allocation1 + $0x38] sm:$0xff pattern:$0x75316420] }
 0x203   :  { %10460 = vmatpush.msk.msra.mxu2 %vm1050_vm3, %v3297_v55  ;;  %10463 = vmatpush.msk.msra.mxu3 %vm1050_vm3, %v3298_v46  ;;  %v17219_v22 = vld [vmem:[#allocation4_spill] sm:$0xff]  ;;  %v12389_v46 = vld.sshfl [vmem:[#allocation1 + $0x28] sm:$0xff pattern:$0x75316420]  ;;  %v3235_v55 = vpop.permute.xlu2 %3234 }
 0x204   :  { %v12377_v47 = vpop.f32.mrf.mxu2  ;;  %v12379_v28 = vpop.f32.mrf.mxu3  ;;  %4919 = vrot.lane.b32.xlu1 %v11862_v32, %s11042_s29  ;;  %3282 = vrot.lane.b32.xlu2 %v3201_v50, %s11040_s22  ;;  %4657 = vst [vmem:[#allocation1 + $0x30] ss:$2 sm:$0xff] %v17219_v22  ;;  %v4658_v32 = vld.sshfl [vmem:[#allocation1] sm:$0xff pattern:$0x75316420] }
 0x205   :  { %17215 = vst [vmem:[#allocation129_spill] sm:$0xff] %v12377_v47  ;;  %v12383_v25 = vpop.f32.mrf.mxu0  ;;  %v12385_v3 = vpop.f32.mrf.mxu1  ;;  %4716 = vrot.lane.b32.xlu0 %v4658_v32, %s11041_s28 }
 0x206   :  { %17216 = vst [vmem:[#allocation130_spill] sm:$0xff] %v12379_v28  ;;  %v3231_v50 = vpop.permute.xlu0 %3230  ;;  %v4660_v28 = vld.sshfl [vmem:[#allocation1 + $0x10] sm:$0xff pattern:$0x75316420] }
 0x207   :  { %17217 = vst [vmem:[#allocation131_spill] sm:$0xff] %v12383_v25  ;;  %v3299_v47 = vsel %vm3286_vm15, %v3229_v41, %v3231_v50  ;;  %v3300_v1 = vsel %vm3286_vm15, %v3231_v50, %v3233_v48  ;;  %v4659_v50 = vld.sshfl [vmem:[#allocation1 + $0x8] sm:$0xff pattern:$0x75316420] }
 0x208   :  { %17218 = vst [vmem:[#allocation132_spill] sm:$0xff] %v12385_v3  ;;  %10432 = vmatmul.msk.f32.gmra.mxu0 %vm1045_vm4, %v12276_v24  ;;  %10435 = vmatmul.msk.f32.gmra.mxu1 %vm1045_vm4, %v12276_v24 }
 0x209   :  { %4668 = vst [vmem:[#allocation1 + $0x20] ss:$2 sm:$0xff] %v11145_v14  ;;  %10438 = vmatmul.msk.f32.gmra.mxu2 %vm1045_vm4, %v12276_v24  ;;  %10441 = vmatmul.msk.f32.gmra.mxu3 %vm1045_vm4, %v12276_v24 }
 0x20a   :  { %4667 = vst [vmem:[#allocation1 + $0x10] ss:$2 sm:$0xff] %v11116_v5 }
 0x20b   :  { %v4664_v41 = vld.sshfl [vmem:[#allocation1 + $0x30] sm:$0xff pattern:$0x75316420]  ;;  %4666 = vst [vmem:[#allocation1] ss:$2 sm:$0xff] %v11121_v6 }
 0x20c   :  { %v12401_v3 = vpop.f32.mrf.mxu2  ;;  %v12403_v25 = vpop.f32.mrf.mxu3  ;;  %4724 = vrot.lane.b32.xlu1 %v4662_v36, %s11041_s28  ;;  %4720 = vrot.lane.b32.xlu2 %v4660_v28, %s11041_s28  ;;  %v3301_v36 = vsel %vm3286_vm15, %v3233_v48, %v3235_v55 }
 0x20d   :  { %17220 = vst [vmem:[#allocation133_spill] sm:$0xff] %v12403_v25  ;;  %v12406_v22 = vpop.f32.mrf.mxu0  ;;  %v12408_v14 = vpop.f32.mrf.mxu1  ;;  %4728 = vrot.lane.b32.xlu0 %v4664_v41, %s11041_s28 }
 0x20e   :  { %17221 = vst [vmem:[#allocation134_spill] sm:$0xff] %v12406_v22  ;;  %v3237_v33 = vpop.permute.xlu1 %3236  ;;  %v3241_v28 = vpop.permute.xlu2 %3240 }
 0x20f   :  { %17222 = vst [vmem:[#allocation135_spill] sm:$0xff] %v12408_v14  ;;  %v3302_v32 = vsel %vm3286_vm15, %v3235_v55, %v3237_v33 }
 0x210   :  { %10443 = vmatmul.msk.f32.vlgmr.msrb.gmra.mxu0 %vm1045_vm4, %v12230_v31  ;;  %10446 = vmatmul.msk.f32.vlgmr.msrb.gmra.mxu1 %vm1045_vm4, %v12230_v31 }
 0x211   :  { %10449 = vmatmul.msk.f32.vlgmr.msrb.gmra.mxu2 %vm1045_vm4, %v12230_v31  ;;  %10452 = vmatmul.msk.f32.vlgmr.msrb.gmra.mxu3 %vm1045_vm4, %v12230_v31 }
 0x212   :  { %10466 = vmatpush.msk.msrb.mxu0 %vm1050_vm3, %v3299_v47  ;;  %10469 = vmatpush.msk.msrb.mxu1 %vm1050_vm3, %v3300_v1  ;;  %v4665_v47 = vld.sshfl [vmem:[#allocation1 + $0x38] sm:$0xff pattern:$0x75316420] }
 0x213   :  { %10472 = vmatpush.msk.msrb.mxu2 %vm1050_vm3, %v3301_v36  ;;  %10475 = vmatpush.msk.msrb.mxu3 %vm1050_vm3, %v3302_v32  ;;  %4669 = vst [vmem:[#allocation1 + $0x30] ss:$2 sm:$0xff] %v17111_v17  ;;  %v4670_v32 = vld.sshfl [vmem:[#allocation1] sm:$0xff pattern:$0x75316420] }
 0x214   :  { %v12428_v48 = vpop.f32.mrf.mxu2  ;;  %v12430_v55 = vpop.f32.mrf.mxu3  ;;  %4730 = vrot.lane.b32.xlu1 %v4665_v47, %s11041_s28  ;;  %4718 = vrot.lane.b32.xlu2 %v4659_v50, %s11041_s28  ;;  %v4672_v17 = vld.sshfl [vmem:[#allocation1 + $0x10] sm:$0xff pattern:$0x75316420] }
 0x215   :  { %17223 = vst [vmem:[#allocation136_spill] sm:$0xff] %v12428_v48  ;;  %v12434_v14 = vpop.f32.mrf.mxu0  ;;  %v12436_v22 = vpop.f32.mrf.mxu1  ;;  %4732 = vrot.lane.b32.xlu0 %v4670_v32, %s11041_s28 }
 0x216   :  { %17224 = vst [vmem:[#allocation137_spill] sm:$0xff] %v12430_v55  ;;  %v3243_v1 = vpop.permute.xlu0 %3242  ;;  %v3239_v36 = vpop.permute.xlu1 %3238  ;;  %v4671_v55 = vld.sshfl [vmem:[#allocation1 + $0x8] sm:$0xff pattern:$0x75316420] }
 0x217   :  { %17225 = vst [vmem:[#allocation138_spill] sm:$0xff] %v12434_v14  ;;  %v3245_v41 = vpop.permute.xlu2 %3244  ;;  %v3303_v48 = vsel %vm3286_vm15, %v3237_v33, %v3239_v36  ;;  %v3304_v25 = vsel %vm3286_vm15, %v3239_v36, %v3241_v28  ;;  %v3305_v32 = vsel %vm3286_vm15, %v3241_v28, %v3243_v1  ;;  %v4674_v36 = vld.sshfl [vmem:[#allocation1 + $0x20] sm:$0xff pattern:$0x75316420] }
 0x218   :  { %17226 = vst [vmem:[#allocation139_spill] sm:$0xff] %v12436_v22  ;;  %10444 = vmatmul.msk.f32.gmra.mxu0 %vm1045_vm4, %v12276_v24  ;;  %10447 = vmatmul.msk.f32.gmra.mxu1 %vm1045_vm4, %v12276_v24 }
 0x219   :  { %10450 = vmatmul.msk.f32.gmra.mxu2 %vm1045_vm4, %v12276_v24  ;;  %10453 = vmatmul.msk.f32.gmra.mxu3 %vm1045_vm4, %v12276_v24  ;;  %4678 = vst [vmem:[#allocation1] ss:$2 sm:$0xff] %v17128_v18 }
 0x21c   :  { %v12449_v47 = vpop.f32.mrf.mxu2  ;;  %v12451_v22 = vpop.f32.mrf.mxu3  ;;  %4736 = vrot.lane.b32.xlu1 %v4672_v17, %s11041_s28  ;;  %4921 = vrot.lane.b32.xlu2 %v11891_v9, %s11042_s29 }
 0x21d   :  { %v12454_v50 = vpop.f32.mrf.mxu0  ;;  %v12456_v14 = vpop.f32.mrf.mxu1  ;;  %4734 = vrot.lane.b32.xlu0 %v4671_v55, %s11041_s28 }
 0x21e   :  { %17227 = vst [vmem:[#allocation140_spill] sm:$0xff] %v12454_v50  ;;  %v3249_v17 = vpop.permute.xlu0 %3248 }
 0x21f   :  { %17228 = vst [vmem:[#allocation141_spill] sm:$0xff] %v12456_v14  ;;  %v3306_v14 = vsel %vm3286_vm15, %v3243_v1, %v3245_v41 }
 0x220   :  { %10455 = vmatmul.msk.f32.vlgmr.msra.gmra.mxu0 %vm1045_vm4, %v12230_v31  ;;  %10458 = vmatmul.msk.f32.vlgmr.msra.gmra.mxu1 %vm1045_vm4, %v12230_v31 }
 0x221   :  { %10461 = vmatmul.msk.f32.vlgmr.msra.gmra.mxu2 %vm1045_vm4, %v12230_v31  ;;  %10464 = vmatmul.msk.f32.vlgmr.msra.gmra.mxu3 %vm1045_vm4, %v12230_v31 }
 0x222   :  { %10478 = vmatpush.msk.msra.mxu0 %vm1050_vm3, %v3303_v48  ;;  %10481 = vmatpush.msk.msra.mxu1 %vm1050_vm3, %v3304_v25 }
 0x223   :  { %10484 = vmatpush.msk.msra.mxu2 %vm1050_vm3, %v3305_v32  ;;  %10487 = vmatpush.msk.msra.mxu3 %vm1050_vm3, %v3306_v14  ;;  %v3247_v14 = vpop.permute.xlu2 %3246 }
 0x224   :  { %v12478_v9 = vpop.f32.mrf.mxu2  ;;  %v12480_v33 = vpop.f32.mrf.mxu3  ;;  %4740 = vrot.lane.b32.xlu1 %v4674_v36, %s11041_s28  ;;  %4726 = vrot.lane.b32.xlu2 %v12389_v46, %s11041_s28  ;;  %v3308_v50 = vsel %vm3286_vm15, %v3247_v14, %v3249_v17 }
 0x225   :  { %v12483_v28 = vpop.f32.mrf.mxu0  ;;  %v12485_v1 = vpop.f32.mrf.mxu1 }
 0x226   :  { %17229 = vst [vmem:[#allocation142_spill] sm:$0xff] %v12483_v28  ;;  %v3251_v25 = vpop.permute.xlu1 %3250  ;;  %v3253_v48 = vpop.permute.xlu0 %3252  ;;  %v3307_v28 = vsel %vm3286_vm15, %v3245_v41, %v3247_v14 }
 0x227   :  { %17230 = vst [vmem:[#allocation143_spill] sm:$0xff] %v12485_v1  ;;  %v4675_v1 = vld.sshfl [vmem:[#allocation1 + $0x28] sm:$0xff pattern:$0x75316420] }
 0x228   :  { %10456 = vmatmul.msk.f32.gmra.mxu0 %vm1045_vm4, %v12276_v24  ;;  %10459 = vmatmul.msk.f32.gmra.mxu1 %vm1045_vm4, %v12276_v24  ;;  %4680 = vst [vmem:[#allocation1 + $0x20] ss:$2 sm:$0xff] %v17118_v7 }
 0x229   :  { %10462 = vmatmul.msk.f32.gmra.mxu2 %vm1045_vm4, %v12276_v24  ;;  %10465 = vmatmul.msk.f32.gmra.mxu3 %vm1045_vm4, %v12276_v24 }
 0x22c   :  { %v12498_v55 = vpop.f32.mrf.mxu2  ;;  %v12500_v32 = vpop.f32.mrf.mxu3  ;;  %4742 = vrot.lane.b32.xlu1 %v4675_v1, %s11041_s28 }
 0x22d   :  { %17231 = vst [vmem:[#allocation144_spill] sm:$0xff] %v12500_v32  ;;  %v12502_v46 = vpop.f32.mrf.mxu0  ;;  %v12504_v36 = vpop.f32.mrf.mxu1  ;;  %v3309_v32 = vsel %vm3286_vm15, %v3249_v17, %v3251_v25 }
 0x22e   :  { %17232 = vst [vmem:[#allocation145_spill] sm:$0xff] %v12502_v46  ;;  %v3310_v46 = vsel %vm3286_vm15, %v3251_v25, %v3253_v48 }
 0x22f   :  { %17233 = vst [vmem:[#allocation146_spill] sm:$0xff] %v12504_v36  ;;  %v4677_v36 = vld.sshfl [vmem:[#allocation1 + $0x38] sm:$0xff pattern:$0x75316420] }
 0x230   :  { %10467 = vmatmul.msk.f32.vlgmr.msrb.gmra.mxu0 %vm1045_vm4, %v12230_v31  ;;  %10470 = vmatmul.msk.f32.vlgmr.msrb.gmra.mxu1 %vm1045_vm4, %v12230_v31 }
 0x231   :  { %10473 = vmatmul.msk.f32.vlgmr.msrb.gmra.mxu2 %vm1045_vm4, %v12230_v31  ;;  %10476 = vmatmul.msk.f32.vlgmr.msrb.gmra.mxu3 %vm1045_vm4, %v12230_v31  ;;  %v3257_v25 = vpop.permute.xlu1 %3256 }
 0x232   :  { %10490 = vmatpush.msk.msrb.mxu0 %vm1050_vm3, %v3307_v28  ;;  %10493 = vmatpush.msk.msrb.mxu1 %vm1050_vm3, %v3308_v50  ;;  %v3259_v50 = vpop.permute.xlu2 %3258  ;;  %v3255_v28 = vpop.permute.xlu0 %3254 }
 0x233   :  { %10496 = vmatpush.msk.msrb.mxu2 %vm1050_vm3, %v3309_v32  ;;  %10499 = vmatpush.msk.msrb.mxu3 %vm1050_vm3, %v3310_v46  ;;  %v4673_v32 = vld.sshfl [vmem:[#allocation1 + $0x18] sm:$0xff pattern:$0x75316420]  ;;  %v3311_v7 = vsel %vm3286_vm15, %v3253_v48, %v3255_v28 }
 0x234   :  { %v12524_v41 = vpop.f32.mrf.mxu2  ;;  %v12526_v1 = vpop.f32.mrf.mxu3  ;;  %4746 = vrot.lane.b32.xlu0 %v4677_v36, %s11041_s28  ;;  %4738 = vrot.lane.b32.xlu2 %v4673_v32, %s11041_s28  ;;  %4679 = vst [vmem:[#allocation1 + $0x10] ss:$2 sm:$0xff] %v17110_v13  ;;  %v4676_v13 = vld.sshfl [vmem:[#allocation1 + $0x30] sm:$0xff pattern:$0x75316420] }
 0x235   :  { %17234 = vst [vmem:[#allocation147_spill] sm:$0xff] %v12524_v41  ;;  %v12528_v17 = vpop.f32.mrf.mxu0  ;;  %v12530_v14 = vpop.f32.mrf.mxu1 }
 0x236   :  { %17235 = vst [vmem:[#allocation148_spill] sm:$0xff] %v12526_v1  ;;  %v3312_v1 = vsel %vm3286_vm15, %v3255_v28, %v3257_v25 }
 0x237   :  { %17236 = vst [vmem:[#allocation149_spill] sm:$0xff] %v12528_v17 }
 0x238   :  { %17237 = vst [vmem:[#allocation150_spill] sm:$0xff] %v12530_v14  ;;  %10468 = vmatmul.msk.f32.gmra.mxu0 %vm1045_vm4, %v12276_v24  ;;  %10471 = vmatmul.msk.f32.gmra.mxu1 %vm1045_vm4, %v12276_v24 }
 0x239   :  { %10474 = vmatmul.msk.f32.gmra.mxu2 %vm1045_vm4, %v12276_v24  ;;  %10477 = vmatmul.msk.f32.gmra.mxu3 %vm1045_vm4, %v12276_v24  ;;  %4681 = vst [vmem:[#allocation1 + $0x30] ss:$2 sm:$0xff] %v17123_v16 }
 0x23b   :  { %v4684_v28 = vld.sshfl [vmem:[#allocation1 + $0x10] sm:$0xff pattern:$0x75316420] }
 0x23c   :  { %v12541_v46 = vpop.f32.mrf.mxu2  ;;  %v12543_v14 = vpop.f32.mrf.mxu3  ;;  %4752 = vrot.lane.b32.xlu0 %v4684_v28, %s11041_s28  ;;  %4744 = vrot.lane.b32.xlu2 %v4676_v13, %s11041_s28 }
 0x23d   :  { %17238 = vst [vmem:[#allocation151_spill] sm:$0xff] %v12541_v46  ;;  %v12547_v36 = vpop.f32.mrf.mxu0  ;;  %v12549_v17 = vpop.f32.mrf.mxu1  ;;  %v4685_v46 = vld.sshfl [vmem:[#allocation1 + $0x18] sm:$0xff pattern:$0x75316420] }
 0x23e   :  { %17239 = vst [vmem:[#allocation152_spill] sm:$0xff] %v12543_v14  ;;  %v3261_v41 = vpop.permute.xlu1 %3260  ;;  %v3313_v14 = vsel %vm3286_vm15, %v3257_v25, %v3259_v50  ;;  %4754 = vrot.lane.b32.xlu1 %v4685_v46, %s11041_s28 }
 0x23f   :  { %17240 = vst [vmem:[#allocation153_spill] sm:$0xff] %v12547_v36  ;;  %v3314_v32 = vsel %vm3286_vm15, %v3259_v50, %v3261_v41  ;;  %v3265_v48 = vpop.permute.xlu2 %3264 }
 0x240   :  { %17241 = vst [vmem:[#allocation154_spill] sm:$0xff] %v12549_v17  ;;  %10479 = vmatmul.msk.f32.vlgmr.msra.gmra.mxu0 %vm1045_vm4, %v12230_v31  ;;  %10482 = vmatmul.msk.f32.vlgmr.msra.gmra.mxu1 %vm1045_vm4, %v12230_v31  ;;  %v4689_v16 = vld.sshfl [vmem:[#allocation1 + $0x38] sm:$0xff pattern:$0x75316420] }
 0x241   :  { %10485 = vmatmul.msk.f32.vlgmr.msra.gmra.mxu2 %vm1045_vm4, %v12230_v31  ;;  %10488 = vmatmul.msk.f32.vlgmr.msra.gmra.mxu3 %vm1045_vm4, %v12230_v31  ;;  %4691 = vst [vmem:[#allocation1 + $0x10] ss:$2 sm:$0xff] %v17162_v26 }
 0x242   :  { %10502 = vmatpush.msk.msra.mxu0 %vm1050_vm3, %v3311_v7  ;;  %10505 = vmatpush.msk.msra.mxu1 %vm1050_vm3, %v3312_v1  ;;  %v4686_v7 = vld.sshfl [vmem:[#allocation1 + $0x20] sm:$0xff pattern:$0x75316420] }
 0x243   :  { %10508 = vmatpush.msk.msra.mxu2 %vm1050_vm3, %v3313_v14  ;;  %10511 = vmatpush.msk.msra.mxu3 %vm1050_vm3, %v3314_v32  ;;  %v3267_v14 = vpop.permute.xlu0 %3266 }
 0x244   :  { %v12567_v17 = vpop.f32.mrf.mxu2  ;;  %v12569_v25 = vpop.f32.mrf.mxu3  ;;  %4756 = vrot.lane.b32.xlu0 %v4686_v7, %s11041_s28  ;;  %v3317_v7 = vsel %vm3286_vm15, %v3265_v48, %v3267_v14 }
 0x245   :  { %17242 = vst [vmem:[#allocation155_spill] sm:$0xff] %v12567_v17  ;;  %v12572_v50 = vpop.f32.mrf.mxu0  ;;  %v12574_v36 = vpop.f32.mrf.mxu1  ;;  %v4688_v17 = vld.sshfl [vmem:[#allocation1 + $0x30] sm:$0xff pattern:$0x75316420] }
 0x246   :  { %17243 = vst [vmem:[#allocation156_spill] sm:$0xff] %v12569_v25  ;;  %v3263_v1 = vpop.permute.xlu1 %3262  ;;  %4760 = vrot.lane.b32.xlu1 %v4688_v17, %s11041_s28 }
 0x247   :  { %17244 = vst [vmem:[#allocation157_spill] sm:$0xff] %v12572_v50  ;;  %v3269_v46 = vpop.permute.xlu2 %3268  ;;  %v4682_v50 = vld.sshfl [vmem:[#allocation1] sm:$0xff pattern:$0x75316420]  ;;  %v3315_v26 = vsel %vm3286_vm15, %v3261_v41, %v3263_v1  ;;  %v3316_v25 = vsel %vm3286_vm15, %v3263_v1, %v3265_v48 }
 0x248   :  { %17245 = vst [vmem:[#allocation158_spill] sm:$0xff] %v12574_v36  ;;  %10480 = vmatmul.msk.f32.gmra.mxu0 %vm1045_vm4, %v12276_v24  ;;  %10483 = vmatmul.msk.f32.gmra.mxu1 %vm1045_vm4, %v12276_v24  ;;  %v4683_v41 = vld.sshfl [vmem:[#allocation1 + $0x8] sm:$0xff pattern:$0x75316420] }
 0x249   :  { %10486 = vmatmul.msk.f32.gmra.mxu2 %vm1045_vm4, %v12276_v24  ;;  %10489 = vmatmul.msk.f32.gmra.mxu3 %vm1045_vm4, %v12276_v24  ;;  %4693 = vst [vmem:[#allocation1 + $0x30] ss:$2 sm:$0xff] %v17163_v29 }
 0x24a   :  { %4748 = vrot.lane.b32.xlu2 %v4682_v50, %s11041_s28  ;;  %4690 = vst [vmem:[#allocation1] ss:$2 sm:$0xff] %v17137_v20 }
 0x24c   :  { %v12588_v32 = vpop.f32.mrf.mxu2  ;;  %v12590_v13 = vpop.f32.mrf.mxu3 }
 0x24d   :  { %v12593_v28 = vpop.f32.mrf.mxu0  ;;  %v12595_v36 = vpop.f32.mrf.mxu1 }
 0x24e   :  { %17246 = vst [vmem:[#allocation159_spill] sm:$0xff] %v12593_v28  ;;  %v3318_v28 = vsel %vm3286_vm15, %v3267_v14, %v3269_v46 }
 0x24f   :  { %17247 = vst [vmem:[#allocation160_spill] sm:$0xff] %v12595_v36  ;;  %v4687_v36 = vld.sshfl [vmem:[#allocation1 + $0x28] sm:$0xff pattern:$0x75316420]  ;;  %v3271_v17 = vpop.permute.xlu2 %3270 }
 0x250   :  { %10491 = vmatmul.msk.f32.vlgmr.msrb.gmra.mxu0 %vm1045_vm4, %v12230_v31  ;;  %10494 = vmatmul.msk.f32.vlgmr.msrb.gmra.mxu1 %vm1045_vm4, %v12230_v31  ;;  %4692 = vst [vmem:[#allocation1 + $0x20] ss:$2 sm:$0xff] %v17180_v0  ;;  %v3319_v29 = vsel %vm3286_vm15, %v3269_v46, %v3271_v17 }
 0x251   :  { %10497 = vmatmul.msk.f32.vlgmr.msrb.gmra.mxu2 %vm1045_vm4, %v12230_v31  ;;  %10500 = vmatmul.msk.f32.vlgmr.msrb.gmra.mxu3 %vm1045_vm4, %v12230_v31 }
 0x252   :  { %10514 = vmatpush.msk.msrb.mxu0 %vm1050_vm3, %v3315_v26  ;;  %10517 = vmatpush.msk.msrb.mxu1 %vm1050_vm3, %v3316_v25 }
 0x253   :  { %10520 = vmatpush.msk.msrb.mxu2 %vm1050_vm3, %v3317_v7  ;;  %10523 = vmatpush.msk.msrb.mxu3 %vm1050_vm3, %v3318_v28 }
 0x254   :  { %v12616_v48 = vpop.f32.mrf.mxu2  ;;  %v12618_v50 = vpop.f32.mrf.mxu3  ;;  %4758 = vrot.lane.b32.xlu0 %v4687_v36, %s11041_s28  ;;  %4750 = vrot.lane.b32.xlu2 %v4683_v41, %s11041_s28  ;;  %v4694_v36 = vld.sshfl [vmem:[#allocation1] sm:$0xff pattern:$0x75316420] }
 0x255   :  { %17248 = vst [vmem:[#allocation161_spill] sm:$0xff] %v12616_v48  ;;  %v12623_v1 = vpop.f32.mrf.mxu0  ;;  %v12625_v26 = vpop.f32.mrf.mxu1  ;;  %4764 = vrot.lane.b32.xlu1 %v4694_v36, %s11041_s28 }
 0x256   :  { %17249 = vst [vmem:[#allocation162_spill] sm:$0xff] %v12618_v50  ;;  %v3273_v25 = vpop.permute.xlu0 %3272  ;;  %v3275_v14 = vpop.permute.xlu1 %3274 }
 0x257   :  { %17250 = vst [vmem:[#allocation163_spill] sm:$0xff] %v12623_v1  ;;  %v4695_v1 = vld.sshfl [vmem:[#allocation1 + $0x8] sm:$0xff pattern:$0x75316420]  ;;  %v3320_v50 = vsel %vm3286_vm15, %v3271_v17, %v3273_v25  ;;  %v3321_v36 = vsel %vm3286_vm15, %v3273_v25, %v3275_v14 }
 0x258   :  { %17251 = vst [vmem:[#allocation164_spill] sm:$0xff] %v12625_v26  ;;  %10492 = vmatmul.msk.f32.gmra.mxu0 %vm1045_vm4, %v12276_v24  ;;  %10495 = vmatmul.msk.f32.gmra.mxu1 %vm1045_vm4, %v12276_v24 }
 0x259   :  { %10498 = vmatmul.msk.f32.gmra.mxu2 %vm1045_vm4, %v12276_v24  ;;  %10501 = vmatmul.msk.f32.gmra.mxu3 %vm1045_vm4, %v12276_v24  ;;  %4702 = vst [vmem:[#allocation1] ss:$2 sm:$0xff] %v17174_v4  ;;  %v4697_v4 = vld.sshfl [vmem:[#allocation1 + $0x18] sm:$0xff pattern:$0x75316420] }
 0x25c   :  { %v12636_v28 = vpop.f32.mrf.mxu2  ;;  %v12638_v7 = vpop.f32.mrf.mxu3  ;;  %4762 = vrot.lane.b32.xlu2 %v4689_v16, %s11041_s28  ;;  %4770 = vrot.lane.b32.xlu0 %v4697_v4, %s11041_s28 }
 0x25d   :  { %17252 = vst [vmem:[#allocation165_spill] sm:$0xff] %v12638_v7  ;;  %v12641_v41 = vpop.f32.mrf.mxu0  ;;  %v12643_v26 = vpop.f32.mrf.mxu1  ;;  %4766 = vrot.lane.b32.xlu1 %v4695_v1, %s11041_s28  ;;  %v4701_v7 = vld.sshfl [vmem:[#allocation1 + $0x38] sm:$0xff pattern:$0x75316420] }
 0x25e   :  { %17253 = vst [vmem:[#allocation166_spill] sm:$0xff] %v12641_v41  ;;  %v3277_v48 = vpop.permute.xlu0 %3276  ;;  %v3283_v46 = vpop.permute.xlu2 %3282 }
 0x25f   :  { %17254 = vst [vmem:[#allocation167_spill] sm:$0xff] %v12643_v26  ;;  %v3322_v26 = vsel %vm3286_vm15, %v3275_v14, %v3277_v48  ;;  %v3281_v41 = vpop.permute.xlu1 %3280 }
 0x260   :  { %10503 = vmatmul.msk.f32.vlgmr.msra.gmra.mxu0 %vm1045_vm4, %v12230_v31  ;;  %10506 = vmatmul.msk.f32.vlgmr.msra.gmra.mxu1 %vm1045_vm4, %v12230_v31 }
 0x261   :  { %10509 = vmatmul.msk.f32.vlgmr.msra.gmra.mxu2 %vm1045_vm4, %v12230_v31  ;;  %10512 = vmatmul.msk.f32.vlgmr.msra.gmra.mxu3 %vm1045_vm4, %v12230_v31 }
 0x262   :  { %10526 = vmatpush.msk.msra.mxu0 %vm1050_vm3, %v3319_v29  ;;  %10529 = vmatpush.msk.msra.mxu1 %vm1050_vm3, %v3320_v50 }
 0x263   :  { %10532 = vmatpush.msk.msra.mxu2 %vm1050_vm3, %v3321_v36  ;;  %10535 = vmatpush.msk.msra.mxu3 %vm1050_vm3, %v3322_v26 }
 0x264   :  { %v12663_v16 = vpop.f32.mrf.mxu2  ;;  %v12665_v25 = vpop.f32.mrf.mxu3 }
 0x265   :  { %17255 = vst [vmem:[#allocation168_spill] sm:$0xff] %v12663_v16  ;;  %v12668_v17 = vpop.f32.mrf.mxu0  ;;  %v12670_v14 = vpop.f32.mrf.mxu1  ;;  %4778 = vrot.lane.b32.xlu1 %v4701_v7, %s11041_s28  ;;  %v4414_v7 = vadd.s32 1, %v11371_v39  ;;  %v4698_v39 = vld.sshfl [vmem:[#allocation1 + $0x20] sm:$0xff pattern:$0x75316420] }
 0x266   :  { %17256 = vst [vmem:[#allocation169_spill] sm:$0xff] %v12665_v25  ;;  %v4721_v29 = vpop.permute.xlu2 %4720  ;;  %v3279_v50 = vpop.permute.xlu0 %3278 }
 0x267   :  { %17257 = vst [vmem:[#allocation170_spill] sm:$0xff] %v12668_v17  ;;  %v4700_v17 = vld.sshfl [vmem:[#allocation1 + $0x30] sm:$0xff pattern:$0x75316420]  ;;  %v3323_v25 = vsel %vm3286_vm15, %v3277_v48, %v3279_v50  ;;  %v3324_v16 = vsel %vm3286_vm15, %v3279_v50, %v3281_v41  ;;  %vm4494_vm5 = vcmp.le.s32.totalorder %v4414_v7, 7 }
 0x268   :  { %17258 = vst [vmem:[#allocation171_spill] sm:$0xff] %v12670_v14  ;;  %10504 = vmatmul.msk.f32.gmra.mxu0 %vm1045_vm4, %v12276_v24  ;;  %10507 = vmatmul.msk.f32.gmra.mxu1 %vm1045_vm4, %v12276_v24 }
 0x269   :  { %10510 = vmatmul.msk.f32.gmra.mxu2 %vm1045_vm4, %v12276_v24  ;;  %10513 = vmatmul.msk.f32.gmra.mxu3 %vm1045_vm4, %v12276_v24  ;;  %4705 = vst [vmem:[#allocation1 + $0x30] ss:$2 sm:$0xff] %v17204_v56 }
 0x26a   :  { %4776 = vrot.lane.b32.xlu0 %v4700_v17, %s11041_s28 }
 0x26c   :  { %v12681_v1 = vpop.f32.mrf.mxu2  ;;  %v12683_v26 = vpop.f32.mrf.mxu3 }
 0x26d   :  { %17259 = vst [vmem:[#allocation172_spill] sm:$0xff] %v12681_v1  ;;  %v12685_v36 = vpop.f32.mrf.mxu0  ;;  %v12687_v4 = vpop.f32.mrf.mxu1  ;;  %v4696_v1 = vld.sshfl [vmem:[#allocation1 + $0x10] sm:$0xff pattern:$0x75316420] }
 0x26e   :  { %17260 = vst [vmem:[#allocation173_spill] sm:$0xff] %v12683_v26  ;;  %v3285_v14 = vpop.permute.xlu1 %3284  ;;  %v3325_v26 = vsel %vm3286_vm15, %v3281_v41, %v3283_v46  ;;  %v4719_v48 = vpop.permute.xlu2 %4718  ;;  %4768 = vrot.lane.b32.xlu2 %v4696_v1, %s11041_s28  ;;  %v4411_v1 = vadd.s32 1, %v11359_v57 }
 0x26f   :  { %17261 = vst [vmem:[#allocation174_spill] sm:$0xff] %v12685_v36  ;;  %v3326_v36 = vsel %vm3286_vm15, %v3283_v46, %v3285_v14  ;;  %v4723_v17 = vpop.permute.xlu0 %4722 }
 0x270   :  { %17262 = vst [vmem:[#allocation175_spill] sm:$0xff] %v12687_v4  ;;  %10515 = vmatmul.msk.f32.vlgmr.msrb.gmra.mxu0 %vm1045_vm4, %v12230_v31  ;;  %10518 = vmatmul.msk.f32.vlgmr.msrb.gmra.mxu1 %vm1045_vm4, %v12230_v31  ;;  %vm4491_vm6 = vcmp.le.s32.totalorder %v4411_v1, 7  ;;  %v4416_v1 = vadd.s32 1, %v11427_v2 }
 0x271   :  { %10521 = vmatmul.msk.f32.vlgmr.msrb.gmra.mxu2 %vm1045_vm4, %v12230_v31  ;;  %10524 = vmatmul.msk.f32.vlgmr.msrb.gmra.mxu3 %vm1045_vm4, %v12230_v31  ;;  %4703 = vst [vmem:[#allocation1 + $0x10] ss:$2 sm:$0xff] %v17200_v52 }
 0x272   :  { %10538 = vmatpush.msk.msrb.mxu0 %vm1050_vm3, %v3323_v25  ;;  %10541 = vmatpush.msk.msrb.mxu1 %vm1050_vm3, %v3324_v16  ;;  %v4706_v16 = vld.sshfl [vmem:[#allocation1] sm:$0xff pattern:$0x75316420]  ;;  %v4413_v25 = vadd.s32 1, %v11369_v45  ;;  %v4800_v45 = vsel %vm4798_vm1, %v4719_v48, %v4721_v29  ;;  %vm4496_vm8 = vcmp.le.s32.totalorder %v4416_v1, 7 }
 0x273   :  { %10544 = vmatpush.msk.msrb.mxu2 %vm1050_vm3, %v3325_v26  ;;  %10547 = vmatpush.msk.msrb.mxu3 %vm1050_vm3, %v3326_v36  ;;  %v4412_v26 = vadd.s32 1, %v11356_v53  ;;  %v4801_v53 = vsel %vm4798_vm1, %v4721_v29, %v4723_v17 }
 0x274   :  { %v12706_v50 = vpop.f32.mrf.mxu2  ;;  %v12708_v41 = vpop.f32.mrf.mxu3  ;;  %4780 = vrot.lane.b32.xlu0 %v4706_v16, %s11041_s28  ;;  %vm4493_vm0 = vcmp.le.s32.totalorder %v4413_v25, 7 }
 0x275   :  { %17263 = vst [vmem:[#allocation176_spill] sm:$0xff] %v12706_v50  ;;  %v12710_v46 = vpop.f32.mrf.mxu0  ;;  %v12712_v14 = vpop.f32.mrf.mxu1  ;;  %vm4492_vm2 = vcmp.le.s32.totalorder %v4412_v26, 7  ;;  %v4881_v52 = vsel %vm4493_vm0, %v4801_v53, 0.0  ;;  %v2279_v53 = vadd.f32 %v12282_v21, %v11786_v37 }
 0x276   :  { %17264 = vst [vmem:[#allocation177_spill] sm:$0xff] %v12708_v41  ;;  %v12714_v4 = vpop.permute.xlu1 %4919  ;;  %v12733_v36 = vpop.permute.xlu2 %4921  ;;  %4772 = vrot.lane.b32.xlu2 %v4698_v39, %s11041_s28 }
 0x277   :  { %17265 = vst [vmem:[#allocation178_spill] sm:$0xff] %v12710_v46  ;;  %v4717_v16 = vpop.permute.xlu0 %4716 }
 0x278   :  { %17266 = vst [vmem:[#allocation179_spill] sm:$0xff] %v12712_v14  ;;  %10516 = vmatmul.msk.f32.gmra.mxu0 %vm1045_vm4, %v12276_v24  ;;  %10519 = vmatmul.msk.f32.gmra.mxu1 %vm1045_vm4, %v12276_v24  ;;  %v4708_v56 = vld.sshfl [vmem:[#allocation1 + $0x10] sm:$0xff pattern:$0x75316420]  ;;  %v4799_v25 = vsel %vm4798_vm1, %v4717_v16, %v4719_v48  ;;  %v4417_v16 = vadd.s32 1, %v11382_v51 }
 0x279   :  { %10522 = vmatmul.msk.f32.gmra.mxu2 %vm1045_vm4, %v12276_v24  ;;  %10525 = vmatmul.msk.f32.gmra.mxu3 %vm1045_vm4, %v12276_v24  ;;  %v12748_v26 = vld.sshfl [vmem:[#allocation1 + $0x18] sm:$0xff pattern:$0x75316420]  ;;  %v4879_v39 = vsel %vm4491_vm6, %v4799_v25, 0.0 }
 0x27a   :  { %4784 = vrot.lane.b32.xlu1 %v4708_v56, %s11041_s28  ;;  %6289 = vst [vmem:[#allocation1 + $0x10] ss:$2 sm:$0xff] %v17203_v54  ;;  %v2302_v54 = vadd.f32 %v12284_v19, %v11788_v10  ;;  %v4699_v56 = vld.sshfl [vmem:[#allocation1 + $0x28] sm:$0xff pattern:$0x75316420]  ;;  %v4415_v19 = vadd.s32 1, %v11425_v49 }
 0x27b   :  { %4704 = vst [vmem:[#allocation1 + $0x20] ss:$2 sm:$0xff] %v17187_v58  ;;  %vm4497_vm9 = vcmp.le.s32.totalorder %v4417_v16, 7 }
 0x27c   :  { %v12735_v14 = vpop.f32.mrf.mxu2  ;;  %v12737_v46 = vpop.f32.mrf.mxu3  ;;  %vm4495_vm7 = vcmp.le.s32.totalorder %v4415_v19, 7  ;;  %v4713_v19 = vld.sshfl [vmem:[#allocation1 + $0x38] sm:$0xff pattern:$0x75316420] }
 0x27d   :  { %17267 = vst [vmem:[#allocation180_spill] sm:$0xff] %v12735_v14  ;;  %v12741_v41 = vpop.f32.mrf.mxu0  ;;  %v12743_v50 = vpop.f32.mrf.mxu1  ;;  %v4880_v14 = vsel %vm4492_vm2, %v4800_v45, 0.0  ;;  %v4707_v45 = vld.sshfl [vmem:[#allocation1 + $0x8] sm:$0xff pattern:$0x75316420] }
 0x27e   :  { %17268 = vst [vmem:[#allocation181_spill] sm:$0xff] %v12737_v46  ;;  %v4725_v57 = vpop.permute.xlu1 %4724  ;;  %4782 = vrot.lane.b32.xlu0 %v4707_v45, %s11041_s28  ;;  %4774 = vrot.lane.b32.xlu2 %v4699_v56, %s11041_s28  ;;  %v4727_v7 = vpop.permute.xlu2 %4726  ;;  %v2282_v45 = vadd.f32 %v12303_v23, %v11800_v8 }
 0x27f   :  { %17269 = vst [vmem:[#allocation182_spill] sm:$0xff] %v12741_v41  ;;  %v4802_v46 = vsel %vm4798_vm1, %v4723_v17, %v4725_v57  ;;  %v4729_v10 = vpop.permute.xlu0 %4728 }
 0x280   :  { %17270 = vst [vmem:[#allocation183_spill] sm:$0xff] %v12743_v50  ;;  %10530 = vmatmul.msk.f32.vlgmr.msra.gmra.mxu1 %vm1045_vm4, %v12230_v31  ;;  %10527 = vmatmul.msk.f32.vlgmr.msra.gmra.mxu0 %vm1045_vm4, %v12230_v31  ;;  %v4882_v29 = vsel %vm4494_vm5, %v4802_v46, 0.0 }
 0x281   :  { %10533 = vmatmul.msk.f32.vlgmr.msra.gmra.mxu2 %vm1045_vm4, %v12230_v31  ;;  %10536 = vmatmul.msk.f32.vlgmr.msra.gmra.mxu3 %vm1045_vm4, %v12230_v31  ;;  %4714 = vst [vmem:[#allocation1] ss:$2 sm:$0xff] %v17208_v30 }
 0x282   :  { %10553 = vmatpush.msk.msra.mxu1 %vm1050_vm3, %v4880_v14  ;;  %10556 = vmatpush.msk.msra.mxu2 %vm1050_vm3, %v4881_v52 }
 0x283   :  { %10559 = vmatpush.msk.msra.mxu3 %vm1050_vm3, %v4882_v29  ;;  %10550 = vmatpush.msk.msra.mxu0 %vm1050_vm3, %v4879_v39  ;;  %v4418_v29 = vadd.s32 1, %v11403_v60  ;;  %v2305_v39 = vadd.f32 %v12305_v59, %v11802_v11  ;;  %v4711_v59 = vld.sshfl [vmem:[#allocation1 + $0x28] sm:$0xff pattern:$0x75316420] }
 0x284   :  { %v3474_v48 = vpop.f32.mrf.mxu2  ;;  %v3497_v17 = vpop.f32.mrf.mxu3 }
 0x285   :  { %v12772_v46 = vadd.f32 %v3474_v48, %v2279_v53  ;;  %v12774_v52 = vadd.f32 %v3497_v17, %v2302_v54  ;;  %v12776_v14 = vpop.f32.mrf.mxu0  ;;  %v12778_v37 = vpop.f32.mrf.mxu1  ;;  %v4803_v53 = vsel %vm4798_vm1, %v4725_v57, %v4727_v7  ;;  %v4710_v54 = vld.sshfl [vmem:[#allocation1 + $0x20] sm:$0xff pattern:$0x75316420]  ;;  %v4804_v17 = vsel %vm4798_vm1, %v4727_v7, %v4729_v10 }
 0x286   :  { %17271 = vst [vmem:[#allocation184_spill] sm:$0xff] %v12776_v14  ;;  %v4731_v25 = vpop.permute.xlu1 %4730  ;;  %4788 = vrot.lane.b32.xlu1 %v4710_v54, %s11041_s28  ;;  %vm4498_vm10 = vcmp.le.s32.totalorder %v4418_v29, 7  ;;  %v4883_v1 = vsel %vm4495_vm7, %v4803_v53, 0.0  ;;  %v4884_v14 = vsel %vm4496_vm8, %v4804_v17, 0.0  ;;  %4794 = vrot.lane.b32.xlu0 %v4713_v19, %s11041_s28  ;;  %v4421_v54 = vadd.s32 1, %v11456_v63 }
 0x287   :  { %17272 = vst [vmem:[#allocation185_spill] sm:$0xff] %v12778_v37  ;;  %v4805_v57 = vsel %vm4798_vm1, %v4729_v10, %v4731_v25  ;;  %v4733_v11 = vpop.permute.xlu0 %4732  ;;  %4786 = vrot.lane.b32.xlu2 %v12748_v26, %s11041_s28  ;;  %v2371_v26 = vadd.f32 %v12331_v35, %v11828_v12  ;;  %v6296_v12 = vld.sshfl [vmem:[#allocation1 + $0x10] sm:$0xff pattern:$0x75316420]  ;;  %v4419_v35 = vadd.s32 1, %v11432_v27 }
 0x288   :  { %10531 = vmatmul.msk.f32.gmra.mxu1 %vm1045_vm4, %v12276_v24  ;;  %10528 = vmatmul.msk.f32.gmra.mxu0 %vm1045_vm4, %v12276_v24  ;;  %v12785_v21 = vld.sshfl [vmem:[#allocation1] sm:$0xff pattern:$0x75316420]  ;;  %v4806_v7 = vsel %vm4798_vm1, %v4731_v25, %v4733_v11  ;;  %6291 = vst [vmem:[#allocation1 + $0x20] ss:$2 sm:$0xff] %v17207_v42  ;;  %v4885_v10 = vsel %vm4497_vm9, %v4805_v57, 0.0  ;;  %v2394_v25 = vadd.f32 %v12333_v40, %v11830_v15 }
 0x289   :  { %10534 = vmatmul.msk.f32.gmra.mxu2 %vm1045_vm4, %v12276_v24  ;;  %10537 = vmatmul.msk.f32.gmra.mxu3 %vm1045_vm4, %v12276_v24  ;;  %6287 = vst [vmem:[#allocation1] ss:$2 sm:$0xff] %v17211_v62  ;;  %v4886_v29 = vsel %vm4498_vm10, %v4806_v7, 0.0  ;;  %v4420_v15 = vadd.s32 1, %v11434_v44  ;;  %v2374_v57 = vadd.f32 %v12351_v34, %v11845_v61  ;;  %vm4499_vm11 = vcmp.le.s32.totalorder %v4419_v35, 7 }
 0x28a   :  { %vm4501_vm13 = vcmp.le.s32.totalorder %v4421_v54, 7  ;;  %v6297_v34 = vld.sshfl [vmem:[#allocation1 + $0x18] sm:$0xff pattern:$0x75316420] }
 0x28b   :  { %vm4500_vm12 = vcmp.le.s32.totalorder %v4420_v15, 7  ;;  %6303 = vst [vmem:[#allocation1 + $0x10] ss:$2 sm:$0xff] %v11116_v5  ;;  %v17280_v5 = vld [vmem:[#allocation86_spill] sm:$0xff]  ;;  %v17281_v15 = vld [vmem:[#allocation129_spill] sm:$0xff] }
 0x28c   :  { %v3477_v56 = vpop.f32.mrf.mxu2  ;;  %v3500_v48 = vpop.f32.mrf.mxu3 }
 0x28d   :  { %v12803_v62 = vadd.f32 %v3477_v56, %v2282_v45  ;;  %v12805_v37 = vadd.f32 %v3500_v48, %v2305_v39  ;;  %v12807_v8 = vpop.f32.mrf.mxu0  ;;  %v12809_v23 = vpop.f32.mrf.mxu1  ;;  %v4422_v48 = vadd.s32 1, %v11458_v43 }
 0x28e   :  { %17273 = vst [vmem:[#allocation186_spill] sm:$0xff] %v12807_v8  ;;  %v4737_v42 = vpop.permute.xlu1 %4736  ;;  %4790 = vrot.lane.b32.xlu1 %v4711_v59, %s11041_s28  ;;  %6356 = vrot.lane.b32.xlu0 %v6296_v12, %s11037_s25  ;;  %v4739_v40 = vpop.permute.xlu2 %4738  ;;  %v17277_v59 = vld [vmem:[#allocation3_spill] sm:$0xff] }
 0x28f   :  { %17274 = vst [vmem:[#allocation187_spill] sm:$0xff] %v12809_v23  ;;  %v4735_v56 = vpop.permute.xlu0 %4734  ;;  %v2397_v19 = vadd.f32 %v17277_v59, %v11847_v38  ;;  %vm4502_vm14 = vcmp.le.s32.totalorder %v4422_v48, 7  ;;  %v17282_v48 = vld [vmem:[#allocation87_spill] sm:$0xff] }
 0x290   :  { %10542 = vmatmul.msk.f32.vlgmr.msrb.gmra.mxu1 %vm1045_vm4, %v12230_v31  ;;  %10539 = vmatmul.msk.f32.vlgmr.msrb.gmra.mxu0 %vm1045_vm4, %v12230_v31 }
 0x291   :  { %10545 = vmatmul.msk.f32.vlgmr.msrb.gmra.mxu2 %vm1045_vm4, %v12230_v31  ;;  %10548 = vmatmul.msk.f32.vlgmr.msrb.gmra.mxu3 %vm1045_vm4, %v12230_v31 }
 0x292   :  { %10562 = vmatpush.msk.msrb.mxu0 %vm1050_vm3, %v4883_v1  ;;  %10565 = vmatpush.msk.msrb.mxu1 %vm1050_vm3, %v4884_v14 }
 0x293   :  { %10568 = vmatpush.msk.msrb.mxu2 %vm1050_vm3, %v4885_v10  ;;  %10571 = vmatpush.msk.msrb.mxu3 %vm1050_vm3, %v4886_v29  ;;  %v4807_v10 = vsel %vm4798_vm1, %v4733_v11, %v4735_v56  ;;  %v4808_v29 = vsel %vm4798_vm1, %v4735_v56, %v4737_v42  ;;  %v2463_v56 = vadd.f32 %v17281_v15, %v17280_v5  ;;  %v17289_v15 = vld [vmem:[#allocation50_spill] sm:$0xff] }
 0x294   :  { %v3566_v16 = vpop.f32.mrf.mxu2  ;;  %v3589_v45 = vpop.f32.mrf.mxu3  ;;  %v4887_v11 = vsel %vm4499_vm11, %v4807_v10, 0.0  ;;  %v4888_v12 = vsel %vm4500_vm12, %v4808_v29, 0.0 }
 0x295   :  { %v12835_v31 = vadd.f32 %v3566_v16, %v2371_v26  ;;  %v12837_v39 = vadd.f32 %v3589_v45, %v2394_v25  ;;  %v12839_v53 = vpop.f32.mrf.mxu0  ;;  %v12841_v14 = vpop.f32.mrf.mxu1  ;;  %v6295_v45 = vld.sshfl [vmem:[#allocation1 + $0x8] sm:$0xff pattern:$0x75316420] }
 0x296   :  { %17275 = vst [vmem:[#allocation188_spill] sm:$0xff] %v12839_v53  ;;  %v12856_v17 = vpop.permute.xlu1 %4740  ;;  %6358 = vrot.lane.b32.xlu1 %v6297_v34, %s11037_s25  ;;  %6354 = vrot.lane.b32.xlu0 %v6295_v45, %s11037_s25  ;;  %v4745_v35 = vpop.permute.xlu2 %4744  ;;  %v4712_v34 = vld.sshfl [vmem:[#allocation1 + $0x30] sm:$0xff pattern:$0x75316420]  ;;  %v17287_v45 = vld [vmem:[#allocation49_spill] sm:$0xff] }
 0x297   :  { %17276 = vst [vmem:[#allocation189_spill] sm:$0xff] %v12841_v14  ;;  %v4810_v38 = vsel %vm4798_vm1, %v4739_v40, %v12856_v17  ;;  %4792 = vrot.lane.b32.xlu2 %v4712_v34, %s11041_s28 }
 0x298   :  { %10543 = vmatmul.msk.f32.gmra.mxu1 %vm1045_vm4, %v12276_v24  ;;  %10540 = vmatmul.msk.f32.gmra.mxu0 %vm1045_vm4, %v12276_v24 }
 0x299   :  { %10546 = vmatmul.msk.f32.gmra.mxu2 %vm1045_vm4, %v12276_v24  ;;  %10549 = vmatmul.msk.f32.gmra.mxu3 %vm1045_vm4, %v12276_v24  ;;  %v4809_v24 = vsel %vm4798_vm1, %v4737_v42, %v4739_v40  ;;  %v4890_v40 = vsel %vm4502_vm14, %v4810_v38, 0.0 }
 0x29a   :  { %v4889_v42 = vsel %vm4501_vm13, %v4809_v24, 0.0  ;;  %v17286_v24 = vld [vmem:[#allocation48_spill] sm:$0xff] }
 0x29b   :  { %v4423_v38 = vadd.s32 1, %v17286_v24 }
 0x29c   :  { %v3569_v1 = vpop.f32.mrf.mxu2  ;;  %v3592_v7 = vpop.f32.mrf.mxu3 }
 0x29d   :  { %v12865_v26 = vadd.f32 %v3569_v1, %v2374_v57  ;;  %v12867_v25 = vadd.f32 %v3592_v7, %v2397_v19  ;;  %v12869_v16 = vpop.f32.mrf.mxu0  ;;  %v12871_v61 = vpop.f32.mrf.mxu1  ;;  %v17283_v57 = vld [vmem:[#allocation130_spill] sm:$0xff]  ;;  %vm4503_vm15 = vcmp.le.s32.totalorder %v4423_v38, 7 }
 0x29e   :  { %17278 = vst [vmem:[#allocation3_spill] sm:$0xff] %v12869_v16  ;;  %v2486_v59 = vadd.f32 %v17283_v57, %v17282_v48  ;;  %v4743_v5 = vpop.permute.xlu1 %4742  ;;  %v17290_v57 = vld [vmem:[#allocation52_spill] sm:$0xff]  ;;  %v6299_v38 = vld.sshfl [vmem:[#allocation1 + $0x28] sm:$0xff pattern:$0x75316420] }
 0x29f   :  { %17279 = vst [vmem:[#allocation190_spill] sm:$0xff] %v12871_v61  ;;  %v4811_v61 = vsel %vm4798_vm1, %v12856_v17, %v4743_v5  ;;  %v4812_v16 = vsel %vm4798_vm1, %v4743_v5, %v4745_v35  ;;  %4796 = vrot.lane.b32.xlu2 %v12785_v21, %s11041_s28  ;;  %v17296_v21 = vld [vmem:[#allocation94_spill] sm:$0xff]  ;;  %v17299_v5 = vld [vmem:[#allocation137_spill] sm:$0xff] }
 0x2a0   :  { %10554 = vmatmul.msk.f32.vlgmr.msra.gmra.mxu1 %vm1045_vm4, %v12714_v4  ;;  %10551 = vmatmul.msk.f32.vlgmr.msra.gmra.mxu0 %vm1045_vm4, %v12714_v4 }
 0x2a1   :  { %10557 = vmatmul.msk.f32.vlgmr.msra.gmra.mxu2 %vm1045_vm4, %v12714_v4  ;;  %10560 = vmatmul.msk.f32.vlgmr.msra.gmra.mxu3 %vm1045_vm4, %v12714_v4 }
 0x2a2   :  { %10574 = vmatpush.msk.msra.mxu0 %vm1050_vm3, %v4887_v11  ;;  %10577 = vmatpush.msk.msra.mxu1 %vm1050_vm3, %v4888_v12  ;;  %v4424_v11 = vadd.s32 1, %v17287_v45  ;;  %v17288_v12 = vld [vmem:[#allocation4_spill] sm:$0xff] }
 0x2a3   :  { %10580 = vmatpush.msk.msra.mxu2 %vm1050_vm3, %v4889_v42  ;;  %10583 = vmatpush.msk.msra.mxu3 %vm1050_vm3, %v4890_v40  ;;  %6293 = vst [vmem:[#allocation1 + $0x30] ss:$2 sm:$0xff] %v17288_v12  ;;  %v10954_v42 = vld [vmem:[%s16727_s1 + $0x8] sm:$0xf]  ;;  %v17292_v12 = vld [vmem:[#allocation91_spill] sm:$0xff] }
 0x2a4   :  { %v3658_v54 = vpop.f32.mrf.mxu2  ;;  %v3681_v19 = vpop.f32.mrf.mxu3  ;;  %6557 = vrot.lane.b32.xlu0 %v10954_v42, %s11043_s8  ;;  %v6294_v40 = vld.sshfl [vmem:[#allocation1] sm:$0xff pattern:$0x75316420]  ;;  %vm4504_vm0 = vcmp.le.s32.totalorder %v4424_v11, 7  ;;  %v4891_v11 = vsel %vm4503_vm15, %v4811_v61, 0.0  ;;  %v17297_v61 = vld [vmem:[#allocation136_spill] sm:$0xff] }
 0x2a5   :  { %v12897_v1 = vadd.f32 %v3658_v54, %v2463_v56  ;;  %v12899_v7 = vadd.f32 %v3681_v19, %v2486_v59  ;;  %v12901_v10 = vpop.f32.mrf.mxu0  ;;  %v12903_v29 = vpop.f32.mrf.mxu1  ;;  %6302 = vst [vmem:[#allocation1] ss:$2 sm:$0xff] %v11121_v6  ;;  %v4425_v56 = vadd.s32 1, %v17289_v15  ;;  %v4426_v59 = vadd.s32 1, %v17290_v57  ;;  %6352 = vrot.lane.b32.xlu1 %v6294_v40, %s11037_s25  ;;  %v17291_v19 = vld [vmem:[#allocation90_spill] sm:$0xff]  ;;  %v17293_v42 = vld [vmem:[#allocation133_spill] sm:$0xff] }
 0x2a6   :  { %17284 = vst [vmem:[#allocation86_spill] sm:$0xff] %v12901_v10  ;;  %v4747_v48 = vpop.permute.xlu0 %4746  ;;  %v4749_v54 = vpop.permute.xlu2 %4748  ;;  %v2466_v34 = vadd.f32 %v12401_v3, %v17291_v19  ;;  %v2489_v6 = vadd.f32 %v17293_v42, %v17292_v12  ;;  %v4892_v12 = vsel %vm4504_vm0, %v4812_v16, 0.0 }
 0x2a7   :  { %17285 = vst [vmem:[#allocation129_spill] sm:$0xff] %v12903_v29  ;;  %v4813_v14 = vsel %vm4798_vm1, %v4745_v35, %v4747_v48  ;;  %v4814_v53 = vsel %vm4798_vm1, %v4747_v48, %v4749_v54  ;;  %vm4505_vm2 = vcmp.le.s32.totalorder %v4425_v56, 7  ;;  %vm4506_vm5 = vcmp.le.s32.totalorder %v4426_v59, 7 }
 0x2a8   :  { %10555 = vmatmul.msk.f32.gmra.mxu1 %vm1045_vm4, %v12733_v36  ;;  %10552 = vmatmul.msk.f32.gmra.mxu0 %vm1045_vm4, %v12733_v36  ;;  %v4893_v17 = vsel %vm4505_vm2, %v4813_v14, 0.0  ;;  %v4894_v35 = vsel %vm4506_vm5, %v4814_v53, 0.0 }
 0x2a9   :  { %10558 = vmatmul.msk.f32.gmra.mxu2 %vm1045_vm4, %v12733_v36  ;;  %10561 = vmatmul.msk.f32.gmra.mxu3 %vm1045_vm4, %v12733_v36 }
 0x2aa   :  { %v6300_v16 = vld.sshfl [vmem:[#allocation1 + $0x30] sm:$0xff pattern:$0x75316420] }
 0x2ac   :  { %v3661_v29 = vpop.f32.mrf.mxu2  ;;  %v3684_v10 = vpop.f32.mrf.mxu3  ;;  %6362 = vrot.lane.b32.xlu0 %v6299_v38, %s11037_s25  ;;  %v17302_v38 = vld [vmem:[#allocation54_spill] sm:$0xff] }
 0x2ad   :  { %v12934_v40 = vadd.f32 %v3661_v29, %v2466_v34  ;;  %v12936_v23 = vadd.f32 %v3684_v10, %v2489_v6  ;;  %v12938_v3 = vpop.f32.mrf.mxu0  ;;  %v12940_v19 = vpop.f32.mrf.mxu1  ;;  %v2555_v10 = vadd.f32 %v17297_v61, %v17296_v21  ;;  %v17298_v29 = vld [vmem:[#allocation95_spill] sm:$0xff]  ;;  %6364 = vrot.lane.b32.xlu1 %v6300_v16, %s11037_s25 }
 0x2ae   :  { %17294 = vst [vmem:[#allocation87_spill] sm:$0xff] %v12938_v3  ;;  %v2578_v56 = vadd.f32 %v17299_v5, %v17298_v29  ;;  %v4753_v6 = vpop.permute.xlu0 %4752  ;;  %v4751_v16 = vpop.permute.xlu2 %4750  ;;  %v17304_v21 = vld [vmem:[#allocation51_spill] sm:$0xff]  ;;  %v17305_v29 = vld [vmem:[#allocation53_spill] sm:$0xff] }
 0x2af   :  { %17295 = vst [vmem:[#allocation130_spill] sm:$0xff] %v12940_v19  ;;  %v4429_v61 = vadd.s32 1, %v17304_v21  ;;  %v4430_v5 = vadd.s32 1, %v17305_v29  ;;  %v4815_v19 = vsel %vm4798_vm1, %v4749_v54, %v4751_v16  ;;  %v4816_v50 = vsel %vm4798_vm1, %v4751_v16, %v4753_v6 }
 0x2b0   :  { %10566 = vmatmul.msk.f32.vlgmr.msrb.gmra.mxu1 %vm1045_vm4, %v12714_v4  ;;  %10563 = vmatmul.msk.f32.vlgmr.msrb.gmra.mxu0 %vm1045_vm4, %v12714_v4 }
 0x2b1   :  { %10569 = vmatmul.msk.f32.vlgmr.msrb.gmra.mxu2 %vm1045_vm4, %v12714_v4  ;;  %10572 = vmatmul.msk.f32.vlgmr.msrb.gmra.mxu3 %vm1045_vm4, %v12714_v4  ;;  %vm4509_vm8 = vcmp.le.s32.totalorder %v4429_v61, 7  ;;  %vm4510_vm9 = vcmp.le.s32.totalorder %v4430_v5, 7 }
 0x2b2   :  { %10586 = vmatpush.msk.msrb.mxu0 %vm1050_vm3, %v4891_v11  ;;  %10589 = vmatpush.msk.msrb.mxu1 %vm1050_vm3, %v4892_v12  ;;  %v4427_v11 = vadd.s32 1, %v17302_v38  ;;  %v12974_v12 = vld [vmem:[%s16727_s1] sm:$0xff] }
 0x2b3   :  { %10592 = vmatpush.msk.msrb.mxu2 %vm1050_vm3, %v4893_v17  ;;  %10595 = vmatpush.msk.msrb.mxu3 %vm1050_vm3, %v4894_v35  ;;  %v17303_v17 = vld [vmem:[#allocation55_spill] sm:$0xff] }
 0x2b4   :  { %v3750_v53 = vpop.f32.mrf.mxu2  ;;  %v3773_v14 = vpop.f32.mrf.mxu3  ;;  %6555 = vrot.lane.b32.xlu2 %v12974_v12, %s11043_s8  ;;  %v4428_v35 = vadd.s32 1, %v17303_v17  ;;  %vm4507_vm6 = vcmp.le.s32.totalorder %v4427_v11, 7  ;;  %v6298_v11 = vld.sshfl [vmem:[#allocation1 + $0x20] sm:$0xff pattern:$0x75316420] }
 0x2b5   :  { %v12962_v48 = vadd.f32 %v3750_v53, %v2555_v10  ;;  %v12964_v59 = vadd.f32 %v3773_v14, %v2578_v56  ;;  %v12966_v34 = vpop.f32.mrf.mxu0  ;;  %v12968_v42 = vpop.f32.mrf.mxu1  ;;  %v6306_v10 = vld.sshfl [vmem:[#allocation1] sm:$0xff pattern:$0x75316420]  ;;  %v17306_v53 = vld [vmem:[#allocation98_spill] sm:$0xff]  ;;  %v4895_v54 = vsel %vm4507_vm6, %v4815_v19, 0.0 }
 0x2b6   :  { %17300 = vst [vmem:[#allocation48_spill] sm:$0xff] %v12966_v34  ;;  %v4755_v56 = vpop.permute.xlu1 %4754  ;;  %v2558_v14 = vadd.f32 %v12449_v47, %v17306_v53  ;;  %vm4508_vm7 = vcmp.le.s32.totalorder %v4428_v35, 7  ;;  %6368 = vrot.lane.b32.xlu1 %v6306_v10, %s11037_s25  ;;  %v17310_v10 = vld [vmem:[#allocation7_spill] sm:$0xff] }
 0x2b7   :  { %17301 = vst [vmem:[#allocation49_spill] sm:$0xff] %v12968_v42  ;;  %v17307_v42 = vld [vmem:[#allocation99_spill] sm:$0xff]  ;;  %v4896_v35 = vsel %vm4508_vm7, %v4816_v50, 0.0  ;;  %v17311_v50 = vld [vmem:[#allocation16_spill] sm:$0xff] }
 0x2b8   :  { %10564 = vmatmul.msk.f32.gmra.mxu0 %vm1045_vm4, %v12733_v36  ;;  %10567 = vmatmul.msk.f32.gmra.mxu1 %vm1045_vm4, %v12733_v36  ;;  %v2581_v34 = vadd.f32 %v12451_v22, %v17307_v42  ;;  %v4817_v22 = vsel %vm4798_vm1, %v4753_v6, %v4755_v56  ;;  %v4757_v42 = vpop.permute.xlu0 %4756  ;;  %6304 = vst [vmem:[#allocation1 + $0x20] ss:$2 sm:$0xff] %v17310_v10  ;;  %v17312_v6 = vld [vmem:[#allocation14_spill] sm:$0xff] }
 0x2b9   :  { %10570 = vmatmul.msk.f32.gmra.mxu2 %vm1045_vm4, %v12733_v36  ;;  %10573 = vmatmul.msk.f32.gmra.mxu3 %vm1045_vm4, %v12733_v36  ;;  %v4818_v16 = vsel %vm4798_vm1, %v4755_v56, %v4757_v42  ;;  %v2647_v19 = vadd.f32 %v12478_v9, %v17311_v50  ;;  %v2670_v61 = vadd.f32 %v12480_v33, %v17312_v6  ;;  %v17319_v50 = vld [vmem:[#allocation59_spill] sm:$0xff]  ;;  %v17320_v6 = vld [vmem:[#allocation104_spill] sm:$0xff] }
 0x2bc   :  { %v3753_v3 = vpop.f32.mrf.mxu2  ;;  %v3776_v8 = vpop.f32.mrf.mxu3  ;;  %6360 = vrot.lane.b32.xlu2 %v6298_v11, %s11037_s25  ;;  %v17316_v11 = vld [vmem:[#allocation56_spill] sm:$0xff] }
 0x2bd   :  { %v12996_v41 = vadd.f32 %v3753_v3, %v2558_v14  ;;  %v12998_v29 = vadd.f32 %v3776_v8, %v2581_v34  ;;  %v13000_v21 = vpop.f32.mrf.mxu0  ;;  %v13002_v47 = vpop.f32.mrf.mxu1  ;;  %v6307_v3 = vld.sshfl [vmem:[#allocation1 + $0x8] sm:$0xff pattern:$0x75316420]  ;;  %v4897_v8 = vsel %vm4509_vm8, %v4817_v22, 0.0  ;;  %v4898_v34 = vsel %vm4510_vm9, %v4818_v16, 0.0 }
 0x2be   :  { %17308 = vst [vmem:[#allocation4_spill] sm:$0xff] %v13000_v21  ;;  %6370 = vrot.lane.b32.xlu1 %v6307_v3, %s11037_s25  ;;  %v4761_v9 = vpop.permute.xlu1 %4760  ;;  %v4431_v33 = vadd.s32 1, %v17316_v11  ;;  %v17318_v3 = vld [vmem:[#allocation58_spill] sm:$0xff] }
 0x2bf   :  { %17309 = vst [vmem:[#allocation50_spill] sm:$0xff] %v13002_v47 }
 0x2c0   :  { %10575 = vmatmul.msk.f32.vlgmr.msra.gmra.mxu0 %vm1045_vm4, %v12714_v4  ;;  %10578 = vmatmul.msk.f32.vlgmr.msra.gmra.mxu1 %vm1045_vm4, %v12714_v4  ;;  %6314 = vst [vmem:[#allocation1] ss:$2 sm:$0xff] %v17128_v18  ;;  %vm4511_vm10 = vcmp.le.s32.totalorder %v4431_v33, 7  ;;  %v17329_v33 = vld [vmem:[#allocation147_spill] sm:$0xff] }
 0x2c1   :  { %10581 = vmatmul.msk.f32.vlgmr.msra.gmra.mxu2 %vm1045_vm4, %v12714_v4  ;;  %10584 = vmatmul.msk.f32.vlgmr.msra.gmra.mxu3 %vm1045_vm4, %v12714_v4 }
 0x2c2   :  { %10598 = vmatpush.msk.msra.mxu0 %vm1050_vm3, %v4895_v54  ;;  %10601 = vmatpush.msk.msra.mxu1 %vm1050_vm3, %v4896_v35  ;;  %v6309_v54 = vld.sshfl [vmem:[#allocation1 + $0x18] sm:$0xff pattern:$0x75316420]  ;;  %v17317_v35 = vld [vmem:[#allocation57_spill] sm:$0xff] }
 0x2c3   :  { %10604 = vmatpush.msk.msra.mxu2 %vm1050_vm3, %v4897_v8  ;;  %10607 = vmatpush.msk.msra.mxu3 %vm1050_vm3, %v4898_v34  ;;  %v4432_v16 = vadd.s32 1, %v17317_v35  ;;  %v4433_v8 = vadd.s32 1, %v17318_v3  ;;  %v4763_v34 = vpop.permute.xlu2 %4762 }
 0x2c4   :  { %v3842_v18 = vpop.f32.mrf.mxu2  ;;  %v3865_v5 = vpop.f32.mrf.mxu3  ;;  %6374 = vrot.lane.b32.xlu0 %v6309_v54, %s11037_s25  ;;  %v4821_v3 = vsel %vm4798_vm1, %v4761_v9, %v4763_v34 }
 0x2c5   :  { %v13027_v56 = vadd.f32 %v3842_v18, %v2647_v19  ;;  %v13029_v53 = vadd.f32 %v3865_v5, %v2670_v61  ;;  %v13031_v14 = vpop.f32.mrf.mxu0  ;;  %v13033_v22 = vpop.f32.mrf.mxu1  ;;  %v4434_v19 = vadd.s32 1, %v17319_v50  ;;  %v2650_v61 = vadd.f32 %v12498_v55, %v17320_v6  ;;  %v17321_v18 = vld [vmem:[#allocation105_spill] sm:$0xff]  ;;  %v17322_v5 = vld [vmem:[#allocation144_spill] sm:$0xff]  ;;  %v17323_v50 = vld [vmem:[#allocation6_spill] sm:$0xff] }
 0x2c6   :  { %17314 = vst [vmem:[#allocation90_spill] sm:$0xff] %v13031_v14  ;;  %v4759_v10 = vpop.permute.xlu0 %4758  ;;  %v2673_v54 = vadd.f32 %v17322_v5, %v17321_v18  ;;  %vm4512_vm11 = vcmp.le.s32.totalorder %v4432_v16, 7  ;;  %vm4513_vm12 = vcmp.le.s32.totalorder %v4433_v8, 7  ;;  %v17330_v8 = vld [vmem:[#allocation21_spill] sm:$0xff] }
 0x2c7   :  { %17313 = vst [vmem:[#allocation52_spill] sm:$0xff] %v13029_v53  ;;  %v4819_v21 = vsel %vm4798_vm1, %v4757_v42, %v4759_v10  ;;  %v4820_v35 = vsel %vm4798_vm1, %v4759_v10, %v4761_v9  ;;  %vm4514_vm13 = vcmp.le.s32.totalorder %v4434_v19, 7  ;;  %v4765_v16 = vpop.permute.xlu1 %4764 }
 0x2c8   :  { %17315 = vst [vmem:[#allocation91_spill] sm:$0xff] %v13033_v22  ;;  %10579 = vmatmul.msk.f32.gmra.mxu1 %vm1045_vm4, %v12733_v36  ;;  %10576 = vmatmul.msk.f32.gmra.mxu0 %vm1045_vm4, %v12733_v36  ;;  %v6301_v22 = vld.sshfl [vmem:[#allocation1 + $0x38] sm:$0xff pattern:$0x75316420]  ;;  %v4899_v42 = vsel %vm4511_vm10, %v4819_v21, 0.0  ;;  %v4900_v10 = vsel %vm4512_vm11, %v4820_v35, 0.0  ;;  %v4822_v9 = vsel %vm4798_vm1, %v4763_v34, %v4765_v16 }
 0x2c9   :  { %10582 = vmatmul.msk.f32.gmra.mxu2 %vm1045_vm4, %v12733_v36  ;;  %10585 = vmatmul.msk.f32.gmra.mxu3 %vm1045_vm4, %v12733_v36  ;;  %6305 = vst [vmem:[#allocation1 + $0x30] ss:$2 sm:$0xff] %v17323_v50  ;;  %v17328_v21 = vld [vmem:[#allocation18_spill] sm:$0xff]  ;;  %v17331_v34 = vld [vmem:[#allocation148_spill] sm:$0xff] }
 0x2ca   :  { %6366 = vrot.lane.b32.xlu2 %v6301_v22, %s11037_s25  ;;  %v2739_v35 = vadd.f32 %v17329_v33, %v17328_v21  ;;  %v2762_v50 = vadd.f32 %v17331_v34, %v17330_v8  ;;  %v17336_v33 = vld [vmem:[#allocation60_spill] sm:$0xff] }
 0x2cb   :  { %v4769_v22 = vpop.permute.xlu2 %4768  ;;  %v4435_v8 = vadd.s32 1, %v17336_v33  ;;  %v17345_v33 = vld [vmem:[#allocation152_spill] sm:$0xff] }
 0x2cc   :  { %v3845_v14 = vpop.f32.mrf.mxu2  ;;  %v3868_v47 = vpop.f32.mrf.mxu3 }
 0x2cd   :  { %v13057_v11 = vadd.f32 %v3845_v14, %v2650_v61  ;;  %v13059_v55 = vadd.f32 %v3868_v47, %v2673_v54  ;;  %v13061_v6 = vpop.f32.mrf.mxu0  ;;  %v13063_v18 = vpop.f32.mrf.mxu1  ;;  %v4901_v47 = vsel %vm4513_vm12, %v4821_v3, 0.0  ;;  %v4902_v14 = vsel %vm4514_vm13, %v4822_v9, 0.0  ;;  %v6308_v9 = vld.sshfl [vmem:[#allocation1 + $0x10] sm:$0xff pattern:$0x75316420] }
 0x2ce   :  { %17326 = vst [vmem:[#allocation136_spill] sm:$0xff] %v13061_v6  ;;  %vm4515_vm14 = vcmp.le.s32.totalorder %v4435_v8, 7 }
 0x2cf   :  { %17324 = vst [vmem:[#allocation133_spill] sm:$0xff] %v13057_v11 }
 0x2d0   :  { %17325 = vst [vmem:[#allocation94_spill] sm:$0xff] %v13059_v55  ;;  %10590 = vmatmul.msk.f32.vlgmr.msrb.gmra.mxu1 %vm1045_vm4, %v12714_v4  ;;  %10587 = vmatmul.msk.f32.vlgmr.msrb.gmra.mxu0 %vm1045_vm4, %v12714_v4  ;;  %v6312_v3 = vld.sshfl [vmem:[#allocation1 + $0x30] sm:$0xff pattern:$0x75316420] }
 0x2d1   :  { %17327 = vst [vmem:[#allocation95_spill] sm:$0xff] %v13063_v18  ;;  %10593 = vmatmul.msk.f32.vlgmr.msrb.gmra.mxu2 %vm1045_vm4, %v12714_v4  ;;  %10596 = vmatmul.msk.f32.vlgmr.msrb.gmra.mxu3 %vm1045_vm4, %v12714_v4  ;;  %v6313_v21 = vld.sshfl [vmem:[#allocation1 + $0x38] sm:$0xff pattern:$0x75316420]  ;;  %v17343_v18 = vld [vmem:[#allocation151_spill] sm:$0xff] }
 0x2d2   :  { %10610 = vmatpush.msk.msrb.mxu0 %vm1050_vm3, %v4899_v42  ;;  %10613 = vmatpush.msk.msrb.mxu1 %vm1050_vm3, %v4900_v10 }
 0x2d3   :  { %10616 = vmatpush.msk.msrb.mxu2 %vm1050_vm3, %v4901_v47  ;;  %10619 = vmatpush.msk.msrb.mxu3 %vm1050_vm3, %v4902_v14  ;;  %v17337_v47 = vld [vmem:[#allocation61_spill] sm:$0xff]  ;;  %v17338_v14 = vld [vmem:[#allocation8_spill] sm:$0xff] }
 0x2d4   :  { %v3934_v19 = vpop.f32.mrf.mxu2  ;;  %v3957_v61 = vpop.f32.mrf.mxu3  ;;  %6380 = vrot.lane.b32.xlu0 %v6312_v3, %s11037_s25  ;;  %v4436_v34 = vadd.s32 1, %v17337_v47  ;;  %6372 = vrot.lane.b32.xlu2 %v6308_v9, %s11037_s25  ;;  %6315 = vst [vmem:[#allocation1 + $0x10] ss:$2 sm:$0xff] %v17338_v14  ;;  %v17344_v47 = vld [vmem:[#allocation108_spill] sm:$0xff] }
 0x2d5   :  { %v13084_v5 = vadd.f32 %v3934_v19, %v2739_v35  ;;  %v13086_v54 = vadd.f32 %v3957_v61, %v2762_v50  ;;  %v13088_v42 = vpop.f32.mrf.mxu0  ;;  %v13090_v10 = vpop.f32.mrf.mxu1  ;;  %6382 = vrot.lane.b32.xlu1 %v6313_v21, %s11037_s25  ;;  %v17339_v35 = vld [vmem:[#allocation10_spill] sm:$0xff]  ;;  %v6318_v61 = vld.sshfl [vmem:[#allocation1] sm:$0xff pattern:$0x75316420]  ;;  %v17341_v21 = vld [vmem:[#allocation63_spill] sm:$0xff] }
 0x2d6   :  { %17334 = vst [vmem:[#allocation55_spill] sm:$0xff] %v13088_v42  ;;  %v17340_v50 = vld [vmem:[#allocation62_spill] sm:$0xff]  ;;  %v4767_v19 = vpop.permute.xlu1 %4766  ;;  %v4771_v9 = vpop.permute.xlu0 %4770  ;;  %v4438_v14 = vadd.s32 1, %v17341_v21  ;;  %v17342_v42 = vld [vmem:[#allocation9_spill] sm:$0xff]  ;;  %vm4516_vm15 = vcmp.le.s32.totalorder %v4436_v34, 7  ;;  %v17350_v34 = vld [vmem:[#allocation24_spill] sm:$0xff] }
 0x2d7   :  { %17332 = vst [vmem:[#allocation137_spill] sm:$0xff] %v13084_v5  ;;  %v4437_v3 = vadd.s32 1, %v17340_v50  ;;  %v2742_v6 = vadd.f32 %v17343_v18, %v17342_v42  ;;  %v4823_v5 = vsel %vm4798_vm1, %v4765_v16, %v4767_v19  ;;  %v4824_v55 = vsel %vm4798_vm1, %v4767_v19, %v4769_v22 }
 0x2d8   :  { %17333 = vst [vmem:[#allocation54_spill] sm:$0xff] %v13086_v54  ;;  %10591 = vmatmul.msk.f32.gmra.mxu1 %vm1045_vm4, %v12733_v36  ;;  %10588 = vmatmul.msk.f32.gmra.mxu0 %vm1045_vm4, %v12733_v36  ;;  %v4825_v21 = vsel %vm4798_vm1, %v4769_v22, %v4771_v9  ;;  %vm4518_vm2 = vcmp.le.s32.totalorder %v4438_v14, 7  ;;  %v4903_v19 = vsel %vm4515_vm14, %v4823_v5, 0.0  ;;  %v17349_v5 = vld [vmem:[#allocation155_spill] sm:$0xff] }
 0x2d9   :  { %17335 = vst [vmem:[#allocation98_spill] sm:$0xff] %v13090_v10  ;;  %10594 = vmatmul.msk.f32.gmra.mxu2 %vm1045_vm4, %v12733_v36  ;;  %10597 = vmatmul.msk.f32.gmra.mxu3 %vm1045_vm4, %v12733_v36  ;;  %v4773_v10 = vpop.permute.xlu2 %4772  ;;  %vm4517_vm0 = vcmp.le.s32.totalorder %v4437_v3, 7 }
 0x2da   :  { %6317 = vst [vmem:[#allocation1 + $0x30] ss:$2 sm:$0xff] %v17339_v35  ;;  %v2765_v35 = vadd.f32 %v17345_v33, %v17344_v47  ;;  %v4826_v33 = vsel %vm4798_vm1, %v4771_v9, %v4773_v10  ;;  %v6310_v47 = vld.sshfl [vmem:[#allocation1 + $0x20] sm:$0xff pattern:$0x75316420]  ;;  %v4905_v22 = vsel %vm4517_vm0, %v4825_v21, 0.0 }
 0x2db   :  { %v6320_v16 = vld.sshfl [vmem:[#allocation1 + $0x10] sm:$0xff pattern:$0x75316420]  ;;  %v6311_v9 = vld.sshfl [vmem:[#allocation1 + $0x28] sm:$0xff pattern:$0x75316420] }
 0x2dc   :  { %v3937_v50 = vpop.f32.mrf.mxu2  ;;  %v3960_v54 = vpop.f32.mrf.mxu3  ;;  %6384 = vrot.lane.b32.xlu0 %v6318_v61, %s11037_s25  ;;  %v4904_v61 = vsel %vm4516_vm15, %v4824_v55, 0.0  ;;  %6376 = vrot.lane.b32.xlu2 %v6310_v47, %s11037_s25  ;;  %v17348_v55 = vld [vmem:[#allocation13_spill] sm:$0xff] }
 0x2dd   :  { %v13116_v11 = vadd.f32 %v3937_v50, %v2742_v6  ;;  %v13118_v53 = vadd.f32 %v3960_v54, %v2765_v35  ;;  %v13120_v18 = vpop.f32.mrf.mxu0  ;;  %v13122_v42 = vpop.f32.mrf.mxu1  ;;  %6388 = vrot.lane.b32.xlu1 %v6320_v16, %s11037_s25  ;;  %v6319_v6 = vld.sshfl [vmem:[#allocation1 + $0x8] sm:$0xff pattern:$0x75316420]  ;;  %v4906_v54 = vsel %vm4518_vm2, %v4826_v33, 0.0  ;;  %v2831_v8 = vadd.f32 %v17349_v5, %v17348_v55  ;;  %v17351_v50 = vld [vmem:[#allocation156_spill] sm:$0xff]  ;;  %v17352_v35 = vld [vmem:[#allocation11_spill] sm:$0xff] }
 0x2de   :  { %17346 = vst [vmem:[#allocation99_spill] sm:$0xff] %v13120_v18  ;;  %v2854_v3 = vadd.f32 %v17351_v50, %v17350_v34  ;;  %v17358_v5 = vld [vmem:[#allocation66_spill] sm:$0xff]  ;;  %v4779_v34 = vpop.permute.xlu1 %4778  ;;  %v17359_v50 = vld [vmem:[#allocation67_spill] sm:$0xff] }
 0x2df   :  { %17347 = vst [vmem:[#allocation7_spill] sm:$0xff] %v13122_v42 }
 0x2e0   :  { %10599 = vmatmul.msk.f32.vlgmr.msra.gmra.mxu0 %vm1045_vm4, %v12714_v4  ;;  %10602 = vmatmul.msk.f32.vlgmr.msra.gmra.mxu1 %vm1045_vm4, %v12714_v4  ;;  %6326 = vst [vmem:[#allocation1] ss:$2 sm:$0xff] %v17137_v20  ;;  %v4777_v20 = vpop.permute.xlu0 %4776 }
 0x2e1   :  { %10605 = vmatmul.msk.f32.vlgmr.msra.gmra.mxu2 %vm1045_vm4, %v12714_v4  ;;  %10608 = vmatmul.msk.f32.vlgmr.msra.gmra.mxu3 %vm1045_vm4, %v12714_v4  ;;  %6316 = vst [vmem:[#allocation1 + $0x20] ss:$2 sm:$0xff] %v17352_v35  ;;  %v4775_v55 = vpop.permute.xlu2 %4774 }
 0x2e2   :  { %10622 = vmatpush.msk.msra.mxu0 %vm1050_vm3, %v4903_v19  ;;  %10625 = vmatpush.msk.msra.mxu1 %vm1050_vm3, %v4904_v61  ;;  %v17356_v61 = vld [vmem:[#allocation64_spill] sm:$0xff] }
 0x2e3   :  { %10628 = vmatpush.msk.msra.mxu2 %vm1050_vm3, %v4905_v22  ;;  %10631 = vmatpush.msk.msra.mxu3 %vm1050_vm3, %v4906_v54  ;;  %v17357_v22 = vld [vmem:[#allocation65_spill] sm:$0xff] }
 0x2e4   :  { %v4026_v21 = vpop.f32.mrf.mxu2  ;;  %v4049_v14 = vpop.f32.mrf.mxu3  ;;  %6386 = vrot.lane.b32.xlu0 %v6319_v6, %s11037_s25  ;;  %6378 = vrot.lane.b32.xlu2 %v6311_v9, %s11037_s25  ;;  %v4439_v6 = vadd.s32 1, %v17356_v61  ;;  %v4440_v54 = vadd.s32 1, %v17357_v22  ;;  %v17360_v9 = vld [vmem:[#allocation25_spill] sm:$0xff]  ;;  %v4828_v22 = vsel %vm4798_vm1, %v4775_v55, %v4777_v20 }
 0x2e5   :  { %v13149_v33 = vadd.f32 %v4026_v21, %v2831_v8  ;;  %v13151_v47 = vadd.f32 %v4049_v14, %v2854_v3  ;;  %v13153_v16 = vpop.f32.mrf.mxu0  ;;  %v13155_v19 = vpop.f32.mrf.mxu1  ;;  %v4441_v8 = vadd.s32 1, %v17358_v5  ;;  %v4442_v3 = vadd.s32 1, %v17359_v50  ;;  %v17361_v14 = vld [vmem:[#allocation111_spill] sm:$0xff] }
 0x2e6   :  { %17354 = vst [vmem:[#allocation14_spill] sm:$0xff] %v13153_v16  ;;  %v2834_v21 = vadd.f32 %v12588_v32, %v17360_v9  ;;  %v2857_v35 = vadd.f32 %v12590_v13, %v17361_v14  ;;  %vm4519_vm5 = vcmp.le.s32.totalorder %v4439_v6, 7  ;;  %vm4520_vm6 = vcmp.le.s32.totalorder %v4440_v54, 7 }
 0x2e7   :  { %17353 = vst [vmem:[#allocation16_spill] sm:$0xff] %v13151_v47  ;;  %v4829_v5 = vsel %vm4798_vm1, %v4777_v20, %v4779_v34  ;;  %vm4521_vm7 = vcmp.le.s32.totalorder %v4441_v8, 7  ;;  %vm4522_vm8 = vcmp.le.s32.totalorder %v4442_v3, 7  ;;  %v4908_v54 = vsel %vm4520_vm6, %v4828_v22, 0.0  ;;  %v17366_v20 = vld [vmem:[#allocation30_spill] sm:$0xff] }
 0x2e8   :  { %17355 = vst [vmem:[#allocation104_spill] sm:$0xff] %v13155_v19  ;;  %10603 = vmatmul.msk.f32.gmra.mxu1 %vm1045_vm4, %v12733_v36  ;;  %10600 = vmatmul.msk.f32.gmra.mxu0 %vm1045_vm4, %v12733_v36  ;;  %v4827_v19 = vsel %vm4798_vm1, %v4773_v10, %v4775_v55  ;;  %v6322_v16 = vld.sshfl [vmem:[#allocation1 + $0x20] sm:$0xff pattern:$0x75316420]  ;;  %v4781_v10 = vpop.permute.xlu0 %4780  ;;  %v17369_v22 = vld [vmem:[#allocation162_spill] sm:$0xff] }
 0x2e9   :  { %10606 = vmatmul.msk.f32.gmra.mxu2 %vm1045_vm4, %v12733_v36  ;;  %10609 = vmatmul.msk.f32.gmra.mxu3 %vm1045_vm4, %v12733_v36  ;;  %v6323_v9 = vld.sshfl [vmem:[#allocation1 + $0x28] sm:$0xff pattern:$0x75316420]  ;;  %v4907_v6 = vsel %vm4519_vm5, %v4827_v19, 0.0  ;;  %v4830_v55 = vsel %vm4798_vm1, %v4779_v34, %v4781_v10  ;;  %v17368_v19 = vld [vmem:[#allocation32_spill] sm:$0xff] }
 0x2ea   :  { %6392 = vrot.lane.b32.xlu1 %v6322_v16, %s11037_s25  ;;  %6328 = vst [vmem:[#allocation1 + $0x20] ss:$2 sm:$0xff] %v17180_v0  ;;  %v17367_v0 = vld [vmem:[#allocation161_spill] sm:$0xff]  ;;  %v2946_v8 = vadd.f32 %v17369_v22, %v17368_v19  ;;  %v17377_v22 = vld [vmem:[#allocation71_spill] sm:$0xff] }
 0x2eb   :  { %v2923_v16 = vadd.f32 %v17367_v0, %v17366_v20 }
 0x2ec   :  { %v4029_v42 = vpop.f32.mrf.mxu2  ;;  %v4052_v18 = vpop.f32.mrf.mxu3 }
 0x2ed   :  { %v13178_v50 = vadd.f32 %v4029_v42, %v2834_v21  ;;  %v13180_v61 = vadd.f32 %v4052_v18, %v2857_v35  ;;  %v13182_v32 = vpop.f32.mrf.mxu0  ;;  %v13184_v13 = vpop.f32.mrf.mxu1  ;;  %v4909_v18 = vsel %vm4521_vm7, %v4829_v5, 0.0  ;;  %v4910_v42 = vsel %vm4522_vm8, %v4830_v55, 0.0  ;;  %v17374_v55 = vld [vmem:[#allocation68_spill] sm:$0xff] }
 0x2ee   :  { %17364 = vst [vmem:[#allocation6_spill] sm:$0xff] %v13182_v32  ;;  %v4785_v5 = vpop.permute.xlu1 %4784  ;;  %v4443_v20 = vadd.s32 1, %v17374_v55 }
 0x2ef   :  { %17362 = vst [vmem:[#allocation105_spill] sm:$0xff] %v13178_v50 }
 0x2f0   :  { %17363 = vst [vmem:[#allocation144_spill] sm:$0xff] %v13180_v61  ;;  %10614 = vmatmul.msk.f32.vlgmr.msrb.gmra.mxu1 %vm1045_vm4, %v12714_v4  ;;  %10611 = vmatmul.msk.f32.vlgmr.msrb.gmra.mxu0 %vm1045_vm4, %v12714_v4  ;;  %v4783_v0 = vpop.permute.xlu0 %4782  ;;  %vm4523_vm9 = vcmp.le.s32.totalorder %v4443_v20, 7 }
 0x2f1   :  { %17365 = vst [vmem:[#allocation18_spill] sm:$0xff] %v13184_v13  ;;  %10617 = vmatmul.msk.f32.vlgmr.msrb.gmra.mxu2 %vm1045_vm4, %v12714_v4  ;;  %10620 = vmatmul.msk.f32.vlgmr.msrb.gmra.mxu3 %vm1045_vm4, %v12714_v4  ;;  %v6321_v13 = vld.sshfl [vmem:[#allocation1 + $0x18] sm:$0xff pattern:$0x75316420]  ;;  %v4831_v55 = vsel %vm4798_vm1, %v4781_v10, %v4783_v0 }
 0x2f2   :  { %10634 = vmatpush.msk.msrb.mxu0 %vm1050_vm3, %v4907_v6  ;;  %10637 = vmatpush.msk.msrb.mxu1 %vm1050_vm3, %v4908_v54  ;;  %v6325_v54 = vld.sshfl [vmem:[#allocation1 + $0x38] sm:$0xff pattern:$0x75316420]  ;;  %v4911_v10 = vsel %vm4523_vm9, %v4831_v55, 0.0 }
 0x2f3   :  { %10640 = vmatpush.msk.msrb.mxu2 %vm1050_vm3, %v4909_v18  ;;  %10643 = vmatpush.msk.msrb.mxu3 %vm1050_vm3, %v4910_v42  ;;  %v4787_v18 = vpop.permute.xlu2 %4786  ;;  %v17387_v55 = vld [vmem:[#allocation168_spill] sm:$0xff] }
 0x2f4   :  { %v4118_v34 = vpop.f32.mrf.mxu2  ;;  %v4141_v3 = vpop.f32.mrf.mxu3  ;;  %6394 = vrot.lane.b32.xlu1 %v6323_v9, %s11037_s25  ;;  %6398 = vrot.lane.b32.xlu0 %v6325_v54, %s11037_s25  ;;  %v17375_v9 = vld [vmem:[#allocation69_spill] sm:$0xff]  ;;  %v17379_v54 = vld [vmem:[#allocation115_spill] sm:$0xff] }
 0x2f5   :  { %v13205_v21 = vadd.f32 %v4118_v34, %v2923_v16  ;;  %v13207_v14 = vadd.f32 %v4141_v3, %v2946_v8  ;;  %v13209_v35 = vpop.f32.mrf.mxu0  ;;  %v13211_v6 = vpop.f32.mrf.mxu1  ;;  %v4444_v42 = vadd.s32 1, %v17375_v9  ;;  %v17376_v16 = vld [vmem:[#allocation70_spill] sm:$0xff]  ;;  %v4446_v8 = vadd.s32 1, %v17377_v22  ;;  %6390 = vrot.lane.b32.xlu2 %v6321_v13, %s11037_s25  ;;  %v17381_v22 = vld [vmem:[#allocation12_spill] sm:$0xff] }
 0x2f6   :  { %17372 = vst [vmem:[#allocation148_spill] sm:$0xff] %v13209_v35  ;;  %v4445_v19 = vadd.s32 1, %v17376_v16  ;;  %v17378_v34 = vld [vmem:[#allocation114_spill] sm:$0xff] }
 0x2f7   :  { %17370 = vst [vmem:[#allocation147_spill] sm:$0xff] %v13205_v21  ;;  %v2926_v3 = vadd.f32 %v12636_v28, %v17378_v34  ;;  %vm4524_vm10 = vcmp.le.s32.totalorder %v4444_v42, 7  ;;  %v4833_v21 = vsel %vm4798_vm1, %v4785_v5, %v4787_v18  ;;  %vm4526_vm12 = vcmp.le.s32.totalorder %v4446_v8, 7 }
 0x2f8   :  { %17371 = vst [vmem:[#allocation21_spill] sm:$0xff] %v13207_v14  ;;  %10615 = vmatmul.msk.f32.gmra.mxu1 %vm1045_vm4, %v12733_v36  ;;  %10612 = vmatmul.msk.f32.gmra.mxu0 %vm1045_vm4, %v12733_v36  ;;  %v4832_v14 = vsel %vm4798_vm1, %v4783_v0, %v4785_v5  ;;  %vm4525_vm11 = vcmp.le.s32.totalorder %v4445_v19, 7  ;;  %v4789_v42 = vpop.permute.xlu1 %4788  ;;  %v4795_v20 = vpop.permute.xlu0 %4794  ;;  %v17389_v19 = vld [vmem:[#allocation169_spill] sm:$0xff] }
 0x2f9   :  { %17373 = vst [vmem:[#allocation8_spill] sm:$0xff] %v13211_v6  ;;  %10618 = vmatmul.msk.f32.gmra.mxu2 %vm1045_vm4, %v12733_v36  ;;  %10621 = vmatmul.msk.f32.gmra.mxu3 %vm1045_vm4, %v12733_v36  ;;  %v17380_v6 = vld [vmem:[#allocation165_spill] sm:$0xff]  ;;  %v4912_v0 = vsel %vm4524_vm10, %v4832_v14, 0.0  ;;  %v4834_v5 = vsel %vm4798_vm1, %v4787_v18, %v4789_v42  ;;  %v17386_v14 = vld [vmem:[#allocation34_spill] sm:$0xff] }
 0x2fa   :  { %v2949_v35 = vadd.f32 %v17380_v6, %v17379_v54  ;;  %6327 = vst [vmem:[#allocation1 + $0x10] ss:$2 sm:$0xff] %v17381_v22  ;;  %v4914_v13 = vsel %vm4526_vm12, %v4834_v5, 0.0  ;;  %v3015_v18 = vadd.f32 %v17387_v55, %v17386_v14  ;;  %v17390_v54 = vld [vmem:[#allocation72_spill] sm:$0xff] }
 0x2fb   :  { %v4447_v5 = vadd.s32 1, %v17390_v54 }
 0x2fc   :  { %v4121_v32 = vpop.f32.mrf.mxu2  ;;  %v4144_v9 = vpop.f32.mrf.mxu3 }
 0x2fd   :  { %v13235_v16 = vadd.f32 %v4121_v32, %v2926_v3  ;;  %v13237_v28 = vadd.f32 %v4144_v9, %v2949_v35  ;;  %v13239_v6 = vpop.f32.mrf.mxu0  ;;  %v13241_v34 = vpop.f32.mrf.mxu1  ;;  %v4913_v32 = vsel %vm4525_vm11, %v4833_v21, 0.0  ;;  %v17388_v9 = vld [vmem:[#allocation37_spill] sm:$0xff]  ;;  %vm4527_vm13 = vcmp.le.s32.totalorder %v4447_v5, 7 }
 0x2fe   :  { %17384 = vst [vmem:[#allocation151_spill] sm:$0xff] %v13239_v6  ;;  %v4793_v35 = vpop.permute.xlu2 %4792  ;;  %v3038_v22 = vadd.f32 %v17389_v19, %v17388_v9 }
 0x2ff   :  { %17382 = vst [vmem:[#allocation10_spill] sm:$0xff] %v13235_v16 }
 0x300   :  { %17383 = vst [vmem:[#allocation9_spill] sm:$0xff] %v13237_v28  ;;  %10623 = vmatmul.msk.f32.vlgmr.msra.gmra.mxu0 %vm1045_vm4, %v12714_v4  ;;  %10626 = vmatmul.msk.f32.vlgmr.msra.gmra.mxu1 %vm1045_vm4, %v12714_v4  ;;  %v6324_v28 = vld.sshfl [vmem:[#allocation1 + $0x30] sm:$0xff pattern:$0x75316420] }
 0x301   :  { %17385 = vst [vmem:[#allocation108_spill] sm:$0xff] %v13241_v34  ;;  %10629 = vmatmul.msk.f32.vlgmr.msra.gmra.mxu2 %vm1045_vm4, %v12714_v4  ;;  %10632 = vmatmul.msk.f32.vlgmr.msra.gmra.mxu3 %vm1045_vm4, %v12714_v4  ;;  %v6332_v21 = vld.sshfl [vmem:[#allocation1 + $0x10] sm:$0xff pattern:$0x75316420] }
 0x302   :  { %10646 = vmatpush.msk.msra.mxu0 %vm1050_vm3, %v4911_v10  ;;  %10649 = vmatpush.msk.msra.mxu1 %vm1050_vm3, %v4912_v0  ;;  %v17391_v10 = vld [vmem:[#allocation73_spill] sm:$0xff]  ;;  %v6333_v19 = vld.sshfl [vmem:[#allocation1 + $0x18] sm:$0xff pattern:$0x75316420] }
 0x303   :  { %10652 = vmatpush.msk.msra.mxu2 %vm1050_vm3, %v4913_v32  ;;  %10655 = vmatpush.msk.msra.mxu3 %vm1050_vm3, %v4914_v13  ;;  %v4448_v34 = vadd.s32 1, %v17391_v10  ;;  %v17396_v32 = vld [vmem:[#allocation74_spill] sm:$0xff]  ;;  %v4791_v13 = vpop.permute.xlu1 %4790  ;;  %v17403_v10 = vld [vmem:[#allocation173_spill] sm:$0xff] }
 0x304   :  { %v4210_v8 = vpop.f32.mrf.mxu2  ;;  %v4233_v3 = vpop.f32.mrf.mxu3  ;;  %6404 = vrot.lane.b32.xlu0 %v6332_v21, %s11037_s25  ;;  %v4449_v9 = vadd.s32 1, %v17396_v32  ;;  %6406 = vrot.lane.b32.xlu1 %v6333_v19, %s11037_s25  ;;  %v17397_v21 = vld [vmem:[#allocation20_spill] sm:$0xff]  ;;  %v17402_v32 = vld [vmem:[#allocation118_spill] sm:$0xff] }
 0x305   :  { %v13264_v0 = vadd.f32 %v4210_v8, %v3015_v18  ;;  %v13266_v6 = vadd.f32 %v4233_v3, %v3038_v22  ;;  %v13268_v14 = vpop.f32.mrf.mxu0  ;;  %v13270_v55 = vpop.f32.mrf.mxu1  ;;  %6339 = vst [vmem:[#allocation1 + $0x10] ss:$2 sm:$0xff] %v17397_v21  ;;  %6396 = vrot.lane.b32.xlu2 %v6324_v28, %s11037_s25  ;;  %vm4528_vm14 = vcmp.le.s32.totalorder %v4448_v34, 7  ;;  %v4837_v18 = vsel %vm4798_vm1, %v4793_v35, %v4795_v20  ;;  %v17398_v22 = vld [vmem:[#allocation15_spill] sm:$0xff] }
 0x306   :  { %17394 = vst [vmem:[#allocation155_spill] sm:$0xff] %v13268_v14  ;;  %v4835_v28 = vsel %vm4798_vm1, %v4789_v42, %v4791_v13  ;;  %v4836_v8 = vsel %vm4798_vm1, %v4791_v13, %v4793_v35  ;;  %vm4529_vm15 = vcmp.le.s32.totalorder %v4449_v9, 7  ;;  %v6334_v3 = vld.sshfl [vmem:[#allocation1 + $0x20] sm:$0xff pattern:$0x75316420]  ;;  %v13288_v19 = vpop.permute.xlu0 %6356  ;;  %v17399_v21 = vld [vmem:[#allocation75_spill] sm:$0xff]  ;;  %v3041_v54 = vadd.f32 %v17403_v10, %v17402_v32 }
 0x307   :  { %17392 = vst [vmem:[#allocation152_spill] sm:$0xff] %v13264_v0  ;;  %v4797_v0 = vpop.permute.xlu2 %4796  ;;  %v17401_v14 = vld [vmem:[#allocation172_spill] sm:$0xff]  ;;  %v4915_v50 = vsel %vm4527_vm13, %v4835_v28, 0.0  ;;  %v4916_v42 = vsel %vm4528_vm14, %v4836_v8, 0.0  ;;  %v4917_v35 = vsel %vm4529_vm15, %v4837_v18, 0.0  ;;  %v17412_v28 = vld [vmem:[#allocation38_spill] sm:$0xff] }
 0x308   :  { %17393 = vst [vmem:[#allocation13_spill] sm:$0xff] %v13266_v6  ;;  %10627 = vmatmul.msk.f32.gmra.mxu1 %vm1045_vm4, %v12733_v36  ;;  %10624 = vmatmul.msk.f32.gmra.mxu0 %vm1045_vm4, %v12733_v36  ;;  %v4450_v6 = vadd.s32 1, %v17399_v21  ;;  %v4838_v10 = vsel %vm4798_vm1, %v4795_v20, %v4797_v0  ;;  %v6331_v34 = vld.sshfl [vmem:[#allocation1 + $0x8] sm:$0xff pattern:$0x75316420]  ;;  %v17409_v20 = vld [vmem:[#allocation23_spill] sm:$0xff] }
 0x309   :  { %17395 = vst [vmem:[#allocation24_spill] sm:$0xff] %v13270_v55  ;;  %10630 = vmatmul.msk.f32.gmra.mxu2 %vm1045_vm4, %v12733_v36  ;;  %10633 = vmatmul.msk.f32.gmra.mxu3 %vm1045_vm4, %v12733_v36  ;;  %v17400_v55 = vld [vmem:[#allocation17_spill] sm:$0xff]  ;;  %v17411_v0 = vld [vmem:[#allocation176_spill] sm:$0xff]  ;;  %vm6434_vm1 = vcmask 1014784  }
 0x30a   :  { %6329 = vst [vmem:[#allocation1 + $0x30] ss:$2 sm:$0xff] %v17398_v22  ;;  %v3018_v22 = vadd.f32 %v17401_v14, %v17400_v55  ;;  %vm4530_vm0 = vcmp.le.s32.totalorder %v4450_v6, 7  ;;  %v6335_v14 = vld.sshfl [vmem:[#allocation1 + $0x28] sm:$0xff pattern:$0x75316420] }
 0x30b   :  { %v6330_v55 = vld.sshfl [vmem:[#allocation1] sm:$0xff pattern:$0x75316420]  ;;  %6340 = vst [vmem:[#allocation1 + $0x20] ss:$2 sm:$0xff] %v17187_v58 }
 0x30c   :  { %v4213_v16 = vpop.f32.mrf.mxu2  ;;  %v4236_v61 = vpop.f32.mrf.mxu3  ;;  %6408 = vrot.lane.b32.xlu0 %v6334_v3, %s11037_s25  ;;  %6338 = vst [vmem:[#allocation1] ss:$2 sm:$0xff] %v17409_v20  ;;  %v17413_v8 = vld [vmem:[#allocation177_spill] sm:$0xff] }
 0x30d   :  { %v13298_v9 = vadd.f32 %v4213_v16, %v3018_v22  ;;  %v13300_v13 = vadd.f32 %v4236_v61, %v3041_v54  ;;  %v13302_v21 = vpop.f32.mrf.mxu0  ;;  %v13304_v47 = vpop.f32.mrf.mxu1  ;;  %6400 = vrot.lane.b32.xlu2 %v6330_v55, %s11037_s25  ;;  %v4918_v61 = vsel %vm4530_vm0, %v4838_v10, 0.0  ;;  %v17407_v16 = vld [vmem:[#allocation26_spill] sm:$0xff]  ;;  %v17410_v54 = vld [vmem:[#allocation29_spill] sm:$0xff]  ;;  %v3130_v3 = vadd.f32 %v17413_v8, %v17412_v28 }
 0x30e   :  { %17406 = vst [vmem:[#allocation25_spill] sm:$0xff] %v13304_v47  ;;  %v3107_v18 = vadd.f32 %v17411_v0, %v17410_v54  ;;  %v6359_v22 = vpop.permute.xlu1 %6358  ;;  %v6355_v58 = vpop.permute.xlu0 %6354  ;;  %v17418_v54 = vld [vmem:[#allocation45_spill] sm:$0xff]  ;;  %v17420_v0 = vld [vmem:[#allocation46_spill] sm:$0xff] }
 0x30f   :  { %17404 = vst [vmem:[#allocation156_spill] sm:$0xff] %v13298_v9  ;;  %v13320_v6 = vpop.permute.xlu2 %6555  ;;  %v6437_v9 = vsel %vm6434_vm1, %v13288_v19, %v6359_v22 }
 0x310   :  { %17405 = vst [vmem:[#allocation11_spill] sm:$0xff] %v13300_v13  ;;  %10638 = vmatmul.msk.f32.vlgmr.msrb.gmra.mxu1 %vm1045_vm4, %v12714_v4  ;;  %10635 = vmatmul.msk.f32.vlgmr.msrb.gmra.mxu0 %vm1045_vm4, %v12714_v4 }
 0x311   :  { %v6336_v5 = vld.sshfl [vmem:[#allocation1 + $0x30] sm:$0xff pattern:$0x75316420]  ;;  %v13307_v32 = vld.sshfl [vmem:[#allocation1 + $0x38] sm:$0xff pattern:$0x75316420]  ;;  %10641 = vmatmul.msk.f32.vlgmr.msrb.gmra.mxu2 %vm1045_vm4, %v12714_v4  ;;  %10644 = vmatmul.msk.f32.vlgmr.msrb.gmra.mxu3 %vm1045_vm4, %v12714_v4 }
 0x312   :  { %6341 = vst [vmem:[#allocation1 + $0x30] ss:$2 sm:$0xff] %v17407_v16  ;;  %10658 = vmatpush.msk.msrb.mxu0 %vm1050_vm3, %v4915_v50  ;;  %10661 = vmatpush.msk.msrb.mxu1 %vm1050_vm3, %v4916_v42 }
 0x313   :  { %17408 = vst [vmem:[#allocation111_spill] sm:$0xff] %v13320_v6  ;;  %10664 = vmatpush.msk.msrb.mxu2 %vm1050_vm3, %v4917_v35  ;;  %10667 = vmatpush.msk.msrb.mxu3 %vm1050_vm3, %v4918_v61  ;;  %v6049_v35 = vadd.s32 2, %v17418_v54  ;;  %v6342_v61 = vld.sshfl [vmem:[#allocation1] sm:$0xff pattern:$0x75316420] }
 0x314   :  { %v4302_v10 = vpop.f32.mrf.mxu2  ;;  %v4325_v55 = vpop.f32.mrf.mxu3  ;;  %6412 = vrot.lane.b32.xlu1 %v6336_v5, %s11037_s25  ;;  %6410 = vrot.lane.b32.xlu0 %v6335_v14, %s11037_s25  ;;  %v17419_v5 = vld [vmem:[#allocation43_spill] sm:$0xff]  ;;  %v17424_v54 = vld [vmem:[#allocation121_spill] sm:$0xff] }
 0x315   :  { %v13333_v50 = vadd.f32 %v4302_v10, %v3107_v18  ;;  %v13335_v42 = vadd.f32 %v4325_v55, %v3130_v3  ;;  %v13337_v16 = vpop.f32.mrf.mxu0  ;;  %v13339_v20 = vpop.f32.mrf.mxu1  ;;  %6402 = vrot.lane.b32.xlu2 %v6331_v34, %s11037_s25  ;;  %v6048_v14 = vadd.s32 2, %v17419_v5  ;;  %v6050_v18 = vadd.s32 2, %v17420_v0  ;;  %v17421_v34 = vld [vmem:[#allocation44_spill] sm:$0xff] }
 0x316   :  { %17416 = vst [vmem:[#allocation32_spill] sm:$0xff] %v13337_v16  ;;  %v6047_v8 = vadd.s32 2, %v17421_v34  ;;  %v17422_v3 = vld [vmem:[#allocation40_spill] sm:$0xff]  ;;  %vm6129_vm2 = vcmp.le.s32.totalorder %v6049_v35, 7 }
 0x317   :  { %17414 = vst [vmem:[#allocation30_spill] sm:$0xff] %v13333_v50  ;;  %v6361_v28 = vpop.permute.xlu2 %6360  ;;  %v17423_v10 = vld [vmem:[#allocation180_spill] sm:$0xff]  ;;  %vm6128_vm5 = vcmp.le.s32.totalorder %v6048_v14, 7  ;;  %vm6130_vm6 = vcmp.le.s32.totalorder %v6050_v18, 7  ;;  %v6353_v14 = vpop.permute.xlu1 %6352  ;;  %v6051_v18 = vadd.s32 2, %v11425_v49 }
 0x318   :  { %17415 = vst [vmem:[#allocation161_spill] sm:$0xff] %v13335_v42  ;;  %10639 = vmatmul.msk.f32.gmra.mxu1 %vm1045_vm4, %v12733_v36  ;;  %10636 = vmatmul.msk.f32.gmra.mxu0 %vm1045_vm4, %v12733_v36  ;;  %v3110_v55 = vadd.f32 %v17423_v10, %v17422_v3  ;;  %v17425_v42 = vld [vmem:[#allocation181_spill] sm:$0xff]  ;;  %v6438_v0 = vsel %vm6434_vm1, %v6359_v22, %v6361_v28  ;;  %vm6127_vm7 = vcmp.le.s32.totalorder %v6047_v8, 7  ;;  %v6343_v16 = vld.sshfl [vmem:[#allocation1 + $0x8] sm:$0xff pattern:$0x75316420] }
 0x319   :  { %17417 = vst [vmem:[#allocation162_spill] sm:$0xff] %v13339_v20  ;;  %10642 = vmatmul.msk.f32.gmra.mxu2 %vm1045_vm4, %v12733_v36  ;;  %10645 = vmatmul.msk.f32.gmra.mxu3 %vm1045_vm4, %v12733_v36  ;;  %v3133_v50 = vadd.f32 %v17425_v42, %v17424_v54  ;;  %v6436_v20 = vsel %vm6434_vm1, %v6355_v58, %v13288_v19  ;;  %v13372_v54 = vpop.permute.xlu0 %6557  ;;  %v6517_v19 = vsel %vm6129_vm2, %v6437_v9, 0.0  ;;  %v6345_v35 = vld.sshfl [vmem:[#allocation1 + $0x18] sm:$0xff pattern:$0x75316420]  ;;  %vm6131_vm8 = vcmp.le.s32.totalorder %v6051_v18, 7 }
 0x31a   :  { %v6516_v47 = vsel %vm6128_vm5, %v6436_v20, 0.0  ;;  %6350 = vst [vmem:[#allocation1] ss:$2 sm:$0xff] %v17208_v30  ;;  %v6349_v49 = vld.sshfl [vmem:[#allocation1 + $0x38] sm:$0xff pattern:$0x75316420] }
 0x31c   :  { %v4305_v5 = vpop.f32.mrf.mxu2  ;;  %v4328_v13 = vpop.f32.mrf.mxu3  ;;  %6416 = vrot.lane.b32.xlu1 %v6342_v61, %s11037_s25  ;;  %v6435_v61 = vsel %vm6434_vm1, %v6353_v14, %v6355_v58  ;;  %6422 = vrot.lane.b32.xlu0 %v6345_v35, %s11037_s25 }
 0x31d   :  { %v13364_v34 = vadd.f32 %v4305_v5, %v3110_v55  ;;  %v13366_v3 = vadd.f32 %v4328_v13, %v3133_v50  ;;  %v13368_v10 = vpop.f32.mrf.mxu0  ;;  %v13370_v42 = vpop.f32.mrf.mxu1  ;;  %6414 = vrot.lane.b32.xlu2 %v13307_v32, %s11037_s25  ;;  %v6518_v13 = vsel %vm6130_vm6, %v6438_v0, 0.0  ;;  %v6515_v22 = vsel %vm6127_vm7, %v6435_v61, 0.0 }
 0x31e   :  { %17428 = vst [vmem:[#allocation165_spill] sm:$0xff] %v13370_v42  ;;  %v6054_v55 = vadd.s32 2, %v11403_v60  ;;  %v17628_v42 = vld [vmem:[#allocation188_spill] sm:$0xff] }
 0x31f   :  { %17426 = vst [vmem:[#allocation114_spill] sm:$0xff] %v13364_v34 }
 0x320   :  { %17427 = vst [vmem:[#allocation115_spill] sm:$0xff] %v13366_v3  ;;  %10650 = vmatmul.msk.f32.vlgmr.msra.gmra.mxu1 %vm1045_vm4, %v12714_v4  ;;  %10647 = vmatmul.msk.f32.vlgmr.msra.gmra.mxu0 %vm1045_vm4, %v12714_v4  ;;  %vm6134_vm11 = vcmp.le.s32.totalorder %v6054_v55, 7  ;;  %v6344_v55 = vld.sshfl [vmem:[#allocation1 + $0x10] sm:$0xff pattern:$0x75316420] }
 0x321   :  { %10653 = vmatmul.msk.f32.vlgmr.msra.gmra.mxu2 %vm1045_vm4, %v12714_v4  ;;  %10656 = vmatmul.msk.f32.vlgmr.msra.gmra.mxu3 %vm1045_vm4, %v12714_v4 }
 0x322   :  { %10673 = vmatpush.msk.msra.mxu1 %vm1050_vm3, %v6516_v47  ;;  %10676 = vmatpush.msk.msra.mxu2 %vm1050_vm3, %v6517_v19  ;;  %v6365_v47 = vpop.permute.xlu1 %6364 }
 0x323   :  { %10679 = vmatpush.msk.msra.mxu3 %vm1050_vm3, %v6518_v13  ;;  %10670 = vmatpush.msk.msra.mxu0 %vm1050_vm3, %v6515_v22  ;;  %v11044_v22 = vmov 20  }
 0x324   :  { %v5110_v30 = vpop.f32.mrf.mxu2  ;;  %v5133_v9 = vpop.f32.mrf.mxu3  ;;  %6418 = vrot.lane.b32.xlu1 %v6343_v16, %s11037_s25  ;;  %v6053_v16 = vadd.s32 2, %v11382_v51  ;;  %10947 = vset.pattern.permute.xlu2 %v11044_v22 }
 0x325   :  { %v13393_v32 = vadd.f32 %v5110_v30, %v12772_v46  ;;  %v13396_v58 = vadd.f32 %v5133_v9, %v12774_v52  ;;  %v13398_v50 = vpop.f32.mrf.mxu1  ;;  %v13400_v20 = vpop.f32.mrf.mxu0  ;;  %v6052_v52 = vadd.s32 2, %v11427_v2  ;;  %10946 = vset.pattern.permute.xlu1 %v11044_v22  ;;  %v6348_v30 = vld.sshfl [vmem:[#allocation1 + $0x30] sm:$0xff pattern:$0x75316420]  ;;  %10948 = vset.pattern.permute.xlu0 %v11044_v22 }
 0x326   :  { %17430 = vst [vmem:[#allocation34_spill] sm:$0xff] %v13398_v50  ;;  %v6367_v8 = vpop.permute.xlu2 %6366  ;;  %v6363_v46 = vpop.permute.xlu0 %6362  ;;  %vm6133_vm10 = vcmp.le.s32.totalorder %v6053_v16, 7  ;;  %6428 = vrot.lane.b32.xlu0 %v6348_v30, %s11037_s25  ;;  %6420 = vrot.lane.b32.xlu2 %v6344_v55, %s11037_s25 }
 0x327   :  { %17429 = vst [vmem:[#allocation12_spill] sm:$0xff] %v13393_v32  ;;  %v6439_v5 = vsel %vm6434_vm1, %v6361_v28, %v6363_v46  ;;  %vm6132_vm9 = vcmp.le.s32.totalorder %v6052_v52, 7  ;;  %v6440_v19 = vsel %vm6434_vm1, %v6363_v46, %v6365_v47  ;;  %v6441_v2 = vsel %vm6434_vm1, %v6365_v47, %v6367_v8  ;;  %v17552_v32 = vld [vmem:[#allocation47_spill] sm:$0xff] }
 0x328   :  { %17431 = vst [vmem:[#allocation168_spill] sm:$0xff] %v13400_v20  ;;  %10651 = vmatmul.msk.f32.gmra.mxu1 %vm1045_vm4, %v12733_v36  ;;  %10648 = vmatmul.msk.f32.gmra.mxu0 %vm1045_vm4, %v12733_v36  ;;  %v6519_v9 = vsel %vm6131_vm8, %v6439_v5, 0.0  ;;  %v6520_v47 = vsel %vm6132_vm9, %v6440_v19, 0.0  ;;  %v6351_v5 = vld.sshfl [vmem:[#allocation1] sm:$0xff pattern:$0x75316420] }
 0x329   :  { %10654 = vmatmul.msk.f32.gmra.mxu2 %vm1045_vm4, %v12733_v36  ;;  %10657 = vmatmul.msk.f32.gmra.mxu3 %vm1045_vm4, %v12733_v36  ;;  %v17624_v20 = vld [vmem:[#allocation185_spill] sm:$0xff] }
 0x32a   :  { %v6369_v28 = vpop.permute.xlu1 %6368 }
 0x32c   :  { %v5113_v0 = vpop.f32.mrf.mxu2  ;;  %v5136_v14 = vpop.f32.mrf.mxu3  ;;  %6430 = vrot.lane.b32.xlu1 %v6349_v49, %s11037_s25 }
 0x32d   :  { %v13420_v51 = vadd.f32 %v5113_v0, %v12803_v62  ;;  %v13423_v61 = vadd.f32 %v5136_v14, %v12805_v37  ;;  %v13425_v60 = vpop.f32.mrf.mxu1  ;;  %v13427_v13 = vpop.f32.mrf.mxu0  ;;  %v6442_v62 = vsel %vm6434_vm1, %v6367_v8, %v6369_v28  ;;  %v6521_v37 = vsel %vm6133_vm10, %v6441_v2, 0.0 }
 0x32e   :  { %17433 = vst [vmem:[#allocation169_spill] sm:$0xff] %v13425_v60  ;;  %v6522_v35 = vsel %vm6134_vm11, %v6442_v62, 0.0  ;;  %v6373_v18 = vpop.permute.xlu2 %6372  ;;  %v6055_v0 = vadd.s32 2, %v11432_v27  ;;  %v6056_v14 = vadd.s32 2, %v11434_v44  ;;  %6432 = vrot.lane.b32.xlu0 %v6351_v5, %s11037_s25  ;;  %v17621_v60 = vld [vmem:[#allocation182_spill] sm:$0xff] }
 0x32f   :  { %17432 = vst [vmem:[#allocation37_spill] sm:$0xff] %v13420_v51 }
 0x330   :  { %17434 = vst [vmem:[#allocation20_spill] sm:$0xff] %v13427_v13  ;;  %10662 = vmatmul.msk.f32.vlgmr.msrb.gmra.mxu1 %vm1045_vm4, %v12714_v4  ;;  %10659 = vmatmul.msk.f32.vlgmr.msrb.gmra.mxu0 %vm1045_vm4, %v12714_v4  ;;  %vm6135_vm12 = vcmp.le.s32.totalorder %v6055_v0, 7  ;;  %vm6136_vm13 = vcmp.le.s32.totalorder %v6056_v14, 7  ;;  %v17619_v13 = vld [vmem:[#allocation39_spill] sm:$0xff] }
 0x331   :  { %10665 = vmatmul.msk.f32.vlgmr.msrb.gmra.mxu2 %vm1045_vm4, %v12714_v4  ;;  %10668 = vmatmul.msk.f32.vlgmr.msrb.gmra.mxu3 %vm1045_vm4, %v12714_v4 }
 0x332   :  { %10682 = vmatpush.msk.msrb.mxu0 %vm1050_vm3, %v6519_v9  ;;  %10685 = vmatpush.msk.msrb.mxu1 %vm1050_vm3, %v6520_v47  ;;  %v6371_v27 = vpop.permute.xlu1 %6370 }
 0x333   :  { %10688 = vmatpush.msk.msrb.mxu2 %vm1050_vm3, %v6521_v37  ;;  %10691 = vmatpush.msk.msrb.mxu3 %vm1050_vm3, %v6522_v35  ;;  %v6443_v22 = vsel %vm6434_vm1, %v6369_v28, %v6371_v27  ;;  %v6444_v30 = vsel %vm6434_vm1, %v6371_v27, %v6373_v18  ;;  %v6346_v37 = vld.sshfl [vmem:[#allocation1 + $0x20] sm:$0xff pattern:$0x75316420]  ;;  %v6061_v27 = vadd.s32 2, %v17289_v15 }
 0x334   :  { %v5202_v8 = vpop.f32.mrf.mxu2  ;;  %v5225_v46 = vpop.f32.mrf.mxu3  ;;  %7684 = vperm.xlu1 %10946, %v12974_v12   ;;  %v6523_v28 = vsel %vm6135_vm12, %v6443_v22, 0.0  ;;  %v6524_v35 = vsel %vm6136_vm13, %v6444_v30, 0.0  ;;  %6424 = vrot.lane.b32.xlu2 %v6346_v37, %s11037_s25 }
 0x335   :  { %v13448_v52 = vadd.f32 %v5202_v8, %v12835_v31  ;;  %v13451_v16 = vadd.f32 %v5225_v46, %v12837_v39  ;;  %v13453_v4 = vpop.f32.mrf.mxu1  ;;  %v13455_v49 = vpop.f32.mrf.mxu0  ;;  %v6057_v31 = vadd.s32 2, %v11456_v63  ;;  %v6058_v39 = vadd.s32 2, %v11458_v43 }
 0x336   :  { %17437 = vst [vmem:[#allocation172_spill] sm:$0xff] %v13453_v4  ;;  %v6377_v44 = vpop.permute.xlu2 %6376  ;;  %v6375_v12 = vpop.permute.xlu0 %6374  ;;  %vm6141_vm5 = vcmp.le.s32.totalorder %v6061_v27, 7 }
 0x337   :  { %17435 = vst [vmem:[#allocation15_spill] sm:$0xff] %v13448_v52  ;;  %vm6137_vm14 = vcmp.le.s32.totalorder %v6057_v31, 7  ;;  %vm6138_vm15 = vcmp.le.s32.totalorder %v6058_v39, 7  ;;  %v6445_v47 = vsel %vm6434_vm1, %v6373_v18, %v6375_v12  ;;  %v6446_v62 = vsel %vm6434_vm1, %v6375_v12, %v6377_v44  ;;  %v6347_v31 = vld.sshfl [vmem:[#allocation1 + $0x28] sm:$0xff pattern:$0x75316420] }
 0x338   :  { %17436 = vst [vmem:[#allocation17_spill] sm:$0xff] %v13451_v16  ;;  %10663 = vmatmul.msk.f32.gmra.mxu1 %vm1045_vm4, %v12733_v36  ;;  %10660 = vmatmul.msk.f32.gmra.mxu0 %vm1045_vm4, %v12733_v36  ;;  %v6059_v39 = vadd.s32 2, %v17286_v24  ;;  %v6062_v12 = vadd.s32 2, %v17290_v57 }
 0x339   :  { %17438 = vst [vmem:[#allocation118_spill] sm:$0xff] %v13455_v49  ;;  %10666 = vmatmul.msk.f32.gmra.mxu2 %vm1045_vm4, %v12733_v36  ;;  %10669 = vmatmul.msk.f32.gmra.mxu3 %vm1045_vm4, %v12733_v36  ;;  %v17618_v49 = vld [vmem:[#allocation178_spill] sm:$0xff] }
 0x33a   :  { %vm6139_vm0 = vcmp.le.s32.totalorder %v6059_v39, 7  ;;  %vm6142_vm6 = vcmp.le.s32.totalorder %v6062_v12, 7 }
 0x33c   :  { %v5205_v19 = vpop.f32.mrf.mxu2  ;;  %v5228_v2 = vpop.f32.mrf.mxu3  ;;  %6426 = vrot.lane.b32.xlu2 %v6347_v31, %s11037_s25 }
 0x33d   :  { %v13474_v43 = vadd.f32 %v5205_v19, %v12865_v26  ;;  %v13477_v63 = vadd.f32 %v5228_v2, %v12867_v25  ;;  %v13479_v36 = vpop.f32.mrf.mxu1  ;;  %v13481_v9 = vpop.f32.mrf.mxu0  ;;  %v6525_v26 = vsel %vm6137_vm14, %v6445_v47, 0.0  ;;  %v6526_v25 = vsel %vm6138_vm15, %v6446_v62, 0.0 }
 0x33e   :  { %17441 = vst [vmem:[#allocation23_spill] sm:$0xff] %v13479_v36  ;;  %v17617_v36 = vld [vmem:[#allocation41_spill] sm:$0xff] }
 0x33f   :  { %17439 = vst [vmem:[#allocation173_spill] sm:$0xff] %v13474_v43  ;;  %v3064_v4 = vadd.f32 %v17618_v49, %v17617_v36 }
 0x340   :  { %17440 = vst [vmem:[#allocation26_spill] sm:$0xff] %v13477_v63  ;;  %10674 = vmatmul.msk.f32.vlgmr.msra.gmra.mxu1 %vm1045_vm4, %v13320_v6  ;;  %10671 = vmatmul.msk.f32.vlgmr.msra.gmra.mxu0 %vm1045_vm4, %v13320_v6 }
 0x341   :  { %17442 = vst [vmem:[#allocation29_spill] sm:$0xff] %v13481_v9  ;;  %10677 = vmatmul.msk.f32.vlgmr.msra.gmra.mxu2 %vm1045_vm4, %v13320_v6  ;;  %10680 = vmatmul.msk.f32.vlgmr.msra.gmra.mxu3 %vm1045_vm4, %v13320_v6 }
 0x342   :  { %10694 = vmatpush.msk.msra.mxu0 %vm1050_vm3, %v6523_v28  ;;  %10697 = vmatpush.msk.msra.mxu1 %vm1050_vm3, %v6524_v35 }
 0x343   :  { %10700 = vmatpush.msk.msra.mxu2 %vm1050_vm3, %v6525_v26  ;;  %10703 = vmatpush.msk.msra.mxu3 %vm1050_vm3, %v6526_v25  ;;  %v10956_v26 = vld [vmem:[%s16727_s1 + $0x8] sm:$0xf] }
 0x344   :  { %v5294_v18 = vpop.f32.mrf.mxu2  ;;  %v5317_v8 = vpop.f32.mrf.mxu3  ;;  %7688 = vperm.xlu2 %10947, %v10956_v26  }
 0x345   :  { %v13499_v46 = vadd.f32 %v5294_v18, %v12897_v1  ;;  %v13502_v55 = vadd.f32 %v5317_v8, %v12899_v7  ;;  %v13504_v5 = vpop.f32.mrf.mxu1  ;;  %v13506_v0 = vpop.f32.mrf.mxu0  ;;  %v6060_v1 = vadd.s32 2, %v17287_v45 }
 0x346   :  { %17445 = vst [vmem:[#allocation177_spill] sm:$0xff] %v13504_v5  ;;  %v6381_v14 = vpop.permute.xlu0 %6380  ;;  %v6379_v7 = vpop.permute.xlu2 %6378  ;;  %v17616_v5 = vld [vmem:[#allocation175_spill] sm:$0xff] }
 0x347   :  { %17443 = vst [vmem:[#allocation176_spill] sm:$0xff] %v13499_v46  ;;  %v6383_v24 = vpop.permute.xlu1 %6382  ;;  %v6447_v22 = vsel %vm6434_vm1, %v6377_v44, %v6379_v7  ;;  %vm6140_vm2 = vcmp.le.s32.totalorder %v6060_v1, 7  ;;  %v6448_v45 = vsel %vm6434_vm1, %v6379_v7, %v6381_v14  ;;  %v6063_v7 = vadd.s32 2, %v17302_v38 }
 0x348   :  { %17444 = vst [vmem:[#allocation38_spill] sm:$0xff] %v13502_v55  ;;  %10675 = vmatmul.msk.f32.gmra.mxu1 %vm1045_vm4, %v13372_v54  ;;  %10672 = vmatmul.msk.f32.gmra.mxu0 %vm1045_vm4, %v13372_v54  ;;  %v6449_v30 = vsel %vm6434_vm1, %v6381_v14, %v6383_v24  ;;  %v6527_v28 = vsel %vm6139_vm0, %v6447_v22, 0.0  ;;  %v6528_v44 = vsel %vm6140_vm2, %v6448_v45, 0.0 }
 0x349   :  { %17446 = vst [vmem:[#allocation45_spill] sm:$0xff] %v13506_v0  ;;  %10678 = vmatmul.msk.f32.gmra.mxu2 %vm1045_vm4, %v13372_v54  ;;  %10681 = vmatmul.msk.f32.gmra.mxu3 %vm1045_vm4, %v13372_v54  ;;  %vm6143_vm7 = vcmp.le.s32.totalorder %v6063_v7, 7  ;;  %v17615_v0 = vld [vmem:[#allocation120_spill] sm:$0xff] }
 0x34a   :  { %v3084_v9 = vadd.f32 %v17616_v5, %v17615_v0  ;;  %v17627_v5 = vld [vmem:[#allocation187_spill] sm:$0xff] }
 0x34c   :  { %v5297_v19 = vpop.f32.mrf.mxu2  ;;  %v5320_v2 = vpop.f32.mrf.mxu3 }
 0x34d   :  { %v13525_v47 = vadd.f32 %v5297_v19, %v12934_v40  ;;  %v13528_v62 = vadd.f32 %v5320_v2, %v12936_v23  ;;  %v13530_v15 = vpop.f32.mrf.mxu1  ;;  %v13532_v37 = vpop.f32.mrf.mxu0  ;;  %v6529_v23 = vsel %vm6141_vm5, %v6449_v30, 0.0  ;;  %v17456_v19 = vld [vmem:[#allocation53_spill] sm:$0xff] }
 0x34e   :  { %17449 = vst [vmem:[#allocation44_spill] sm:$0xff] %v13530_v15  ;;  %v6385_v57 = vpop.permute.xlu0 %6384  ;;  %v6066_v38 = vadd.s32 2, %v17456_v19  ;;  %v17466_v19 = vld [vmem:[#allocation56_spill] sm:$0xff]  ;;  %v17613_v15 = vld [vmem:[#allocation119_spill] sm:$0xff] }
 0x34f   :  { %17447 = vst [vmem:[#allocation43_spill] sm:$0xff] %v13525_v47  ;;  %v6450_v35 = vsel %vm6434_vm1, %v6383_v24, %v6385_v57  ;;  %v6389_v25 = vpop.permute.xlu1 %6388  ;;  %v6391_v27 = vpop.permute.xlu2 %6390  ;;  %v6064_v24 = vadd.s32 2, %v17303_v17 }
 0x350   :  { %17448 = vst [vmem:[#allocation46_spill] sm:$0xff] %v13528_v62  ;;  %10686 = vmatmul.msk.f32.vlgmr.msrb.gmra.mxu1 %vm1045_vm4, %v13320_v6  ;;  %10683 = vmatmul.msk.f32.vlgmr.msrb.gmra.mxu0 %vm1045_vm4, %v13320_v6  ;;  %v6530_v40 = vsel %vm6142_vm6, %v6450_v35, 0.0  ;;  %v6453_v17 = vsel %vm6434_vm1, %v6389_v25, %v6391_v27  ;;  %vm6146_vm10 = vcmp.le.s32.totalorder %v6066_v38, 7  ;;  %v6067_v38 = vadd.s32 2, %v17466_v19 }
 0x351   :  { %17450 = vst [vmem:[#allocation40_spill] sm:$0xff] %v13532_v37  ;;  %10689 = vmatmul.msk.f32.vlgmr.msrb.gmra.mxu2 %vm1045_vm4, %v13320_v6  ;;  %10692 = vmatmul.msk.f32.vlgmr.msrb.gmra.mxu3 %vm1045_vm4, %v13320_v6  ;;  %vm6144_vm8 = vcmp.le.s32.totalorder %v6064_v24, 7  ;;  %v17462_v24 = vld [vmem:[#allocation52_spill] sm:$0xff] }
 0x352   :  { %10706 = vmatpush.msk.msrb.mxu0 %vm1050_vm3, %v6527_v28  ;;  %10709 = vmatpush.msk.msrb.mxu1 %vm1050_vm3, %v6528_v44  ;;  %vm6147_vm11 = vcmp.le.s32.totalorder %v6067_v38, 7  ;;  %v17611_v37 = vld [vmem:[#allocation36_spill] sm:$0xff] }
 0x353   :  { %10712 = vmatpush.msk.msrb.mxu2 %vm1050_vm3, %v6529_v23  ;;  %10715 = vmatpush.msk.msrb.mxu3 %vm1050_vm3, %v6530_v40 }
 0x354   :  { %v5386_v18 = vpop.f32.mrf.mxu2  ;;  %v5409_v8 = vpop.f32.mrf.mxu3 }
 0x355   :  { %v13551_v14 = vadd.f32 %v5386_v18, %v12962_v48  ;;  %v13554_v31 = vadd.f32 %v5409_v8, %v12964_v59  ;;  %v13556_v39 = vpop.f32.mrf.mxu1  ;;  %v13558_v1 = vpop.f32.mrf.mxu0  ;;  %v17455_v59 = vld [vmem:[#allocation51_spill] sm:$0xff] }
 0x356   :  { %17453 = vst [vmem:[#allocation181_spill] sm:$0xff] %v13556_v39  ;;  %v6387_v48 = vpop.permute.xlu0 %6386  ;;  %v6065_v12 = vadd.s32 2, %v17455_v59  ;;  %v17609_v39 = vld [vmem:[#allocation35_spill] sm:$0xff] }
 0x357   :  { %17451 = vst [vmem:[#allocation180_spill] sm:$0xff] %v13551_v14  ;;  %v6451_v45 = vsel %vm6434_vm1, %v6385_v57, %v6387_v48  ;;  %v6452_v30 = vsel %vm6434_vm1, %v6387_v48, %v6389_v25 }
 0x358   :  { %17452 = vst [vmem:[#allocation121_spill] sm:$0xff] %v13554_v31  ;;  %10684 = vmatmul.msk.f32.gmra.mxu0 %vm1045_vm4, %v13372_v54  ;;  %10687 = vmatmul.msk.f32.gmra.mxu1 %vm1045_vm4, %v13372_v54  ;;  %vm6145_vm9 = vcmp.le.s32.totalorder %v6065_v12, 7  ;;  %v6531_v40 = vsel %vm6143_vm7, %v6451_v45, 0.0  ;;  %v6532_v18 = vsel %vm6144_vm8, %v6452_v30, 0.0 }
 0x359   :  { %17454 = vst [vmem:[#allocation191_spill] sm:$0xff] %v13558_v1  ;;  %10690 = vmatmul.msk.f32.gmra.mxu2 %vm1045_vm4, %v13372_v54  ;;  %10693 = vmatmul.msk.f32.gmra.mxu3 %vm1045_vm4, %v13372_v54 }
 0x35c   :  { %v5389_v2 = vpop.f32.mrf.mxu2  ;;  %v5412_v22 = vpop.f32.mrf.mxu3 }
 0x35d   :  { %v13576_v28 = vadd.f32 %v5389_v2, %v12996_v41  ;;  %v13579_v44 = vadd.f32 %v5412_v22, %v12998_v29  ;;  %v13581_v35 = vpop.f32.mrf.mxu1  ;;  %v13583_v26 = vpop.f32.mrf.mxu0  ;;  %v6533_v41 = vsel %vm6145_vm9, %v6453_v17, 0.0  ;;  %v17467_v2 = vld [vmem:[#allocation57_spill] sm:$0xff] }
 0x35e   :  { %17459 = vst [vmem:[#allocation192_spill] sm:$0xff] %v13581_v35  ;;  %v6393_v23 = vpop.permute.xlu1 %6392  ;;  %v6068_v22 = vadd.s32 2, %v17467_v2  ;;  %v17470_v2 = vld [vmem:[#allocation133_spill] sm:$0xff]  ;;  %v17597_v35 = vld [vmem:[#allocation112_spill] sm:$0xff] }
 0x35f   :  { %17457 = vst [vmem:[#allocation51_spill] sm:$0xff] %v13576_v28  ;;  %v6454_v57 = vsel %vm6434_vm1, %v6391_v27, %v6393_v23  ;;  %v6397_v25 = vpop.permute.xlu2 %6396 }
 0x360   :  { %17458 = vst [vmem:[#allocation53_spill] sm:$0xff] %v13579_v44  ;;  %10695 = vmatmul.msk.f32.vlgmr.msra.gmra.mxu0 %vm1045_vm4, %v13320_v6  ;;  %10698 = vmatmul.msk.f32.vlgmr.msra.gmra.mxu1 %vm1045_vm4, %v13320_v6  ;;  %v6534_v29 = vsel %vm6146_vm10, %v6454_v57, 0.0  ;;  %vm6148_vm12 = vcmp.le.s32.totalorder %v6068_v22, 7 }
 0x361   :  { %17460 = vst [vmem:[#allocation193_spill] sm:$0xff] %v13583_v26  ;;  %10701 = vmatmul.msk.f32.vlgmr.msra.gmra.mxu2 %vm1045_vm4, %v13320_v6  ;;  %10704 = vmatmul.msk.f32.vlgmr.msra.gmra.mxu3 %vm1045_vm4, %v13320_v6  ;;  %v17595_v26 = vld [vmem:[#allocation28_spill] sm:$0xff] }
 0x362   :  { %10718 = vmatpush.msk.msra.mxu0 %vm1050_vm3, %v6531_v40  ;;  %10721 = vmatpush.msk.msra.mxu1 %vm1050_vm3, %v6532_v18  ;;  %v17469_v40 = vld [vmem:[#allocation59_spill] sm:$0xff] }
 0x363   :  { %10724 = vmatpush.msk.msra.mxu2 %vm1050_vm3, %v6533_v41  ;;  %10727 = vmatpush.msk.msra.mxu3 %vm1050_vm3, %v6534_v29  ;;  %v6070_v18 = vadd.s32 2, %v17469_v40 }
 0x364   :  { %v5478_v8 = vpop.f32.mrf.mxu2  ;;  %v5501_v7 = vpop.f32.mrf.mxu3 }
 0x365   :  { %v13599_v27 = vadd.f32 %v5478_v8, %v13027_v56  ;;  %v13602_v48 = vadd.f32 %v5501_v7, %v17462_v24  ;;  %v13604_v59 = vpop.f32.mrf.mxu1  ;;  %v13606_v12 = vpop.f32.mrf.mxu0  ;;  %v17468_v56 = vld [vmem:[#allocation58_spill] sm:$0xff]  ;;  %vm6150_vm14 = vcmp.le.s32.totalorder %v6070_v18, 7  ;;  %v17476_v18 = vld [vmem:[#allocation137_spill] sm:$0xff] }
 0x366   :  { %17464 = vst [vmem:[#allocation195_spill] sm:$0xff] %v13604_v59  ;;  %v6395_v45 = vpop.permute.xlu1 %6394  ;;  %v6069_v30 = vadd.s32 2, %v17468_v56  ;;  %v6399_v17 = vpop.permute.xlu0 %6398  ;;  %v17472_v56 = vld [vmem:[#allocation94_spill] sm:$0xff]  ;;  %v17593_v59 = vld [vmem:[#allocation27_spill] sm:$0xff] }
 0x367   :  { %17461 = vst [vmem:[#allocation194_spill] sm:$0xff] %v13599_v27  ;;  %v6401_v57 = vpop.permute.xlu2 %6400  ;;  %v6455_v8 = vsel %vm6434_vm1, %v6393_v23, %v6395_v45  ;;  %v6456_v7 = vsel %vm6434_vm1, %v6395_v45, %v6397_v25  ;;  %v6457_v24 = vsel %vm6434_vm1, %v6397_v25, %v6399_v17 }
 0x368   :  { %17463 = vst [vmem:[#allocation52_spill] sm:$0xff] %v13602_v48  ;;  %10699 = vmatmul.msk.f32.gmra.mxu1 %vm1045_vm4, %v13372_v54  ;;  %10696 = vmatmul.msk.f32.gmra.mxu0 %vm1045_vm4, %v13372_v54  ;;  %v6458_v19 = vsel %vm6434_vm1, %v6399_v17, %v6401_v57  ;;  %vm6149_vm13 = vcmp.le.s32.totalorder %v6069_v30, 7  ;;  %v6535_v22 = vsel %vm6147_vm11, %v6455_v8, 0.0  ;;  %v6536_v23 = vsel %vm6148_vm12, %v6456_v7, 0.0 }
 0x369   :  { %17465 = vst [vmem:[#allocation196_spill] sm:$0xff] %v13606_v12  ;;  %10702 = vmatmul.msk.f32.gmra.mxu2 %vm1045_vm4, %v13372_v54  ;;  %10705 = vmatmul.msk.f32.gmra.mxu3 %vm1045_vm4, %v13372_v54  ;;  %v6537_v25 = vsel %vm6149_vm13, %v6457_v24, 0.0  ;;  %v6538_v45 = vsel %vm6150_vm14, %v6458_v19, 0.0  ;;  %v17589_v12 = vld [vmem:[#allocation109_spill] sm:$0xff] }
 0x36c   :  { %v5481_v41 = vpop.f32.mrf.mxu2  ;;  %v5504_v29 = vpop.f32.mrf.mxu3 }
 0x36d   :  { %v13625_v48 = vadd.f32 %v5481_v41, %v17470_v2  ;;  %v13628_v27 = vadd.f32 %v5504_v29, %v17472_v56  ;;  %v13630_v40 = vpop.f32.mrf.mxu1  ;;  %v13632_v38 = vpop.f32.mrf.mxu0  ;;  %v17478_v29 = vld [vmem:[#allocation54_spill] sm:$0xff]  ;;  %v17482_v2 = vld [vmem:[#allocation60_spill] sm:$0xff] }
 0x36e   :  { %17474 = vst [vmem:[#allocation58_spill] sm:$0xff] %v13630_v40  ;;  %v6071_v56 = vadd.s32 2, %v17482_v2 }
 0x36f   :  { %17471 = vst [vmem:[#allocation56_spill] sm:$0xff] %v13625_v48 }
 0x370   :  { %17473 = vst [vmem:[#allocation57_spill] sm:$0xff] %v13628_v27  ;;  %10710 = vmatmul.msk.f32.vlgmr.msrb.gmra.mxu1 %vm1045_vm4, %v13320_v6  ;;  %10707 = vmatmul.msk.f32.vlgmr.msrb.gmra.mxu0 %vm1045_vm4, %v13320_v6  ;;  %vm6151_vm15 = vcmp.le.s32.totalorder %v6071_v56, 7 }
 0x371   :  { %17475 = vst [vmem:[#allocation59_spill] sm:$0xff] %v13632_v38  ;;  %10713 = vmatmul.msk.f32.vlgmr.msrb.gmra.mxu2 %vm1045_vm4, %v13320_v6  ;;  %10716 = vmatmul.msk.f32.vlgmr.msrb.gmra.mxu3 %vm1045_vm4, %v13320_v6 }
 0x372   :  { %10730 = vmatpush.msk.msrb.mxu0 %vm1050_vm3, %v6535_v22  ;;  %10733 = vmatpush.msk.msrb.mxu1 %vm1050_vm3, %v6536_v23  ;;  %v17483_v22 = vld [vmem:[#allocation61_spill] sm:$0xff] }
 0x373   :  { %10736 = vmatpush.msk.msrb.mxu2 %vm1050_vm3, %v6537_v25  ;;  %10739 = vmatpush.msk.msrb.mxu3 %vm1050_vm3, %v6538_v45  ;;  %v6072_v23 = vadd.s32 2, %v17483_v22  ;;  %v6403_v25 = vpop.permute.xlu2 %6402  ;;  %v17484_v45 = vld [vmem:[#allocation62_spill] sm:$0xff] }
 0x374   :  { %v5570_v30 = vpop.f32.mrf.mxu2  ;;  %v5593_v17 = vpop.f32.mrf.mxu3 }
 0x375   :  { %v13647_v41 = vadd.f32 %v5570_v30, %v17476_v18  ;;  %v13650_v8 = vadd.f32 %v5593_v17, %v17478_v29  ;;  %v13652_v7 = vpop.f32.mrf.mxu0  ;;  %v13654_v24 = vpop.f32.mrf.mxu1  ;;  %v6073_v30 = vadd.s32 2, %v17484_v45  ;;  %v17485_v17 = vld [vmem:[#allocation63_spill] sm:$0xff]  ;;  %v6459_v29 = vsel %vm6434_vm1, %v6401_v57, %v6403_v25 }
 0x376   :  { %17480 = vst [vmem:[#allocation137_spill] sm:$0xff] %v13652_v7  ;;  %v6405_v19 = vpop.permute.xlu0 %6404  ;;  %v6074_v18 = vadd.s32 2, %v17485_v17  ;;  %vm6152_vm0 = vcmp.le.s32.totalorder %v6072_v23, 7  ;;  %v6539_v28 = vsel %vm6151_vm15, %v6459_v29, 0.0 }
 0x377   :  { %17477 = vst [vmem:[#allocation133_spill] sm:$0xff] %v13647_v41  ;;  %v6460_v2 = vsel %vm6434_vm1, %v6403_v25, %v6405_v19  ;;  %vm6153_vm2 = vcmp.le.s32.totalorder %v6073_v30, 7 }
 0x378   :  { %17479 = vst [vmem:[#allocation94_spill] sm:$0xff] %v13650_v8  ;;  %10711 = vmatmul.msk.f32.gmra.mxu1 %vm1045_vm4, %v13372_v54  ;;  %10708 = vmatmul.msk.f32.gmra.mxu0 %vm1045_vm4, %v13372_v54  ;;  %v6407_v8 = vpop.permute.xlu1 %6406  ;;  %vm6154_vm5 = vcmp.le.s32.totalorder %v6074_v18, 7  ;;  %v6540_v56 = vsel %vm6152_vm0, %v6460_v2, 0.0 }
 0x379   :  { %17481 = vst [vmem:[#allocation54_spill] sm:$0xff] %v13654_v24  ;;  %10714 = vmatmul.msk.f32.gmra.mxu2 %vm1045_vm4, %v13372_v54  ;;  %10717 = vmatmul.msk.f32.gmra.mxu3 %vm1045_vm4, %v13372_v54  ;;  %v6461_v57 = vsel %vm6434_vm1, %v6405_v19, %v6407_v8  ;;  %v17491_v19 = vld [vmem:[#allocation16_spill] sm:$0xff] }
 0x37c   :  { %v5573_v41 = vpop.f32.mrf.mxu2  ;;  %v5596_v27 = vpop.f32.mrf.mxu3 }
 0x37d   :  { %v13671_v22 = vadd.f32 %v5573_v41, %v13116_v11  ;;  %v13674_v45 = vadd.f32 %v5596_v27, %v13118_v53  ;;  %v13676_v48 = vpop.f32.mrf.mxu0  ;;  %v13678_v44 = vpop.f32.mrf.mxu1  ;;  %v6541_v53 = vsel %vm6153_vm2, %v6461_v57, 0.0 }
 0x37e   :  { %17488 = vst [vmem:[#allocation62_spill] sm:$0xff] %v13676_v48  ;;  %v6409_v17 = vpop.permute.xlu0 %6408  ;;  %v6415_v57 = vpop.permute.xlu2 %6414 }
 0x37f   :  { %17486 = vst [vmem:[#allocation60_spill] sm:$0xff] %v13671_v22  ;;  %v6462_v23 = vsel %vm6434_vm1, %v6407_v8, %v6409_v17 }
 0x380   :  { %17487 = vst [vmem:[#allocation61_spill] sm:$0xff] %v13674_v45  ;;  %10719 = vmatmul.msk.f32.vlgmr.msra.gmra.mxu0 %vm1045_vm4, %v13320_v6  ;;  %10722 = vmatmul.msk.f32.vlgmr.msra.gmra.mxu1 %vm1045_vm4, %v13320_v6  ;;  %v6542_v11 = vsel %vm6154_vm5, %v6462_v23, 0.0  ;;  %v17497_v23 = vld [vmem:[#allocation66_spill] sm:$0xff]  ;;  %v17501_v45 = vld [vmem:[#allocation144_spill] sm:$0xff] }
 0x381   :  { %17489 = vst [vmem:[#allocation63_spill] sm:$0xff] %v13678_v44  ;;  %10725 = vmatmul.msk.f32.vlgmr.msra.gmra.mxu2 %vm1045_vm4, %v13320_v6  ;;  %10728 = vmatmul.msk.f32.vlgmr.msra.gmra.mxu3 %vm1045_vm4, %v13320_v6  ;;  %v17580_v44 = vld [vmem:[#allocation143_spill] sm:$0xff] }
 0x382   :  { %10742 = vmatpush.msk.msra.mxu0 %vm1050_vm3, %v6539_v28  ;;  %10745 = vmatpush.msk.msra.mxu1 %vm1050_vm3, %v6540_v56  ;;  %v17495_v28 = vld [vmem:[#allocation64_spill] sm:$0xff]  ;;  %v17496_v56 = vld [vmem:[#allocation65_spill] sm:$0xff] }
 0x383   :  { %10748 = vmatpush.msk.msra.mxu2 %vm1050_vm3, %v6541_v53  ;;  %10751 = vmatpush.msk.msra.mxu3 %vm1050_vm3, %v6542_v11  ;;  %v6075_v2 = vadd.s32 2, %v17495_v28  ;;  %v6077_v53 = vadd.s32 2, %v17497_v23 }
 0x384   :  { %v5662_v27 = vpop.f32.mrf.mxu2  ;;  %v5685_v41 = vpop.f32.mrf.mxu3 }
 0x385   :  { %v13695_v8 = vadd.f32 %v5662_v27, %v13149_v33  ;;  %v13698_v25 = vadd.f32 %v5685_v41, %v17491_v19  ;;  %v13700_v30 = vpop.f32.mrf.mxu0  ;;  %v13702_v18 = vpop.f32.mrf.mxu1  ;;  %v6076_v33 = vadd.s32 2, %v17496_v56  ;;  %v17498_v27 = vld [vmem:[#allocation67_spill] sm:$0xff]  ;;  %vm6155_vm6 = vcmp.le.s32.totalorder %v6075_v2, 7  ;;  %v17499_v56 = vld [vmem:[#allocation105_spill] sm:$0xff] }
 0x386   :  { %17493 = vst [vmem:[#allocation198_spill] sm:$0xff] %v13700_v30  ;;  %v6413_v29 = vpop.permute.xlu1 %6412  ;;  %v6411_v11 = vpop.permute.xlu0 %6410  ;;  %v6078_v41 = vadd.s32 2, %v17498_v27  ;;  %vm6157_vm8 = vcmp.le.s32.totalorder %v6077_v53, 7 }
 0x387   :  { %17490 = vst [vmem:[#allocation197_spill] sm:$0xff] %v13695_v8  ;;  %vm6156_vm7 = vcmp.le.s32.totalorder %v6076_v33, 7  ;;  %v6464_v8 = vsel %vm6434_vm1, %v6411_v11, %v6413_v29  ;;  %v6465_v2 = vsel %vm6434_vm1, %v6413_v29, %v6415_v57  ;;  %v6421_v29 = vpop.permute.xlu2 %6420 }
 0x388   :  { %17492 = vst [vmem:[#allocation16_spill] sm:$0xff] %v13698_v25  ;;  %10723 = vmatmul.msk.f32.gmra.mxu1 %vm1045_vm4, %v13372_v54  ;;  %10720 = vmatmul.msk.f32.gmra.mxu0 %vm1045_vm4, %v13372_v54  ;;  %v6463_v25 = vsel %vm6434_vm1, %v6409_v17, %v6411_v11  ;;  %vm6158_vm9 = vcmp.le.s32.totalorder %v6078_v41, 7  ;;  %v6544_v62 = vsel %vm6156_vm7, %v6464_v8, 0.0  ;;  %v17507_v41 = vld [vmem:[#allocation21_spill] sm:$0xff] }
 0x389   :  { %17494 = vst [vmem:[#allocation199_spill] sm:$0xff] %v13702_v18  ;;  %10726 = vmatmul.msk.f32.gmra.mxu2 %vm1045_vm4, %v13372_v54  ;;  %10729 = vmatmul.msk.f32.gmra.mxu3 %vm1045_vm4, %v13372_v54  ;;  %v6543_v33 = vsel %vm6155_vm6, %v6463_v25, 0.0 }
 0x38c   :  { %v5665_v19 = vpop.f32.mrf.mxu2  ;;  %v5688_v28 = vpop.f32.mrf.mxu3 }
 0x38d   :  { %v13719_v23 = vadd.f32 %v5665_v19, %v17499_v56  ;;  %v13722_v22 = vadd.f32 %v5688_v28, %v17501_v45  ;;  %v13724_v31 = vpop.f32.mrf.mxu0  ;;  %v13726_v14 = vpop.f32.mrf.mxu1  ;;  %v6545_v45 = vsel %vm6157_vm8, %v6465_v2, 0.0  ;;  %v17511_v2 = vld [vmem:[#allocation68_spill] sm:$0xff] }
 0x38e   :  { %17503 = vst [vmem:[#allocation66_spill] sm:$0xff] %v13724_v31  ;;  %v6417_v27 = vpop.permute.xlu1 %6416 }
 0x38f   :  { %17500 = vst [vmem:[#allocation64_spill] sm:$0xff] %v13719_v23  ;;  %v6466_v17 = vsel %vm6434_vm1, %v6415_v57, %v6417_v27  ;;  %v17505_v57 = vld [vmem:[#allocation147_spill] sm:$0xff]  ;;  %v17517_v23 = vld [vmem:[#allocation9_spill] sm:$0xff] }
 0x390   :  { %17502 = vst [vmem:[#allocation65_spill] sm:$0xff] %v13722_v22  ;;  %10734 = vmatmul.msk.f32.vlgmr.msrb.gmra.mxu1 %vm1045_vm4, %v13320_v6  ;;  %10731 = vmatmul.msk.f32.vlgmr.msrb.gmra.mxu0 %vm1045_vm4, %v13320_v6  ;;  %v6546_v53 = vsel %vm6158_vm9, %v6466_v17, 0.0  ;;  %v17512_v17 = vld [vmem:[#allocation69_spill] sm:$0xff] }
 0x391   :  { %17504 = vst [vmem:[#allocation67_spill] sm:$0xff] %v13726_v14  ;;  %10737 = vmatmul.msk.f32.vlgmr.msrb.gmra.mxu2 %vm1045_vm4, %v13320_v6  ;;  %10740 = vmatmul.msk.f32.vlgmr.msrb.gmra.mxu3 %vm1045_vm4, %v13320_v6 }
 0x392   :  { %10754 = vmatpush.msk.msrb.mxu0 %vm1050_vm3, %v6543_v33  ;;  %10757 = vmatpush.msk.msrb.mxu1 %vm1050_vm3, %v6544_v62  ;;  %v6079_v33 = vadd.s32 2, %v17511_v2  ;;  %v6080_v62 = vadd.s32 2, %v17512_v17  ;;  %v6425_v2 = vpop.permute.xlu2 %6424 }
 0x393   :  { %10760 = vmatpush.msk.msrb.mxu2 %vm1050_vm3, %v6545_v45  ;;  %10763 = vmatpush.msk.msrb.mxu3 %vm1050_vm3, %v6546_v53  ;;  %v17513_v45 = vld [vmem:[#allocation70_spill] sm:$0xff] }
 0x394   :  { %v5754_v8 = vpop.f32.mrf.mxu2  ;;  %v5777_v25 = vpop.f32.mrf.mxu3  ;;  %v6081_v53 = vadd.s32 2, %v17513_v45  ;;  %vm6159_vm10 = vcmp.le.s32.totalorder %v6079_v33, 7  ;;  %vm6160_vm11 = vcmp.le.s32.totalorder %v6080_v62, 7  ;;  %v17515_v45 = vld [vmem:[#allocation10_spill] sm:$0xff]  ;;  %v17525_v33 = vld [vmem:[#allocation72_spill] sm:$0xff] }
 0x395   :  { %v13743_v11 = vadd.f32 %v5754_v8, %v17505_v57  ;;  %v13746_v19 = vadd.f32 %v5777_v25, %v17507_v41  ;;  %v13748_v28 = vpop.f32.mrf.mxu0  ;;  %v13750_v56 = vpop.f32.mrf.mxu1  ;;  %v17514_v8 = vld [vmem:[#allocation71_spill] sm:$0xff]  ;;  %v6083_v62 = vadd.s32 2, %v17525_v33 }
 0x396   :  { %17509 = vst [vmem:[#allocation147_spill] sm:$0xff] %v13748_v28  ;;  %v6082_v57 = vadd.s32 2, %v17514_v8  ;;  %v6423_v25 = vpop.permute.xlu0 %6422  ;;  %v6419_v41 = vpop.permute.xlu1 %6418  ;;  %vm6161_vm12 = vcmp.le.s32.totalorder %v6081_v53, 7  ;;  %v17526_v53 = vld [vmem:[#allocation73_spill] sm:$0xff] }
 0x397   :  { %17506 = vst [vmem:[#allocation105_spill] sm:$0xff] %v13743_v11  ;;  %v6467_v11 = vsel %vm6434_vm1, %v6417_v27, %v6419_v41  ;;  %v6468_v22 = vsel %vm6434_vm1, %v6419_v41, %v6421_v29  ;;  %v6469_v43 = vsel %vm6434_vm1, %v6421_v29, %v6423_v25  ;;  %v6470_v3 = vsel %vm6434_vm1, %v6423_v25, %v6425_v2  ;;  %v17527_v25 = vld [vmem:[#allocation74_spill] sm:$0xff]  ;;  %v17563_v28 = vld [vmem:[#allocation93_spill] sm:$0xff] }
 0x398   :  { %17508 = vst [vmem:[#allocation144_spill] sm:$0xff] %v13746_v19  ;;  %10735 = vmatmul.msk.f32.gmra.mxu1 %vm1045_vm4, %v13372_v54  ;;  %10732 = vmatmul.msk.f32.gmra.mxu0 %vm1045_vm4, %v13372_v54  ;;  %vm6162_vm13 = vcmp.le.s32.totalorder %v6082_v57, 7  ;;  %v6547_v27 = vsel %vm6159_vm10, %v6467_v11, 0.0  ;;  %v6548_v41 = vsel %vm6160_vm11, %v6468_v22, 0.0  ;;  %v6084_v57 = vadd.s32 2, %v17526_v53 }
 0x399   :  { %17510 = vst [vmem:[#allocation21_spill] sm:$0xff] %v13750_v56  ;;  %10738 = vmatmul.msk.f32.gmra.mxu2 %vm1045_vm4, %v13372_v54  ;;  %10741 = vmatmul.msk.f32.gmra.mxu3 %vm1045_vm4, %v13372_v54  ;;  %vm6163_vm14 = vcmp.le.s32.totalorder %v6083_v62, 7  ;;  %v17561_v56 = vld [vmem:[#allocation92_spill] sm:$0xff] }
 0x39a   :  { %vm6164_vm15 = vcmp.le.s32.totalorder %v6084_v57, 7 }
 0x39c   :  { %v5757_v17 = vpop.f32.mrf.mxu2  ;;  %v5780_v19 = vpop.f32.mrf.mxu3 }
 0x39d   :  { %v13767_v8 = vadd.f32 %v5757_v17, %v17515_v45  ;;  %v13770_v47 = vadd.f32 %v5780_v19, %v17517_v23  ;;  %v13772_v55 = vpop.f32.mrf.mxu0  ;;  %v13774_v46 = vpop.f32.mrf.mxu1  ;;  %v6549_v23 = vsel %vm6161_vm12, %v6469_v43, 0.0  ;;  %v6550_v19 = vsel %vm6162_vm13, %v6470_v3, 0.0 }
 0x39e   :  { %17519 = vst [vmem:[#allocation70_spill] sm:$0xff] %v13772_v55  ;;  %v6429_v29 = vpop.permute.xlu0 %6428  ;;  %v6085_v17 = vadd.s32 2, %v17527_v25  ;;  %v6431_v45 = vpop.permute.xlu1 %6430  ;;  %v17559_v55 = vld [vmem:[#allocation89_spill] sm:$0xff] }
 0x39f   :  { %17516 = vst [vmem:[#allocation68_spill] sm:$0xff] %v13767_v8  ;;  %v6473_v25 = vsel %vm6434_vm1, %v6429_v29, %v6431_v45 }
 0x3a0   :  { %17518 = vst [vmem:[#allocation69_spill] sm:$0xff] %v13770_v47  ;;  %10743 = vmatmul.msk.f32.vlgmr.msra.gmra.mxu0 %vm1045_vm4, %v13320_v6  ;;  %10746 = vmatmul.msk.f32.vlgmr.msra.gmra.mxu1 %vm1045_vm4, %v13320_v6  ;;  %vm6165_vm0 = vcmp.le.s32.totalorder %v6085_v17, 7 }
 0x3a1   :  { %17520 = vst [vmem:[#allocation71_spill] sm:$0xff] %v13774_v46  ;;  %10749 = vmatmul.msk.f32.vlgmr.msra.gmra.mxu2 %vm1045_vm4, %v13320_v6  ;;  %10752 = vmatmul.msk.f32.vlgmr.msra.gmra.mxu3 %vm1045_vm4, %v13320_v6  ;;  %v17557_v46 = vld [vmem:[#allocation88_spill] sm:$0xff] }
 0x3a2   :  { %10766 = vmatpush.msk.msra.mxu0 %vm1050_vm3, %v6547_v27  ;;  %10769 = vmatpush.msk.msra.mxu1 %vm1050_vm3, %v6548_v41  ;;  %v6427_v27 = vpop.permute.xlu2 %6426  ;;  %v17528_v41 = vld [vmem:[#allocation75_spill] sm:$0xff] }
 0x3a3   :  { %10772 = vmatpush.msk.msra.mxu2 %vm1050_vm3, %v6549_v23  ;;  %10775 = vmatpush.msk.msra.mxu3 %vm1050_vm3, %v6550_v19  ;;  %v6086_v23 = vadd.s32 2, %v17528_v41  ;;  %v6471_v33 = vsel %vm6434_vm1, %v6425_v2, %v6427_v27  ;;  %v6472_v53 = vsel %vm6434_vm1, %v6427_v27, %v6429_v29  ;;  %v6553_v2 = vsel %vm6165_vm0, %v6473_v25, 0.0  ;;  %v17542_v25 = vld [vmem:[#allocation124_spill] sm:$0xff] }
 0x3a4   :  { %v13792_v22 = vpop.f32.mrf.mxu2  ;;  %v13794_v11 = vpop.f32.mrf.mxu3  ;;  %v6551_v52 = vsel %vm6163_vm14, %v6471_v33, 0.0  ;;  %v6552_v63 = vsel %vm6164_vm15, %v6472_v53, 0.0  ;;  %v17541_v53 = vld [vmem:[#allocation78_spill] sm:$0xff] }
 0x3a5   :  { %17521 = vst [vmem:[#allocation10_spill] sm:$0xff] %v13792_v22  ;;  %v13796_v3 = vpop.f32.mrf.mxu0  ;;  %v13798_v43 = vpop.f32.mrf.mxu1  ;;  %vm6166_vm2 = vcmp.le.s32.totalorder %v6086_v23, 7  ;;  %v17539_v23 = vld [vmem:[#allocation77_spill] sm:$0xff] }
 0x3a6   :  { %17522 = vst [vmem:[#allocation9_spill] sm:$0xff] %v13794_v11  ;;  %v6433_v19 = vpop.permute.xlu0 %6432  ;;  %v17555_v22 = vld [vmem:[#allocation85_spill] sm:$0xff] }
 0x3a7   :  { %17523 = vst [vmem:[#allocation200_spill] sm:$0xff] %v13796_v3  ;;  %v6474_v41 = vsel %vm6434_vm1, %v6431_v45, %v6433_v19  ;;  %v17540_v19 = vld [vmem:[#allocation123_spill] sm:$0xff] }
 0x3a8   :  { %17524 = vst [vmem:[#allocation201_spill] sm:$0xff] %v13798_v43  ;;  %10744 = vmatmul.msk.f32.gmra.mxu0 %vm1045_vm4, %v13372_v54  ;;  %10747 = vmatmul.msk.f32.gmra.mxu1 %vm1045_vm4, %v13372_v54  ;;  %v6554_v62 = vsel %vm6166_vm2, %v6474_v41, 0.0  ;;  %v2256_v33 = vadd.f32 %v17540_v19, %v17539_v23  ;;  %v2236_v41 = vadd.f32 %v17542_v25, %v17541_v53  ;;  %v17550_v23 = vld [vmem:[#allocation5_spill] sm:$0xff]  ;;  %v17553_v43 = vld [vmem:[#allocation84_spill] sm:$0xff]  ;;  %v17554_v3 = vld [vmem:[#allocation127_spill] sm:$0xff] }
 0x3a9   :  { %10750 = vmatmul.msk.f32.gmra.mxu2 %vm1045_vm4, %v13372_v54  ;;  %10753 = vmatmul.msk.f32.gmra.mxu3 %vm1045_vm4, %v13372_v54  ;;  %v2417_v11 = vadd.f32 %v17554_v3, %v17553_v43  ;;  %v17556_v53 = vld [vmem:[#allocation128_spill] sm:$0xff]  ;;  %v17568_v3 = vld [vmem:[#allocation138_spill] sm:$0xff] }
 0x3aa   :  { %v2440_v25 = vadd.f32 %v17556_v53, %v17555_v22  ;;  %v17569_v22 = vld [vmem:[#allocation97_spill] sm:$0xff]  ;;  %v17570_v53 = vld [vmem:[#allocation139_spill] sm:$0xff] }
 0x3ab   :  { %v2535_v31 = vadd.f32 %v17570_v53, %v17569_v22  ;;  %v17583_v22 = vld [vmem:[#allocation107_spill] sm:$0xff]  ;;  %v17584_v53 = vld [vmem:[#allocation146_spill] sm:$0xff] }
 0x3ac   :  { %v13812_v47 = vpop.f32.mrf.mxu2  ;;  %v13814_v8 = vpop.f32.mrf.mxu3  ;;  %v2716_v7 = vadd.f32 %v17584_v53, %v17583_v22  ;;  %v17598_v22 = vld [vmem:[#allocation159_spill] sm:$0xff] }
 0x3ad   :  { %17529 = vst [vmem:[#allocation72_spill] sm:$0xff] %v13812_v47  ;;  %v13818_v51 = vpop.f32.mrf.mxu0  ;;  %v13820_v34 = vpop.f32.mrf.mxu1  ;;  %v2877_v53 = vadd.f32 %v17598_v22, %v17597_v35  ;;  %v17605_v35 = vld [vmem:[#allocation116_spill] sm:$0xff]  ;;  %v17608_v22 = vld [vmem:[#allocation167_spill] sm:$0xff] }
 0x3ae   :  { %17530 = vst [vmem:[#allocation73_spill] sm:$0xff] %v13814_v8  ;;  %v17551_v8 = vld [vmem:[#allocation83_spill] sm:$0xff] }
 0x3af   :  { %17531 = vst [vmem:[#allocation74_spill] sm:$0xff] %v13818_v51  ;;  %v17549_v51 = vld [vmem:[#allocation82_spill] sm:$0xff]  ;;  %v2351_v47 = vadd.f32 %v17552_v32, %v17551_v8  ;;  %v17567_v8 = vld [vmem:[#allocation96_spill] sm:$0xff] }
 0x3b0   :  { %17532 = vst [vmem:[#allocation75_spill] sm:$0xff] %v13820_v34  ;;  %10755 = vmatmul.msk.f32.vlgmr.msrb.gmra.mxu0 %vm1045_vm4, %v13320_v6  ;;  %10758 = vmatmul.msk.f32.vlgmr.msrb.gmra.mxu1 %vm1045_vm4, %v13320_v6  ;;  %v17547_v34 = vld [vmem:[#allocation81_spill] sm:$0xff]  ;;  %v2328_v19 = vadd.f32 %v17550_v23, %v17549_v51  ;;  %v17564_v51 = vld [vmem:[#allocation135_spill] sm:$0xff]  ;;  %v2512_v43 = vadd.f32 %v17568_v3, %v17567_v8  ;;  %v17581_v8 = vld [vmem:[#allocation106_spill] sm:$0xff] }
 0x3b1   :  { %10761 = vmatmul.msk.f32.vlgmr.msrb.gmra.mxu2 %vm1045_vm4, %v13320_v6  ;;  %10764 = vmatmul.msk.f32.vlgmr.msrb.gmra.mxu3 %vm1045_vm4, %v13320_v6  ;;  %v2532_v23 = vadd.f32 %v17564_v51, %v17563_v28  ;;  %v17577_v28 = vld [vmem:[#allocation102_spill] sm:$0xff]  ;;  %v17582_v3 = vld [vmem:[#allocation145_spill] sm:$0xff] }
 0x3b2   :  { %10778 = vmatpush.msk.msrb.mxu0 %vm1050_vm3, %v6551_v52  ;;  %10781 = vmatpush.msk.msrb.mxu1 %vm1050_vm3, %v6552_v63  ;;  %v17537_v52 = vld [vmem:[#allocation76_spill] sm:$0xff]  ;;  %v17538_v63 = vld [vmem:[#allocation122_spill] sm:$0xff]  ;;  %v2693_v24 = vadd.f32 %v17582_v3, %v17581_v8  ;;  %v13957_v49 = vadd.f32 %v17628_v42, %v2328_v19  ;;  %v17636_v42 = vld [vmem:[#allocation87_spill] sm:$0xff] }
 0x3b3   :  { %10784 = vmatpush.msk.msrb.mxu2 %vm1050_vm3, %v6553_v2  ;;  %10787 = vmatpush.msk.msrb.mxu3 %vm1050_vm3, %v6554_v62  ;;  %v2233_v27 = vadd.f32 %v17538_v63, %v17537_v52  ;;  %v17543_v2 = vld [vmem:[#allocation79_spill] sm:$0xff]  ;;  %v17544_v62 = vld [vmem:[#allocation125_spill] sm:$0xff]  ;;  %v17548_v52 = vld [vmem:[#allocation126_spill] sm:$0xff] }
 0x3b4   :  { %v13836_v29 = vpop.f32.mrf.mxu2  ;;  %v13838_v57 = vpop.f32.mrf.mxu3  ;;  %v2348_v63 = vadd.f32 %v17548_v52, %v17547_v34  ;;  %v17562_v34 = vld [vmem:[#allocation134_spill] sm:$0xff] }
 0x3b5   :  { %17533 = vst [vmem:[#allocation202_spill] sm:$0xff] %v13836_v29  ;;  %v13840_v17 = vpop.f32.mrf.mxu0  ;;  %v13842_v45 = vpop.f32.mrf.mxu1  ;;  %v2509_v52 = vadd.f32 %v17562_v34, %v17561_v56  ;;  %v17578_v51 = vld [vmem:[#allocation142_spill] sm:$0xff] }
 0x3b6   :  { %17534 = vst [vmem:[#allocation203_spill] sm:$0xff] %v13838_v57  ;;  %v17546_v57 = vld [vmem:[#allocation2_spill] sm:$0xff]  ;;  %v4336_v0 = vadd.f32 %v17627_v5, %v2348_v63  ;;  %v17635_v63 = vld [vmem:[#allocation129_spill] sm:$0xff] }
 0x3b7   :  { %17535 = vst [vmem:[#allocation204_spill] sm:$0xff] %v13840_v17  ;;  %v17545_v17 = vld [vmem:[#allocation80_spill] sm:$0xff]  ;;  %v17596_v8 = vld [vmem:[#allocation158_spill] sm:$0xff]  ;;  %v4343_v19 = vadd.f32 %v17636_v42, %v2509_v52  ;;  %v17650_v42 = vld [vmem:[#allocation7_spill] sm:$0xff] }
 0x3b8   :  { %17536 = vst [vmem:[#allocation205_spill] sm:$0xff] %v13842_v45  ;;  %10756 = vmatmul.msk.f32.gmra.mxu0 %vm1045_vm4, %v13372_v54  ;;  %10759 = vmatmul.msk.f32.gmra.mxu1 %vm1045_vm4, %v13372_v54  ;;  %v2259_v45 = vadd.f32 %v17544_v62, %v17543_v2  ;;  %v2325_v29 = vadd.f32 %v17546_v57, %v17545_v17  ;;  %v17558_v2 = vld [vmem:[#allocation131_spill] sm:$0xff]  ;;  %v17560_v57 = vld [vmem:[#allocation132_spill] sm:$0xff]  ;;  %v17637_v5 = vld [vmem:[#allocation130_spill] sm:$0xff] }
 0x3b9   :  { %10762 = vmatmul.msk.f32.gmra.mxu2 %vm1045_vm4, %v13372_v54  ;;  %10765 = vmatmul.msk.f32.gmra.mxu3 %vm1045_vm4, %v13372_v54  ;;  %v2420_v62 = vadd.f32 %v17558_v2, %v17557_v46  ;;  %v2443_v17 = vadd.f32 %v17560_v57, %v17559_v55  ;;  %v17571_v46 = vld [vmem:[#allocation100_spill] sm:$0xff]  ;;  %v17573_v55 = vld [vmem:[#allocation101_spill] sm:$0xff]  ;;  %v2811_v3 = vadd.f32 %v17596_v8, %v17595_v26  ;;  %v17606_v26 = vld [vmem:[#allocation166_spill] sm:$0xff] }
 0x3ba   :  { %v17572_v2 = vld [vmem:[#allocation140_spill] sm:$0xff]  ;;  %v17574_v57 = vld [vmem:[#allocation141_spill] sm:$0xff] }
 0x3bb   :  { %v2601_v18 = vadd.f32 %v17572_v2, %v17571_v46  ;;  %v2624_v30 = vadd.f32 %v17574_v57, %v17573_v55  ;;  %v17585_v46 = vld [vmem:[#allocation22_spill] sm:$0xff]  ;;  %v17586_v2 = vld [vmem:[#allocation149_spill] sm:$0xff]  ;;  %v17587_v55 = vld [vmem:[#allocation19_spill] sm:$0xff] }
 0x3bc   :  { %v13880_v14 = vpop.f32.mrf.mxu2  ;;  %v13882_v32 = vpop.f32.mrf.mxu3  ;;  %v2696_v38 = vadd.f32 %v17586_v2, %v17585_v46  ;;  %v17588_v57 = vld [vmem:[#allocation150_spill] sm:$0xff]  ;;  %v17599_v46 = vld [vmem:[#allocation113_spill] sm:$0xff] }
 0x3bd   :  { %17565 = vst [vmem:[#allocation76_spill] sm:$0xff] %v13880_v14  ;;  %v13892_v56 = vpop.f32.mrf.mxu0  ;;  %v13894_v34 = vpop.f32.mrf.mxu1  ;;  %v2604_v14 = vadd.f32 %v17578_v51, %v17577_v28  ;;  %v2719_v40 = vadd.f32 %v17588_v57, %v17587_v55  ;;  %v17592_v28 = vld [vmem:[#allocation154_spill] sm:$0xff]  ;;  %v17601_v2 = vld [vmem:[#allocation33_spill] sm:$0xff]  ;;  %v17603_v57 = vld [vmem:[#allocation31_spill] sm:$0xff] }
 0x3be   :  { %17566 = vst [vmem:[#allocation122_spill] sm:$0xff] %v13882_v32  ;;  %v17579_v32 = vld [vmem:[#allocation103_spill] sm:$0xff]  ;;  %v17607_v8 = vld [vmem:[#allocation117_spill] sm:$0xff] }
 0x3bf   :  { %17575 = vst [vmem:[#allocation77_spill] sm:$0xff] %v13892_v56  ;;  %v2627_v48 = vadd.f32 %v17580_v44, %v17579_v32  ;;  %v17591_v56 = vld [vmem:[#allocation110_spill] sm:$0xff]  ;;  %v17594_v44 = vld [vmem:[#allocation157_spill] sm:$0xff]  ;;  %v2992_v1 = vadd.f32 %v17608_v22, %v17607_v8  ;;  %v4331_v8 = vadd.f32 %v17621_v60, %v2233_v27  ;;  %v17622_v22 = vld [vmem:[#allocation183_spill] sm:$0xff] }
 0x3c0   :  { %17576 = vst [vmem:[#allocation123_spill] sm:$0xff] %v13894_v34  ;;  %v17590_v34 = vld [vmem:[#allocation153_spill] sm:$0xff]  ;;  %v2808_v51 = vadd.f32 %v17592_v28, %v17591_v56  ;;  %v2788_v32 = vadd.f32 %v17594_v44, %v17593_v59  ;;  %10767 = vmatmul.msk.f32.vlgmr.msra.gmra.mxu0 %vm1045_vm4, %v13320_v6  ;;  %10770 = vmatmul.msk.f32.vlgmr.msra.gmra.mxu1 %vm1045_vm4, %v13320_v6  ;;  %v17602_v56 = vld [vmem:[#allocation163_spill] sm:$0xff]  ;;  %v17604_v59 = vld [vmem:[#allocation164_spill] sm:$0xff] }
 0x3c1   :  { %v2785_v16 = vadd.f32 %v17590_v34, %v17589_v12  ;;  %v17600_v12 = vld [vmem:[#allocation160_spill] sm:$0xff]  ;;  %v2880_v55 = vadd.f32 %v17602_v56, %v17601_v2  ;;  %v2903_v28 = vadd.f32 %v17604_v59, %v17603_v57  ;;  %10773 = vmatmul.msk.f32.vlgmr.msra.gmra.mxu2 %vm1045_vm4, %v13320_v6  ;;  %10776 = vmatmul.msk.f32.vlgmr.msra.gmra.mxu3 %vm1045_vm4, %v13320_v6  ;;  %v17612_v2 = vld [vmem:[#allocation171_spill] sm:$0xff]  ;;  %v17614_v57 = vld [vmem:[#allocation174_spill] sm:$0xff] }
 0x3c2   :  { %v2900_v34 = vadd.f32 %v17600_v12, %v17599_v46  ;;  %v2969_v44 = vadd.f32 %v17606_v26, %v17605_v35  ;;  %v17610_v46 = vld [vmem:[#allocation170_spill] sm:$0xff]  ;;  %v2995_v56 = vadd.f32 %v17612_v2, %v17611_v37  ;;  %v3061_v59 = vadd.f32 %v17614_v57, %v17613_v15  ;;  %v17620_v35 = vld [vmem:[#allocation179_spill] sm:$0xff]  ;;  %v17631_v27 = vld [vmem:[#allocation189_spill] sm:$0xff] }
 0x3c3   :  { %v2972_v12 = vadd.f32 %v17610_v46, %v17609_v39  ;;  %v3087_v26 = vadd.f32 %v17620_v35, %v17619_v13  ;;  %v4332_v6 = vadd.f32 %v17622_v22, %v2256_v33  ;;  %v17623_v39 = vld [vmem:[#allocation184_spill] sm:$0xff]  ;;  %v4372_v37 = vadd.f32 %v17624_v20, %v2259_v45  ;;  %v17626_v57 = vld [vmem:[#allocation186_spill] sm:$0xff] }
 0x3c4   :  { %v4371_v46 = vadd.f32 %v17623_v39, %v2236_v41  ;;  %v13952_v2 = vpop.f32.mrf.mxu2  ;;  %v6769_v15 = vpop.f32.mrf.mxu3  ;;  %v4335_v50 = vadd.f32 %v17626_v57, %v2325_v29  ;;  %v4376_v33 = vadd.f32 %v17631_v27, %v2351_v47  ;;  %v17632_v41 = vld [vmem:[#allocation3_spill] sm:$0xff]  ;;  %v17633_v45 = vld [vmem:[#allocation190_spill] sm:$0xff]  ;;  %v4380_v57 = vadd.f32 %v17635_v63, %v2443_v17  ;;  %v17640_v27 = vld [vmem:[#allocation4_spill] sm:$0xff] }
 0x3c5   :  { %17625 = vst [vmem:[#allocation78_spill] sm:$0xff] %v13952_v2  ;;  %v7606_v13 = vadd.f32 %v6769_v15, %v13396_v58  ;;  %v13960_v36 = vpop.f32.mrf.mxu0  ;;  %v13962_v60 = vpop.f32.mrf.mxu1  ;;  %v4339_v20 = vadd.f32 %v17632_v41, %v2417_v11  ;;  %v4340_v35 = vadd.f32 %v17633_v45, %v2440_v25  ;;  %v17634_v22 = vld [vmem:[#allocation86_spill] sm:$0xff]  ;;  %v4344_v58 = vadd.f32 %v17637_v5, %v2532_v23  ;;  %v17639_v2 = vld [vmem:[#allocation49_spill] sm:$0xff]  ;;  %v17643_v23 = vld [vmem:[#allocation91_spill] sm:$0xff] }
 0x3c6   :  { %17629 = vst [vmem:[#allocation124_spill] sm:$0xff] %v13960_v36  ;;  %v4379_v39 = vadd.f32 %v17634_v22, %v2420_v62  ;;  %v13968_v29 = vpop.permute.xlu1 %7684  ;;  %v17638_v36 = vld [vmem:[#allocation48_spill] sm:$0xff]  ;;  %v4384_v47 = vadd.f32 %v17639_v2, %v2535_v31  ;;  %v13977_v11 = vadd.f32 %v17640_v27, %v2601_v18  ;;  %v17641_v25 = vld [vmem:[#allocation50_spill] sm:$0xff] }
 0x3c7   :  { %17630 = vst [vmem:[#allocation79_spill] sm:$0xff] %v13962_v60  ;;  %v7694_v15 = vadd.f32 %v13968_v29, %v7606_v13  ;;  %v4383_v60 = vadd.f32 %v17638_v36, %v2512_v43  ;;  %v4348_v62 = vadd.f32 %v17641_v25, %v2624_v30  ;;  %v17642_v17 = vld [vmem:[#allocation90_spill] sm:$0xff]  ;;  %v4388_v13 = vadd.f32 %v17643_v23, %v2627_v48  ;;  %v17645_v31 = vld [vmem:[#allocation136_spill] sm:$0xff]  ;;  %v17646_v43 = vld [vmem:[#allocation95_spill] sm:$0xff] }
 0x3c8   :  { %10771 = vmatmul.msk.f32.gmra.mxu1 %vm1045_vm4, %v13372_v54  ;;  %10768 = vmatmul.msk.f32.gmra.mxu0 %vm1045_vm4, %v13372_v54  ;;  %v13985_v52 = vadd.f32 %v17642_v17, %v2604_v14  ;;  %v4351_v18 = vadd.f32 %v17645_v31, %v2693_v24  ;;  %v4352_v2 = vadd.f32 %v17646_v43, %v2716_v7  ;;  %v17647_v36 = vld [vmem:[#allocation55_spill] sm:$0xff]  ;;  %v17648_v30 = vld [vmem:[#allocation98_spill] sm:$0xff]  ;;  %v17652_v27 = vld [vmem:[#allocation104_spill] sm:$0xff] }
 0x3c9   :  { %v13988_v41 = vmax.f32 %v7694_v15, 0.0  ;;  %10774 = vmatmul.msk.f32.gmra.mxu2 %vm1045_vm4, %v13372_v54  ;;  %10777 = vmatmul.msk.f32.gmra.mxu3 %vm1045_vm4, %v13372_v54  ;;  %v4391_v45 = vadd.f32 %v17647_v36, %v2696_v38  ;;  %v4392_v22 = vadd.f32 %v17648_v30, %v2719_v40  ;;  %v17649_v14 = vld [vmem:[#allocation99_spill] sm:$0xff]  ;;  %v14000_v48 = vadd.f32 %v17650_v42, %v2808_v51  ;;  %v17651_v5 = vld [vmem:[#allocation14_spill] sm:$0xff]  ;;  %v17655_v38 = vld [vmem:[#allocation148_spill] sm:$0xff] }
 0x3ca   :  { %v4355_v63 = vadd.f32 %v17649_v14, %v2785_v16  ;;  %v14003_v15 = vadd.f32 %v17651_v5, %v2788_v32  ;;  %v14006_v25 = vadd.f32 %v17652_v27, %v2811_v3  ;;  %v17653_v17 = vld [vmem:[#allocation6_spill] sm:$0xff]  ;;  %v14015_v31 = vadd.f32 %v17655_v38, %v2880_v55  ;;  %v17656_v40 = vld [vmem:[#allocation8_spill] sm:$0xff]  ;;  %v17657_v32 = vld [vmem:[#allocation151_spill] sm:$0xff] }
 0x3cb   :  { %17644 = vst [vmem:[#allocation125_spill] sm:$0xff] %v13988_v41  ;;  %v14009_v23 = vadd.f32 %v17653_v17, %v2877_v53  ;;  %v17654_v24 = vld [vmem:[#allocation18_spill] sm:$0xff]  ;;  %v14018_v16 = vadd.f32 %v17656_v40, %v2903_v28  ;;  %v14023_v36 = vadd.f32 %v17657_v32, %v2969_v44  ;;  %v17658_v3 = vld [vmem:[#allocation108_spill] sm:$0xff]  ;;  %v7894_v53 = vrot.slane %v13988_v41, 4  ;;  %v17659_v42 = vld [vmem:[#allocation155_spill] sm:$0xff] }
 0x3cc   :  { %v14012_v7 = vadd.f32 %v17654_v24, %v2900_v34  ;;  %v14020_v51 = vpop.f32.mrf.mxu2  ;;  %v6772_v43 = vpop.f32.mrf.mxu3  ;;  %v14026_v30 = vadd.f32 %v17658_v3, %v2992_v1  ;;  %v14035_v28 = vadd.f32 %v17659_v42, %v2972_v12  ;;  %v17660_v5 = vld [vmem:[#allocation24_spill] sm:$0xff]  ;;  %v14041_v44 = vadd.f32 %v13302_v21, %v3061_v59  ;;  %v17661_v17 = vld [vmem:[#allocation25_spill] sm:$0xff]  ;;  %v17663_v40 = vld [vmem:[#allocation162_spill] sm:$0xff] }
 0x3cd   :  { %v7646_v34 = vadd.f32 %v6772_v43, %v13423_v61  ;;  %v14030_v14 = vpop.f32.mrf.mxu0  ;;  %v14032_v55 = vpop.f32.mrf.mxu1  ;;  %v14038_v27 = vadd.f32 %v17660_v5, %v2995_v56  ;;  %v14044_v1 = vadd.f32 %v17661_v17, %v3084_v9  ;;  %v17662_v38 = vld [vmem:[#allocation32_spill] sm:$0xff]  ;;  %v14052_v43 = vadd.f32 %v17663_v40, %v3087_v26  ;;  %v17664_v56 = vld [vmem:[#allocation165_spill] sm:$0xff]  ;;  %v17665_v42 = vld [vmem:[#allocation34_spill] sm:$0xff] }
 0x3ce   :  { %v14046_v24 = vpop.permute.xlu2 %7688  ;;  %v14049_v61 = vadd.f32 %v17662_v38, %v3064_v4  ;;  %v5967_v12 = vadd.f32 %v13368_v10, %v4331_v8  ;;  %v5968_v3 = vadd.f32 %v17664_v56, %v4332_v6  ;;  %v14058_v21 = vadd.f32 %v17665_v42, %v4372_v37  ;;  %v17666_v59 = vld [vmem:[#allocation168_spill] sm:$0xff]  ;;  %v17667_v5 = vld [vmem:[#allocation111_spill] sm:$0xff]  ;;  %v17668_v4 = vld [vmem:[#allocation169_spill] sm:$0xff] }
 0x3cf   :  { %v7734_v32 = vadd.f32 %v14046_v24, %v7646_v34  ;;  %v14061_v9 = vadd.f32 %v17666_v59, %v4371_v46  ;;  %v14068_v26 = vadd.f32 %v17668_v4, %v4336_v0  ;;  %v17669_v10 = vld [vmem:[#allocation20_spill] sm:$0xff]  ;;  %v7974_v6 = vadd.f32 %v7894_v53, %v13988_v41  ;;  %v17671_v17 = vld [vmem:[#allocation118_spill] sm:$0xff]  ;;  %v17672_v0 = vld [vmem:[#allocation23_spill] sm:$0xff] }
 0x3d0   :  { %10779 = vmatmul.msk.f32.vlgmr.msrb.gmra.mxu0 %vm1045_vm4, %v17667_v5  ;;  %10782 = vmatmul.msk.f32.vlgmr.msrb.gmra.mxu1 %vm1045_vm4, %v17667_v5  ;;  %v5971_v8 = vadd.f32 %v17669_v10, %v4335_v50  ;;  %v17670_v46 = vld [vmem:[#allocation172_spill] sm:$0xff]  ;;  %v14081_v38 = vadd.f32 %v17671_v17, %v13957_v49  ;;  %v14084_v40 = vadd.f32 %v17672_v0, %v4340_v35  ;;  %v17673_v50 = vld [vmem:[#allocation29_spill] sm:$0xff]  ;;  %v17680_v17 = vld [vmem:[#allocation191_spill] sm:$0xff] }
 0x3d1   :  { %v7814_v34 = vmax.f32 %v7734_v32, 0.0  ;;  %10785 = vmatmul.msk.f32.vlgmr.msrb.gmra.mxu2 %vm1045_vm4, %v17667_v5  ;;  %10788 = vmatmul.msk.f32.vlgmr.msrb.gmra.mxu3 %vm1045_vm4, %v17667_v5  ;;  %v14077_v37 = vadd.f32 %v17670_v46, %v4376_v33  ;;  %v14087_v32 = vadd.f32 %v17673_v50, %v4339_v20  ;;  %v17674_v53 = vld [vmem:[#allocation177_spill] sm:$0xff]  ;;  %v17676_v5 = vld [vmem:[#allocation44_spill] sm:$0xff]  ;;  %v14107_v20 = vadd.f32 %v17680_v17, %v4383_v60  ;;  %v17687_v17 = vld [vmem:[#allocation58_spill] sm:$0xff] }
 0x3d2   :  { %v14090_v56 = vadd.f32 %v17674_v53, %v4380_v57  ;;  %v17675_v42 = vld [vmem:[#allocation45_spill] sm:$0xff]  ;;  %v14096_v4 = vadd.f32 %v17676_v5, %v4344_v58  ;;  %v17678_v10 = vld [vmem:[#allocation40_spill] sm:$0xff] }
 0x3d3   :  { %v14093_v59 = vadd.f32 %v17675_v42, %v4379_v39  ;;  %v14098_v33 = vadd.f32 %v7974_v6, %v7814_v34  ;;  %v14101_v49 = vadd.f32 %v17678_v10, %v4343_v19  ;;  %v17679_v46 = vld [vmem:[#allocation181_spill] sm:$0xff]  ;;  %v17681_v0 = vld [vmem:[#allocation192_spill] sm:$0xff]  ;;  %v17683_v34 = vld [vmem:[#allocation195_spill] sm:$0xff] }
 0x3d4   :  { %v14104_v35 = vadd.f32 %v17679_v46, %v4384_v47  ;;  %v14110_v57 = vadd.f32 %v17681_v0, %v4348_v62  ;;  %v6838_v50 = vpop.f32.mrf.mxu2  ;;  %v6861_v39 = vpop.f32.mrf.mxu3  ;;  %v17682_v53 = vld [vmem:[#allocation193_spill] sm:$0xff]  ;;  %v14117_v6 = vadd.f32 %v17683_v34, %v4388_v13  ;;  %v17686_v62 = vld [vmem:[#allocation196_spill] sm:$0xff]  ;;  %v14130_v0 = vadd.f32 %v17687_v17, %v4352_v2  ;;  %v17689_v13 = vld [vmem:[#allocation123_spill] sm:$0xff] }
 0x3d5   :  { %17677 = vst [vmem:[#allocation80_spill] sm:$0xff] %v14098_v33  ;;  %v14114_v58 = vadd.f32 %v17682_v53, %v13977_v11  ;;  %v17684_v19 = vld [vmem:[#allocation77_spill] sm:$0xff]  ;;  %v14121_v10 = vpop.f32.mrf.mxu0  ;;  %v14123_v60 = vpop.f32.mrf.mxu1  ;;  %v14127_v46 = vadd.f32 %v17686_v62, %v13985_v52  ;;  %v17688_v11 = vld [vmem:[#allocation59_spill] sm:$0xff]  ;;  %v7604_v34 = vadd.f32 %v17689_v13, %v5968_v3 }
 0x3d6   :  { %v7603_v42 = vadd.f32 %v17684_v19, %v5967_v12  ;;  %v17685_v5 = vld [vmem:[#allocation17_spill] sm:$0xff]  ;;  %v14133_v53 = vadd.f32 %v17688_v11, %v4351_v18  ;;  %v17693_v62 = vld [vmem:[#allocation63_spill] sm:$0xff]  ;;  %v17694_v18 = vld [vmem:[#allocation198_spill] sm:$0xff] }
 0x3d7   :  { %v7610_v47 = vadd.f32 %v6861_v39, %v17685_v5  ;;  %v17690_v41 = vld [vmem:[#allocation137_spill] sm:$0xff]  ;;  %v17691_v39 = vld [vmem:[#allocation54_spill] sm:$0xff]  ;;  %v14148_v2 = vadd.f32 %v17693_v62, %v14000_v48  ;;  %v14152_v17 = vadd.f32 %v17694_v18, %v14003_v15  ;;  %v17695_v3 = vld [vmem:[#allocation199_spill] sm:$0xff] }
 0x3d8   :  { %v14137_v12 = vadd.f32 %v17690_v41, %v4391_v45  ;;  %v14140_v19 = vadd.f32 %v17691_v39, %v4392_v22  ;;  %v17692_v5 = vld [vmem:[#allocation62_spill] sm:$0xff]  ;;  %v14156_v41 = vadd.f32 %v17695_v3, %v14006_v25  ;;  %10780 = vmatmul.msk.f32.gmra.mxu0 %vm1045_vm4, %v13372_v54  ;;  %10783 = vmatmul.msk.f32.gmra.mxu1 %vm1045_vm4, %v13372_v54  ;;  %v17709_v3 = vld [vmem:[#allocation9_spill] sm:$0xff] }
 0x3d9   :  { %v14143_v33 = vadd.f32 %v17692_v5, %v4355_v63  ;;  %v7698_v52 = vadd.f32 %v13968_v29, %v7610_v47  ;;  %v17696_v45 = vld [vmem:[#allocation66_spill] sm:$0xff]  ;;  %v17697_v63 = vld [vmem:[#allocation67_spill] sm:$0xff]  ;;  %10786 = vmatmul.msk.f32.gmra.mxu2 %vm1045_vm4, %v13372_v54  ;;  %10789 = vmatmul.msk.f32.gmra.mxu3 %vm1045_vm4, %v13372_v54  ;;  %v7691_v25 = vadd.f32 %v13968_v29, %v7603_v42  ;;  %v17705_v54 = vld [vmem:[#allocation152_spill] sm:$0xff] }
 0x3da   :  { %v14164_v22 = vadd.f32 %v17696_v45, %v14009_v23  ;;  %v14168_v48 = vadd.f32 %v17697_v63, %v14012_v7  ;;  %v17699_v47 = vld [vmem:[#allocation147_spill] sm:$0xff]  ;;  %v17700_v23 = vld [vmem:[#allocation21_spill] sm:$0xff]  ;;  %v17701_v7 = vld [vmem:[#allocation70_spill] sm:$0xff]  ;;  %v7692_v5 = vadd.f32 %v13968_v29, %v7604_v34 }
 0x3db   :  { %v14170_v15 = vmax.f32 %v7698_v52, 0.0  ;;  %v14179_v11 = vadd.f32 %v17699_v47, %v14015_v31  ;;  %v14183_v13 = vadd.f32 %v17700_v23, %v14018_v16  ;;  %v14187_v39 = vadd.f32 %v17701_v7, %v14023_v36  ;;  %v17703_v52 = vld [vmem:[#allocation71_spill] sm:$0xff]  ;;  %v17706_v42 = vld [vmem:[#allocation10_spill] sm:$0xff]  ;;  %v17708_v31 = vld [vmem:[#allocation13_spill] sm:$0xff] }
 0x3dc   :  { %v14192_v62 = vadd.f32 %v17703_v52, %v14026_v30  ;;  %v14196_v18 = vadd.f32 %v17706_v42, %v17705_v54  ;;  %v14200_v45 = vadd.f32 %v17709_v3, %v17708_v31  ;;  %v17711_v16 = vld [vmem:[#allocation200_spill] sm:$0xff]  ;;  %v17713_v36 = vld [vmem:[#allocation201_spill] sm:$0xff]  ;;  %v17719_v52 = vld [vmem:[#allocation78_spill] sm:$0xff]  ;;  %v7607_v42 = vadd.f32 %v14030_v14, %v5971_v8  ;;  %v6864_v31 = vpop.f32.mrf.mxu3 }
 0x3dd   :  { %17698 = vst [vmem:[#allocation2_spill] sm:$0xff] %v14170_v15  ;;  %v14204_v63 = vadd.f32 %v17711_v16, %v14035_v28  ;;  %v14208_v47 = vadd.f32 %v17713_v36, %v14038_v27  ;;  %v17715_v34 = vld [vmem:[#allocation156_spill] sm:$0xff]  ;;  %v17720_v3 = vld [vmem:[#allocation11_spill] sm:$0xff]  ;;  %v7898_v28 = vrot.slane %v14170_v15, 4  ;;  %v17723_v16 = vld [vmem:[#allocation26_spill] sm:$0xff]  ;;  %v6884_v36 = vpop.f32.mrf.mxu0 }
 0x3de   :  { %17702 = vst [vmem:[#allocation81_spill] sm:$0xff] %v14187_v39  ;;  %v17716_v23 = vld [vmem:[#allocation72_spill] sm:$0xff]  ;;  %v7650_v27 = vadd.f32 %v6864_v31, %v17723_v16  ;;  %v17730_v31 = vld [vmem:[#allocation30_spill] sm:$0xff]  ;;  %v17733_v39 = vld [vmem:[#allocation203_spill] sm:$0xff] }
 0x3df   :  { %17704 = vst [vmem:[#allocation126_spill] sm:$0xff] %v14192_v62  ;;  %v14212_v30 = vadd.f32 %v17716_v23, %v17715_v34  ;;  %v17718_v7 = vld [vmem:[#allocation12_spill] sm:$0xff]  ;;  %v17725_v34 = vld [vmem:[#allocation74_spill] sm:$0xff] }
 0x3e0   :  { %17707 = vst [vmem:[#allocation82_spill] sm:$0xff] %v14196_v18  ;;  %v7605_v54 = vadd.f32 %v17719_v52, %v17718_v7  ;;  %v6841_v18 = vpop.f32.mrf.mxu2  ;;  %v14227_v23 = vadd.f32 %v17725_v34, %v14041_v44  ;;  %v17726_v14 = vld [vmem:[#allocation124_spill] sm:$0xff]  ;;  %v17727_v7 = vld [vmem:[#allocation79_spill] sm:$0xff]  ;;  %v17731_v16 = vld [vmem:[#allocation202_spill] sm:$0xff]  ;;  %v7738_v34 = vadd.f32 %v14046_v24, %v7650_v27 }
 0x3e1   :  { %17710 = vst [vmem:[#allocation5_spill] sm:$0xff] %v14200_v45  ;;  %v17721_v45 = vld [vmem:[#allocation73_spill] sm:$0xff]  ;;  %v7643_v8 = vadd.f32 %v17726_v14, %v14061_v9  ;;  %v7644_v52 = vadd.f32 %v17727_v7, %v14058_v21  ;;  %v17734_v9 = vld [vmem:[#allocation204_spill] sm:$0xff]  ;;  %v17736_v7 = vld [vmem:[#allocation15_spill] sm:$0xff] }
 0x3e2   :  { %17712 = vst [vmem:[#allocation83_spill] sm:$0xff] %v14204_v63  ;;  %v14219_v62 = vadd.f32 %v17721_v45, %v17720_v3  ;;  %v14223_v63 = vmax.f32 %v7691_v25, 0.0  ;;  %v14233_v45 = vmax.f32 %v7692_v5, 0.0  ;;  %v17729_v3 = vld [vmem:[#allocation75_spill] sm:$0xff]  ;;  %v14241_v25 = vadd.f32 %v17731_v16, %v17730_v31 }
 0x3e3   :  { %17714 = vst [vmem:[#allocation47_spill] sm:$0xff] %v14208_v47  ;;  %v6907_v47 = vpop.f32.mrf.mxu1  ;;  %v14250_v14 = vadd.f32 %v17734_v9, %v14049_v61  ;;  %v7693_v21 = vadd.f32 %v13968_v29, %v7605_v54  ;;  %v7695_v5 = vadd.f32 %v13968_v29, %v7607_v42  ;;  %v7818_v31 = vmax.f32 %v7738_v34, 0.0  ;;  %v17739_v9 = vld [vmem:[#allocation114_spill] sm:$0xff] }
 0x3e4   :  { %17717 = vst [vmem:[#allocation84_spill] sm:$0xff] %v14212_v30  ;;  %v17732_v30 = vld [vmem:[#allocation161_spill] sm:$0xff]  ;;  %v7978_v16 = vadd.f32 %v7898_v28, %v14170_v15  ;;  %v7731_v61 = vadd.f32 %v14046_v24, %v7643_v8  ;;  %v7732_v54 = vadd.f32 %v14046_v24, %v7644_v52  ;;  %v7892_v42 = vrot.slane %v14233_v45, 4  ;;  %v6953_v15 = vpop.f32.mrf.mxu3 }
 0x3e5   :  { %17722 = vst [vmem:[#allocation127_spill] sm:$0xff] %v14219_v62  ;;  %v14237_v62 = vadd.f32 %v17729_v3, %v14044_v1  ;;  %v14245_v44 = vadd.f32 %v17733_v39, %v17732_v30  ;;  %v7608_v1 = vadd.f32 %v14032_v55, %v14068_v26  ;;  %v7609_v3 = vadd.f32 %v6838_v50, %v17736_v7  ;;  %v17737_v30 = vld [vmem:[#allocation205_spill] sm:$0xff] }
 0x3e6   :  { %17724 = vst [vmem:[#allocation85_spill] sm:$0xff] %v14223_v63  ;;  %v7891_v39 = vrot.slane %v14223_v63, 4  ;;  %v14261_v27 = vadd.f32 %v17737_v30, %v14052_v43  ;;  %v14270_v26 = vadd.f32 %v7978_v16, %v7818_v31  ;;  %v7611_v50 = vadd.f32 %v6884_v36, %v14087_v32  ;;  %v17742_v43 = vld [vmem:[#allocation37_spill] sm:$0xff]  ;;  %v6887_v32 = vpop.f32.mrf.mxu0 }
 0x3e7   :  { %17728 = vst [vmem:[#allocation128_spill] sm:$0xff] %v14233_v45  ;;  %v7612_v28 = vadd.f32 %v6907_v47, %v14084_v40  ;;  %v14274_v34 = vmax.f32 %v7693_v21, 0.0  ;;  %v7645_v7 = vadd.f32 %v14020_v51, %v17742_v43  ;;  %v14278_v8 = vmax.f32 %v7695_v5, 0.0  ;;  %v17747_v16 = vld [vmem:[#allocation173_spill] sm:$0xff] }
 0x3e8   :  { %17735 = vst [vmem:[#allocation88_spill] sm:$0xff] %v14250_v14  ;;  %v17740_v14 = vld [vmem:[#allocation76_spill] sm:$0xff]  ;;  %v7696_v52 = vadd.f32 %v13968_v29, %v7608_v1  ;;  %v6930_v30 = vpop.f32.mrf.mxu2  ;;  %v7697_v31 = vadd.f32 %v13968_v29, %v7609_v3  ;;  %v7647_v40 = vadd.f32 %v14121_v10, %v14081_v38  ;;  %v7971_v36 = vadd.f32 %v7891_v39, %v14223_v63 }
 0x3e9   :  { %17738 = vst [vmem:[#allocation131_spill] sm:$0xff] %v14261_v27  ;;  %v14268_v55 = vadd.f32 %v17740_v14, %v17739_v9  ;;  %v17744_v27 = vld [vmem:[#allocation115_spill] sm:$0xff]  ;;  %v17745_v14 = vld [vmem:[#allocation122_spill] sm:$0xff]  ;;  %v7648_v51 = vadd.f32 %v14123_v60, %v14077_v37  ;;  %v7811_v21 = vmax.f32 %v7731_v61, 0.0  ;;  %v7812_v5 = vmax.f32 %v7732_v54, 0.0 }
 0x3ea   :  { %17741 = vst [vmem:[#allocation89_spill] sm:$0xff] %v14274_v34  ;;  %v14283_v9 = vadd.f32 %v17745_v14, %v17744_v27  ;;  %v7972_v1 = vadd.f32 %v7892_v42, %v14233_v45  ;;  %v7649_v43 = vadd.f32 %v6841_v18, %v17747_v16  ;;  %v7699_v27 = vadd.f32 %v13968_v29, %v7611_v50  ;;  %v17748_v14 = vld [vmem:[#allocation176_spill] sm:$0xff]  ;;  %v17751_v61 = vld [vmem:[#allocation38_spill] sm:$0xff] }
 0x3eb   :  { %17743 = vst [vmem:[#allocation132_spill] sm:$0xff] %v14278_v8  ;;  %v6910_v47 = vpop.f32.mrf.mxu1  ;;  %v7700_v3 = vadd.f32 %v13968_v29, %v7612_v28  ;;  %v7893_v38 = vrot.slane %v14274_v34, 4  ;;  %v7733_v10 = vadd.f32 %v14046_v24, %v7645_v7  ;;  %v7895_v39 = vrot.slane %v14278_v8, 4 }
 0x3ec   :  { %17746 = vst [vmem:[#allocation92_spill] sm:$0xff] %v14283_v9  ;;  %v7613_v9 = vadd.f32 %v6930_v30, %v17748_v14  ;;  %v14299_v63 = vmax.f32 %v7696_v52, 0.0  ;;  %v14301_v37 = vmax.f32 %v7697_v31, 0.0  ;;  %v7735_v60 = vadd.f32 %v14046_v24, %v7647_v40 }
 0x3ed   :  { %v7614_v18 = vadd.f32 %v6953_v15, %v17751_v61  ;;  %v7651_v54 = vadd.f32 %v6887_v32, %v14093_v59  ;;  %v7736_v42 = vadd.f32 %v14046_v24, %v7648_v51  ;;  %v7652_v50 = vadd.f32 %v6910_v47, %v14090_v56  ;;  %v6956_v47 = vpop.f32.mrf.mxu3 }
 0x3ee   :  { %17749 = vst [vmem:[#allocation134_spill] sm:$0xff] %v14299_v63  ;;  %v14308_v28 = vadd.f32 %v7971_v36, %v7811_v21  ;;  %v14310_v30 = vadd.f32 %v7972_v1, %v7812_v5  ;;  %v7737_v7 = vadd.f32 %v14046_v24, %v7649_v43  ;;  %v14313_v52 = vmax.f32 %v7699_v27, 0.0  ;;  %v6976_v1 = vpop.f32.mrf.mxu0 }
 0x3ef   :  { %17750 = vst [vmem:[#allocation93_spill] sm:$0xff] %v14301_v37  ;;  %v14315_v31 = vmax.f32 %v7700_v3, 0.0  ;;  %v7701_v40 = vadd.f32 %v13968_v29, %v7613_v9  ;;  %v7813_v16 = vmax.f32 %v7733_v10, 0.0  ;;  %v7973_v15 = vadd.f32 %v7893_v38, %v14274_v34  ;;  %v17755_v34 = vld [vmem:[#allocation46_spill] sm:$0xff] }
 0x3f0   :  { %v7896_v59 = vrot.slane %v14299_v63, 4  ;;  %v7975_v32 = vadd.f32 %v7895_v39, %v14278_v8  ;;  %v6933_v56 = vpop.f32.mrf.mxu2  ;;  %v7897_v36 = vrot.slane %v14301_v37, 4  ;;  %v7815_v51 = vmax.f32 %v7735_v60, 0.0  ;;  %v17754_v60 = vld [vmem:[#allocation43_spill] sm:$0xff] }
 0x3f1   :  { %17752 = vst [vmem:[#allocation135_spill] sm:$0xff] %v14315_v31  ;;  %v7702_v21 = vadd.f32 %v13968_v29, %v7614_v18  ;;  %v7739_v5 = vadd.f32 %v14046_v24, %v7651_v54  ;;  %v7816_v27 = vmax.f32 %v7736_v42, 0.0  ;;  %v7740_v9 = vadd.f32 %v14046_v24, %v7652_v50 }
 0x3f2   :  { %v7615_v3 = vadd.f32 %v6976_v1, %v14101_v49  ;;  %v7817_v38 = vmax.f32 %v7737_v7, 0.0  ;;  %v7899_v10 = vrot.slane %v14313_v52, 4  ;;  %v7900_v39 = vrot.slane %v14315_v31, 4 }
 0x3f3   :  { %v6999_v43 = vpop.f32.mrf.mxu1  ;;  %v14329_v61 = vmax.f32 %v7701_v40, 0.0  ;;  %v7653_v18 = vadd.f32 %v6933_v56, %v17754_v60  ;;  %v7654_v54 = vadd.f32 %v6956_v47, %v17755_v34  ;;  %v7976_v50 = vadd.f32 %v7896_v59, %v14299_v63 }
 0x3f4   :  { %v7616_v14 = vadd.f32 %v6999_v43, %v14096_v4  ;;  %v7703_v45 = vadd.f32 %v13968_v29, %v7615_v3  ;;  %v7977_v49 = vadd.f32 %v7897_v36, %v14301_v37  ;;  %v14337_v4 = vmax.f32 %v7702_v21, 0.0 }
 0x3f5   :  { %17753 = vst [vmem:[#allocation96_spill] sm:$0xff] %v14329_v61  ;;  %v7819_v7 = vmax.f32 %v7739_v5, 0.0  ;;  %v14339_v1 = vadd.f32 %v7973_v15, %v7813_v16  ;;  %v14341_v43 = vadd.f32 %v7975_v32, %v7815_v51  ;;  %v7820_v40 = vmax.f32 %v7740_v9, 0.0  ;;  %v7045_v51 = vpop.f32.mrf.mxu3  ;;  %v17757_v5 = vld [vmem:[#allocation180_spill] sm:$0xff]  ;;  %v17758_v9 = vld [vmem:[#allocation121_spill] sm:$0xff] }
 0x3f6   :  { %v7704_v42 = vadd.f32 %v13968_v29, %v7616_v14  ;;  %v14343_v8 = vmax.f32 %v7703_v45, 0.0  ;;  %v14345_v56 = vadd.f32 %v7976_v50, %v7816_v27  ;;  %v14347_v34 = vadd.f32 %v7977_v49, %v7817_v38  ;;  %v6979_v38 = vpop.f32.mrf.mxu0 }
 0x3f7   :  { %v7979_v47 = vadd.f32 %v7899_v10, %v14313_v52  ;;  %v7901_v59 = vrot.slane %v14329_v61, 4  ;;  %v7980_v36 = vadd.f32 %v7900_v39, %v14315_v31  ;;  %v7741_v16 = vadd.f32 %v14046_v24, %v7653_v18 }
 0x3f8   :  { %v14350_v3 = vmax.f32 %v7704_v42, 0.0  ;;  %v7742_v15 = vadd.f32 %v14046_v24, %v7654_v54  ;;  %v7022_v32 = vpop.f32.mrf.mxu2  ;;  %v7902_v45 = vrot.slane %v14337_v4, 4  ;;  %v7618_v14 = vadd.f32 %v7045_v51, %v17758_v9 }
 0x3f9   :  { %v14357_v21 = vadd.f32 %v7979_v47, %v7819_v7  ;;  %v7617_v27 = vadd.f32 %v7022_v32, %v17757_v5  ;;  %v14361_v60 = vadd.f32 %v7980_v36, %v7820_v40  ;;  %v7903_v39 = vrot.slane %v14343_v8, 4 }
 0x3fa   :  { %17756 = vst [vmem:[#allocation138_spill] sm:$0xff] %v14350_v3  ;;  %v7655_v18 = vadd.f32 %v6979_v38, %v14107_v20  ;;  %v7904_v42 = vrot.slane %v14350_v3, 4  ;;  %v7706_v49 = vadd.f32 %v13968_v29, %v7618_v14  ;;  %v17759_v7 = vlaneseq }
 0x3fb   :  { %v7002_v10 = vpop.f32.mrf.mxu1  ;;  %v7705_v50 = vadd.f32 %v13968_v29, %v7617_v27  ;;  %v7821_v32 = vmax.f32 %v7741_v16, 0.0  ;;  %v7822_v51 = vmax.f32 %v7742_v15, 0.0  ;;  %v7981_v5 = vadd.f32 %v7901_v59, %v14329_v61 }
 0x3fc   :  { %v7656_v54 = vadd.f32 %v7002_v10, %v14104_v35  ;;  %v14370_v47 = vshrl.u32 %v17759_v7, 7  ;;  %v7743_v40 = vadd.f32 %v14046_v24, %v7655_v18  ;;  %v14377_v35 = vmax.f32 %v7706_v49, 0.0 }
 0x3fd   :  { %v14375_v20 = vmax.f32 %v7705_v50, 0.0  ;;  %v7982_v27 = vadd.f32 %v7902_v45, %v14337_v4  ;;  %v7983_v38 = vadd.f32 %v7903_v39, %v14343_v8  ;;  %v7984_v15 = vadd.f32 %v7904_v42, %v14350_v3  ;;  %v17763_v39 = vld [vmem:[#allocation51_spill] sm:$0xff]  ;;  %v17764_v42 = vld [vmem:[#allocation53_spill] sm:$0xff] }
 0x3fe   :  { %17760 = vst [vmem:[#allocation97_spill] sm:$0xff] %v14370_v47  ;;  %v7744_v36 = vadd.f32 %v14046_v24, %v7656_v54  ;;  %v8102_v9 = vadd.s32 120, %v14370_v47  ;;  %v7823_v14 = vmax.f32 %v7743_v40, 0.0  ;;  %v8101_v54 = vadd.s32 112, %v14370_v47  ;;  %v7048_v40 = vpop.f32.mrf.mxu3  ;;  %v7068_v3 = vpop.f32.mrf.mxu0 }
 0x3ff   :  { %17761 = vst [vmem:[#allocation139_spill] sm:$0xff] %v14375_v20  ;;  %v7905_v16 = vrot.slane %v14375_v20, 4  ;;  %v14385_v59 = vadd.f32 %v7981_v5, %v7821_v32  ;;  %v14387_v50 = vadd.f32 %v7982_v27, %v7822_v51  ;;  %v7906_v49 = vrot.slane %v14377_v35, 4  ;;  %v17765_v5 = vld [vmem:[#allocation42_spill] sm:$0xff] }
 0x400   :  { %17762 = vst [vmem:[#allocation100_spill] sm:$0xff] %v14377_v35  ;;  %v7824_v10 = vmax.f32 %v7744_v36, 0.0  ;;  %v8182_v18 = vand.u32 7, %v8102_v9  ;;  %v14390_v7 = vadd.f32 %v7983_v38, %v7823_v14  ;;  %v7025_v45 = vpop.f32.mrf.mxu2  ;;  %v7658_v9 = vadd.f32 %v7048_v40, %v17764_v42 }
 0x401   :  { %v7657_v36 = vadd.f32 %v7025_v45, %v17763_v39  ;;  %v7985_v37 = vadd.f32 %v7905_v16, %v14375_v20  ;;  %v7619_v32 = vadd.f32 %v7068_v3, %v14114_v58  ;;  %v16857_v38 = vmov 1.0  }
 0x402   :  { %v14392_v61 = vadd.f32 %v7984_v15, %v7824_v10  ;;  %vm8262_vm3 = vcmp.eq.s32.totalorder %v8182_v18, %v17765_v5  ;;  %v7746_v14 = vadd.f32 %v14046_v24, %v7658_v9  ;;  %v8181_v10 = vand.u32 7, %v8101_v54 }
 0x403   :  { %v7091_v31 = vpop.f32.mrf.mxu1  ;;  %v7745_v27 = vadd.f32 %v14046_v24, %v7657_v36  ;;  %10790 = vmatpush.msk.msra.mxu0 %vm8262_vm3, %v16857_v38  ;;  %v8100_v16 = vadd.s32 104, %v14370_v47  ;;  %v7986_v15 = vadd.f32 %v7906_v49, %v14377_v35  ;;  %v7707_v45 = vadd.f32 %v13968_v29, %v7619_v32 }
 0x404   :  { %v7620_v51 = vadd.f32 %v7091_v31, %v14110_v57  ;;  %v8099_v57 = vadd.s32 96, %v14370_v47  ;;  %v7826_v3 = vmax.f32 %v7746_v14, 0.0  ;;  %vm8261_vm4 = vcmp.eq.s32.totalorder %v8181_v10, %v17765_v5 }
 0x405   :  { %v7825_v31 = vmax.f32 %v7745_v27, 0.0  ;;  %v8180_v18 = vand.u32 7, %v8100_v16  ;;  %v14409_v40 = vmax.f32 %v7707_v45, 0.0  ;;  %10791 = vmatpush.msk.msra.mxu0 %vm8261_vm4, %v16857_v38  ;;  %v8098_v49 = vadd.s32 88, %v14370_v47  ;;  %v17768_v16 = vld [vmem:[#allocation194_spill] sm:$0xff]  ;;  %v17769_v45 = vld [vmem:[#allocation52_spill] sm:$0xff] }
 0x406   :  { %v7708_v58 = vadd.f32 %v13968_v29, %v7620_v51  ;;  %v8179_v54 = vand.u32 7, %v8099_v57  ;;  %v14417_v42 = vadd.f32 %v7986_v15, %v7826_v3  ;;  %v8097_v9 = vadd.s32 80, %v14370_v47  ;;  %v7137_v14 = vpop.f32.mrf.mxu3 }
 0x407   :  { %17766 = vst [vmem:[#allocation140_spill] sm:$0xff] %v14409_v40  ;;  %v14415_v36 = vadd.f32 %v7985_v37, %v7825_v31  ;;  %vm8260_vm1 = vcmp.eq.s32.totalorder %v8180_v18, %v17765_v5  ;;  %v7907_v32 = vrot.slane %v14409_v40, 4  ;;  %v8178_v10 = vand.u32 7, %v8098_v49 }
 0x408   :  { %v14411_v39 = vmax.f32 %v7708_v58, 0.0  ;;  %v7114_v27 = vpop.f32.mrf.mxu2  ;;  %10792 = vmatpush.msk.msra.mxu0 %vm8260_vm1, %v16857_v38  ;;  %vm8259_vm5 = vcmp.eq.s32.totalorder %v8179_v54, %v17765_v5  ;;  %v7622_v15 = vadd.f32 %v7137_v14, %v17769_v45  ;;  %v7071_v58 = vpop.f32.mrf.mxu0  ;;  %v8177_v31 = vand.u32 7, %v8097_v9 }
 0x409   :  { %v7621_v37 = vadd.f32 %v7114_v27, %v17768_v16  ;;  %v8096_v3 = vadd.s32 72, %v14370_v47  ;;  %v7659_v18 = vadd.f32 %v7071_v58, %v14127_v46  ;;  %v7987_v20 = vadd.f32 %v7907_v32, %v14409_v40 }
 0x40a   :  { %17767 = vst [vmem:[#allocation101_spill] sm:$0xff] %v14411_v39  ;;  %v7908_v51 = vrot.slane %v14411_v39, 4  ;;  %v17770_v35 = vmov 1.0   ;;  %v7710_v49 = vadd.f32 %v13968_v29, %v7622_v15  ;;  %vm8258_vm6 = vcmp.eq.s32.totalorder %v8178_v10, %v17765_v5 }
 0x40b   :  { %v7094_v57 = vpop.f32.mrf.mxu1  ;;  %10793 = vmatpush.msk.msra.mxu0 %vm8259_vm5, %v17770_v35  ;;  %v7709_v54 = vadd.f32 %v13968_v29, %v7621_v37  ;;  %vm8257_vm7 = vcmp.eq.s32.totalorder %v8177_v31, %v17765_v5  ;;  %v7747_v9 = vadd.f32 %v14046_v24, %v7659_v18  ;;  %v8176_v32 = vand.u32 7, %v8096_v3 }
 0x40c   :  { %v7660_v63 = vadd.f32 %v7094_v57, %v14117_v6  ;;  %v7988_v38 = vadd.f32 %v7908_v51, %v14411_v39  ;;  %v8095_v6 = vadd.s32 64, %v14370_v47  ;;  %v14443_v27 = vmax.f32 %v7710_v49, 0.0 }
 0x40d   :  { %10794 = vmatpush.msk.msra.mxu0 %vm8258_vm6, %v17770_v35  ;;  %v14441_v51 = vmax.f32 %v7709_v54, 0.0  ;;  %v8094_v14 = vadd.s32 56, %v14370_v47  ;;  %v8150_v16 = vadd.s32 504, %v14370_v47  ;;  %v7827_v10 = vmax.f32 %v7747_v9, 0.0  ;;  %v17773_v9 = vld [vmem:[#allocation56_spill] sm:$0xff] }
 0x40e   :  { %v7748_v46 = vadd.f32 %v14046_v24, %v7660_v63  ;;  %17772 = vst [vmem:[#allocation102_spill] sm:$0xff] %v14443_v27  ;;  %vm8256_vm8 = vcmp.eq.s32.totalorder %v8176_v32, %v17765_v5  ;;  %v8175_v63 = vand.u32 7, %v8095_v6  ;;  %v7910_v15 = vrot.slane %v14443_v27, 4  ;;  %v7140_v54 = vpop.f32.mrf.mxu3  ;;  %v17774_v6 = vld [vmem:[#allocation57_spill] sm:$0xff] }
 0x40f   :  { %17771 = vst [vmem:[#allocation141_spill] sm:$0xff] %v14441_v51  ;;  %10795 = vmatpush.msk.msra.mxu0 %vm8257_vm7, %v17770_v35  ;;  %v7909_v45 = vrot.slane %v14441_v51, 4  ;;  %v8174_v58 = vand.u32 7, %v8094_v14  ;;  %v8230_v57 = vand.u32 7, %v8150_v16  ;;  %v14451_v31 = vadd.f32 %v7987_v20, %v7827_v10 }
 0x410   :  { %v7828_v37 = vmax.f32 %v7748_v46, 0.0  ;;  %v7117_v18 = vpop.f32.mrf.mxu2  ;;  %vm8255_vm9 = vcmp.eq.s32.totalorder %v8175_v63, %v17765_v5  ;;  %v8093_v49 = vadd.s32 48, %v14370_v47  ;;  %v7662_v40 = vadd.f32 %v7140_v54, %v17774_v6  ;;  %v7160_v20 = vpop.f32.mrf.mxu0 }
 0x411   :  { %10796 = vmatpush.msk.msra.mxu0 %vm8256_vm8, %v17770_v35  ;;  %v7661_v46 = vadd.f32 %v7117_v18, %v17773_v9  ;;  %v7989_v32 = vadd.f32 %v7909_v45, %v14441_v51  ;;  %v7990_v14 = vadd.f32 %v7910_v15, %v14443_v27  ;;  %vm8254_vm10 = vcmp.eq.s32.totalorder %v8174_v58, %v17765_v5 }
 0x412   :  { %v14453_v3 = vadd.f32 %v7988_v38, %v7828_v37  ;;  %v7623_v38 = vadd.f32 %v7160_v20, %v14133_v53  ;;  %vm8310_vm11 = vcmp.eq.s32.totalorder %v8230_v57, %v17765_v5  ;;  %v7750_v63 = vadd.f32 %v14046_v24, %v7662_v40 }
 0x413   :  { %v7183_v16 = vpop.f32.mrf.mxu1  ;;  %10797 = vmatpush.msk.msra.mxu0 %vm8255_vm9, %v17770_v35  ;;  %v7749_v37 = vadd.f32 %v14046_v24, %v7661_v46  ;;  %10838 = vmatpush.msk.msra.mxu3 %vm8310_vm11, %v17770_v35  ;;  %v8173_v45 = vand.u32 7, %v8093_v49  ;;  %v8149_v15 = vadd.s32 496, %v14370_v47  ;;  %v8148_v58 = vadd.s32 488, %v14370_v47 }
 0x414   :  { %v7624_v10 = vadd.f32 %v7183_v16, %v14130_v0  ;;  %v7711_v18 = vadd.f32 %v13968_v29, %v7623_v38  ;;  %v8092_v0 = vadd.s32 40, %v14370_v47  ;;  %v7830_v54 = vmax.f32 %v7750_v63, 0.0 }
 0x415   :  { %10798 = vmatpush.msk.msra.mxu0 %vm8254_vm10, %v17770_v35  ;;  %v7829_v57 = vmax.f32 %v7749_v37, 0.0  ;;  %vm8253_vm12 = vcmp.eq.s32.totalorder %v8173_v45, %v17765_v5  ;;  %v8229_v40 = vand.u32 7, %v8149_v15  ;;  %v8228_v6 = vand.u32 7, %v8148_v58 }
 0x416   :  { %v7712_v53 = vadd.f32 %v13968_v29, %v7624_v10  ;;  %v14477_v9 = vmax.f32 %v7711_v18, 0.0  ;;  %v8172_v46 = vand.u32 7, %v8092_v0  ;;  %v14484_v16 = vadd.f32 %v7990_v14, %v7830_v54  ;;  %v7229_v45 = vpop.f32.mrf.mxu3  ;;  %v17778_v14 = vld [vmem:[#allocation94_spill] sm:$0xff] }
 0x417   :  { %10799 = vmatpush.msk.msra.mxu0 %vm8253_vm12, %v17770_v35  ;;  %v14482_v20 = vadd.f32 %v7989_v32, %v7829_v57  ;;  %vm8309_vm13 = vcmp.eq.s32.totalorder %v8229_v40, %v17765_v5  ;;  %v8091_v38 = vadd.s32 32, %v14370_v47  ;;  %vm8308_vm15 = vcmp.eq.s32.totalorder %v8228_v6, %v17765_v5  ;;  %v17777_v32 = vld [vmem:[#allocation133_spill] sm:$0xff] }
 0x418   :  { %17775 = vst [vmem:[#allocation142_spill] sm:$0xff] %v14477_v9  ;;  %v14479_v49 = vmax.f32 %v7712_v53, 0.0  ;;  %v7911_v10 = vrot.slane %v14477_v9, 4  ;;  %v7206_v63 = vpop.f32.mrf.mxu2  ;;  %10839 = vmatpush.msk.msra.mxu3 %vm8309_vm13, %v17770_v35  ;;  %vm8252_vm14 = vcmp.eq.s32.totalorder %v8172_v46, %v17765_v5  ;;  %v7626_v18 = vadd.f32 %v7229_v45, %v17778_v14  ;;  %v7163_v53 = vpop.f32.mrf.mxu0 }
 0x419   :  { %v7625_v15 = vadd.f32 %v7206_v63, %v17777_v32  ;;  %10800 = vmatpush.msk.msra.mxu0 %vm8252_vm14, %v17770_v35  ;;  %v8171_v58 = vand.u32 7, %v8091_v38  ;;  %v8147_v57 = vadd.s32 480, %v14370_v47  ;;  %v7663_v54 = vadd.f32 %v7163_v53, %v14137_v12 }
 0x41a   :  { %17776 = vst [vmem:[#allocation103_spill] sm:$0xff] %v14479_v49  ;;  %v7912_v37 = vrot.slane %v14479_v49, 4  ;;  %v7991_v40 = vadd.f32 %v7911_v10, %v14477_v9  ;;  %10840 = vmatpush.msk.msra.mxu3 %vm8308_vm15, %v17770_v35  ;;  %v7714_v63 = vadd.f32 %v13968_v29, %v7626_v18  ;;  %v8090_v12 = vadd.s32 24, %v14370_v47 }
 0x41b   :  { %v7186_v0 = vpop.f32.mrf.mxu1  ;;  %v7713_v6 = vadd.f32 %v13968_v29, %v7625_v15  ;;  %vm8251_vm0 = vcmp.eq.s32.totalorder %v8171_v58, %v17765_v5  ;;  %v8227_v45 = vand.u32 7, %v8147_v57  ;;  %v7751_v38 = vadd.f32 %v14046_v24, %v7663_v54 }
 0x41c   :  { %v7664_v51 = vadd.f32 %v7186_v0, %v14140_v19  ;;  %v7992_v46 = vadd.f32 %v7912_v37, %v14479_v49  ;;  %10801 = vmatpush.msk.msra.mxu0 %vm8251_vm0, %v17770_v35  ;;  %v8146_v19 = vadd.s32 472, %v14370_v47  ;;  %v14512_v37 = vmax.f32 %v7714_v63, 0.0 }
 0x41d   :  { %v14510_v10 = vmax.f32 %v7713_v6, 0.0  ;;  %vm8307_vm2 = vcmp.eq.s32.totalorder %v8227_v45, %v17765_v5  ;;  %v8089_v15 = vadd.s32 16, %v14370_v47  ;;  %v7831_v14 = vmax.f32 %v7751_v38, 0.0  ;;  %v17783_v38 = vld [vmem:[#allocation60_spill] sm:$0xff] }
 0x41e   :  { %v7752_v32 = vadd.f32 %v14046_v24, %v7664_v51  ;;  %17780 = vst [vmem:[#allocation106_spill] sm:$0xff] %v14512_v37  ;;  %10841 = vmatpush.msk.msra.mxu3 %vm8307_vm2, %v17770_v35  ;;  %v8170_v53 = vand.u32 7, %v8090_v12  ;;  %v8226_v51 = vand.u32 7, %v8146_v19  ;;  %v7914_v58 = vrot.slane %v14512_v37, 4  ;;  %v7232_v9 = vpop.f32.mrf.mxu3  ;;  %v17784_v19 = vld [vmem:[#allocation61_spill] sm:$0xff] }
 0x41f   :  { %17779 = vst [vmem:[#allocation143_spill] sm:$0xff] %v14510_v10  ;;  %v7913_v0 = vrot.slane %v14510_v10, 4  ;;  %v8169_v57 = vand.u32 7, %v8089_v15  ;;  %v8145_v54 = vadd.s32 464, %v14370_v47  ;;  %v8031_v6 = vadd.f32 %v7991_v40, %v7831_v14 }
 0x420   :  { %v7832_v18 = vmax.f32 %v7752_v32, 0.0  ;;  %v7209_v49 = vpop.f32.mrf.mxu2  ;;  %vm14521_vm3 = vcmp.eq.s32.totalorder %v8170_v53, %v17765_v5  ;;  %vm8306_vm4 = vcmp.eq.s32.totalorder %v8226_v51, %v17765_v5  ;;  %v7666_v39 = vadd.f32 %v7232_v9, %v17784_v19  ;;  %v7252_v27 = vpop.f32.mrf.mxu0 }
 0x421   :  { %v7665_v32 = vadd.f32 %v7209_v49, %v17783_v38  ;;  %v7993_v12 = vadd.f32 %v7913_v0, %v14510_v10  ;;  %v7994_v15 = vadd.f32 %v7914_v58, %v14512_v37  ;;  %10802 = vmatpush.msk.msra.mxu0 %vm14521_vm3, %v17770_v35  ;;  %v7627_v49 = vadd.f32 %v7252_v27, %v14143_v33 }
 0x422   :  { %v8032_v63 = vadd.f32 %v7992_v46, %v7832_v18  ;;  %v14534_v46 = vadd.f32 %v8031_v6, %v14308_v28  ;;  %10842 = vmatpush.msk.msra.mxu3 %vm8306_vm4, %v17770_v35  ;;  %v7754_v53 = vadd.f32 %v14046_v24, %v7666_v39  ;;  %vm14545_vm1 = vcmp.eq.s32.totalorder %v8169_v57, %v17765_v5 }
 0x423   :  { %v7275_v40 = vpop.f32.mrf.mxu1  ;;  %v7753_v9 = vadd.f32 %v14046_v24, %v7665_v32  ;;  %v17785_v51 = vmov 0  ;;  %v8225_v28 = vand.u32 7, %v8145_v54  ;;  %v7715_v0 = vadd.f32 %v13968_v29, %v7627_v49  ;;  %10803 = vmatpush.msk.msra.mxu0 %vm14545_vm1, %v17770_v35 }
 0x424   :  { %v14537_v14 = vadd.f32 %v8032_v63, %v14310_v30  ;;  %v7628_v18 = vadd.f32 %v7275_v40, %v14148_v2  ;;  %v17786_v51 = vsel %vm14545_vm1, 4294967295, %v17785_v51  ;;  %v8088_v33 = vadd.s32 8, %v14370_v47 }
 0x425   :  { %17787 = vst [vmem:[#allocation145_spill] sm:$0xff] %v17786_v51  ;;  %v8144_v2 = vadd.s32 456, %v14370_v47  ;;  %v7833_v27 = vmax.f32 %v7753_v9, 0.0  ;;  %v7834_v39 = vmax.f32 %v7754_v53, 0.0  ;;  %vm8305_vm5 = vcmp.eq.s32.totalorder %v8225_v28, %v17765_v5 }
 0x426   :  { %v7716_v30 = vadd.f32 %v13968_v29, %v7628_v18  ;;  %v8167_v58 = vand.u32 7, %v14370_v47  ;;  %v14558_v57 = vmax.f32 %v7715_v0, 0.0  ;;  %10843 = vmatpush.msk.msra.mxu3 %vm8305_vm5, %v17770_v35  ;;  %v8168_v6 = vand.u32 7, %v8088_v33  ;;  %v7321_v53 = vpop.f32.mrf.mxu3 }
 0x427   :  { %v8224_v63 = vand.u32 7, %v8144_v2  ;;  %v8033_v38 = vadd.f32 %v7993_v12, %v7833_v27  ;;  %v8034_v32 = vadd.f32 %v7994_v15, %v7834_v39  ;;  %v17790_v19 = vmov 0  ;;  %v17796_v15 = vld [vmem:[#allocation80_spill] sm:$0xff] }
 0x428   :  { %17788 = vst [vmem:[#allocation107_spill] sm:$0xff] %v14558_v57  ;;  %v14560_v54 = vmax.f32 %v7716_v30, 0.0  ;;  %vm14564_vm6 = vcmp.eq.s32.totalorder %v8167_v58, %v17765_v5  ;;  %v8143_v40 = vadd.s32 448, %v14370_v47  ;;  %v7915_v49 = vrot.slane %v14558_v57, 4  ;;  %v7298_v9 = vpop.f32.mrf.mxu2  ;;  %v17797_v30 = vld [vmem:[#allocation197_spill] sm:$0xff]  ;;  %v17798_v2 = vld [vmem:[#allocation16_spill] sm:$0xff]  ;;  %v7255_v39 = vpop.f32.mrf.mxu0 }
 0x429   :  { %v17791_v19 = vsel %vm14564_vm6, 4294967295, %v17790_v19  ;;  %vm14572_vm7 = vcmp.eq.s32.totalorder %v8168_v6, %v17765_v5  ;;  %v17793_v28 = vmov 0  ;;  %vm8304_vm8 = vcmp.eq.s32.totalorder %v8224_v63, %v17765_v5 }
 0x42a   :  { %17789 = vst [vmem:[#allocation146_spill] sm:$0xff] %v14560_v54  ;;  %v7916_v18 = vrot.slane %v14560_v54, 4  ;;  %v17794_v28 = vsel %vm14572_vm7, 4294967295, %v17793_v28  ;;  %v14578_v12 = vadd.f32 %v8033_v38, %v14339_v1  ;;  %v14581_v0 = vadd.f32 %v8034_v32, %v17796_v15  ;;  %10804 = vmatpush.msk.msra.mxu0 %vm14572_vm7, %v17770_v35  ;;  %10844 = vmatpush.msk.msra.mxu3 %vm8304_vm8, %v17770_v35 }
 0x42b   :  { %17792 = vst [vmem:[#allocation22_spill] sm:$0xff] %v17791_v19  ;;  %v7629_v33 = vadd.f32 %v7298_v9, %v17797_v30  ;;  %v7630_v27 = vadd.f32 %v7321_v53, %v17798_v2  ;;  %v7278_v58 = vpop.f32.mrf.mxu1  ;;  %v7667_v6 = vadd.f32 %v7255_v39, %v14152_v17  ;;  %v7995_v63 = vadd.f32 %v7915_v49, %v14558_v57 }
 0x42c   :  { %17795 = vst [vmem:[#allocation149_spill] sm:$0xff] %v17794_v28  ;;  %v7668_v1 = vadd.f32 %v7278_v58, %v14156_v41  ;;  %v7996_v38 = vadd.f32 %v7916_v18, %v14560_v54  ;;  %10805 = vmatpush.msk.msra.mxu0 %vm14564_vm6, %v17770_v35  ;;  %v8223_v53 = vand.u32 7, %v8143_v40  ;;  %v8166_v15 = vadd.s32 632, %v14370_v47 }
 0x42d   :  { %v7717_v32 = vadd.f32 %v13968_v29, %v7629_v33  ;;  %v7718_v9 = vadd.f32 %v13968_v29, %v7630_v27  ;;  %v7755_v17 = vadd.f32 %v14046_v24, %v7667_v6  ;;  %v8142_v41 = vadd.s32 440, %v14370_v47 }
 0x42e   :  { %v7756_v49 = vadd.f32 %v14046_v24, %v7668_v1  ;;  %v8165_v18 = vadd.s32 624, %v14370_v47  ;;  %vm8303_vm9 = vcmp.eq.s32.totalorder %v8223_v53, %v17765_v5  ;;  %v8246_v2 = vand.u32 7, %v8166_v15  ;;  %v7324_v57 = vpop.f32.mrf.mxu3  ;;  %v17801_v53 = vld [vmem:[#allocation64_spill] sm:$0xff] }
 0x42f   :  { %v14603_v30 = vmax.f32 %v7717_v32, 0.0  ;;  %v14605_v33 = vmax.f32 %v7718_v9, 0.0  ;;  %v7835_v27 = vmax.f32 %v7755_v17, 0.0  ;;  %10845 = vmatpush.msk.msra.mxu3 %vm8303_vm9, %v17770_v35  ;;  %v8222_v40 = vand.u32 7, %v8142_v41 }
 0x430   :  { %v7836_v39 = vmax.f32 %v7756_v49, 0.0  ;;  %v8245_v58 = vand.u32 7, %v8165_v18  ;;  %vm8326_vm10 = vcmp.eq.s32.totalorder %v8246_v2, %v17765_v5  ;;  %v8141_v32 = vadd.s32 432, %v14370_v47  ;;  %v7301_v10 = vpop.f32.mrf.mxu2  ;;  %v17802_v49 = vld [vmem:[#allocation65_spill] sm:$0xff]  ;;  %v7344_v2 = vpop.f32.mrf.mxu0 }
 0x431   :  { %17799 = vst [vmem:[#allocation19_spill] sm:$0xff] %v14603_v30  ;;  %v7917_v6 = vrot.slane %v14603_v30, 4  ;;  %v7918_v1 = vrot.slane %v14605_v33, 4  ;;  %v8035_v54 = vadd.f32 %v7995_v63, %v7835_v27  ;;  %10854 = vmatpush.msk.msrb.mxu0 %vm8326_vm10, %v17770_v35  ;;  %vm8302_vm11 = vcmp.eq.s32.totalorder %v8222_v40, %v17765_v5 }
 0x432   :  { %17800 = vst [vmem:[#allocation150_spill] sm:$0xff] %v14605_v33  ;;  %v8036_v9 = vadd.f32 %v7996_v38, %v7836_v39  ;;  %vm8325_vm12 = vcmp.eq.s32.totalorder %v8245_v58, %v17765_v5  ;;  %v7669_v15 = vadd.f32 %v7301_v10, %v17801_v53  ;;  %v7670_v41 = vadd.f32 %v7324_v57, %v17802_v49 }
 0x433   :  { %v7997_v17 = vadd.f32 %v7917_v6, %v14603_v30  ;;  %v7998_v18 = vadd.f32 %v7918_v1, %v14605_v33  ;;  %v7367_v37 = vpop.f32.mrf.mxu1  ;;  %10846 = vmatpush.msk.msra.mxu3 %vm8302_vm11, %v17770_v35  ;;  %v14622_v63 = vadd.f32 %v8035_v54, %v14341_v43  ;;  %v7631_v27 = vadd.f32 %v7344_v2, %v14164_v22  ;;  %v15294_v33 = vld [vmem:[%s16729_s2 + $0x130] sm:$0xff] }
 0x434   :  { %v14625_v38 = vadd.f32 %v8036_v9, %v14345_v56  ;;  %v7632_v10 = vadd.f32 %v7367_v37, %v14168_v48  ;;  %10855 = vmatpush.msk.msrb.mxu0 %vm8325_vm12, %v17770_v35  ;;  %v7757_v57 = vadd.f32 %v14046_v24, %v7669_v15  ;;  %v7758_v39 = vadd.f32 %v14046_v24, %v7670_v41 }
 0x435   :  { %v8221_v40 = vand.u32 7, %v8141_v32  ;;  %v8164_v58 = vadd.s32 616, %v14370_v47  ;;  %v7719_v6 = vadd.f32 %v13968_v29, %v7631_v27  ;;  %v8140_v56 = vadd.s32 424, %v14370_v47 }
 0x436   :  { %v7720_v43 = vadd.f32 %v13968_v29, %v7632_v10  ;;  %v8163_v54 = vadd.s32 608, %v14370_v47  ;;  %v7837_v22 = vmax.f32 %v7757_v57, 0.0  ;;  %v7838_v1 = vmax.f32 %v7758_v39, 0.0  ;;  %v7413_v57 = vpop.f32.mrf.mxu3 }
 0x437   :  { %vm8301_vm13 = vcmp.eq.s32.totalorder %v8221_v40, %v17765_v5  ;;  %v8244_v48 = vand.u32 7, %v8164_v58  ;;  %v14638_v37 = vmax.f32 %v7719_v6, 0.0  ;;  %v8220_v32 = vand.u32 7, %v8140_v56  ;;  %v17806_v58 = vld [vmem:[#allocation144_spill] sm:$0xff] }
 0x438   :  { %v14640_v9 = vmax.f32 %v7720_v43, 0.0  ;;  %10847 = vmatpush.msk.msra.mxu3 %vm8301_vm13, %v17770_v35  ;;  %v8243_v53 = vand.u32 7, %v8163_v54  ;;  %v8037_v15 = vadd.f32 %v7997_v17, %v7837_v22  ;;  %v8038_v49 = vadd.f32 %v7998_v18, %v7838_v1  ;;  %v7390_v10 = vpop.f32.mrf.mxu2  ;;  %v17805_v18 = vld [vmem:[#allocation105_spill] sm:$0xff]  ;;  %v7347_v43 = vpop.f32.mrf.mxu0 }
 0x439   :  { %17803 = vst [vmem:[#allocation109_spill] sm:$0xff] %v14638_v37  ;;  %vm8324_vm14 = vcmp.eq.s32.totalorder %v8244_v48, %v17765_v5  ;;  %v8139_v41 = vadd.s32 416, %v14370_v47  ;;  %v7919_v2 = vrot.slane %v14638_v37, 4  ;;  %vm8300_vm15 = vcmp.eq.s32.totalorder %v8220_v32, %v17765_v5 }
 0x43a   :  { %17804 = vst [vmem:[#allocation153_spill] sm:$0xff] %v14640_v9  ;;  %v7920_v27 = vrot.slane %v14640_v9, 4  ;;  %10856 = vmatpush.msk.msrb.mxu0 %vm8324_vm14, %v17770_v35  ;;  %vm8323_vm0 = vcmp.eq.s32.totalorder %v8243_v53, %v17765_v5  ;;  %v14651_v39 = vadd.f32 %v8037_v15, %v14347_v34  ;;  %v14654_v17 = vadd.f32 %v8038_v49, %v14270_v26 }
 0x43b   :  { %v7633_v40 = vadd.f32 %v7390_v10, %v17805_v18  ;;  %v7634_v6 = vadd.f32 %v7413_v57, %v17806_v58  ;;  %v7370_v56 = vpop.f32.mrf.mxu1  ;;  %10848 = vmatpush.msk.msra.mxu3 %vm8300_vm15, %v17770_v35  ;;  %v7671_v54 = vadd.f32 %v7347_v43, %v14179_v11  ;;  %v7999_v22 = vadd.f32 %v7919_v2, %v14638_v37  ;;  %v15261_v37 = vld [vmem:[%s16729_s2 + $0x220] sm:$0xff] }
 0x43c   :  { %v7672_v1 = vadd.f32 %v7370_v56, %v14183_v13  ;;  %v8000_v34 = vadd.f32 %v7920_v27, %v14640_v9  ;;  %10857 = vmatpush.msk.msrb.mxu0 %vm8323_vm0, %v17770_v35  ;;  %v8219_v32 = vand.u32 7, %v8139_v41  ;;  %v8162_v53 = vadd.s32 600, %v14370_v47  ;;  %v17818_v9 = vld [vmem:[#allocation47_spill] sm:$0xff]  ;;  %17858 = vst [vmem:[#allocation186_spill] sm:$0xff] %v15261_v37 }
 0x43d   :  { %v7721_v26 = vadd.f32 %v13968_v29, %v7633_v40  ;;  %v7722_v48 = vadd.f32 %v13968_v29, %v7634_v6  ;;  %v7759_v15 = vadd.f32 %v14046_v24, %v7671_v54  ;;  %v8138_v11 = vadd.s32 408, %v14370_v47 }
 0x43e   :  { %v7760_v49 = vadd.f32 %v14046_v24, %v7672_v1  ;;  %v8118_v2 = vadd.s32 248, %v14370_v47  ;;  %vm8299_vm2 = vcmp.eq.s32.totalorder %v8219_v32, %v17765_v5  ;;  %v8242_v10 = vand.u32 7, %v8162_v53 }
 0x43f   :  { %v14671_v13 = vmax.f32 %v7721_v26, 0.0  ;;  %v14673_v27 = vmax.f32 %v7722_v48, 0.0  ;;  %v7839_v57 = vmax.f32 %v7759_v15, 0.0  ;;  %10849 = vmatpush.msk.msra.mxu3 %vm8299_vm2, %v17770_v35  ;;  %v8218_v41 = vand.u32 7, %v8138_v11  ;;  %v7416_v26 = vpop.f32.mrf.mxu3  ;;  %v17809_v48 = vld [vmem:[#allocation68_spill] sm:$0xff]  ;;  %v17810_v15 = vld [vmem:[#allocation69_spill] sm:$0xff] }
 0x440   :  { %v7840_v18 = vmax.f32 %v7760_v49, 0.0  ;;  %v8198_v40 = vand.u32 7, %v8118_v2  ;;  %vm8322_vm4 = vcmp.eq.s32.totalorder %v8242_v10, %v17765_v5  ;;  %v8134_v43 = vadd.s32 376, %v14370_v47  ;;  %v7393_v1 = vpop.f32.mrf.mxu2  ;;  %v7436_v2 = vpop.f32.mrf.mxu0 }
 0x441   :  { %17807 = vst [vmem:[#allocation110_spill] sm:$0xff] %v14671_v13  ;;  %v7921_v58 = vrot.slane %v14671_v13, 4  ;;  %v7922_v6 = vrot.slane %v14673_v27, 4  ;;  %v8039_v56 = vadd.f32 %v7999_v22, %v7839_v57  ;;  %10858 = vmatpush.msk.msrb.mxu0 %vm8322_vm4, %v17770_v35  ;;  %vm8298_vm5 = vcmp.eq.s32.totalorder %v8218_v41, %v17765_v5  ;;  %v17811_v57 = vld [vmem:[#allocation81_spill] sm:$0xff]  ;;  %v17812_v41 = vld [vmem:[#allocation126_spill] sm:$0xff] }
 0x442   :  { %17808 = vst [vmem:[#allocation154_spill] sm:$0xff] %v14673_v27  ;;  %v8040_v54 = vadd.f32 %v8000_v34, %v7840_v18  ;;  %vm8278_vm8 = vcmp.eq.s32.totalorder %v8198_v40, %v17765_v5  ;;  %v7673_v32 = vadd.f32 %v7393_v1, %v17809_v48  ;;  %v7674_v49 = vadd.f32 %v7416_v26, %v17810_v15 }
 0x443   :  { %v8001_v53 = vadd.f32 %v7921_v58, %v14671_v13  ;;  %v8002_v11 = vadd.f32 %v7922_v6, %v14673_v27  ;;  %v7459_v10 = vpop.f32.mrf.mxu1  ;;  %10850 = vmatpush.msk.msra.mxu3 %vm8298_vm5, %v17770_v35  ;;  %v14690_v22 = vadd.f32 %v8039_v56, %v14357_v21  ;;  %v7635_v18 = vadd.f32 %v7436_v2, %v17811_v57  ;;  %v15274_v27 = vld [vmem:[%s16729_s2 + $0x218] sm:$0xff] }
 0x444   :  { %v14693_v34 = vadd.f32 %v8040_v54, %v14361_v60  ;;  %v7636_v40 = vadd.f32 %v7459_v10, %v17812_v41  ;;  %10806 = vmatpush.msk.msra.mxu1 %vm8278_vm8, %v17770_v35  ;;  %v7761_v58 = vadd.f32 %v14046_v24, %v7673_v32  ;;  %v7762_v6 = vadd.f32 %v14046_v24, %v7674_v49 }
 0x445   :  { %v8214_v1 = vand.u32 7, %v8134_v43  ;;  %v8161_v26 = vadd.s32 592, %v14370_v47  ;;  %v7723_v48 = vadd.f32 %v13968_v29, %v7635_v18  ;;  %v8137_v60 = vadd.s32 400, %v14370_v47  ;;  %17859 = vst [vmem:[#allocation187_spill] sm:$0xff] %v15274_v27 }
 0x446   :  { %v7724_v21 = vadd.f32 %v13968_v29, %v7636_v40  ;;  %v8117_v56 = vadd.s32 240, %v14370_v47  ;;  %v7841_v54 = vmax.f32 %v7761_v58, 0.0  ;;  %v7842_v15 = vmax.f32 %v7762_v6, 0.0 }
 0x447   :  { %vm8294_vm9 = vcmp.eq.s32.totalorder %v8214_v1, %v17765_v5  ;;  %v8241_v2 = vand.u32 7, %v8161_v26  ;;  %v14706_v10 = vmax.f32 %v7723_v48, 0.0  ;;  %v8217_v43 = vand.u32 7, %v8137_v60  ;;  %v7505_v1 = vpop.f32.mrf.mxu3 }
 0x448   :  { %v14708_v32 = vmax.f32 %v7724_v21, 0.0  ;;  %10822 = vmatpush.msk.msra.mxu2 %vm8294_vm9, %v17770_v35  ;;  %v8197_v49 = vand.u32 7, %v8117_v56  ;;  %v8041_v57 = vadd.f32 %v8001_v53, %v7841_v54  ;;  %v8042_v18 = vadd.f32 %v8002_v11, %v7842_v15  ;;  %v7482_v6 = vpop.f32.mrf.mxu2  ;;  %v17815_v11 = vld [vmem:[#allocation82_spill] sm:$0xff]  ;;  %v17816_v21 = vld [vmem:[#allocation5_spill] sm:$0xff]  ;;  %v7439_v56 = vpop.f32.mrf.mxu0  ;;  %v17817_v15 = vld [vmem:[#allocation83_spill] sm:$0xff] }
 0x449   :  { %17813 = vst [vmem:[#allocation27_spill] sm:$0xff] %v14706_v10  ;;  %vm8321_vm10 = vcmp.eq.s32.totalorder %v8241_v2, %v17765_v5  ;;  %v8133_v41 = vadd.s32 368, %v14370_v47  ;;  %v7923_v40 = vrot.slane %v14706_v10, 4  ;;  %vm8297_vm11 = vcmp.eq.s32.totalorder %v8217_v43, %v17765_v5 }
 0x44a   :  { %17814 = vst [vmem:[#allocation157_spill] sm:$0xff] %v14708_v32  ;;  %v7924_v58 = vrot.slane %v14708_v32, 4  ;;  %10859 = vmatpush.msk.msrb.mxu0 %vm8321_vm10, %v17770_v35  ;;  %vm8277_vm12 = vcmp.eq.s32.totalorder %v8197_v49, %v17765_v5  ;;  %v8061_v26 = vadd.f32 %v8041_v57, %v14385_v59  ;;  %v8062_v53 = vadd.f32 %v8042_v18, %v14387_v50 }
 0x44b   :  { %v7637_v48 = vadd.f32 %v7482_v6, %v17815_v11  ;;  %v7638_v60 = vadd.f32 %v7505_v1, %v17816_v21  ;;  %v7462_v54 = vpop.f32.mrf.mxu1  ;;  %10851 = vmatpush.msk.msra.mxu3 %vm8297_vm11, %v17770_v35  ;;  %v7675_v2 = vadd.f32 %v7439_v56, %v17817_v15  ;;  %v8003_v13 = vadd.f32 %v7923_v40, %v14706_v10  ;;  %v15255_v10 = vld [vmem:[%s16729_s2 + $0x148] sm:$0xff] }
 0x44c   :  { %v7676_v43 = vadd.f32 %v7462_v54, %v17818_v9  ;;  %v8004_v49 = vadd.f32 %v7924_v58, %v14708_v32  ;;  %10807 = vmatpush.msk.msra.mxu1 %vm8277_vm12, %v17770_v35  ;;  %v14729_v59 = vadd.f32 %v8061_v26, %v14534_v46  ;;  %v14732_v50 = vadd.f32 %v8062_v53, %v14537_v14 }
 0x44d   :  { %v7725_v57 = vadd.f32 %v13968_v29, %v7637_v48  ;;  %v7726_v18 = vadd.f32 %v13968_v29, %v7638_v60  ;;  %v7763_v6 = vadd.f32 %v14046_v24, %v7675_v2  ;;  %v8213_v1 = vand.u32 7, %v8133_v41  ;;  %17857 = vst [vmem:[#allocation185_spill] sm:$0xff] %v15255_v10 }
 0x44e   :  { %v7764_v40 = vadd.f32 %v14046_v24, %v7676_v43  ;;  %v8160_v9 = vadd.s32 584, %v14370_v47  ;;  %v8136_v46 = vadd.s32 392, %v14370_v47  ;;  %v8116_v14 = vadd.s32 232, %v14370_v47 }
 0x44f   :  { %v14739_v58 = vmax.f32 %v7725_v57, 0.0  ;;  %v14741_v11 = vmax.f32 %v7726_v18, 0.0  ;;  %v7843_v26 = vmax.f32 %v7763_v6, 0.0  ;;  %vm8293_vm13 = vcmp.eq.s32.totalorder %v8213_v1, %v17765_v5  ;;  %v7508_v57 = vpop.f32.mrf.mxu3  ;;  %v17821_v1 = vld [vmem:[#allocation84_spill] sm:$0xff] }
 0x450   :  { %v7844_v53 = vmax.f32 %v7764_v40, 0.0  ;;  %v8240_v48 = vand.u32 7, %v8160_v9  ;;  %10823 = vmatpush.msk.msra.mxu2 %vm8293_vm13, %v17770_v35  ;;  %v8216_v41 = vand.u32 7, %v8136_v46  ;;  %v8196_v56 = vand.u32 7, %v8116_v14  ;;  %v7485_v43 = vpop.f32.mrf.mxu2 }
 0x451   :  { %17819 = vst [vmem:[#allocation28_spill] sm:$0xff] %v14739_v58  ;;  %v7925_v21 = vrot.slane %v14739_v58, 4  ;;  %v7926_v60 = vrot.slane %v14741_v11, 4  ;;  %v8043_v54 = vadd.f32 %v8003_v13, %v7843_v26  ;;  %v8132_v2 = vadd.s32 360, %v14370_v47 }
 0x452   :  { %17820 = vst [vmem:[#allocation158_spill] sm:$0xff] %v14741_v11  ;;  %v8044_v15 = vadd.f32 %v8004_v49, %v7844_v53  ;;  %vm8320_vm14 = vcmp.eq.s32.totalorder %v8240_v48, %v17765_v5  ;;  %vm8296_vm15 = vcmp.eq.s32.totalorder %v8216_v41, %v17765_v5  ;;  %vm8276_vm0 = vcmp.eq.s32.totalorder %v8196_v56, %v17765_v5  ;;  %v17822_v53 = vld [vmem:[#allocation127_spill] sm:$0xff]  ;;  %v14774_v56 = vld [vmem:[%s16729_s2 + $0x78] sm:$0xff] }
 0x453   :  { %10860 = vmatpush.msk.msrb.mxu0 %vm8320_vm14, %v17770_v35  ;;  %v8159_v18 = vadd.s32 576, %v14370_v47  ;;  %v8135_v6 = vadd.s32 384, %v14370_v47  ;;  %v8063_v40 = vadd.f32 %v8043_v54, %v14390_v7  ;;  %10852 = vmatpush.msk.msra.mxu3 %vm8296_vm15, %v17770_v35  ;;  %v8212_v49 = vand.u32 7, %v8132_v2  ;;  %v7528_v54 = vpop.f32.mrf.mxu0 }
 0x454   :  { %v8064_v13 = vadd.f32 %v8044_v15, %v14392_v61  ;;  %10808 = vmatpush.msk.msra.mxu1 %vm8276_vm0, %v17770_v35  ;;  %v7677_v9 = vadd.f32 %v7485_v43, %v17821_v1  ;;  %v8005_v26 = vadd.f32 %v7925_v21, %v14739_v58  ;;  %v7678_v48 = vadd.f32 %v7508_v57, %v17822_v53  ;;  %v7551_v15 = vpop.f32.mrf.mxu1 }
 0x455   :  { %v8239_v46 = vand.u32 7, %v8159_v18  ;;  %v8215_v14 = vand.u32 7, %v8135_v6  ;;  %v14764_v41 = vadd.f32 %v8063_v40, %v14578_v12  ;;  %vm8292_vm2 = vcmp.eq.s32.totalorder %v8212_v49, %v17765_v5  ;;  %v14789_v18 = vld [vmem:[%s16729_s2 + $0x70] sm:$0xff] }
 0x456   :  { %v14767_v7 = vadd.f32 %v8064_v13, %v14581_v0  ;;  %v7765_v61 = vadd.f32 %v14046_v24, %v7677_v9  ;;  %10824 = vmatpush.msk.msra.mxu2 %vm8292_vm2, %v17770_v35  ;;  %v7766_v12 = vadd.f32 %v14046_v24, %v7678_v48  ;;  %v8006_v0 = vadd.f32 %v7926_v60, %v14741_v11  ;;  %v17856_v11 = vld [vmem:[#allocation125_spill] sm:$0xff] }
 0x457   :  { %vm8319_vm4 = vcmp.eq.s32.totalorder %v8239_v46, %v17765_v5  ;;  %vm8295_vm5 = vcmp.eq.s32.totalorder %v8215_v14, %v17765_v5  ;;  %v8115_v2 = vadd.s32 224, %v14370_v47  ;;  %v8131_v43 = vadd.s32 352, %v14370_v47 }
 0x458   :  { %10861 = vmatpush.msk.msrb.mxu0 %vm8319_vm4, %v17770_v35  ;;  %10853 = vmatpush.msk.msra.mxu3 %vm8295_vm5, %v17770_v35  ;;  %v7845_v21 = vmax.f32 %v7765_v61, 0.0  ;;  %v8158_v57 = vadd.s32 568, %v14370_v47  ;;  %v7846_v6 = vmax.f32 %v7766_v12, 0.0  ;;  %v7639_v60 = vadd.f32 %v7528_v54, %v14227_v23  ;;  %v14801_v23 = vld [vmem:[%s16729_s2 + $0x68] sm:$0xff] }
 0x459   :  { %v7640_v40 = vadd.f32 %v7551_v15, %v14237_v62  ;;  %v8114_v13 = vadd.s32 216, %v14370_v47  ;;  %v8195_v1 = vand.u32 7, %v8115_v2  ;;  %v8211_v9 = vand.u32 7, %v8131_v43 }
 0x45a   :  { %8652 = vmatpush.msrb.mxu3 %v14774_v56  ;;  %v8045_v49 = vadd.f32 %v8005_v26, %v7845_v21  ;;  %v8238_v46 = vand.u32 7, %v8158_v57  ;;  %v8046_v14 = vadd.f32 %v8006_v0, %v7846_v6  ;;  %v7727_v53 = vadd.f32 %v13968_v29, %v7639_v60  ;;  %v14836_v6 = vld [vmem:[%s16729_s2 + $0x58] sm:$0xff] }
 0x45b   :  { %v7728_v48 = vadd.f32 %v13968_v29, %v7640_v40  ;;  %v8194_v61 = vand.u32 7, %v8114_v13  ;;  %vm8275_vm8 = vcmp.eq.s32.totalorder %v8195_v1, %v17765_v5  ;;  %vm8291_vm9 = vcmp.eq.s32.totalorder %v8211_v9, %v17765_v5 }
 0x45c   :  { %8653 = vmatpush.msrb.mxu3 %v14789_v18  ;;  %v8065_v62 = vadd.f32 %v8045_v49, %v14415_v36  ;;  %vm8318_vm10 = vcmp.eq.s32.totalorder %v8238_v46, %v17765_v5  ;;  %v8066_v26 = vadd.f32 %v8046_v14, %v14417_v42  ;;  %10809 = vmatpush.msk.msra.mxu1 %vm8275_vm8, %v17770_v35  ;;  %v14810_v54 = vmax.f32 %v7727_v53, 0.0  ;;  %v14818_v36 = vld [vmem:[%s16729_s2 + $0x60] sm:$0xff]  ;;  %v7574_v14 = vpop.f32.mrf.mxu2  ;;  %v7597_v53 = vpop.f32.mrf.mxu3 }
 0x45d   :  { %10825 = vmatpush.msk.msra.mxu2 %vm8291_vm9, %v17770_v35  ;;  %v14812_v15 = vmax.f32 %v7728_v48, 0.0  ;;  %vm8274_vm11 = vcmp.eq.s32.totalorder %v8194_v61, %v17765_v5  ;;  %10862 = vmatpush.msk.msrb.mxu0 %vm8318_vm10, %v17770_v35  ;;  %v8130_v42 = vadd.s32 344, %v14370_v47  ;;  %v8157_v0 = vadd.s32 560, %v14370_v47  ;;  %v14846_v48 = vld [vmem:[%s16729_s2 + $0x50] sm:$0xff] }
 0x45e   :  { %17823 = vst [vmem:[#allocation112_spill] sm:$0xff] %v14810_v54  ;;  %v14821_v12 = vadd.f32 %v8065_v62, %v14622_v63  ;;  %v8113_v21 = vadd.s32 208, %v14370_v47  ;;  %8654 = vmatpush.msrb.mxu3 %v14801_v23  ;;  %v8076_v2 = vadd.f32 %v8066_v26, %v14625_v38  ;;  %v7927_v43 = vrot.slane %v14810_v54, 4  ;;  %10810 = vmatpush.msk.msra.mxu1 %vm8274_vm11, %v17770_v35 }
 0x45f   :  { %17824 = vst [vmem:[#allocation159_spill] sm:$0xff] %v14812_v15  ;;  %v7928_v57 = vrot.slane %v14812_v15, 4  ;;  %v8129_v63 = vadd.s32 336, %v14370_v47  ;;  %v8210_v60 = vand.u32 7, %v8130_v42  ;;  %v8237_v40 = vand.u32 7, %v8157_v0  ;;  %v14859_v42 = vld [vmem:[%s16729_s2 + $0x48] sm:$0xff] }
 0x460   :  { %v8193_v13 = vand.u32 7, %v8113_v21  ;;  %v8156_v49 = vadd.s32 552, %v14370_v47  ;;  %8655 = vmatpush.msrb.mxu3 %v14818_v36  ;;  %v8081_v38 = vadd.f32 %v8076_v2, %v14729_v59  ;;  %v8112_v9 = vadd.s32 200, %v14370_v47 }
 0x461   :  { %v8209_v1 = vand.u32 7, %v8129_v63  ;;  %v8128_v46 = vadd.s32 328, %v14370_v47  ;;  %vm8290_vm12 = vcmp.eq.s32.totalorder %v8210_v60, %v17765_v5  ;;  %vm8317_vm13 = vcmp.eq.s32.totalorder %v8237_v40, %v17765_v5  ;;  %v7531_v63 = vpop.f32.mrf.mxu0 }
 0x462   :  { %vm8273_vm14 = vcmp.eq.s32.totalorder %v8193_v13, %v17765_v5  ;;  %v8236_v61 = vand.u32 7, %v8156_v49  ;;  %8656 = vmatpush.msrb.mxu3 %v14836_v6  ;;  %10826 = vmatpush.msk.msra.mxu2 %vm8290_vm12, %v17770_v35  ;;  %v8192_v59 = vand.u32 7, %v8112_v9  ;;  %v8155_v26 = vadd.s32 544, %v14370_v47  ;;  %v7554_v9 = vpop.f32.mrf.mxu1 }
 0x463   :  { %10863 = vmatpush.msk.msrb.mxu0 %vm8317_vm13, %v17770_v35  ;;  %vm8289_vm15 = vcmp.eq.s32.totalorder %v8209_v1, %v17765_v5  ;;  %v8208_v62 = vand.u32 7, %v8128_v46  ;;  %10811 = vmatpush.msk.msra.mxu1 %vm8273_vm14, %v17770_v35  ;;  %v7641_v0 = vadd.f32 %v7574_v14, %v14241_v25  ;;  %v7642_v21 = vadd.f32 %v7597_v53, %v14245_v44  ;;  %v14875_v25 = vld [vmem:[%s16729_s2 + $0x40] sm:$0xff]  ;;  %v17825_v14 = vld [vmem:[#allocation88_spill] sm:$0xff] }
 0x464   :  { %vm8316_vm0 = vcmp.eq.s32.totalorder %v8236_v61, %v17765_v5  ;;  %v8111_v2 = vadd.s32 192, %v14370_v47  ;;  %8657 = vmatpush.msrb.mxu3 %v14846_v48  ;;  %10827 = vmatpush.msk.msra.mxu2 %vm8289_vm15, %v17770_v35  ;;  %vm8272_vm2 = vcmp.eq.s32.totalorder %v8192_v59, %v17765_v5  ;;  %v8235_v60 = vand.u32 7, %v8155_v26 }
 0x465   :  { %10864 = vmatpush.msk.msrb.mxu0 %vm8316_vm0, %v17770_v35  ;;  %vm8288_vm4 = vcmp.eq.s32.totalorder %v8208_v62, %v17765_v5  ;;  %v8127_v40 = vadd.s32 320, %v14370_v47  ;;  %10812 = vmatpush.msk.msra.mxu1 %vm8272_vm2, %v17770_v35  ;;  %v7729_v44 = vadd.f32 %v13968_v29, %v7641_v0  ;;  %v7730_v13 = vadd.f32 %v13968_v29, %v7642_v21  ;;  %v14889_v29 = vld [vmem:[%s16729_s2 + $0x38] sm:$0xff] }
 0x466   :  { %v8191_v49 = vand.u32 7, %v8111_v2  ;;  %v8154_v1 = vadd.s32 536, %v14370_v47  ;;  %8658 = vmatpush.msrb.mxu3 %v14859_v42  ;;  %10828 = vmatpush.msk.msra.mxu2 %vm8288_vm4, %v17770_v35  ;;  %vm8315_vm5 = vcmp.eq.s32.totalorder %v8235_v60, %v17765_v5  ;;  %v7679_v53 = vadd.f32 %v7531_v63, %v17825_v14  ;;  %v14908_v2 = vld [vmem:[%s16729_s2 + $0x30] sm:$0xff] }
 0x467   :  { %v8207_v46 = vand.u32 7, %v8127_v40  ;;  %v8007_v61 = vadd.f32 %v7927_v43, %v14810_v54  ;;  %8423 = vmatmul.f32.vlgmr.msra.gmra.mxu0 %v8081_v38  ;;  %v14892_v59 = vmax.f32 %v7729_v44, 0.0  ;;  %v14894_v62 = vmax.f32 %v7730_v13, 0.0  ;;  %v17828_v38 = vld [vmem:[#allocation131_spill] sm:$0xff] }
 0x468   :  { %10865 = vmatpush.msk.msrb.mxu0 %vm8315_vm5, %v17770_v35  ;;  %vm8271_vm8 = vcmp.eq.s32.totalorder %v8191_v49, %v17765_v5  ;;  %v8234_v26 = vand.u32 7, %v8154_v1  ;;  %8659 = vmatpush.msrb.mxu3 %v14875_v25  ;;  %v7767_v43 = vadd.f32 %v14046_v24, %v7679_v53  ;;  %v7680_v0 = vadd.f32 %v7554_v9, %v17828_v38  ;;  %v14923_v1 = vld [vmem:[%s16729_s2 + $0x28] sm:$0xff] }
 0x469   :  { %17826 = vst [vmem:[#allocation113_spill] sm:$0xff] %v14892_v59  ;;  %10813 = vmatpush.msk.msra.mxu1 %vm8271_vm8, %v17770_v35  ;;  %vm8287_vm9 = vcmp.eq.s32.totalorder %v8207_v46, %v17765_v5  ;;  %v8008_v21 = vadd.f32 %v7928_v57, %v14812_v15  ;;  %v7929_v63 = vrot.slane %v14892_v59, 4  ;;  %v7930_v60 = vrot.slane %v14894_v62, 4 }
 0x46a   :  { %17827 = vst [vmem:[#allocation160_spill] sm:$0xff] %v14894_v62  ;;  %10829 = vmatpush.msk.msra.mxu2 %vm8287_vm9, %v17770_v35  ;;  %vm8314_vm10 = vcmp.eq.s32.totalorder %v8234_v26, %v17765_v5  ;;  %v8110_v40 = vadd.s32 184, %v14370_v47  ;;  %8660 = vmatpush.msrb.mxu3 %v14889_v29  ;;  %v7847_v57 = vmax.f32 %v7767_v43, 0.0  ;;  %v7768_v44 = vadd.f32 %v14046_v24, %v7680_v0 }
 0x46b   :  { %10866 = vmatpush.msk.msrb.mxu0 %vm8314_vm10, %v17770_v35  ;;  %v8126_v13 = vadd.s32 312, %v14370_v47  ;;  %v8153_v49 = vadd.s32 528, %v14370_v47  ;;  %v8109_v46 = vadd.s32 176, %v14370_v47  ;;  %v8125_v14 = vadd.s32 304, %v14370_v47 }
 0x46c   :  { %v8190_v9 = vand.u32 7, %v8110_v40  ;;  %v8152_v53 = vadd.s32 520, %v14370_v47  ;;  %8661 = vmatpush.msrb.mxu3 %v14908_v2  ;;  %v8047_v26 = vadd.f32 %v8007_v61, %v7847_v57  ;;  %v7848_v43 = vmax.f32 %v7768_v44, 0.0  ;;  %v14934_v40 = vld [vmem:[%s16729_s2 + $0x20] sm:$0xff]  ;;  %v7577_v61 = vpop.f32.mrf.mxu2  ;;  %v7600_v57 = vpop.f32.mrf.mxu3 }
 0x46d   :  { %v8206_v38 = vand.u32 7, %v8126_v13  ;;  %v8233_v0 = vand.u32 7, %v8153_v49  ;;  %v8189_v54 = vand.u32 7, %v8109_v46  ;;  %v8205_v58 = vand.u32 7, %v8125_v14 }
 0x46e   :  { %vm8270_vm11 = vcmp.eq.s32.totalorder %v8190_v9, %v17765_v5  ;;  %v8232_v15 = vand.u32 7, %v8152_v53  ;;  %8662 = vmatpush.msrb.mxu3 %v14923_v1  ;;  %v8067_v32 = vadd.f32 %v8047_v26, %v14451_v31  ;;  %v8048_v30 = vadd.f32 %v8008_v21, %v7848_v43  ;;  %v14949_v21 = vld [vmem:[%s16729_s2 + $0x18] sm:$0xff] }
 0x46f   :  { %10814 = vmatpush.msk.msra.mxu1 %vm8270_vm11, %v17770_v35  ;;  %vm8286_vm12 = vcmp.eq.s32.totalorder %v8206_v38, %v17765_v5  ;;  %vm8313_vm13 = vcmp.eq.s32.totalorder %v8233_v0, %v17765_v5  ;;  %vm8269_vm14 = vcmp.eq.s32.totalorder %v8189_v54, %v17765_v5  ;;  %vm8285_vm15 = vcmp.eq.s32.totalorder %v8205_v58, %v17765_v5 }
 0x470   :  { %10830 = vmatpush.msk.msra.mxu2 %vm8286_vm12, %v17770_v35  ;;  %10867 = vmatpush.msk.msrb.mxu0 %vm8313_vm13, %v17770_v35  ;;  %vm8312_vm0 = vcmp.eq.s32.totalorder %v8232_v15, %v17765_v5  ;;  %v8108_v31 = vadd.s32 168, %v14370_v47  ;;  %v8077_v44 = vadd.f32 %v8067_v32, %v14651_v39  ;;  %v8068_v13 = vadd.f32 %v8048_v30, %v14453_v3  ;;  %v17829_v39 = vld [vmem:[#allocation92_spill] sm:$0xff]  ;;  %v14965_v3 = vld [vmem:[%s16729_s2 + $0x10] sm:$0xff] }
 0x471   :  { %10815 = vmatpush.msk.msra.mxu1 %vm8269_vm14, %v17770_v35  ;;  %v8124_v49 = vadd.s32 296, %v14370_v47  ;;  %v8151_v54 = vadd.s32 512, %v14370_v47  ;;  %8663 = vmatpush.msrb.mxu3 %v14934_v40  ;;  %v7681_v15 = vadd.f32 %v7577_v61, %v14268_v55  ;;  %v8009_v9 = vadd.f32 %v7929_v63, %v14892_v59  ;;  %v14976_v55 = vld [vmem:[%s16729_s2 + $0x1f8] sm:$0xff]  ;;  %v15241_v59 = vld [vmem:[%s16729_s2 + $0x150] sm:$0xff] }
 0x472   :  { %10831 = vmatpush.msk.msra.mxu2 %vm8285_vm15, %v17770_v35  ;;  %10868 = vmatpush.msk.msrb.mxu0 %vm8312_vm0, %v17770_v35  ;;  %v8188_v58 = vand.u32 7, %v8108_v31  ;;  %v7682_v32 = vadd.f32 %v7600_v57, %v17829_v39  ;;  %v14968_v30 = vadd.f32 %v8077_v44, %v14732_v50  ;;  %v8078_v46 = vadd.f32 %v8068_v13, %v14654_v17  ;;  %v14984_v17 = vld [vmem:[%s16729_s2 + $0x8] sm:$0xff]  ;;  %v15006_v57 = vld [vmem:[%s16729_s2] sm:$0xff] }
 0x473   :  { %v8204_v14 = vand.u32 7, %v8124_v49  ;;  %v8231_v53 = vand.u32 7, %v8151_v54  ;;  %8664 = vmatpush.msrb.mxu3 %v14949_v21  ;;  %17830 = vst [vmem:[#allocation33_spill] sm:$0xff] %v14976_v55  ;;  %v7769_v63 = vadd.f32 %v14046_v24, %v7681_v15  ;;  %v8010_v50 = vadd.f32 %v7930_v60, %v14894_v62  ;;  %v15247_v62 = vld [vmem:[%s16729_s2 + $0x228] sm:$0xff] }
 0x474   :  { %vm8268_vm2 = vcmp.eq.s32.totalorder %v8188_v58, %v17765_v5  ;;  %v7770_v26 = vadd.f32 %v14046_v24, %v7682_v32  ;;  %v14987_v43 = vadd.f32 %v8078_v46, %v14764_v41  ;;  %v8107_v38 = vadd.s32 160, %v14370_v47  ;;  %v15000_v41 = vld [vmem:[%s16729_s2 + $0x1f0] sm:$0xff]  ;;  %v15016_v32 = vld [vmem:[%s16729_s2 + $0x1e8] sm:$0xff]  ;;  %17855 = vst [vmem:[#allocation184_spill] sm:$0xff] %v15247_v62 }
 0x475   :  { %10816 = vmatpush.msk.msra.mxu1 %vm8268_vm2, %v17770_v35  ;;  %vm8284_vm4 = vcmp.eq.s32.totalorder %v8204_v14, %v17765_v5  ;;  %vm8311_vm5 = vcmp.eq.s32.totalorder %v8231_v53, %v17765_v5  ;;  %8665 = vmatpush.msrb.mxu3 %v14965_v3  ;;  %v7849_v24 = vmax.f32 %v7769_v63, 0.0  ;;  %v8123_v0 = vadd.s32 288, %v14370_v47  ;;  %17831 = vst [vmem:[#allocation163_spill] sm:$0xff] %v15000_v41 }
 0x476   :  { %10832 = vmatpush.msk.msra.mxu2 %vm8284_vm4, %v17770_v35  ;;  %10869 = vmatpush.msk.msrb.mxu0 %vm8311_vm5, %v17770_v35  ;;  %v7850_v60 = vmax.f32 %v7770_v26, 0.0  ;;  %v8106_v61 = vadd.s32 152, %v14370_v47  ;;  %v8187_v31 = vand.u32 7, %v8107_v38  ;;  %v8122_v44 = vadd.s32 280, %v14370_v47  ;;  %17832 = vst [vmem:[#allocation31_spill] sm:$0xff] %v15016_v32  ;;  %v15029_v26 = vld [vmem:[%s16729_s2 + $0x1e0] sm:$0xff] }
 0x477   :  { %v8105_v13 = vadd.s32 144, %v14370_v47  ;;  %v8121_v49 = vadd.s32 272, %v14370_v47  ;;  %8666 = vmatpush.msrb.mxu3 %v14984_v17  ;;  %v8049_v54 = vadd.f32 %v8009_v9, %v7849_v24  ;;  %v8203_v15 = vand.u32 7, %v8123_v0  ;;  %17833 = vst [vmem:[#allocation164_spill] sm:$0xff] %v15029_v26 }
 0x478   :  { %8712 = vmatpush.msra.mxu0 %v14976_v55  ;;  %v8050_v58 = vadd.f32 %v8010_v50, %v7850_v60  ;;  %v8186_v39 = vand.u32 7, %v8106_v61  ;;  %vm8267_vm8 = vcmp.eq.s32.totalorder %v8187_v31, %v17765_v5  ;;  %v8202_v46 = vand.u32 7, %v8122_v44  ;;  %v15048_v60 = vld [vmem:[%s16729_s2 + $0x1d8] sm:$0xff] }
 0x479   :  { %v8185_v14 = vand.u32 7, %v8105_v13  ;;  %v8201_v53 = vand.u32 7, %v8121_v49  ;;  %8667 = vmatpush.msrb.mxu3 %v15006_v57  ;;  %v8069_v63 = vadd.f32 %v8049_v54, %v14482_v20  ;;  %10817 = vmatpush.msk.msra.mxu1 %vm8267_vm8, %v17770_v35  ;;  %vm8283_vm9 = vcmp.eq.s32.totalorder %v8203_v15, %v17765_v5  ;;  %17836 = vst [vmem:[#allocation116_spill] sm:$0xff] %v15048_v60  ;;  %v15060_v49 = vld [vmem:[%s16729_s2 + $0x1d0] sm:$0xff]  ;;  %v15082_v54 = vld [vmem:[%s16729_s2 + $0x278] sm:$0xff] }
 0x47a   :  { %8713 = vmatpush.msra.mxu0 %v15000_v41  ;;  %v8070_v9 = vadd.f32 %v8050_v58, %v14484_v16  ;;  %vm8266_vm10 = vcmp.eq.s32.totalorder %v8186_v39, %v17765_v5  ;;  %10833 = vmatpush.msk.msra.mxu2 %vm8283_vm9, %v17770_v35  ;;  %vm8282_vm11 = vcmp.eq.s32.totalorder %v8202_v46, %v17765_v5  ;;  %v8104_v16 = vadd.s32 136, %v14370_v47  ;;  %v15089_v58 = vld [vmem:[%s16729_s2 + $0x1c0] sm:$0xff]  ;;  %v15096_v15 = vld [vmem:[%s16729_s2 + $0x270] sm:$0xff]  ;;  %v15101_v39 = vld [vmem:[%s16729_s2 + $0x1b8] sm:$0xff] }
 0x47b   :  { %vm8265_vm12 = vcmp.eq.s32.totalorder %v8185_v14, %v17765_v5  ;;  %vm15036_vm13 = vcmp.eq.s32.totalorder %v8201_v53, %v17765_v5  ;;  %v8079_v50 = vadd.f32 %v8069_v63, %v14690_v22  ;;  %10818 = vmatpush.msk.msra.mxu1 %vm8266_vm10, %v17770_v35  ;;  %v8120_v24 = vadd.s32 264, %v14370_v47  ;;  %17837 = vst [vmem:[#allocation166_spill] sm:$0xff] %v15060_v49  ;;  %v15126_v46 = vld [vmem:[%s16729_s2 + $0x260] sm:$0xff]  ;;  %v15132_v53 = vld [vmem:[%s16729_s2 + $0x1a8] sm:$0xff]  ;;  %v15142_v63 = vld [vmem:[%s16729_s2 + $0x258] sm:$0xff] }
 0x47c   :  { %8714 = vmatpush.msra.mxu0 %v15016_v32  ;;  %v8080_v38 = vadd.f32 %v8070_v9, %v14693_v34  ;;  %v8103_v0 = vadd.s32 128, %v14370_v47  ;;  %10834 = vmatpush.msk.msra.mxu2 %vm8282_vm11, %v17770_v35  ;;  %v8184_v61 = vand.u32 7, %v8104_v16  ;;  %v8119_v22 = vadd.s32 256, %v14370_v47  ;;  %17839 = vst [vmem:[#allocation167_spill] sm:$0xff] %v15089_v58  ;;  %v17842_v14 = vld [vmem:[#allocation85_spill] sm:$0xff]  ;;  %v15153_v20 = vld [vmem:[%s16729_s2 + $0x178] sm:$0xff] }
 0x47d   :  { %v8084_v34 = vadd.f32 %v8079_v50, %v14767_v7  ;;  %10819 = vmatpush.msk.msra.mxu1 %vm8265_vm12, %v17770_v35  ;;  %v8200_v44 = vand.u32 7, %v8120_v24  ;;  %17840 = vst [vmem:[#allocation35_spill] sm:$0xff] %v15101_v39  ;;  %v15147_v9 = vld [vmem:[%s16729_s2 + $0x1a0] sm:$0xff]  ;;  %v15162_v16 = vld [vmem:[%s16729_s2 + $0x250] sm:$0xff]  ;;  %v15168_v50 = vld [vmem:[%s16729_s2 + $0x198] sm:$0xff]  ;;  %vm8595_vm4 = vcmask 64512  }
 0x47e   :  { %8715 = vmatpush.msra.mxu0 %v15029_v26  ;;  %v8085_v31 = vadd.f32 %v8080_v38, %v14821_v12  ;;  %v8183_v13 = vand.u32 7, %v8103_v0  ;;  %10835 = vmatpush.msk.msra.mxu2 %vm15036_vm13, %v17770_v35  ;;  %vm8264_vm14 = vcmp.eq.s32.totalorder %v8184_v61, %v17765_v5  ;;  %v8199_v7 = vand.u32 7, %v8119_v22  ;;  %v15076_v12 = vld [vmem:[%s16729_s2 + $0x1c8] sm:$0xff]  ;;  %17843 = vst [vmem:[#allocation36_spill] sm:$0xff] %v15132_v53  ;;  %v15174_v38 = vld [vmem:[%s16729_s2 + $0x170] sm:$0xff]  ;;  %v15198_v22 = vld [vmem:[%s16729_s2 + $0x240] sm:$0xff] }
 0x47f   :  { %10820 = vmatpush.msk.msra.mxu1 %vm8264_vm14, %v17770_v35  ;;  %vm8280_vm15 = vcmp.eq.s32.totalorder %v8200_v44, %v17765_v5  ;;  %8483 = vmatmul.f32.vlgmr.msra.gmra.mxu3 %v8084_v34  ;;  %17838 = vst [vmem:[#allocation117_spill] sm:$0xff] %v15076_v12  ;;  %v15180_v24 = vld [vmem:[%s16729_s2 + $0x248] sm:$0xff]  ;;  %v15186_v0 = vld [vmem:[%s16729_s2 + $0x190] sm:$0xff]  ;;  %v15216_v44 = vld [vmem:[%s16729_s2 + $0x238] sm:$0xff]  ;;  %vm8620_vm10 = vcmask 257024   ;;  %vm8628_vm11 = vcmask 261120  }
 0x480   :  { %8716 = vmatpush.msra.mxu0 %v15048_v60  ;;  %vm8263_vm0 = vcmp.eq.s32.totalorder %v8183_v13, %v17765_v5  ;;  %10836 = vmatpush.msk.msra.mxu2 %vm8280_vm15, %v17770_v35  ;;  %vm8279_vm2 = vcmp.eq.s32.totalorder %v8199_v7, %v17765_v5  ;;  %17844 = vst [vmem:[#allocation171_spill] sm:$0xff] %v15147_v9  ;;  %v15192_v61 = vld [vmem:[%s16729_s2 + $0x168] sm:$0xff]  ;;  %v15222_v13 = vld [vmem:[%s16729_s2 + $0x180] sm:$0xff]  ;;  %v15228_v7 = vld [vmem:[%s16729_s2 + $0x158] sm:$0xff] }
 0x481   :  { %10821 = vmatpush.msk.msra.mxu1 %vm8263_vm0, %v17770_v35  ;;  %8503 = vmatmul.f32.vlgmr.msrb.gmra.mxu0 %v8085_v31  ;;  %17845 = vst [vmem:[#allocation119_spill] sm:$0xff] %v15153_v20  ;;  %v15204_v34 = vld [vmem:[%s16729_s2 + $0x188] sm:$0xff]  ;;  %v15210_v31 = vld [vmem:[%s16729_s2 + $0x160] sm:$0xff]  ;;  %v15281_v5 = vld [vmem:[%s16729_s2 + $0x138] sm:$0xff] }
 0x482   :  { %8717 = vmatpush.msra.mxu0 %v15060_v49  ;;  %10837 = vmatpush.msk.msra.mxu2 %vm8279_vm2, %v17770_v35  ;;  %17846 = vst [vmem:[#allocation174_spill] sm:$0xff] %v15168_v50  ;;  %v15287_v47 = vld [vmem:[%s16729_s2 + $0x210] sm:$0xff] }
 0x483   :  { %8443 = vmatmul.f32.vlgmr.msra.gmra.mxu1 %v14968_v30  ;;  %8463 = vmatmul.f32.vlgmr.msra.gmra.mxu2 %v14987_v43  ;;  %v15111_v30 = vld [vmem:[%s16729_s2 + $0x268] sm:$0xff]  ;;  %v15116_v43 = vld [vmem:[%s16729_s2 + $0x1b0] sm:$0xff]  ;;  %17847 = vst [vmem:[#allocation120_spill] sm:$0xff] %v15174_v38 }
 0x484   :  { %8718 = vmatpush.msra.mxu0 %v15076_v12  ;;  %8732 = vmatpush.msra.mxu3 %v15082_v54  ;;  %17841 = vst [vmem:[#allocation170_spill] sm:$0xff] %v15116_v43 }
 0x485   :  { %10871 = vmatpush.msk.msrb.mxu2 %vm14521_vm3, %v17770_v35  ;;  %17848 = vst [vmem:[#allocation175_spill] sm:$0xff] %v15186_v0 }
 0x486   :  { %8719 = vmatpush.msra.mxu0 %v15089_v58  ;;  %8733 = vmatpush.msra.mxu3 %v15096_v15  ;;  %17849 = vst [vmem:[#allocation41_spill] sm:$0xff] %v15192_v61 }
 0x487   :  { %10872 = vmatpush.msk.msrb.mxu2 %vm14545_vm1, %v17770_v35  ;;  %8668 = vmatmul.f32.vlgmr.msrb.gmra.mxu3 %v17842_v14  ;;  %17850 = vst [vmem:[#allocation178_spill] sm:$0xff] %v15204_v34  ;;  %v15234_v14 = vld [vmem:[%s16729_s2 + $0x230] sm:$0xff] }
 0x488   :  { %8720 = vmatpush.msra.mxu0 %v15101_v39  ;;  %8734 = vmatpush.msra.mxu3 %v15111_v30  ;;  %17851 = vst [vmem:[#allocation39_spill] sm:$0xff] %v15210_v31 }
 0x489   :  { %10873 = vmatpush.msk.msrb.mxu2 %vm14572_vm7, %v17770_v35  ;;  %17852 = vst [vmem:[#allocation179_spill] sm:$0xff] %v15216_v44 }
 0x48a   :  { %8721 = vmatpush.msra.mxu0 %v15116_v43  ;;  %8735 = vmatpush.msra.mxu3 %v15126_v46  ;;  %17853 = vst [vmem:[#allocation182_spill] sm:$0xff] %v15228_v7 }
 0x48b   :  { %10874 = vmatpush.msk.msrb.mxu2 %vm14564_vm6, %v17770_v35  ;;  %17854 = vst [vmem:[#allocation183_spill] sm:$0xff] %v15234_v14 }
 0x48c   :  { %8722 = vmatpush.msra.mxu0 %v15132_v53  ;;  %8736 = vmatpush.msra.mxu3 %v15142_v63  ;;  %17860 = vst [vmem:[#allocation188_spill] sm:$0xff] %v15287_v47 }
 0x48d   :  { %8692 = vmatpush.msra.mxu2 %v15153_v20 }
 0x48e   :  { %8723 = vmatpush.msra.mxu0 %v15147_v9  ;;  %8737 = vmatpush.msra.mxu3 %v15162_v16 }
 0x48f   :  { %8693 = vmatpush.msra.mxu2 %v15174_v38 }
 0x490   :  { %8724 = vmatpush.msra.mxu0 %v15168_v50  ;;  %8738 = vmatpush.msra.mxu3 %v15180_v24 }
 0x491   :  { %8694 = vmatpush.msra.mxu2 %v15192_v61 }
 0x492   :  { %8725 = vmatpush.msra.mxu0 %v15186_v0  ;;  %8739 = vmatpush.msra.mxu3 %v15198_v22 }
 0x493   :  { %8695 = vmatpush.msra.mxu2 %v15210_v31 }
 0x494   :  { %8726 = vmatpush.msra.mxu0 %v15204_v34  ;;  %8740 = vmatpush.msra.mxu3 %v15216_v44  ;;  %v15330_v44 = vld [vmem:[%s16729_s2 + $0x118] sm:$0xff] }
 0x495   :  { %8696 = vmatpush.msra.mxu2 %v15228_v7  ;;  %17864 = vst [vmem:[#allocation190_spill] sm:$0xff] %v15330_v44 }
 0x496   :  { %8727 = vmatpush.msra.mxu0 %v15222_v13  ;;  %8741 = vmatpush.msra.mxu3 %v15234_v14  ;;  %v17863_v14 = vld [vmem:[#allocation132_spill] sm:$0xff] }
 0x497   :  { %8697 = vmatpush.msra.mxu2 %v15241_v59  ;;  %8728 = vmatmul.f32.vlgmr.msra.gmra.mxu0 %v17856_v11  ;;  %v15268_v11 = vld [vmem:[%s16729_s2 + $0x140] sm:$0xff] }
 0x498   :  { %8827 = vmatpush.msrb.mxu0 %v15153_v20  ;;  %8742 = vmatpush.msra.mxu3 %v15247_v62  ;;  %v15313_v62 = vld [vmem:[%s16729_s2 + $0x200] sm:$0xff] }
 0x499   :  { %8698 = vmatpush.msra.mxu2 %v15255_v10 }
 0x49a   :  { %8828 = vmatpush.msrb.mxu0 %v15174_v38  ;;  %8743 = vmatpush.msra.mxu3 %v15261_v37  ;;  %v15300_v37 = vld [vmem:[%s16729_s2 + $0x208] sm:$0xff] }
 0x49b   :  { %8699 = vmatpush.msra.mxu2 %v15268_v11  ;;  %17861 = vst [vmem:[#allocation189_spill] sm:$0xff] %v15300_v37 }
 0x49c   :  { %8829 = vmatpush.msrb.mxu0 %v15192_v61  ;;  %8744 = vmatpush.msra.mxu3 %v15274_v27  ;;  %v15307_v27 = vld [vmem:[%s16729_s2 + $0x128] sm:$0xff] }
 0x49d   :  { %8700 = vmatpush.msra.mxu2 %v15281_v5 }
 0x49e   :  { %8830 = vmatpush.msrb.mxu0 %v15210_v31  ;;  %8745 = vmatpush.msra.mxu3 %v15287_v47  ;;  %v15320_v47 = vld [vmem:[%s16729_s2 + $0x120] sm:$0xff] }
 0x49f   :  { %8701 = vmatpush.msra.mxu2 %v15294_v33  ;;  %17862 = vst [vmem:[#allocation3_spill] sm:$0xff] %v15320_v47 }
 0x4a0   :  { %8831 = vmatpush.msrb.mxu0 %v15228_v7  ;;  %8746 = vmatpush.msra.mxu3 %v15300_v37  ;;  %v15338_v37 = vld [vmem:[%s16729_s2 + $0x110] sm:$0xff] }
 0x4a1   :  { %8702 = vmatpush.msra.mxu2 %v15307_v27  ;;  %17865 = vst [vmem:[#allocation86_spill] sm:$0xff] %v15338_v37 }
 0x4a2   :  { %8832 = vmatpush.msrb.mxu0 %v15241_v59  ;;  %8747 = vmatpush.msra.mxu3 %v15313_v62 }
 0x4a3   :  { %8703 = vmatpush.msra.mxu2 %v15320_v47  ;;  %8748 = vmatmul.f32.vlgmr.msra.gmra.mxu3 %v17863_v14  ;;  %v15346_v14 = vld [vmem:[%s16729_s2 + $0x108] sm:$0xff] }
 0x4a4   :  { %8833 = vmatpush.msrb.mxu0 %v15255_v10  ;;  %8847 = vmatpush.msrb.mxu3 %v14976_v55  ;;  %17866 = vst [vmem:[#allocation129_spill] sm:$0xff] %v15346_v14  ;;  %v15354_v55 = vld [vmem:[%s16729_s2 + $0x100] sm:$0xff] }
 0x4a5   :  { %8704 = vmatpush.msra.mxu2 %v15330_v44  ;;  %17867 = vst [vmem:[#allocation87_spill] sm:$0xff] %v15354_v55 }
 0x4a6   :  { %8834 = vmatpush.msrb.mxu0 %v15268_v11  ;;  %8848 = vmatpush.msrb.mxu3 %v15000_v41 }
 0x4a7   :  { %8705 = vmatpush.msra.mxu2 %v15338_v37 }
 0x4a8   :  { %8835 = vmatpush.msrb.mxu0 %v15281_v5  ;;  %8849 = vmatpush.msrb.mxu3 %v15016_v32 }
 0x4a9   :  { %8706 = vmatpush.msra.mxu2 %v15346_v14 }
 0x4aa   :  { %8836 = vmatpush.msrb.mxu0 %v15294_v33  ;;  %8850 = vmatpush.msrb.mxu3 %v15029_v26  ;;  %v15370_v26 = vld [vmem:[%s16729_s2 + $0xf8] sm:$0xff] }
 0x4ab   :  { %8707 = vmatpush.msra.mxu2 %v15354_v55 }
 0x4ac   :  { %8837 = vmatpush.msrb.mxu0 %v15307_v27  ;;  %8851 = vmatpush.msrb.mxu3 %v15048_v60 }
 0x4ae   :  { %8838 = vmatpush.msrb.mxu0 %v15320_v47  ;;  %8852 = vmatpush.msrb.mxu3 %v15060_v49  ;;  %v17868_v49 = vld [vmem:[#allocation2_spill] sm:$0xff] }
 0x4b0   :  { %8839 = vmatpush.msrb.mxu0 %v15330_v44  ;;  %8853 = vmatpush.msrb.mxu3 %v15076_v12  ;;  %v15378_v12 = vld [vmem:[%s16729_s2 + $0xf0] sm:$0xff] }
 0x4b2   :  { %8840 = vmatpush.msrb.mxu0 %v15338_v37  ;;  %8854 = vmatpush.msrb.mxu3 %v15089_v58  ;;  %v15385_v58 = vld [vmem:[%s16729_s2 + $0xe8] sm:$0xff] }
 0x4b4   :  { %8841 = vmatpush.msrb.mxu0 %v15346_v14  ;;  %8855 = vmatpush.msrb.mxu3 %v15101_v39 }
 0x4b6   :  { %8842 = vmatpush.msrb.mxu0 %v15354_v55  ;;  %8856 = vmatpush.msrb.mxu3 %v15116_v43  ;;  %v15399_v43 = vld [vmem:[%s16729_s2 + $0xd8] sm:$0xff] }
 0x4b7   :  { %8843 = vmatmul.f32.vlgmr.msrb.gmra.mxu0 %v17868_v49  ;;  %v15392_v49 = vld [vmem:[%s16729_s2 + $0xe0] sm:$0xff] }
 0x4b8   :  { %8942 = vmatpush.msra.mxu0 %v15370_v26  ;;  %8857 = vmatpush.msrb.mxu3 %v15132_v53  ;;  %v15406_v53 = vld [vmem:[%s16729_s2 + $0xd0] sm:$0xff] }
 0x4ba   :  { %8943 = vmatpush.msra.mxu0 %v15378_v12  ;;  %8858 = vmatpush.msrb.mxu3 %v15147_v9  ;;  %v15413_v9 = vld [vmem:[%s16729_s2 + $0xc8] sm:$0xff] }
 0x4bc   :  { %8944 = vmatpush.msra.mxu0 %v15385_v58  ;;  %8859 = vmatpush.msrb.mxu3 %v15168_v50  ;;  %v15420_v50 = vld [vmem:[%s16729_s2 + $0xc0] sm:$0xff] }
 0x4be   :  { %8945 = vmatpush.msra.mxu0 %v15392_v49  ;;  %8860 = vmatpush.msrb.mxu3 %v15186_v0  ;;  %v15428_v0 = vld [vmem:[%s16729_s2 + $0xb8] sm:$0xff] }
 0x4c0   :  { %8946 = vmatpush.msra.mxu0 %v15399_v43  ;;  %8861 = vmatpush.msrb.mxu3 %v15204_v34  ;;  %v15435_v34 = vld [vmem:[%s16729_s2 + $0xb0] sm:$0xff] }
 0x4c2   :  { %8947 = vmatpush.msra.mxu0 %v15406_v53  ;;  %8862 = vmatpush.msrb.mxu3 %v15222_v13 }
 0x4c3   :  { %8863 = vmatmul.f32.vlgmr.msrb.gmra.mxu3 %v14313_v52  ;;  %v15442_v52 = vld [vmem:[%s16729_s2 + $0xa8] sm:$0xff] }
 0x4c4   :  { %8948 = vmatpush.msra.mxu0 %v15413_v9  ;;  %8962 = vmatpush.msra.mxu3 %v15153_v20  ;;  %v15449_v20 = vld [vmem:[%s16729_s2 + $0xa0] sm:$0xff] }
 0x4c6   :  { %8949 = vmatpush.msra.mxu0 %v15420_v50  ;;  %8963 = vmatpush.msra.mxu3 %v15174_v38  ;;  %v15456_v38 = vld [vmem:[%s16729_s2 + $0x98] sm:$0xff] }
 0x4c8   :  { %8950 = vmatpush.msra.mxu0 %v15428_v0  ;;  %8964 = vmatpush.msra.mxu3 %v15192_v61  ;;  %v15463_v61 = vld [vmem:[%s16729_s2 + $0x90] sm:$0xff] }
 0x4ca   :  { %8951 = vmatpush.msra.mxu0 %v15435_v34  ;;  %8965 = vmatpush.msra.mxu3 %v15210_v31  ;;  %v15470_v31 = vld [vmem:[%s16729_s2 + $0x88] sm:$0xff] }
 0x4cc   :  { %8952 = vmatpush.msra.mxu0 %v15442_v52  ;;  %8966 = vmatpush.msra.mxu3 %v15228_v7  ;;  %v15477_v7 = vld [vmem:[%s16729_s2 + $0x80] sm:$0xff] }
 0x4ce   :  { %8953 = vmatpush.msra.mxu0 %v15449_v20  ;;  %8967 = vmatpush.msra.mxu3 %v15241_v59 }
 0x4d0   :  { %8954 = vmatpush.msra.mxu0 %v15456_v38  ;;  %8968 = vmatpush.msra.mxu3 %v15255_v10  ;;  %v8587_v10 = vld [vmem:[%s16730_s3] sm:$0xff] }
 0x4d1   :  { %8614 = vmatpush.msrb.mxu1 %v8587_v10  ;;  %v17869_v10 = vld [vmem:[#allocation100_spill] sm:$0xff] }
 0x4d2   :  { %8955 = vmatpush.msra.mxu0 %v15463_v61  ;;  %8969 = vmatpush.msra.mxu3 %v15268_v11 }
 0x4d3   :  { %8672 = vmatpush.msra.mxu1 %v15370_v26 }
 0x4d4   :  { %8956 = vmatpush.msra.mxu0 %v15470_v31  ;;  %8970 = vmatpush.msra.mxu3 %v15281_v5 }
 0x4d5   :  { %8673 = vmatpush.msra.mxu1 %v15378_v12 }
 0x4d6   :  { %8957 = vmatpush.msra.mxu0 %v15477_v7  ;;  %8971 = vmatpush.msra.mxu3 %v15294_v33 }
 0x4d7   :  { %8958 = vmatmul.f32.vlgmr.msra.gmra.mxu0 %v14337_v4  ;;  %8674 = vmatpush.msra.mxu1 %v15385_v58 }
 0x4d8   :  { %10886 = vmatpush.msk.msrb.mxu0 %vm14521_vm3, %v17770_v35  ;;  %8972 = vmatpush.msra.mxu3 %v15307_v27 }
 0x4d9   :  { %8675 = vmatpush.msra.mxu1 %v15392_v49 }
 0x4da   :  { %10887 = vmatpush.msk.msrb.mxu0 %vm14545_vm1, %v17770_v35  ;;  %8973 = vmatpush.msra.mxu3 %v15320_v47 }
 0x4db   :  { %8676 = vmatpush.msra.mxu1 %v15399_v43 }
 0x4dc   :  { %10888 = vmatpush.msk.msrb.mxu0 %vm14572_vm7, %v17770_v35  ;;  %8974 = vmatpush.msra.mxu3 %v15330_v44 }
 0x4dd   :  { %8677 = vmatpush.msra.mxu1 %v15406_v53 }
 0x4de   :  { %10889 = vmatpush.msk.msrb.mxu0 %vm14564_vm6, %v17770_v35  ;;  %8975 = vmatpush.msra.mxu3 %v15338_v37 }
 0x4df   :  { %8678 = vmatpush.msra.mxu1 %v15413_v9 }
 0x4e0   :  { %9077 = vmatpush.msra.mxu0 %v15370_v26  ;;  %8976 = vmatpush.msra.mxu3 %v15346_v14 }
 0x4e1   :  { %8679 = vmatpush.msra.mxu1 %v15420_v50 }
 0x4e2   :  { %9078 = vmatpush.msra.mxu0 %v15378_v12  ;;  %8977 = vmatpush.msra.mxu3 %v15354_v55 }
 0x4e3   :  { %8978 = vmatmul.f32.vlgmr.msra.gmra.mxu3 %v14343_v8  ;;  %8680 = vmatpush.msra.mxu1 %v15428_v0 }
 0x4e4   :  { %9079 = vmatpush.msra.mxu0 %v15385_v58  ;;  %9057 = vmatpush.msrb.mxu3 %v14774_v56  ;;  %v8424_v8 = vpop.f32.mrf.mxu0 }
 0x4e5   :  { %8681 = vmatpush.msra.mxu1 %v15435_v34 }
 0x4e6   :  { %9080 = vmatpush.msra.mxu0 %v15392_v49  ;;  %9058 = vmatpush.msrb.mxu3 %v14789_v18 }
 0x4e7   :  { %8682 = vmatpush.msra.mxu1 %v15442_v52 }
 0x4e8   :  { %9081 = vmatpush.msra.mxu0 %v15399_v43  ;;  %9059 = vmatpush.msrb.mxu3 %v14801_v23 }
 0x4e9   :  { %8683 = vmatpush.msra.mxu1 %v15449_v20 }
 0x4ea   :  { %9082 = vmatpush.msra.mxu0 %v15406_v53  ;;  %9060 = vmatpush.msrb.mxu3 %v14818_v36 }
 0x4eb   :  { %8684 = vmatpush.msra.mxu1 %v15456_v38 }
 0x4ec   :  { %9083 = vmatpush.msra.mxu0 %v15413_v9  ;;  %9061 = vmatpush.msrb.mxu3 %v14836_v6 }
 0x4ed   :  { %8685 = vmatpush.msra.mxu1 %v15463_v61 }
 0x4ee   :  { %9084 = vmatpush.msra.mxu0 %v15420_v50  ;;  %9062 = vmatpush.msrb.mxu3 %v14846_v48 }
 0x4ef   :  { %8686 = vmatpush.msra.mxu1 %v15470_v31 }
 0x4f0   :  { %9085 = vmatpush.msra.mxu0 %v15428_v0  ;;  %9063 = vmatpush.msrb.mxu3 %v14859_v42 }
 0x4f1   :  { %8687 = vmatpush.msra.mxu1 %v15477_v7 }
 0x4f2   :  { %9086 = vmatpush.msra.mxu0 %v15435_v34  ;;  %9064 = vmatpush.msrb.mxu3 %v14875_v25  ;;  %v17870_v25 = vld [vmem:[#allocation179_spill] sm:$0xff] }
 0x4f4   :  { %9087 = vmatpush.msra.mxu0 %v15442_v52  ;;  %9065 = vmatpush.msrb.mxu3 %v14889_v29  ;;  %v17871_v29 = vld [vmem:[#allocation128_spill] sm:$0xff] }
 0x4f6   :  { %9088 = vmatpush.msra.mxu0 %v15449_v20  ;;  %9066 = vmatpush.msrb.mxu3 %v14908_v2  ;;  %v17872_v2 = vld [vmem:[#allocation183_spill] sm:$0xff] }
 0x4f8   :  { %9089 = vmatpush.msra.mxu0 %v15456_v38  ;;  %9067 = vmatpush.msrb.mxu3 %v14923_v1 }
 0x4fa   :  { %9090 = vmatpush.msra.mxu0 %v15463_v61  ;;  %9068 = vmatpush.msrb.mxu3 %v14934_v40 }
 0x4fc   :  { %9091 = vmatpush.msra.mxu0 %v15470_v31  ;;  %9069 = vmatpush.msrb.mxu3 %v14949_v21 }
 0x4fe   :  { %9092 = vmatpush.msra.mxu0 %v15477_v7  ;;  %9070 = vmatpush.msrb.mxu3 %v14965_v3  ;;  %v8504_v48 = vpop.f32.mrf.mxu0 }
 0x500   :  { %9071 = vmatpush.msrb.mxu3 %v14984_v17  ;;  %v8444_v4 = vpop.f32.mrf.mxu1 }
 0x501   :  { %v8445_v56 = vadd.f32 %v8444_v4, %v8424_v8  ;;  %v17873_v8 = vld [vmem:[#allocation184_spill] sm:$0xff]  ;;  %v17874_v4 = vld [vmem:[#allocation186_spill] sm:$0xff] }
 0x502   :  { %9072 = vmatpush.msrb.mxu3 %v15006_v57  ;;  %v8484_v23 = vpop.f32.mrf.mxu3 }
 0x503   :  { %9073 = vmatmul.f32.vlgmr.msrb.gmra.mxu3 %v17869_v10  ;;  %v17875_v10 = vld [vmem:[#allocation187_spill] sm:$0xff] }
 0x504   :  { %9137 = vmatpush.msra.mxu3 %v15082_v54 }
 0x506   :  { %v8464_v18 = vpop.f32.mrf.mxu2  ;;  %9138 = vmatpush.msra.mxu3 %v15096_v15 }
 0x507   :  { %v8465_v36 = vadd.f32 %v8464_v18, %v8445_v56  ;;  %v17876_v56 = vld [vmem:[#allocation188_spill] sm:$0xff]  ;;  %v17877_v18 = vld [vmem:[#allocation189_spill] sm:$0xff] }
 0x508   :  { %9139 = vmatpush.msra.mxu3 %v15111_v30 }
 0x509   :  { %v8485_v6 = vadd.f32 %v8484_v23, %v8465_v36  ;;  %v17878_v23 = vld [vmem:[#allocation102_spill] sm:$0xff]  ;;  %v17879_v36 = vld [vmem:[#allocation33_spill] sm:$0xff] }
 0x50a   :  { %9140 = vmatpush.msra.mxu3 %v15126_v46 }
 0x50b   :  { %v8505_v42 = vadd.f32 %v8504_v48, %v8485_v6  ;;  %v17880_v6 = vld [vmem:[#allocation164_spill] sm:$0xff]  ;;  %v17881_v48 = vld [vmem:[#allocation166_spill] sm:$0xff] }
 0x50c   :  { %9141 = vmatpush.msra.mxu3 %v15142_v63 }
 0x50d   :  { %10870 = vmatmul.msk.f32.vlgmr.msrb.gmra.mxu1 %vm8595_vm4, %v8505_v42  ;;  %v17882_v42 = vld [vmem:[#allocation117_spill] sm:$0xff] }
 0x50e   :  { %9142 = vmatpush.msra.mxu3 %v15162_v16  ;;  %10876 = vmatpush.msk.msrb.mxu1 %vm14521_vm3, %v17770_v35 }
 0x510   :  { %9143 = vmatpush.msra.mxu3 %v15180_v24  ;;  %10877 = vmatpush.msk.msrb.mxu1 %vm14545_vm1, %v17770_v35 }
 0x512   :  { %9144 = vmatpush.msra.mxu3 %v15198_v22  ;;  %10878 = vmatpush.msk.msrb.mxu1 %vm14572_vm7, %v17770_v35 }
 0x514   :  { %9145 = vmatpush.msra.mxu3 %v17870_v25  ;;  %10879 = vmatpush.msk.msrb.mxu1 %vm14564_vm6, %v17770_v35 }
 0x515   :  { %8688 = vmatmul.f32.vlgmr.msra.gmra.mxu1 %v17871_v29  ;;  %v17883_v29 = vld [vmem:[#allocation167_spill] sm:$0xff] }
 0x516   :  { %9146 = vmatpush.msra.mxu3 %v17872_v2  ;;  %8807 = vmatpush.msra.mxu1 %v15370_v26 }
 0x518   :  { %9147 = vmatpush.msra.mxu3 %v17873_v8  ;;  %8808 = vmatpush.msra.mxu1 %v15378_v12 }
 0x51a   :  { %9148 = vmatpush.msra.mxu3 %v17874_v4  ;;  %8809 = vmatpush.msra.mxu1 %v15385_v58 }
 0x51c   :  { %9149 = vmatpush.msra.mxu3 %v17875_v10  ;;  %8810 = vmatpush.msra.mxu1 %v15392_v49 }
 0x51e   :  { %9150 = vmatpush.msra.mxu3 %v17876_v56  ;;  %8811 = vmatpush.msra.mxu1 %v15399_v43 }
 0x520   :  { %9151 = vmatpush.msra.mxu3 %v17877_v18  ;;  %8812 = vmatpush.msra.mxu1 %v15406_v53 }
 0x522   :  { %9152 = vmatpush.msra.mxu3 %v15313_v62  ;;  %8813 = vmatpush.msra.mxu1 %v15413_v9 }
 0x523   :  { %9153 = vmatmul.f32.vlgmr.msra.gmra.mxu3 %v17878_v23  ;;  %v17884_v23 = vld [vmem:[#allocation170_spill] sm:$0xff] }
 0x524   :  { %9252 = vmatpush.msrb.mxu3 %v17879_v36  ;;  %8814 = vmatpush.msra.mxu1 %v15420_v50  ;;  %v17893_v36 = vld [vmem:[#allocation41_spill] sm:$0xff] }
 0x526   :  { %9253 = vmatpush.msrb.mxu3 %v15000_v41  ;;  %8815 = vmatpush.msra.mxu1 %v15428_v0  ;;  %v17891_v41 = vld [vmem:[#allocation119_spill] sm:$0xff] }
 0x528   :  { %9254 = vmatpush.msrb.mxu3 %v15016_v32  ;;  %8816 = vmatpush.msra.mxu1 %v15435_v34  ;;  %v17888_v32 = vld [vmem:[#allocation175_spill] sm:$0xff] }
 0x52a   :  { %9255 = vmatpush.msrb.mxu3 %v17880_v6  ;;  %8817 = vmatpush.msra.mxu1 %v15442_v52  ;;  %v17886_v6 = vld [vmem:[#allocation171_spill] sm:$0xff] }
 0x52c   :  { %9256 = vmatpush.msrb.mxu3 %v15048_v60  ;;  %8818 = vmatpush.msra.mxu1 %v15449_v20  ;;  %v17885_v60 = vld [vmem:[#allocation36_spill] sm:$0xff] }
 0x52e   :  { %9257 = vmatpush.msrb.mxu3 %v17881_v48  ;;  %8819 = vmatpush.msra.mxu1 %v15456_v38  ;;  %v17887_v48 = vld [vmem:[#allocation174_spill] sm:$0xff] }
 0x530   :  { %9258 = vmatpush.msrb.mxu3 %v17882_v42  ;;  %8820 = vmatpush.msra.mxu1 %v15463_v61  ;;  %v17889_v42 = vld [vmem:[#allocation178_spill] sm:$0xff] }
 0x532   :  { %9259 = vmatpush.msrb.mxu3 %v17883_v29  ;;  %8821 = vmatpush.msra.mxu1 %v15470_v31  ;;  %v17890_v29 = vld [vmem:[#allocation106_spill] sm:$0xff] }
 0x534   :  { %9260 = vmatpush.msrb.mxu3 %v15101_v39  ;;  %8822 = vmatpush.msra.mxu1 %v15477_v7  ;;  %v17892_v39 = vld [vmem:[#allocation120_spill] sm:$0xff] }
 0x536   :  { %9261 = vmatpush.msrb.mxu3 %v17884_v23  ;;  %v17894_v23 = vld [vmem:[#allocation39_spill] sm:$0xff] }
 0x538   :  { %9262 = vmatpush.msrb.mxu3 %v17885_v60  ;;  %v17895_v60 = vld [vmem:[#allocation182_spill] sm:$0xff] }
 0x53a   :  { %9263 = vmatpush.msrb.mxu3 %v17886_v6 }
 0x53c   :  { %9264 = vmatpush.msrb.mxu3 %v17887_v48  ;;  %v17896_v48 = vld [vmem:[#allocation185_spill] sm:$0xff] }
 0x53e   :  { %9265 = vmatpush.msrb.mxu3 %v17888_v32 }
 0x540   :  { %9266 = vmatpush.msrb.mxu3 %v17889_v42 }
 0x542   :  { %9267 = vmatpush.msrb.mxu3 %v15222_v13 }
 0x543   :  { %9268 = vmatmul.f32.vlgmr.msrb.gmra.mxu3 %v17890_v29  ;;  %v17897_v29 = vld [vmem:[#allocation150_spill] sm:$0xff] }
 0x544   :  { %9367 = vmatpush.msra.mxu3 %v17891_v41 }
 0x546   :  { %9368 = vmatpush.msra.mxu3 %v17892_v39 }
 0x548   :  { %9369 = vmatpush.msra.mxu3 %v17893_v36 }
 0x54a   :  { %9370 = vmatpush.msra.mxu3 %v17894_v23 }
 0x54c   :  { %9371 = vmatpush.msra.mxu3 %v17895_v60 }
 0x54e   :  { %9372 = vmatpush.msra.mxu3 %v15241_v59 }
 0x550   :  { %9373 = vmatpush.msra.mxu3 %v17896_v48 }
 0x552   :  { %9374 = vmatpush.msra.mxu3 %v15268_v11 }
 0x554   :  { %9375 = vmatpush.msra.mxu3 %v15281_v5 }
 0x556   :  { %9376 = vmatpush.msra.mxu3 %v15294_v33 }
 0x558   :  { %9377 = vmatpush.msra.mxu3 %v15307_v27 }
 0x55a   :  { %9378 = vmatpush.msra.mxu3 %v15320_v47  ;;  %v17900_v47 = vld [vmem:[#allocation154_spill] sm:$0xff] }
 0x55c   :  { %9379 = vmatpush.msra.mxu3 %v15330_v44  ;;  %v17899_v44 = vld [vmem:[#allocation42_spill] sm:$0xff] }
 0x55e   :  { %9380 = vmatpush.msra.mxu3 %v15338_v37 }
 0x560   :  { %9381 = vmatpush.msra.mxu3 %v15346_v14 }
 0x562   :  { %9382 = vmatpush.msra.mxu3 %v15354_v55 }
 0x563   :  { %9383 = vmatmul.f32.vlgmr.msra.gmra.mxu3 %v17897_v29  ;;  %v17898_v29 = vld [vmem:[#allocation97_spill] sm:$0xff] }
 0x564   :  { %9482 = vmatpush.msrb.mxu3 %v15370_v26  ;;  %v8590_v55 = vadd.s32 1, %v17898_v29  ;;  %v8588_v14 = vmul.u32 8, %v17898_v29 }
 0x566   :  { %9483 = vmatpush.msrb.mxu3 %v15378_v12  ;;  %v8591_v37 = vmul.u32 8, %v8590_v55  ;;  %vm8589_vm5 = vcmp.ge.s32.totalorder %v17899_v44, %v8588_v14  ;;  %v11046_v55 = vmov 0.0  }
 0x568   :  { %9484 = vmatpush.msrb.mxu3 %v15385_v58  ;;  %vm8592_vm8 = vcmp.lt.s32.totalorder %v17899_v44, %v8591_v37 }
 0x569   :  { %vm8593_vm9 = vmand %vm8589_vm5, %vm8592_vm8 }
 0x56a   :  { %9485 = vmatpush.msrb.mxu3 %v15392_v49  ;;  %v15664_v29 = vsel %vm8593_vm9, 1.0, %v11046_v55 }
 0x56c   :  { %9486 = vmatpush.msrb.mxu3 %v15399_v43 }
 0x56e   :  { %9487 = vmatpush.msrb.mxu3 %v15406_v53 }
 0x570   :  { %9488 = vmatpush.msrb.mxu3 %v15413_v9 }
 0x572   :  { %9489 = vmatpush.msrb.mxu3 %v15420_v50 }
 0x574   :  { %9490 = vmatpush.msrb.mxu3 %v15428_v0 }
 0x576   :  { %9491 = vmatpush.msrb.mxu3 %v15435_v34 }
 0x578   :  { %9492 = vmatpush.msrb.mxu3 %v15442_v52 }
 0x57a   :  { %9493 = vmatpush.msrb.mxu3 %v15449_v20 }
 0x57c   :  { %9494 = vmatpush.msrb.mxu3 %v15456_v38 }
 0x57e   :  { %9495 = vmatpush.msrb.mxu3 %v15463_v61 }
 0x580   :  { %9496 = vmatpush.msrb.mxu3 %v15470_v31 }
 0x582   :  { %9497 = vmatpush.msrb.mxu3 %v15477_v7 }
 0x583   :  { %9498 = vmatmul.f32.vlgmr.msrb.gmra.mxu3 %v17900_v47 }
 0x584   :  { %10906 = vmatpush.msk.msra.mxu3 %vm14521_vm3, %v17770_v35 }
 0x586   :  { %10907 = vmatpush.msk.msra.mxu3 %vm14545_vm1, %v17770_v35 }
 0x588   :  { %10908 = vmatpush.msk.msra.mxu3 %vm14572_vm7, %v17770_v35 }
 0x58a   :  { %v8616_v14 = vpop.f32.mrf.mxu1  ;;  %10909 = vmatpush.msk.msra.mxu3 %vm14564_vm6, %v17770_v35 }
 0x58b   :  { %v8619_v47 = vmul.f32 %v8616_v14, %v15664_v29  ;;  %v17913_v14 = vld [vmem:[#allocation170_spill] sm:$0xff] }
 0x58c   :  { %9617 = vmatpush.msrb.mxu3 %v15370_v26 }
 0x58d   :  { %v8621_v37 = vsel %vm8620_vm10, %v8619_v47, 0.0  ;;  %v17914_v47 = vld [vmem:[#allocation36_spill] sm:$0xff] }
 0x58e   :  { %9618 = vmatpush.msrb.mxu3 %v15378_v12  ;;  %v8622_v44 = vrot.slane %v8621_v37, 4  ;;  %v15686_v12 = vld [vmem:[%s16729_s2 + $0x78] sm:$0xff] }
 0x590   :  { %9619 = vmatpush.msrb.mxu3 %v15385_v58  ;;  %v8623_v55 = vadd.f32 %v8622_v44, %v8621_v37  ;;  %v17901_v58 = vld [vmem:[#allocation89_spill] sm:$0xff]  ;;  %v17915_v37 = vld [vmem:[#allocation174_spill] sm:$0xff] }
 0x591   :  { %v17916_v44 = vld [vmem:[#allocation138_spill] sm:$0xff] }
 0x592   :  { %9620 = vmatpush.msrb.mxu3 %v15392_v49  ;;  %v8624_v28 = vrot.slane %v8623_v55, 2  ;;  %v17911_v49 = vld [vmem:[#allocation167_spill] sm:$0xff] }
 0x594   :  { %9621 = vmatpush.msrb.mxu3 %v15399_v43  ;;  %v8625_v51 = vadd.f32 %v8624_v28, %v8623_v55  ;;  %v15693_v28 = vld [vmem:[%s16729_s2 + $0x70] sm:$0xff]  ;;  %v15715_v43 = vld [vmem:[%s16729_s2 + $0x58] sm:$0xff] }
 0x595   :  { %v17917_v55 = vld [vmem:[#allocation3_spill] sm:$0xff] }
 0x596   :  { %9622 = vmatpush.msrb.mxu3 %v15406_v53  ;;  %v8626_v19 = vrot.slane %v8625_v51, 1  ;;  %v15722_v53 = vld [vmem:[%s16729_s2 + $0x50] sm:$0xff] }
 0x598   :  { %9623 = vmatpush.msrb.mxu3 %v15413_v9  ;;  %v8627_v26 = vadd.f32 %v8626_v19, %v8625_v51  ;;  %v15700_v51 = vld [vmem:[%s16729_s2 + $0x68] sm:$0xff]  ;;  %v15707_v19 = vld [vmem:[%s16729_s2 + $0x60] sm:$0xff] }
 0x599   :  { %v15729_v9 = vld [vmem:[%s16729_s2 + $0x48] sm:$0xff] }
 0x59a   :  { %9624 = vmatpush.msrb.mxu3 %v15420_v50  ;;  %10875 = vmatmul.msk.f32.vlgmr.msrb.gmra.mxu2 %vm8628_vm11, %v8627_v26  ;;  %v15743_v50 = vld [vmem:[%s16729_s2 + $0x38] sm:$0xff]  ;;  %v17918_v26 = vld [vmem:[#allocation190_spill] sm:$0xff] }
 0x59b   :  { %8787 = vmatpush.msrb.mxu2 %v15686_v12 }
 0x59c   :  { %9625 = vmatpush.msrb.mxu3 %v15428_v0  ;;  %v17902_v0 = vld [vmem:[#allocation134_spill] sm:$0xff] }
 0x59d   :  { %8788 = vmatpush.msrb.mxu2 %v15693_v28 }
 0x59e   :  { %9626 = vmatpush.msrb.mxu3 %v15435_v34  ;;  %v17909_v34 = vld [vmem:[#allocation166_spill] sm:$0xff] }
 0x59f   :  { %8789 = vmatpush.msrb.mxu2 %v15700_v51 }
 0x5a0   :  { %9627 = vmatpush.msrb.mxu3 %v15442_v52  ;;  %v17912_v52 = vld [vmem:[#allocation35_spill] sm:$0xff] }
 0x5a1   :  { %8790 = vmatpush.msrb.mxu2 %v15707_v19 }
 0x5a2   :  { %9628 = vmatpush.msrb.mxu3 %v15449_v20  ;;  %8708 = vmatmul.f32.vlgmr.msra.gmra.mxu2 %v17901_v58  ;;  %v15736_v20 = vld [vmem:[%s16729_s2 + $0x40] sm:$0xff]  ;;  %v17919_v58 = vld [vmem:[#allocation86_spill] sm:$0xff] }
 0x5a3   :  { %8791 = vmatpush.msrb.mxu2 %v15715_v43 }
 0x5a4   :  { %9629 = vmatpush.msrb.mxu3 %v15456_v38  ;;  %v15749_v38 = vld [vmem:[%s16729_s2 + $0x30] sm:$0xff] }
 0x5a5   :  { %8792 = vmatpush.msrb.mxu2 %v15722_v53 }
 0x5a6   :  { %9630 = vmatpush.msrb.mxu3 %v15463_v61 }
 0x5a7   :  { %8793 = vmatpush.msrb.mxu2 %v15729_v9 }
 0x5a8   :  { %9631 = vmatpush.msrb.mxu3 %v15470_v31 }
 0x5a9   :  { %8794 = vmatpush.msrb.mxu2 %v15736_v20 }
 0x5aa   :  { %9632 = vmatpush.msrb.mxu3 %v15477_v7  ;;  %v17910_v7 = vld [vmem:[#allocation117_spill] sm:$0xff] }
 0x5ab   :  { %8795 = vmatpush.msrb.mxu2 %v15743_v50 }
 0x5ad   :  { %8796 = vmatpush.msrb.mxu2 %v15749_v38 }
 0x5af   :  { %8797 = vmatpush.msrb.mxu2 %v14923_v1  ;;  %v17903_v1 = vld [vmem:[#allocation135_spill] sm:$0xff] }
 0x5b1   :  { %8798 = vmatpush.msrb.mxu2 %v14934_v40  ;;  %v17904_v40 = vld [vmem:[#allocation33_spill] sm:$0xff] }
 0x5b3   :  { %8799 = vmatpush.msrb.mxu2 %v14949_v21  ;;  %v17905_v21 = vld [vmem:[#allocation163_spill] sm:$0xff] }
 0x5b5   :  { %8800 = vmatpush.msrb.mxu2 %v14965_v3  ;;  %v17906_v3 = vld [vmem:[#allocation31_spill] sm:$0xff] }
 0x5b7   :  { %8801 = vmatpush.msrb.mxu2 %v14984_v17  ;;  %v17907_v17 = vld [vmem:[#allocation164_spill] sm:$0xff] }
 0x5b9   :  { %8802 = vmatpush.msrb.mxu2 %v15006_v57  ;;  %v17908_v57 = vld [vmem:[#allocation116_spill] sm:$0xff] }
 0x5ba   :  { %8803 = vmatmul.f32.vlgmr.msrb.gmra.mxu2 %v17902_v0  ;;  %v17920_v0 = vld [vmem:[#allocation129_spill] sm:$0xff] }
 0x5bb   :  { %8867 = vmatpush.msra.mxu2 %v15082_v54 }
 0x5bd   :  { %8868 = vmatpush.msra.mxu2 %v15096_v15 }
 0x5bf   :  { %8869 = vmatpush.msra.mxu2 %v15111_v30 }
 0x5c1   :  { %8870 = vmatpush.msra.mxu2 %v15126_v46 }
 0x5c3   :  { %8871 = vmatpush.msra.mxu2 %v15142_v63 }
 0x5c5   :  { %8872 = vmatpush.msra.mxu2 %v15162_v16 }
 0x5c7   :  { %8873 = vmatpush.msra.mxu2 %v15180_v24 }
 0x5c9   :  { %8874 = vmatpush.msra.mxu2 %v15198_v22 }
 0x5cb   :  { %8875 = vmatpush.msra.mxu2 %v17870_v25 }
 0x5cd   :  { %8876 = vmatpush.msra.mxu2 %v17872_v2 }
 0x5cf   :  { %8877 = vmatpush.msra.mxu2 %v17873_v8 }
 0x5d1   :  { %8878 = vmatpush.msra.mxu2 %v17874_v4 }
 0x5d3   :  { %8879 = vmatpush.msra.mxu2 %v17875_v10 }
 0x5d5   :  { %8880 = vmatpush.msra.mxu2 %v17876_v56 }
 0x5d7   :  { %8881 = vmatpush.msra.mxu2 %v17877_v18 }
 0x5d9   :  { %8882 = vmatpush.msra.mxu2 %v15313_v62 }
 0x5da   :  { %8883 = vmatmul.f32.vlgmr.msra.gmra.mxu2 %v17903_v1  ;;  %v17921_v1 = vld [vmem:[#allocation87_spill] sm:$0xff] }
 0x5db   :  { %8982 = vmatpush.msrb.mxu2 %v17904_v40  ;;  %v17922_v40 = vld [vmem:[#allocation101_spill] sm:$0xff] }
 0x5dd   :  { %8983 = vmatpush.msrb.mxu2 %v17905_v21 }
 0x5df   :  { %8984 = vmatpush.msrb.mxu2 %v17906_v3  ;;  %v8669_v3 = vpop.f32.mrf.mxu3 }
 0x5e1   :  { %8985 = vmatpush.msrb.mxu2 %v17907_v17  ;;  %v8689_v17 = vpop.f32.mrf.mxu1 }
 0x5e3   :  { %8986 = vmatpush.msrb.mxu2 %v17908_v57  ;;  %v8690_v57 = vadd.f32 %v8689_v17, %v8669_v3 }
 0x5e5   :  { %8987 = vmatpush.msrb.mxu2 %v17909_v34 }
 0x5e7   :  { %8988 = vmatpush.msrb.mxu2 %v17910_v7 }
 0x5e9   :  { %8989 = vmatpush.msrb.mxu2 %v17911_v49  ;;  %v8729_v49 = vpop.f32.mrf.mxu0 }
 0x5eb   :  { %8990 = vmatpush.msrb.mxu2 %v17912_v52 }
 0x5ed   :  { %8991 = vmatpush.msrb.mxu2 %v17913_v14  ;;  %v8749_v14 = vpop.f32.mrf.mxu3 }
 0x5ef   :  { %8992 = vmatpush.msrb.mxu2 %v17914_v47 }
 0x5f1   :  { %8993 = vmatpush.msrb.mxu2 %v17886_v6 }
 0x5f3   :  { %8994 = vmatpush.msrb.mxu2 %v17915_v37 }
 0x5f5   :  { %8995 = vmatpush.msrb.mxu2 %v17888_v32 }
 0x5f7   :  { %8996 = vmatpush.msrb.mxu2 %v17889_v42 }
 0x5f9   :  { %8997 = vmatpush.msrb.mxu2 %v15222_v13 }
 0x5fa   :  { %8998 = vmatmul.f32.vlgmr.msrb.gmra.mxu2 %v17916_v44 }
 0x5fb   :  { %9097 = vmatpush.msra.mxu2 %v17891_v41 }
 0x5fd   :  { %9098 = vmatpush.msra.mxu2 %v17892_v39 }
 0x5ff   :  { %9099 = vmatpush.msra.mxu2 %v17893_v36 }
 0x601   :  { %9100 = vmatpush.msra.mxu2 %v17894_v23 }
 0x603   :  { %9101 = vmatpush.msra.mxu2 %v17895_v60 }
 0x605   :  { %9102 = vmatpush.msra.mxu2 %v15241_v59 }
 0x607   :  { %9103 = vmatpush.msra.mxu2 %v17896_v48 }
 0x609   :  { %9104 = vmatpush.msra.mxu2 %v15268_v11 }
 0x60b   :  { %9105 = vmatpush.msra.mxu2 %v15281_v5 }
 0x60d   :  { %9106 = vmatpush.msra.mxu2 %v15294_v33 }
 0x60f   :  { %9107 = vmatpush.msra.mxu2 %v15307_v27 }
 0x611   :  { %9108 = vmatpush.msra.mxu2 %v17917_v55 }
 0x613   :  { %9109 = vmatpush.msra.mxu2 %v17918_v26 }
 0x615   :  { %9110 = vmatpush.msra.mxu2 %v17919_v58 }
 0x617   :  { %9111 = vmatpush.msra.mxu2 %v17920_v0 }
 0x619   :  { %9112 = vmatpush.msra.mxu2 %v17921_v1 }
 0x61a   :  { %9113 = vmatmul.f32.vlgmr.msra.gmra.mxu2 %v17922_v40 }
 0x61b   :  { %9192 = vmatpush.msrb.mxu2 %v15686_v12 }
 0x61d   :  { %9193 = vmatpush.msrb.mxu2 %v15693_v28  ;;  %v15812_v21 = vpop.f32.mrf.mxu2 }
 0x61e   :  { %17923 = vst [vmem:[#allocation130_spill] sm:$0xff] %v15812_v21  ;;  %v16215_v21 = vld [vmem:[%s16729_s2 + $0x148] sm:$0xff] }
 0x61f   :  { %9194 = vmatpush.msrb.mxu2 %v15700_v51  ;;  %17959 = vst [vmem:[#allocation25_spill] sm:$0xff] %v16215_v21 }
 0x621   :  { %9195 = vmatpush.msrb.mxu2 %v15707_v19 }
 0x623   :  { %9196 = vmatpush.msrb.mxu2 %v15715_v43 }
 0x625   :  { %9197 = vmatpush.msrb.mxu2 %v15722_v53  ;;  %v8709_v34 = vpop.f32.mrf.mxu2 }
 0x626   :  { %v8710_v7 = vadd.f32 %v8709_v34, %v8690_v57  ;;  %v15827_v57 = vld [vmem:[%s16729_s2 + $0x28] sm:$0xff] }
 0x627   :  { %9198 = vmatpush.msrb.mxu2 %v15729_v9 }
 0x628   :  { %v8730_v52 = vadd.f32 %v8729_v49, %v8710_v7  ;;  %v15833_v7 = vld [vmem:[%s16729_s2 + $0x20] sm:$0xff] }
 0x629   :  { %9199 = vmatpush.msrb.mxu2 %v15736_v20 }
 0x62a   :  { %v8750_v44 = vadd.f32 %v8749_v14, %v8730_v52  ;;  %v15839_v52 = vld [vmem:[%s16729_s2 + $0x18] sm:$0xff] }
 0x62b   :  { %9200 = vmatpush.msrb.mxu2 %v15743_v50 }
 0x62c   :  { %v8753_v40 = vmul.f32 %v8750_v44, %v15664_v29  ;;  %v15845_v44 = vld [vmem:[%s16729_s2 + $0x10] sm:$0xff] }
 0x62d   :  { %9201 = vmatpush.msrb.mxu2 %v15749_v38 }
 0x62e   :  { %v8754_v3 = vsel %vm8620_vm10, %v8753_v40, 0.0 }
 0x62f   :  { %v8755_v17 = vrot.slane %v8754_v3, 4  ;;  %9202 = vmatpush.msrb.mxu2 %v15827_v57 }
 0x631   :  { %v8756_v34 = vadd.f32 %v8755_v17, %v8754_v3  ;;  %9203 = vmatpush.msrb.mxu2 %v15833_v7  ;;  %v15851_v3 = vld [vmem:[%s16729_s2 + $0x8] sm:$0xff] }
 0x633   :  { %v8757_v49 = vrot.slane %v8756_v34, 2  ;;  %9204 = vmatpush.msrb.mxu2 %v15839_v52 }
 0x635   :  { %v8758_v14 = vadd.f32 %v8757_v49, %v8756_v34  ;;  %9205 = vmatpush.msrb.mxu2 %v15845_v44  ;;  %v15857_v34 = vld [vmem:[%s16729_s2] sm:$0xff]  ;;  %v17924_v49 = vld [vmem:[#allocation142_spill] sm:$0xff] }
 0x637   :  { %v8759_v40 = vrot.slane %v8758_v14, 1  ;;  %9206 = vmatpush.msrb.mxu2 %v15851_v3 }
 0x639   :  { %v8760_v17 = vadd.f32 %v8759_v40, %v8758_v14  ;;  %9207 = vmatpush.msrb.mxu2 %v15857_v34 }
 0x63a   :  { %9208 = vmatmul.f32.vlgmr.msrb.gmra.mxu2 %v17924_v49 }
 0x63b   :  { %9272 = vmatpush.msra.mxu2 %v15082_v54  ;;  %10880 = vmatmul.msk.f32.vlgmr.msrb.gmra.mxu1 %vm8628_vm11, %v8760_v17  ;;  %v17928_v17 = vld [vmem:[#allocation93_spill] sm:$0xff] }
 0x63c   :  { %10881 = vmatpush.msk.msrb.mxu1 %vm14521_vm3, %v17770_v35 }
 0x63d   :  { %9273 = vmatpush.msra.mxu2 %v15096_v15  ;;  %v17929_v15 = vld [vmem:[#allocation107_spill] sm:$0xff] }
 0x63e   :  { %10882 = vmatpush.msk.msrb.mxu1 %vm14545_vm1, %v17770_v35 }
 0x63f   :  { %9274 = vmatpush.msra.mxu2 %v15111_v30  ;;  %v15907_v30 = vld [vmem:[%s16729_s2 + $0x1f8] sm:$0xff] }
 0x640   :  { %10883 = vmatpush.msk.msrb.mxu1 %vm14572_vm7, %v17770_v35  ;;  %17930 = vst [vmem:[#allocation48_spill] sm:$0xff] %v15907_v30 }
 0x641   :  { %9275 = vmatpush.msra.mxu2 %v15126_v46  ;;  %v15914_v46 = vld [vmem:[%s16729_s2 + $0x1f0] sm:$0xff] }
 0x642   :  { %10884 = vmatpush.msk.msrb.mxu1 %vm14564_vm6, %v17770_v35  ;;  %17931 = vst [vmem:[#allocation49_spill] sm:$0xff] %v15914_v46 }
 0x643   :  { %9276 = vmatpush.msra.mxu2 %v15142_v63  ;;  %8823 = vmatmul.f32.vlgmr.msra.gmra.mxu1 %v17928_v17  ;;  %v15928_v63 = vld [vmem:[%s16729_s2 + $0x1e0] sm:$0xff]  ;;  %v16076_v17 = vld [vmem:[%s16729_s2 + $0x228] sm:$0xff] }
 0x644   :  { %8922 = vmatpush.msra.mxu1 %v15686_v12  ;;  %17933 = vst [vmem:[#allocation50_spill] sm:$0xff] %v15928_v63 }
 0x645   :  { %9277 = vmatpush.msra.mxu2 %v15162_v16  ;;  %v15935_v16 = vld [vmem:[%s16729_s2 + $0x1d8] sm:$0xff] }
 0x646   :  { %8923 = vmatpush.msra.mxu1 %v15693_v28  ;;  %17934 = vst [vmem:[#allocation90_spill] sm:$0xff] %v15935_v16 }
 0x647   :  { %9278 = vmatpush.msra.mxu2 %v15180_v24  ;;  %v15941_v24 = vld [vmem:[%s16729_s2 + $0x1d0] sm:$0xff] }
 0x648   :  { %8924 = vmatpush.msra.mxu1 %v15700_v51  ;;  %17935 = vst [vmem:[#allocation91_spill] sm:$0xff] %v15941_v24 }
 0x649   :  { %9279 = vmatpush.msra.mxu2 %v15198_v22  ;;  %v15947_v22 = vld [vmem:[%s16729_s2 + $0x1c8] sm:$0xff] }
 0x64a   :  { %8925 = vmatpush.msra.mxu1 %v15707_v19  ;;  %17936 = vst [vmem:[#allocation136_spill] sm:$0xff] %v15947_v22 }
 0x64b   :  { %9280 = vmatpush.msra.mxu2 %v17870_v25  ;;  %v15953_v25 = vld [vmem:[%s16729_s2 + $0x1c0] sm:$0xff] }
 0x64c   :  { %8926 = vmatpush.msra.mxu1 %v15715_v43  ;;  %17937 = vst [vmem:[#allocation95_spill] sm:$0xff] %v15953_v25 }
 0x64d   :  { %9281 = vmatpush.msra.mxu2 %v17872_v2  ;;  %v15959_v2 = vld [vmem:[%s16729_s2 + $0x1b8] sm:$0xff] }
 0x64e   :  { %8927 = vmatpush.msra.mxu1 %v15722_v53  ;;  %17938 = vst [vmem:[#allocation55_spill] sm:$0xff] %v15959_v2 }
 0x64f   :  { %9282 = vmatpush.msra.mxu2 %v17873_v8  ;;  %v15965_v8 = vld [vmem:[%s16729_s2 + $0x1b0] sm:$0xff] }
 0x650   :  { %8928 = vmatpush.msra.mxu1 %v15729_v9  ;;  %17939 = vst [vmem:[#allocation98_spill] sm:$0xff] %v15965_v8 }
 0x651   :  { %9283 = vmatpush.msra.mxu2 %v17874_v4  ;;  %v17940_v4 = vld [vmem:[#allocation109_spill] sm:$0xff] }
 0x652   :  { %8929 = vmatpush.msra.mxu1 %v15736_v20 }
 0x653   :  { %9284 = vmatpush.msra.mxu2 %v17875_v10  ;;  %v8844_v10 = vpop.f32.mrf.mxu0 }
 0x654   :  { %8930 = vmatpush.msra.mxu1 %v15743_v50 }
 0x655   :  { %9285 = vmatpush.msra.mxu2 %v17876_v56  ;;  %v16038_v56 = vld [vmem:[%s16729_s2 + $0x258] sm:$0xff] }
 0x656   :  { %8931 = vmatpush.msra.mxu1 %v15749_v38 }
 0x657   :  { %9286 = vmatpush.msra.mxu2 %v17877_v18 }
 0x658   :  { %8932 = vmatpush.msra.mxu1 %v15827_v57 }
 0x659   :  { %9287 = vmatpush.msra.mxu2 %v15313_v62  ;;  %v15921_v62 = vld [vmem:[%s16729_s2 + $0x1e8] sm:$0xff] }
 0x65a   :  { %9288 = vmatmul.f32.vlgmr.msra.gmra.mxu2 %v17929_v15  ;;  %8933 = vmatpush.msra.mxu1 %v15833_v7  ;;  %17932 = vst [vmem:[#allocation4_spill] sm:$0xff] %v15921_v62 }
 0x65b   :  { %9387 = vmatpush.msrb.mxu2 %v15907_v30 }
 0x65c   :  { %8934 = vmatpush.msra.mxu1 %v15839_v52 }
 0x65d   :  { %9388 = vmatpush.msrb.mxu2 %v15914_v46 }
 0x65e   :  { %8935 = vmatpush.msra.mxu1 %v15845_v44 }
 0x65f   :  { %9389 = vmatpush.msrb.mxu2 %v15921_v62 }
 0x660   :  { %8936 = vmatpush.msra.mxu1 %v15851_v3 }
 0x661   :  { %9390 = vmatpush.msrb.mxu2 %v15928_v63 }
 0x662   :  { %8937 = vmatpush.msra.mxu1 %v15857_v34 }
 0x663   :  { %9391 = vmatpush.msrb.mxu2 %v15935_v16 }
 0x665   :  { %9392 = vmatpush.msrb.mxu2 %v15941_v24 }
 0x667   :  { %9393 = vmatpush.msrb.mxu2 %v15947_v22 }
 0x669   :  { %9394 = vmatpush.msrb.mxu2 %v15953_v25 }
 0x66b   :  { %9395 = vmatpush.msrb.mxu2 %v15959_v2 }
 0x66d   :  { %9396 = vmatpush.msrb.mxu2 %v15965_v8 }
 0x66f   :  { %9397 = vmatpush.msrb.mxu2 %v17914_v47 }
 0x671   :  { %9398 = vmatpush.msrb.mxu2 %v17886_v6  ;;  %v16044_v6 = vld [vmem:[%s16729_s2 + $0x250] sm:$0xff] }
 0x673   :  { %9399 = vmatpush.msrb.mxu2 %v17915_v37  ;;  %v16056_v37 = vld [vmem:[%s16729_s2 + $0x240] sm:$0xff] }
 0x675   :  { %9400 = vmatpush.msrb.mxu2 %v17888_v32  ;;  %v8804_v32 = vpop.f32.mrf.mxu2 }
 0x677   :  { %9401 = vmatpush.msrb.mxu2 %v17889_v42 }
 0x679   :  { %9402 = vmatpush.msrb.mxu2 %v15222_v13  ;;  %v16032_v13 = vld [vmem:[%s16729_s2 + $0x260] sm:$0xff] }
 0x67a   :  { %9403 = vmatmul.f32.vlgmr.msrb.gmra.mxu2 %v17940_v4  ;;  %v16082_v4 = vld [vmem:[%s16729_s2 + $0x220] sm:$0xff] }
 0x67b   :  { %9502 = vmatpush.msra.mxu2 %v17891_v41  ;;  %v16020_v41 = vld [vmem:[%s16729_s2 + $0x270] sm:$0xff] }
 0x67d   :  { %9503 = vmatpush.msra.mxu2 %v17892_v39  ;;  %v8884_v42 = vpop.f32.mrf.mxu2 }
 0x67f   :  { %9504 = vmatpush.msra.mxu2 %v17893_v36  ;;  %v8864_v36 = vpop.f32.mrf.mxu3 }
 0x681   :  { %9505 = vmatpush.msra.mxu2 %v17894_v23  ;;  %v16050_v23 = vld [vmem:[%s16729_s2 + $0x248] sm:$0xff] }
 0x683   :  { %9506 = vmatpush.msra.mxu2 %v17895_v60  ;;  %v16026_v60 = vld [vmem:[%s16729_s2 + $0x268] sm:$0xff] }
 0x685   :  { %9507 = vmatpush.msra.mxu2 %v15241_v59  ;;  %v17941_v59 = vld [vmem:[#allocation27_spill] sm:$0xff] }
 0x687   :  { %9508 = vmatpush.msra.mxu2 %v17896_v48 }
 0x689   :  { %9509 = vmatpush.msra.mxu2 %v15268_v11 }
 0x68b   :  { %9510 = vmatpush.msra.mxu2 %v15281_v5 }
 0x68d   :  { %9511 = vmatpush.msra.mxu2 %v15294_v33  ;;  %v17942_v33 = vld [vmem:[#allocation158_spill] sm:$0xff] }
 0x68f   :  { %9512 = vmatpush.msra.mxu2 %v15307_v27  ;;  %v16014_v27 = vld [vmem:[%s16729_s2 + $0x278] sm:$0xff] }
 0x691   :  { %9513 = vmatpush.msra.mxu2 %v17917_v55 }
 0x693   :  { %9514 = vmatpush.msra.mxu2 %v17918_v26 }
 0x695   :  { %9515 = vmatpush.msra.mxu2 %v17919_v58  ;;  %v16064_v58 = vld [vmem:[%s16729_s2 + $0x238] sm:$0xff] }
 0x697   :  { %9516 = vmatpush.msra.mxu2 %v17920_v0 }
 0x699   :  { %9517 = vmatpush.msra.mxu2 %v17921_v1  ;;  %v16070_v1 = vld [vmem:[%s16729_s2 + $0x230] sm:$0xff] }
 0x69a   :  { %9518 = vmatmul.f32.vlgmr.msra.gmra.mxu2 %v17941_v59 }
 0x69b   :  { %9597 = vmatpush.msrb.mxu2 %v15686_v12 }
 0x69d   :  { %9598 = vmatpush.msrb.mxu2 %v15693_v28 }
 0x69f   :  { %9599 = vmatpush.msrb.mxu2 %v15700_v51 }
 0x6a1   :  { %9600 = vmatpush.msrb.mxu2 %v15707_v19 }
 0x6a3   :  { %9601 = vmatpush.msrb.mxu2 %v15715_v43 }
 0x6a5   :  { %9602 = vmatpush.msrb.mxu2 %v15722_v53 }
 0x6a7   :  { %9603 = vmatpush.msrb.mxu2 %v15729_v9 }
 0x6a9   :  { %9604 = vmatpush.msrb.mxu2 %v15736_v20 }
 0x6ab   :  { %9605 = vmatpush.msrb.mxu2 %v15743_v50 }
 0x6ad   :  { %9606 = vmatpush.msrb.mxu2 %v15749_v38 }
 0x6af   :  { %9607 = vmatpush.msrb.mxu2 %v15827_v57 }
 0x6b1   :  { %9608 = vmatpush.msrb.mxu2 %v15833_v7 }
 0x6b3   :  { %9609 = vmatpush.msrb.mxu2 %v15839_v52 }
 0x6b5   :  { %9610 = vmatpush.msrb.mxu2 %v15845_v44 }
 0x6b7   :  { %9611 = vmatpush.msrb.mxu2 %v15851_v3 }
 0x6b8   :  { %v16007_v5 = vpop.f32.mrf.mxu1 }
 0x6b9   :  { %9612 = vmatpush.msrb.mxu2 %v15857_v34 }
 0x6ba   :  { %9613 = vmatmul.f32.vlgmr.msrb.gmra.mxu2 %v17942_v33  ;;  %v16088_v33 = vld [vmem:[%s16729_s2 + $0x218] sm:$0xff] }
 0x6bb   :  { %9677 = vmatpush.msra.mxu2 %v16014_v27 }
 0x6bd   :  { %9678 = vmatpush.msra.mxu2 %v16020_v41 }
 0x6bf   :  { %9679 = vmatpush.msra.mxu2 %v16026_v60 }
 0x6c0   :  { %v8824_v39 = vpop.f32.mrf.mxu1 }
 0x6c1   :  { %9680 = vmatpush.msra.mxu2 %v16032_v13  ;;  %v8825_v11 = vadd.f32 %v8824_v39, %v8804_v32  ;;  %v16094_v39 = vld [vmem:[%s16729_s2 + $0x210] sm:$0xff] }
 0x6c3   :  { %9681 = vmatpush.msra.mxu2 %v16038_v56  ;;  %v8845_v18 = vadd.f32 %v8844_v10, %v8825_v11  ;;  %v16100_v10 = vld [vmem:[%s16729_s2 + $0x208] sm:$0xff] }
 0x6c5   :  { %9682 = vmatpush.msra.mxu2 %v16044_v6  ;;  %v8865_v48 = vadd.f32 %v8864_v36, %v8845_v18  ;;  %v16107_v18 = vld [vmem:[%s16729_s2 + $0x200] sm:$0xff]  ;;  %v17943_v36 = vld [vmem:[#allocation160_spill] sm:$0xff] }
 0x6c7   :  { %9683 = vmatpush.msra.mxu2 %v16050_v23  ;;  %v8885_v47 = vadd.f32 %v8884_v42, %v8865_v48  ;;  %v17944_v48 = vld [vmem:[#allocation96_spill] sm:$0xff]  ;;  %v17945_v42 = vld [vmem:[#allocation139_spill] sm:$0xff] }
 0x6c9   :  { %9684 = vmatpush.msra.mxu2 %v16056_v37  ;;  %v8888_v55 = vmul.f32 %v8885_v47, %v15664_v29  ;;  %v16142_v47 = vld [vmem:[%s16729_s2 + $0x1a8] sm:$0xff] }
 0x6ca   :  { %17946 = vst [vmem:[#allocation99_spill] sm:$0xff] %v16142_v47 }
 0x6cb   :  { %v8889_v26 = vsel %vm8620_vm10, %v8888_v55, 0.0  ;;  %9685 = vmatpush.msra.mxu2 %v16064_v58  ;;  %v16148_v55 = vld [vmem:[%s16729_s2 + $0x1a0] sm:$0xff] }
 0x6cc   :  { %v8890_v0 = vrot.slane %v8889_v26, 4  ;;  %17947 = vst [vmem:[#allocation7_spill] sm:$0xff] %v16148_v55 }
 0x6cd   :  { %9686 = vmatpush.msra.mxu2 %v16070_v1 }
 0x6ce   :  { %v8891_v49 = vadd.f32 %v8890_v0, %v8889_v26  ;;  %v16154_v26 = vld [vmem:[%s16729_s2 + $0x198] sm:$0xff]  ;;  %v16160_v0 = vld [vmem:[%s16729_s2 + $0x190] sm:$0xff] }
 0x6cf   :  { %9687 = vmatpush.msra.mxu2 %v16076_v17  ;;  %17948 = vst [vmem:[#allocation14_spill] sm:$0xff] %v16154_v26 }
 0x6d0   :  { %v8892_v15 = vrot.slane %v8891_v49, 2  ;;  %17949 = vst [vmem:[#allocation104_spill] sm:$0xff] %v16160_v0 }
 0x6d1   :  { %9688 = vmatpush.msra.mxu2 %v16082_v4 }
 0x6d2   :  { %v8893_v59 = vadd.f32 %v8892_v15, %v8891_v49  ;;  %v16166_v49 = vld [vmem:[%s16729_s2 + $0x188] sm:$0xff]  ;;  %v16172_v15 = vld [vmem:[%s16729_s2 + $0x180] sm:$0xff] }
 0x6d3   :  { %9689 = vmatpush.msra.mxu2 %v16088_v33  ;;  %17950 = vst [vmem:[#allocation6_spill] sm:$0xff] %v16166_v49 }
 0x6d4   :  { %v8894_v32 = vrot.slane %v8893_v59, 1  ;;  %17951 = vst [vmem:[#allocation18_spill] sm:$0xff] %v16172_v15 }
 0x6d5   :  { %9690 = vmatpush.msra.mxu2 %v16094_v39 }
 0x6d6   :  { %v8895_v11 = vadd.f32 %v8894_v32, %v8893_v59  ;;  %v17952_v59 = vld [vmem:[#allocation141_spill] sm:$0xff]  ;;  %v16179_v32 = vld [vmem:[%s16729_s2 + $0x178] sm:$0xff] }
 0x6d7   :  { %9691 = vmatpush.msra.mxu2 %v16100_v10  ;;  %17953 = vst [vmem:[#allocation148_spill] sm:$0xff] %v16179_v32 }
 0x6d8   :  { %10885 = vmatmul.msk.f32.vlgmr.msrb.gmra.mxu1 %vm8628_vm11, %v8895_v11  ;;  %v16185_v11 = vld [vmem:[%s16729_s2 + $0x170] sm:$0xff] }
 0x6d9   :  { %9692 = vmatpush.msra.mxu2 %v16107_v18  ;;  %9002 = vmatpush.msrb.mxu1 %v16014_v27  ;;  %17954 = vst [vmem:[#allocation8_spill] sm:$0xff] %v16185_v11 }
 0x6da   :  { %9693 = vmatmul.f32.vlgmr.msra.gmra.mxu2 %v17943_v36  ;;  %v16191_v36 = vld [vmem:[%s16729_s2 + $0x168] sm:$0xff] }
 0x6db   :  { %9003 = vmatpush.msrb.mxu1 %v16020_v41  ;;  %17955 = vst [vmem:[#allocation151_spill] sm:$0xff] %v16191_v36 }
 0x6dd   :  { %9004 = vmatpush.msrb.mxu1 %v16026_v60 }
 0x6df   :  { %9005 = vmatpush.msrb.mxu1 %v16032_v13 }
 0x6e0   :  { %8938 = vmatmul.f32.vlgmr.msra.gmra.mxu1 %v17944_v48  ;;  %v16197_v48 = vld [vmem:[%s16729_s2 + $0x160] sm:$0xff] }
 0x6e1   :  { %9006 = vmatpush.msrb.mxu1 %v16038_v56  ;;  %17956 = vst [vmem:[#allocation108_spill] sm:$0xff] %v16197_v48 }
 0x6e3   :  { %9007 = vmatpush.msrb.mxu1 %v16044_v6 }
 0x6e5   :  { %9008 = vmatpush.msrb.mxu1 %v16050_v23 }
 0x6e7   :  { %9009 = vmatpush.msrb.mxu1 %v16056_v37 }
 0x6e9   :  { %9010 = vmatpush.msrb.mxu1 %v16064_v58 }
 0x6eb   :  { %9011 = vmatpush.msrb.mxu1 %v16070_v1 }
 0x6ed   :  { %9012 = vmatpush.msrb.mxu1 %v16076_v17 }
 0x6ef   :  { %9013 = vmatpush.msrb.mxu1 %v16082_v4 }
 0x6f1   :  { %9014 = vmatpush.msrb.mxu1 %v16088_v33 }
 0x6f3   :  { %9015 = vmatpush.msrb.mxu1 %v16094_v39 }
 0x6f5   :  { %9016 = vmatpush.msrb.mxu1 %v16100_v10 }
 0x6f7   :  { %9017 = vmatpush.msrb.mxu1 %v16107_v18 }
 0x6f8   :  { %9018 = vmatmul.f32.vlgmr.msrb.gmra.mxu1 %v17945_v42  ;;  %v16203_v42 = vld [vmem:[%s16729_s2 + $0x158] sm:$0xff] }
 0x6f9   :  { %9117 = vmatpush.msra.mxu1 %v15907_v30  ;;  %17957 = vst [vmem:[#allocation155_spill] sm:$0xff] %v16203_v42 }
 0x6fb   :  { %9118 = vmatpush.msra.mxu1 %v15914_v46 }
 0x6fd   :  { %9119 = vmatpush.msra.mxu1 %v15921_v62 }
 0x6ff   :  { %9120 = vmatpush.msra.mxu1 %v15928_v63  ;;  %v17971_v63 = vld [vmem:[#allocation19_spill] sm:$0xff] }
 0x701   :  { %9121 = vmatpush.msra.mxu1 %v15935_v16 }
 0x703   :  { %9122 = vmatpush.msra.mxu1 %v15941_v24  ;;  %v16359_v24 = vld [vmem:[%s16729_s2 + $0x80] sm:$0xff] }
 0x705   :  { %9123 = vmatpush.msra.mxu1 %v15947_v22 }
 0x707   :  { %9124 = vmatpush.msra.mxu1 %v15953_v25 }
 0x709   :  { %9125 = vmatpush.msra.mxu1 %v15959_v2  ;;  %v17970_v2 = vld [vmem:[#allocation97_spill] sm:$0xff] }
 0x70a   :  { %vm8752_vm12 = vcmp.eq.s32.totalorder %v17970_v2, 0  ;;  %vm8887_vm13 = vcmp.eq.s32.totalorder %v17970_v2, 1  ;;  %vm9022_vm14 = vcmp.eq.s32.totalorder %v17970_v2, 2  ;;  %vm9157_vm15 = vcmp.eq.s32.totalorder %v17970_v2, 3 }
 0x70b   :  { %9126 = vmatpush.msra.mxu1 %v15965_v8  ;;  %v8784_v8 = vperm.slane %v16007_v5, 0  ;;  %vm9292_vm0 = vcmp.eq.s32.totalorder %v17970_v2, 4  ;;  %vm9427_vm2 = vcmp.eq.s32.totalorder %v17970_v2, 5  ;;  %vm9562_vm5 = vcmp.eq.s32.totalorder %v17970_v2, 6 }
 0x70d   :  { %9127 = vmatpush.msra.mxu1 %v16142_v47  ;;  %v16348_v47 = vld [vmem:[%s16729_s2 + $0x98] sm:$0xff]  ;;  %v8785_v16 = vsel %vm8752_vm12, %v8784_v8, 0.0  ;;  %v8999_v8 = vpop.f32.mrf.mxu2 }
 0x70f   :  { %9128 = vmatpush.msra.mxu1 %v16148_v55  ;;  %v16342_v55 = vld [vmem:[%s16729_s2 + $0xa0] sm:$0xff] }
 0x711   :  { %9129 = vmatpush.msra.mxu1 %v16154_v26  ;;  %v16336_v26 = vld [vmem:[%s16729_s2 + $0xa8] sm:$0xff] }
 0x713   :  { %9130 = vmatpush.msra.mxu1 %v16160_v0  ;;  %v16330_v0 = vld [vmem:[%s16729_s2 + $0xb0] sm:$0xff] }
 0x715   :  { %9131 = vmatpush.msra.mxu1 %v16166_v49  ;;  %v16324_v49 = vld [vmem:[%s16729_s2 + $0xb8] sm:$0xff] }
 0x717   :  { %9132 = vmatpush.msra.mxu1 %v16172_v15  ;;  %v16318_v15 = vld [vmem:[%s16729_s2 + $0xc0] sm:$0xff] }
 0x718   :  { %9133 = vmatmul.f32.vlgmr.msra.gmra.mxu1 %v17952_v59  ;;  %v16209_v59 = vld [vmem:[%s16729_s2 + $0x150] sm:$0xff] }
 0x719   :  { %9232 = vmatpush.msrb.mxu1 %v16179_v32  ;;  %17958 = vst [vmem:[#allocation24_spill] sm:$0xff] %v16209_v59  ;;  %v16312_v32 = vld [vmem:[%s16729_s2 + $0xc8] sm:$0xff] }
 0x71b   :  { %9233 = vmatpush.msrb.mxu1 %v16185_v11  ;;  %v16306_v11 = vld [vmem:[%s16729_s2 + $0xd0] sm:$0xff] }
 0x71d   :  { %9234 = vmatpush.msrb.mxu1 %v16191_v36  ;;  %v16300_v36 = vld [vmem:[%s16729_s2 + $0xd8] sm:$0xff] }
 0x71f   :  { %9235 = vmatpush.msrb.mxu1 %v16197_v48  ;;  %v16221_v48 = vld [vmem:[%s16729_s2 + $0x140] sm:$0xff] }
 0x720   :  { %17960 = vst [vmem:[#allocation32_spill] sm:$0xff] %v16221_v48 }
 0x721   :  { %9236 = vmatpush.msrb.mxu1 %v16203_v42  ;;  %v16227_v42 = vld [vmem:[%s16729_s2 + $0x138] sm:$0xff] }
 0x722   :  { %17961 = vst [vmem:[#allocation162_spill] sm:$0xff] %v16227_v42 }
 0x723   :  { %9237 = vmatpush.msrb.mxu1 %v16209_v59  ;;  %v16233_v59 = vld [vmem:[%s16729_s2 + $0x130] sm:$0xff] }
 0x724   :  { %17962 = vst [vmem:[#allocation165_spill] sm:$0xff] %v16233_v59 }
 0x725   :  { %9238 = vmatpush.msrb.mxu1 %v16215_v21  ;;  %v16239_v21 = vld [vmem:[%s16729_s2 + $0x128] sm:$0xff] }
 0x726   :  { %17963 = vst [vmem:[#allocation34_spill] sm:$0xff] %v16239_v21 }
 0x727   :  { %9239 = vmatpush.msrb.mxu1 %v16221_v48  ;;  %v16245_v48 = vld [vmem:[%s16729_s2 + $0x120] sm:$0xff] }
 0x728   :  { %17964 = vst [vmem:[#allocation168_spill] sm:$0xff] %v16245_v48 }
 0x729   :  { %9240 = vmatpush.msrb.mxu1 %v16227_v42  ;;  %v16251_v42 = vld [vmem:[%s16729_s2 + $0x118] sm:$0xff] }
 0x72a   :  { %17965 = vst [vmem:[#allocation111_spill] sm:$0xff] %v16251_v42 }
 0x72b   :  { %9241 = vmatpush.msrb.mxu1 %v16233_v59  ;;  %v16257_v59 = vld [vmem:[%s16729_s2 + $0x110] sm:$0xff] }
 0x72c   :  { %17966 = vst [vmem:[#allocation169_spill] sm:$0xff] %v16257_v59 }
 0x72d   :  { %9242 = vmatpush.msrb.mxu1 %v16239_v21  ;;  %v16263_v21 = vld [vmem:[%s16729_s2 + $0x108] sm:$0xff] }
 0x72e   :  { %17967 = vst [vmem:[#allocation20_spill] sm:$0xff] %v16263_v21 }
 0x72f   :  { %9243 = vmatpush.msrb.mxu1 %v16245_v48  ;;  %v16269_v48 = vld [vmem:[%s16729_s2 + $0x100] sm:$0xff] }
 0x730   :  { %17968 = vst [vmem:[#allocation172_spill] sm:$0xff] %v16269_v48 }
 0x731   :  { %9244 = vmatpush.msrb.mxu1 %v16251_v42  ;;  %v17969_v42 = vld [vmem:[#allocation143_spill] sm:$0xff] }
 0x733   :  { %9245 = vmatpush.msrb.mxu1 %v16257_v59  ;;  %v16276_v59 = vld [vmem:[%s16729_s2 + $0xf8] sm:$0xff] }
 0x735   :  { %9246 = vmatpush.msrb.mxu1 %v16263_v21  ;;  %v16282_v21 = vld [vmem:[%s16729_s2 + $0xf0] sm:$0xff] }
 0x737   :  { %9247 = vmatpush.msrb.mxu1 %v16269_v48  ;;  %v16288_v48 = vld [vmem:[%s16729_s2 + $0xe8] sm:$0xff] }
 0x738   :  { %9248 = vmatmul.f32.vlgmr.msrb.gmra.mxu1 %v17969_v42  ;;  %v16294_v42 = vld [vmem:[%s16729_s2 + $0xe0] sm:$0xff] }
 0x739   :  { %9347 = vmatpush.msra.mxu1 %v16276_v59 }
 0x73b   :  { %9348 = vmatpush.msra.mxu1 %v16282_v21 }
 0x73d   :  { %9349 = vmatpush.msra.mxu1 %v16288_v48 }
 0x73f   :  { %9350 = vmatpush.msra.mxu1 %v16294_v42 }
 0x741   :  { %9351 = vmatpush.msra.mxu1 %v16300_v36 }
 0x743   :  { %9352 = vmatpush.msra.mxu1 %v16306_v11 }
 0x745   :  { %9353 = vmatpush.msra.mxu1 %v16312_v32 }
 0x747   :  { %9354 = vmatpush.msra.mxu1 %v16318_v15 }
 0x749   :  { %9355 = vmatpush.msra.mxu1 %v16324_v49 }
 0x74b   :  { %9356 = vmatpush.msra.mxu1 %v16330_v0 }
 0x74d   :  { %9357 = vmatpush.msra.mxu1 %v16336_v26 }
 0x74f   :  { %9358 = vmatpush.msra.mxu1 %v16342_v55 }
 0x751   :  { %9359 = vmatpush.msra.mxu1 %v16348_v47 }
 0x753   :  { %9360 = vmatpush.msra.mxu1 %v15463_v61 }
 0x755   :  { %9361 = vmatpush.msra.mxu1 %v15470_v31  ;;  %v8916_v25 = vpop.f32.mrf.mxu1 }
 0x756   :  { %v8919_v22 = vperm.slane %v8916_v25, 0 }
 0x757   :  { %9362 = vmatpush.msra.mxu1 %v16359_v24 }
 0x758   :  { %9363 = vmatmul.f32.vlgmr.msra.gmra.mxu1 %v17971_v63  ;;  %v8920_v61 = vsel %vm8887_vm13, %v8919_v22, 0.0  ;;  %v8959_v63 = vpop.f32.mrf.mxu0  ;;  %v8979_v22 = vpop.f32.mrf.mxu3 }
 0x759   :  { %v16363_v5 = vadd.f32 %v8920_v61, %v8785_v16  ;;  %10901 = vmatpush.msk.msrb.mxu1 %vm14521_vm3, %v17770_v35 }
 0x75b   :  { %10902 = vmatpush.msk.msrb.mxu1 %vm14545_vm1, %v17770_v35 }
 0x75d   :  { %10903 = vmatpush.msk.msrb.mxu1 %vm14572_vm7, %v17770_v35  ;;  %v8939_v31 = vpop.f32.mrf.mxu1 }
 0x75e   :  { %v8960_v16 = vadd.f32 %v8959_v63, %v8939_v31 }
 0x75f   :  { %10904 = vmatpush.msk.msrb.mxu1 %vm14564_vm6, %v17770_v35 }
 0x760   :  { %v8980_v25 = vadd.f32 %v8979_v22, %v8960_v16 }
 0x761   :  { %9462 = vmatpush.msra.mxu1 %v15686_v12 }
 0x762   :  { %v9000_v61 = vadd.f32 %v8999_v8, %v8980_v25 }
 0x763   :  { %9463 = vmatpush.msra.mxu1 %v15693_v28 }
 0x765   :  { %9464 = vmatpush.msra.mxu1 %v15700_v51 }
 0x767   :  { %9465 = vmatpush.msra.mxu1 %v15707_v19 }
 0x769   :  { %9466 = vmatpush.msra.mxu1 %v15715_v43 }
 0x76b   :  { %9467 = vmatpush.msra.mxu1 %v15722_v53 }
 0x76d   :  { %9468 = vmatpush.msra.mxu1 %v15729_v9 }
 0x76f   :  { %9469 = vmatpush.msra.mxu1 %v15736_v20 }
 0x771   :  { %9470 = vmatpush.msra.mxu1 %v15743_v50 }
 0x773   :  { %9471 = vmatpush.msra.mxu1 %v15749_v38 }
 0x775   :  { %9472 = vmatpush.msra.mxu1 %v15827_v57  ;;  %v9019_v62 = vpop.f32.mrf.mxu1 }
 0x776   :  { %v9020_v46 = vadd.f32 %v9019_v62, %v9000_v61 }
 0x777   :  { %9473 = vmatpush.msra.mxu1 %v15833_v7 }
 0x778   :  { %v9023_v31 = vmul.f32 %v9020_v46, %v15664_v29  ;;  %v17972_v46 = vld [vmem:[#allocation140_spill] sm:$0xff] }
 0x779   :  { %9474 = vmatpush.msra.mxu1 %v15839_v52 }
 0x77a   :  { %v9024_v63 = vsel %vm8620_vm10, %v9023_v31, 0.0 }
 0x77b   :  { %9475 = vmatpush.msra.mxu1 %v15845_v44  ;;  %v9025_v16 = vrot.slane %v9024_v63, 4 }
 0x77d   :  { %9476 = vmatpush.msra.mxu1 %v15851_v3  ;;  %v9026_v22 = vadd.f32 %v9025_v16, %v9024_v63 }
 0x77f   :  { %9477 = vmatpush.msra.mxu1 %v15857_v34  ;;  %v9027_v25 = vrot.slane %v9026_v22, 2 }
 0x781   :  { %v9028_v8 = vadd.f32 %v9027_v25, %v9026_v22 }
 0x783   :  { %v9029_v30 = vrot.slane %v9028_v8, 1 }
 0x785   :  { %v9030_v62 = vadd.f32 %v9029_v30, %v9028_v8  ;;  %v11036_v30 = vld [vmem:[%s16729_s2 + $0x88] sm:$0xff] }
 0x787   :  { %10890 = vmatmul.msk.f32.vlgmr.msrb.gmra.mxu0 %vm8628_vm11, %v9030_v62 }
 0x788   :  { %10891 = vmatpush.msk.msrb.mxu0 %vm14521_vm3, %v17770_v35 }
 0x78a   :  { %10892 = vmatpush.msk.msrb.mxu0 %vm14545_vm1, %v17770_v35 }
 0x78c   :  { %10893 = vmatpush.msk.msrb.mxu0 %vm14572_vm7, %v17770_v35 }
 0x78e   :  { %10894 = vmatpush.msk.msrb.mxu0 %vm14564_vm6, %v17770_v35 }
 0x78f   :  { %9093 = vmatmul.f32.vlgmr.msra.gmra.mxu0 %v17972_v46 }
 0x790   :  { %9212 = vmatpush.msra.mxu0 %v16276_v59 }
 0x792   :  { %9213 = vmatpush.msra.mxu0 %v16282_v21  ;;  %v11035_v21 = vld [vmem:[%s16729_s2 + $0x90] sm:$0xff] }
 0x794   :  { %9214 = vmatpush.msra.mxu0 %v16288_v48 }
 0x795   :  { %v9134_v48 = vpop.f32.mrf.mxu1 }
 0x796   :  { %9215 = vmatpush.msra.mxu0 %v16294_v42 }
 0x798   :  { %9216 = vmatpush.msra.mxu0 %v16300_v36 }
 0x79a   :  { %9217 = vmatpush.msra.mxu0 %v16306_v11  ;;  %v9114_v11 = vpop.f32.mrf.mxu2 }
 0x79c   :  { %9218 = vmatpush.msra.mxu0 %v16312_v32 }
 0x79e   :  { %9219 = vmatpush.msra.mxu0 %v16318_v15 }
 0x7a0   :  { %9220 = vmatpush.msra.mxu0 %v16324_v49 }
 0x7a2   :  { %9221 = vmatpush.msra.mxu0 %v16330_v0 }
 0x7a4   :  { %9222 = vmatpush.msra.mxu0 %v16336_v26 }
 0x7a6   :  { %9223 = vmatpush.msra.mxu0 %v16342_v55 }
 0x7a8   :  { %9224 = vmatpush.msra.mxu0 %v16348_v47  ;;  %v9074_v47 = vpop.f32.mrf.mxu3 }
 0x7aa   :  { %9225 = vmatpush.msra.mxu0 %v11035_v21 }
 0x7ac   :  { %9226 = vmatpush.msra.mxu0 %v11036_v30 }
 0x7ae   :  { %9227 = vmatpush.msra.mxu0 %v16359_v24 }
 0x7b0   :  { %v9154_v42 = vpop.f32.mrf.mxu3 }
 0x804   :  { %v9051_v0 = vpop.f32.mrf.mxu0 }
 0x805   :  { %v9054_v26 = vperm.slane %v9051_v0, 0 }
 0x807   :  { %v9055_v49 = vsel %vm9022_vm14, %v9054_v26, 0.0 }
 0x808   :  { %v9056_v55 = vadd.f32 %v9055_v49, %v16363_v5  ;;  %v17973_v5 = vld [vmem:[#allocation103_spill] sm:$0xff]  ;;  %v17974_v49 = vld [vmem:[#allocation146_spill] sm:$0xff] }
 0x80c   :  { %v9094_v15 = vpop.f32.mrf.mxu0 }
 0x80d   :  { %v9095_v32 = vadd.f32 %v9094_v15, %v9074_v47  ;;  %v17976_v47 = vld [vmem:[#allocation48_spill] sm:$0xff]  ;;  %v17977_v15 = vld [vmem:[#allocation49_spill] sm:$0xff] }
 0x80f   :  { %v9115_v36 = vadd.f32 %v9114_v11, %v9095_v32  ;;  %v17978_v32 = vld [vmem:[#allocation4_spill] sm:$0xff]  ;;  %v17979_v11 = vld [vmem:[#allocation50_spill] sm:$0xff] }
 0x811   :  { %v9135_v59 = vadd.f32 %v9134_v48, %v9115_v36  ;;  %v17980_v36 = vld [vmem:[#allocation90_spill] sm:$0xff]  ;;  %v17981_v48 = vld [vmem:[#allocation91_spill] sm:$0xff] }
 0x813   :  { %v9155_v61 = vadd.f32 %v9154_v42, %v9135_v59  ;;  %v17982_v59 = vld [vmem:[#allocation136_spill] sm:$0xff]  ;;  %v17983_v42 = vld [vmem:[#allocation95_spill] sm:$0xff] }
 0x815   :  { %v9158_v31 = vmul.f32 %v9155_v61, %v15664_v29  ;;  %v17984_v61 = vld [vmem:[#allocation55_spill] sm:$0xff] }
 0x817   :  { %v9159_v24 = vsel %vm8620_vm10, %v9158_v31, 0.0  ;;  %v17985_v31 = vld [vmem:[#allocation98_spill] sm:$0xff] }
 0x818   :  { %v9160_v63 = vrot.slane %v9159_v24, 4 }
 0x81a   :  { %v9161_v16 = vadd.f32 %v9160_v63, %v9159_v24  ;;  %v17986_v24 = vld [vmem:[#allocation99_spill] sm:$0xff] }
 0x81b   :  { %v17987_v63 = vld [vmem:[#allocation7_spill] sm:$0xff] }
 0x81c   :  { %v9162_v22 = vrot.slane %v9161_v16, 2 }
 0x81e   :  { %v9163_v25 = vadd.f32 %v9162_v22, %v9161_v16  ;;  %v17988_v16 = vld [vmem:[#allocation14_spill] sm:$0xff]  ;;  %v17989_v22 = vld [vmem:[#allocation104_spill] sm:$0xff] }
 0x820   :  { %v9164_v8 = vrot.slane %v9163_v25, 1 }
 0x822   :  { %v9165_v62 = vadd.f32 %v9164_v8, %v9163_v25  ;;  %v17990_v25 = vld [vmem:[#allocation6_spill] sm:$0xff] }
 0x823   :  { %v17991_v8 = vld [vmem:[#allocation18_spill] sm:$0xff] }
 0x824   :  { %10895 = vmatmul.msk.f32.vlgmr.msrb.gmra.mxu0 %vm8628_vm11, %v9165_v62  ;;  %v17992_v62 = vld [vmem:[#allocation157_spill] sm:$0xff] }
 0x825   :  { %10896 = vmatpush.msk.msrb.mxu0 %vm14521_vm3, %v17770_v35 }
 0x827   :  { %10897 = vmatpush.msk.msrb.mxu0 %vm14545_vm1, %v17770_v35 }
 0x829   :  { %10898 = vmatpush.msk.msrb.mxu0 %vm14572_vm7, %v17770_v35 }
 0x82b   :  { %10899 = vmatpush.msk.msrb.mxu0 %vm14564_vm6, %v17770_v35 }
 0x82c   :  { %9228 = vmatmul.f32.vlgmr.msra.gmra.mxu0 %v17973_v5  ;;  %v17993_v5 = vld [vmem:[#allocation148_spill] sm:$0xff] }
 0x82d   :  { %9327 = vmatpush.msra.mxu0 %v15686_v12 }
 0x82f   :  { %9328 = vmatpush.msra.mxu0 %v15693_v28 }
 0x831   :  { %9329 = vmatpush.msra.mxu0 %v15700_v51 }
 0x833   :  { %9330 = vmatpush.msra.mxu0 %v15707_v19 }
 0x835   :  { %9331 = vmatpush.msra.mxu0 %v15715_v43  ;;  %v9209_v43 = vpop.f32.mrf.mxu2 }
 0x837   :  { %9332 = vmatpush.msra.mxu0 %v15722_v53 }
 0x839   :  { %9333 = vmatpush.msra.mxu0 %v15729_v9 }
 0x83b   :  { %9334 = vmatpush.msra.mxu0 %v15736_v20  ;;  %v9249_v20 = vpop.f32.mrf.mxu1 }
 0x83d   :  { %9335 = vmatpush.msra.mxu0 %v15743_v50 }
 0x83f   :  { %9336 = vmatpush.msra.mxu0 %v15749_v38  ;;  %v9269_v38 = vpop.f32.mrf.mxu3 }
 0x841   :  { %9337 = vmatpush.msra.mxu0 %v15827_v57 }
 0x843   :  { %9338 = vmatpush.msra.mxu0 %v15833_v7  ;;  %v9289_v7 = vpop.f32.mrf.mxu2 }
 0x845   :  { %9339 = vmatpush.msra.mxu0 %v15839_v52 }
 0x847   :  { %9340 = vmatpush.msra.mxu0 %v15845_v44 }
 0x849   :  { %9341 = vmatpush.msra.mxu0 %v15851_v3 }
 0x84b   :  { %9342 = vmatpush.msra.mxu0 %v15857_v34 }
 0x8a1   :  { %v9186_v12 = vpop.f32.mrf.mxu0 }
 0x8a2   :  { %v9189_v28 = vperm.slane %v9186_v12, 0  ;;  %v17994_v12 = vld [vmem:[#allocation8_spill] sm:$0xff] }
 0x8a4   :  { %v9190_v51 = vsel %vm9157_vm15, %v9189_v28, 0.0  ;;  %v17995_v28 = vld [vmem:[#allocation151_spill] sm:$0xff] }
 0x8a5   :  { %v16464_v19 = vadd.f32 %v9190_v51, %v9056_v55  ;;  %v17975_v55 = vld [vmem:[#allocation153_spill] sm:$0xff]  ;;  %v17996_v51 = vld [vmem:[#allocation108_spill] sm:$0xff] }
 0x8a9   :  { %v9229_v53 = vpop.f32.mrf.mxu0 }
 0x8aa   :  { %v9230_v9 = vadd.f32 %v9229_v53, %v9209_v43  ;;  %v17997_v43 = vld [vmem:[#allocation155_spill] sm:$0xff]  ;;  %v17998_v53 = vld [vmem:[#allocation24_spill] sm:$0xff] }
 0x8ac   :  { %v9250_v50 = vadd.f32 %v9249_v20, %v9230_v9  ;;  %v17999_v9 = vld [vmem:[#allocation25_spill] sm:$0xff]  ;;  %v18000_v20 = vld [vmem:[#allocation32_spill] sm:$0xff] }
 0x8ae   :  { %v9270_v57 = vadd.f32 %v9269_v38, %v9250_v50  ;;  %v18001_v50 = vld [vmem:[#allocation162_spill] sm:$0xff]  ;;  %v18002_v38 = vld [vmem:[#allocation165_spill] sm:$0xff] }
 0x8b0   :  { %v9290_v52 = vadd.f32 %v9289_v7, %v9270_v57  ;;  %v18003_v57 = vld [vmem:[#allocation34_spill] sm:$0xff]  ;;  %v18004_v7 = vld [vmem:[#allocation168_spill] sm:$0xff] }
 0x8b2   :  { %v9293_v44 = vmul.f32 %v9290_v52, %v15664_v29  ;;  %v18005_v52 = vld [vmem:[#allocation111_spill] sm:$0xff] }
 0x8b4   :  { %v9294_v3 = vsel %vm8620_vm10, %v9293_v44, 0.0  ;;  %v18006_v44 = vld [vmem:[#allocation169_spill] sm:$0xff] }
 0x8b5   :  { %v9295_v34 = vrot.slane %v9294_v3, 4 }
 0x8b7   :  { %v9296_v46 = vadd.f32 %v9295_v34, %v9294_v3  ;;  %v18007_v3 = vld [vmem:[#allocation20_spill] sm:$0xff] }
 0x8b8   :  { %v18008_v34 = vld [vmem:[#allocation172_spill] sm:$0xff] }
 0x8b9   :  { %v9297_v21 = vrot.slane %v9296_v46, 2 }
 0x8bb   :  { %v9298_v30 = vadd.f32 %v9297_v21, %v9296_v46  ;;  %v18009_v46 = vld [vmem:[#allocation159_spill] sm:$0xff] }
 0x8bd   :  { %v9299_v0 = vrot.slane %v9298_v30, 1 }
 0x8bf   :  { %v9300_v26 = vadd.f32 %v9299_v0, %v9298_v30 }
 0x8c1   :  { %10900 = vmatmul.msk.f32.vlgmr.msrb.gmra.mxu0 %vm8628_vm11, %v9300_v26 }
 0x8c2   :  { %9407 = vmatpush.msrb.mxu0 %v16014_v27 }
 0x8c4   :  { %9408 = vmatpush.msrb.mxu0 %v16020_v41 }
 0x8c6   :  { %9409 = vmatpush.msrb.mxu0 %v16026_v60 }
 0x8c8   :  { %9410 = vmatpush.msrb.mxu0 %v16032_v13 }
 0x8c9   :  { %9343 = vmatmul.f32.vlgmr.msra.gmra.mxu0 %v17974_v49 }
 0x8ca   :  { %9411 = vmatpush.msrb.mxu0 %v16038_v56 }
 0x8cc   :  { %9412 = vmatpush.msrb.mxu0 %v16044_v6 }
 0x8ce   :  { %9413 = vmatpush.msrb.mxu0 %v16050_v23 }
 0x8d0   :  { %9414 = vmatpush.msrb.mxu0 %v16056_v37 }
 0x8d2   :  { %9415 = vmatpush.msrb.mxu0 %v16064_v58 }
 0x8d4   :  { %9416 = vmatpush.msrb.mxu0 %v16070_v1 }
 0x8d6   :  { %9417 = vmatpush.msrb.mxu0 %v16076_v17 }
 0x8d8   :  { %9418 = vmatpush.msrb.mxu0 %v16082_v4 }
 0x8da   :  { %9419 = vmatpush.msrb.mxu0 %v16088_v33 }
 0x8dc   :  { %9420 = vmatpush.msrb.mxu0 %v16094_v39 }
 0x8de   :  { %9421 = vmatpush.msrb.mxu0 %v16100_v10 }
 0x8e0   :  { %9422 = vmatpush.msrb.mxu0 %v16107_v18 }
 0x8e1   :  { %9423 = vmatmul.f32.vlgmr.msrb.gmra.mxu0 %v17975_v55  ;;  %v9364_v55 = vpop.f32.mrf.mxu1 }
 0x8e2   :  { %9522 = vmatpush.msra.mxu0 %v17976_v47 }
 0x8e4   :  { %9523 = vmatpush.msra.mxu0 %v17977_v15 }
 0x8e6   :  { %9524 = vmatpush.msra.mxu0 %v17978_v32 }
 0x8e8   :  { %9525 = vmatpush.msra.mxu0 %v17979_v11 }
 0x8ea   :  { %9526 = vmatpush.msra.mxu0 %v17980_v36 }
 0x8ec   :  { %9527 = vmatpush.msra.mxu0 %v17981_v48 }
 0x8ee   :  { %9528 = vmatpush.msra.mxu0 %v17982_v59 }
 0x8f0   :  { %9529 = vmatpush.msra.mxu0 %v17983_v42 }
 0x8f2   :  { %9530 = vmatpush.msra.mxu0 %v17984_v61 }
 0x8f4   :  { %9531 = vmatpush.msra.mxu0 %v17985_v31 }
 0x8f6   :  { %9532 = vmatpush.msra.mxu0 %v17986_v24 }
 0x8f8   :  { %9533 = vmatpush.msra.mxu0 %v17987_v63 }
 0x8fa   :  { %9534 = vmatpush.msra.mxu0 %v17988_v16 }
 0x8fc   :  { %9535 = vmatpush.msra.mxu0 %v17989_v22 }
 0x8fe   :  { %9536 = vmatpush.msra.mxu0 %v17990_v25 }
 0x900   :  { %9537 = vmatpush.msra.mxu0 %v17991_v8 }
 0x901   :  { %9538 = vmatmul.f32.vlgmr.msra.gmra.mxu0 %v17992_v62 }
 0x902   :  { %9637 = vmatpush.msrb.mxu0 %v17993_v5  ;;  %v9384_v5 = vpop.f32.mrf.mxu3 }
 0x904   :  { %9638 = vmatpush.msrb.mxu0 %v17994_v12 }
 0x906   :  { %9639 = vmatpush.msrb.mxu0 %v17995_v28  ;;  %v9404_v28 = vpop.f32.mrf.mxu2 }
 0x908   :  { %9640 = vmatpush.msrb.mxu0 %v17996_v51 }
 0x90a   :  { %9641 = vmatpush.msrb.mxu0 %v17997_v43 }
 0x90c   :  { %9642 = vmatpush.msrb.mxu0 %v17998_v53 }
 0x90e   :  { %9643 = vmatpush.msrb.mxu0 %v17999_v9 }
 0x910   :  { %9644 = vmatpush.msrb.mxu0 %v18000_v20 }
 0x912   :  { %9645 = vmatpush.msrb.mxu0 %v18001_v50 }
 0x914   :  { %9646 = vmatpush.msrb.mxu0 %v18002_v38 }
 0x916   :  { %9647 = vmatpush.msrb.mxu0 %v18003_v57 }
 0x918   :  { %9648 = vmatpush.msrb.mxu0 %v18004_v7 }
 0x91a   :  { %9649 = vmatpush.msrb.mxu0 %v18005_v52 }
 0x91c   :  { %9650 = vmatpush.msrb.mxu0 %v18006_v44 }
 0x91e   :  { %9651 = vmatpush.msrb.mxu0 %v18007_v3 }
 0x920   :  { %9652 = vmatpush.msrb.mxu0 %v18008_v34 }
 0x921   :  { %9653 = vmatmul.f32.vlgmr.msrb.gmra.mxu0 %v18009_v46 }
 0x93e   :  { %v9321_v21 = vpop.f32.mrf.mxu0 }
 0x93f   :  { %v9324_v30 = vperm.slane %v9321_v21, 0 }
 0x941   :  { %v9325_v0 = vsel %vm9292_vm0, %v9324_v30, 0.0 }
 0x942   :  { %v9326_v26 = vadd.f32 %v9325_v0, %v16464_v19  ;;  %v18010_v19 = vld [vmem:[#allocation110_spill] sm:$0xff] }
 0x946   :  { %v9344_v49 = vpop.f32.mrf.mxu0 }
 0x947   :  { %v9365_v62 = vadd.f32 %v9364_v55, %v9344_v49  ;;  %v9743_v55 = vld [vmem:[%s16732_s5] sm:$0xff] }
 0x949   :  { %v9385_v12 = vadd.f32 %v9384_v5, %v9365_v62  ;;  %v9744_v62 = vld [vmem:[%s16732_s5 + $0x8] sm:$0xff]  ;;  %v9751_v5 = vld [vmem:[%s16732_s5 + $0x40] sm:$0xff] }
 0x94a   :  { %9801 = vmatpush.msra.mxu0 %v9744_v62  ;;  %9941 = vmatpush.msrb.mxu2 %v9751_v5 }
 0x94b   :  { %v9405_v51 = vadd.f32 %v9404_v28, %v9385_v12  ;;  %v9745_v12 = vld [vmem:[%s16732_s5 + $0x10] sm:$0xff]  ;;  %v9746_v28 = vld [vmem:[%s16732_s5 + $0x18] sm:$0xff] }
 0x94c   :  { %9841 = vmatpush.msrb.mxu0 %v9746_v28 }
 0x95e   :  { %v9424_v43 = vpop.f32.mrf.mxu0 }
 0x95f   :  { %v9425_v53 = vadd.f32 %v9424_v43, %v9405_v51  ;;  %v9750_v51 = vld [vmem:[%s16732_s5 + $0x38] sm:$0xff]  ;;  %v9755_v43 = vld [vmem:[%s16732_s5 + $0x60] sm:$0xff] }
 0x960   :  { %10021 = vmatpush.msra.mxu2 %v9755_v43 }
 0x961   :  { %v9428_v9 = vmul.f32 %v9425_v53, %v15664_v29 }
 0x963   :  { %v9429_v20 = vsel %vm8620_vm10, %v9428_v9, 0.0 }
 0x964   :  { %v9430_v50 = vrot.slane %v9429_v20, 4 }
 0x966   :  { %v9431_v38 = vadd.f32 %v9430_v50, %v9429_v20  ;;  %v18014_v50 = vld [vmem:[#allocation130_spill] sm:$0xff] }
 0x968   :  { %v9432_v57 = vrot.slane %v9431_v38, 2 }
 0x96a   :  { %v9433_v7 = vadd.f32 %v9432_v57, %v9431_v38  ;;  %v9732_v38 = vperm.slane %v18014_v50, 0 }
 0x96c   :  { %v9434_v52 = vrot.slane %v9433_v7, 1 }
 0x96e   :  { %v9435_v44 = vadd.f32 %v9434_v52, %v9433_v7  ;;  %v10949_v7 = vld [vmem:[%s16731_s4] ss:$0 sm:$0xff] }
 0x970   :  { %10905 = vmatmul.msk.f32.vlgmr.msrb.gmra.mxu1 %vm8628_vm11, %v9435_v44 }
 0x971   :  { %9542 = vmatpush.msrb.mxu1 %v16014_v27  ;;  %v18011_v27 = vld [vmem:[#allocation28_spill] sm:$0xff] }
 0x973   :  { %9543 = vmatpush.msrb.mxu1 %v16020_v41  ;;  %v18012_v41 = vld [vmem:[#allocation113_spill] sm:$0xff] }
 0x975   :  { %9544 = vmatpush.msrb.mxu1 %v16026_v60 }
 0x977   :  { %9545 = vmatpush.msrb.mxu1 %v16032_v13 }
 0x978   :  { %9478 = vmatmul.f32.vlgmr.msra.gmra.mxu1 %v18010_v19 }
 0x979   :  { %9546 = vmatpush.msrb.mxu1 %v16038_v56 }
 0x97b   :  { %9547 = vmatpush.msrb.mxu1 %v16044_v6 }
 0x97d   :  { %9548 = vmatpush.msrb.mxu1 %v16050_v23 }
 0x97f   :  { %9549 = vmatpush.msrb.mxu1 %v16056_v37  ;;  %v9499_v37 = vpop.f32.mrf.mxu3 }
 0x981   :  { %9550 = vmatpush.msrb.mxu1 %v16064_v58 }
 0x983   :  { %9551 = vmatpush.msrb.mxu1 %v16070_v1  ;;  %v9519_v1 = vpop.f32.mrf.mxu2 }
 0x985   :  { %9552 = vmatpush.msrb.mxu1 %v16076_v17 }
 0x987   :  { %9553 = vmatpush.msrb.mxu1 %v16082_v4  ;;  %v9539_v4 = vpop.f32.mrf.mxu0 }
 0x989   :  { %9554 = vmatpush.msrb.mxu1 %v16088_v33 }
 0x98b   :  { %9555 = vmatpush.msrb.mxu1 %v16094_v39 }
 0x98d   :  { %9556 = vmatpush.msrb.mxu1 %v16100_v10 }
 0x98f   :  { %9557 = vmatpush.msrb.mxu1 %v16107_v18 }
 0x990   :  { %9558 = vmatmul.f32.vlgmr.msrb.gmra.mxu1 %v18011_v27 }
 0x991   :  { %9657 = vmatpush.msra.mxu1 %v17976_v47 }
 0x993   :  { %9658 = vmatpush.msra.mxu1 %v17977_v15 }
 0x995   :  { %9659 = vmatpush.msra.mxu1 %v17978_v32 }
 0x997   :  { %9660 = vmatpush.msra.mxu1 %v17979_v11 }
 0x999   :  { %9661 = vmatpush.msra.mxu1 %v17980_v36 }
 0x99b   :  { %9662 = vmatpush.msra.mxu1 %v17981_v48 }
 0x99d   :  { %9663 = vmatpush.msra.mxu1 %v17982_v59 }
 0x99f   :  { %9664 = vmatpush.msra.mxu1 %v17983_v42  ;;  %v18013_v42 = vld [vmem:[#allocation112_spill] sm:$0xff] }
 0x9a1   :  { %9665 = vmatpush.msra.mxu1 %v17984_v61 }
 0x9a3   :  { %9666 = vmatpush.msra.mxu1 %v17985_v31 }
 0x9a5   :  { %9667 = vmatpush.msra.mxu1 %v17986_v24 }
 0x9a7   :  { %9668 = vmatpush.msra.mxu1 %v17987_v63  ;;  %v9614_v63 = vpop.f32.mrf.mxu2 }
 0x9a9   :  { %9669 = vmatpush.msra.mxu1 %v17988_v16 }
 0x9ab   :  { %9670 = vmatpush.msra.mxu1 %v17989_v22  ;;  %v9654_v22 = vpop.f32.mrf.mxu0 }
 0x9ad   :  { %9671 = vmatpush.msra.mxu1 %v17990_v25 }
 0x9af   :  { %9672 = vmatpush.msra.mxu1 %v17991_v8  ;;  %v9694_v3 = vpop.f32.mrf.mxu2 }
 0x9b0   :  { %9673 = vmatmul.f32.vlgmr.msra.gmra.mxu1 %v18012_v41 }
 0x9ed   :  { %v9456_v60 = vpop.f32.mrf.mxu1 }
 0x9ee   :  { %v9459_v13 = vperm.slane %v9456_v60, 0 }
 0x9f0   :  { %v9460_v56 = vsel %vm9427_vm2, %v9459_v13, 0.0  ;;  %v9749_v13 = vld [vmem:[%s16732_s5 + $0x30] sm:$0xff] }
 0x9f1   :  { %v9461_v6 = vadd.f32 %v9460_v56, %v9326_v26  ;;  %v9754_v56 = vld [vmem:[%s16732_s5 + $0x58] sm:$0xff] }
 0x9f5   :  { %v9479_v23 = vpop.f32.mrf.mxu1 }
 0x9f6   :  { %v9500_v58 = vadd.f32 %v9499_v37, %v9479_v23  ;;  %v9752_v23 = vld [vmem:[%s16732_s5 + $0x48] sm:$0xff]  ;;  %v9753_v37 = vld [vmem:[%s16732_s5 + $0x50] sm:$0xff] }
 0x9f8   :  { %v9520_v17 = vadd.f32 %v9519_v1, %v9500_v58  ;;  %v9758_v58 = vld [vmem:[%s16732_s5 + $0x78] sm:$0xff]  ;;  %v9756_v1 = vld [vmem:[%s16732_s5 + $0x68] sm:$0xff] }
 0x9fa   :  { %v9540_v33 = vadd.f32 %v9539_v4, %v9520_v17  ;;  %v9757_v17 = vld [vmem:[%s16732_s5 + $0x70] sm:$0xff]  ;;  %v9762_v4 = vld [vmem:[%s16732_s5 + $0x98] sm:$0xff] }
 0xa0d   :  { %v9559_v39 = vpop.f32.mrf.mxu1 }
 0xa0e   :  { %v9560_v10 = vadd.f32 %v9559_v39, %v9540_v33  ;;  %v9760_v33 = vld [vmem:[%s16732_s5 + $0x88] sm:$0xff]  ;;  %v9761_v39 = vld [vmem:[%s16732_s5 + $0x90] sm:$0xff] }
 0xa10   :  { %v9563_v18 = vmul.f32 %v9560_v10, %v15664_v29 }
 0xa12   :  { %v9564_v47 = vsel %vm8620_vm10, %v9563_v18, 0.0 }
 0xa13   :  { %v9565_v15 = vrot.slane %v9564_v47, 4 }
 0xa15   :  { %v9566_v32 = vadd.f32 %v9565_v15, %v9564_v47 }
 0xa17   :  { %v9567_v11 = vrot.slane %v9566_v32, 2 }
 0xa19   :  { %v9568_v36 = vadd.f32 %v9567_v11, %v9566_v32 }
 0xa1b   :  { %v9569_v48 = vrot.slane %v9568_v36, 1 }
 0xa1d   :  { %v9570_v59 = vadd.f32 %v9569_v48, %v9568_v36 }
 0xa1f   :  { %10910 = vmatmul.msk.f32.vlgmr.msra.gmra.mxu3 %vm8628_vm11, %v9570_v59 }
 0xa20   :  { %10911 = vmatpush.msk.msra.mxu3 %vm14521_vm3, %v17770_v35  ;;  %vm9697_vm3 = vcmp.eq.s32.totalorder %v17970_v2, 7  ;;  %v9748_v2 = vld [vmem:[%s16732_s5 + $0x28] sm:$0xff] }
 0xa22   :  { %10912 = vmatpush.msk.msra.mxu3 %vm14545_vm1, %v17770_v35 }
 0xa24   :  { %10913 = vmatpush.msk.msra.mxu3 %vm14572_vm7, %v17770_v35 }
 0xa26   :  { %10914 = vmatpush.msk.msra.mxu3 %vm14564_vm6, %v17770_v35 }
 0xa27   :  { %9633 = vmatmul.f32.vlgmr.msrb.gmra.mxu3 %v18013_v42 }
 0xa28   :  { %9781 = vmatpush.msrb.mxu3 %v9743_v55 }
 0xa2d   :  { %v9674_v8 = vpop.f32.mrf.mxu1 }
 0xaa2   :  { %v9591_v61 = vpop.f32.mrf.mxu3 }
 0xaa3   :  { %v9594_v31 = vperm.slane %v9591_v61, 0 }
 0xaa5   :  { %v9595_v45 = vsel %vm9562_vm5, %v9594_v31, 0.0 }
 0xaa6   :  { %v9596_v24 = vadd.f32 %v9595_v45, %v9461_v6  ;;  %v9759_v6 = vld [vmem:[%s16732_s5 + $0x80] sm:$0xff] }
 0xaaa   :  { %v9634_v16 = vpop.f32.mrf.mxu3 }
 0xaab   :  { %v9635_v14 = vadd.f32 %v9634_v16, %v9614_v63 }
 0xaad   :  { %v9655_v25 = vadd.f32 %v9654_v22, %v9635_v14 }
 0xaaf   :  { %v9675_v40 = vadd.f32 %v9674_v8, %v9655_v25 }
 0xab1   :  { %v9695_v34 = vadd.f32 %v9694_v3, %v9675_v40 }
 0xab3   :  { %v9698_v54 = vmul.f32 %v9695_v34, %v15664_v29  ;;  %v9747_v29 = vld [vmem:[%s16732_s5 + $0x20] sm:$0xff] }
 0xab4   :  { %9861 = vmatpush.msrb.mxu1 %v9747_v29 }
 0xab5   :  { %v9699_v35 = vsel %vm8620_vm10, %v9698_v54, 0.0 }
 0xab6   :  { %v9700_v46 = vrot.slane %v9699_v35, 4  ;;  %9921 = vmatpush.msra.mxu1 %v9750_v51 }
 0xab8   :  { %v9701_v21 = vadd.f32 %v9700_v46, %v9699_v35 }
 0xaba   :  { %v9702_v30 = vrot.slane %v9701_v21, 2 }
 0xabc   :  { %v9703_v0 = vadd.f32 %v9702_v30, %v9701_v21 }
 0xabe   :  { %v9704_v26 = vrot.slane %v9703_v0, 1 }
 0xac0   :  { %v9705_v49 = vadd.f32 %v9704_v26, %v9703_v0 }
 0xac2   :  { %10915 = vmatmul.msk.f32.vlgmr.msra.gmra.mxu3 %vm8628_vm11, %v9705_v49 }
 0xac3   :  { %9821 = vmatpush.msra.mxu3 %v9745_v12 }
 0xb45   :  { %v9726_v53 = vpop.f32.mrf.mxu3 }
 0xb46   :  { %v9729_v9 = vperm.slane %v9726_v53, 0 }
 0xb48   :  { %v9730_v20 = vsel %vm9697_vm3, %v9729_v9, 0.0 }
 0xb49   :  { %v9731_v57 = vadd.f32 %v9730_v20, %v9596_v24 }
 0xb4b   :  { %v9733_v52 = vadd.f32 %v9732_v38, %v9731_v57 }
 0xb4d   :  { %v9738_v44 = vadd.f32 %v10949_v7, %v9733_v52 }
 0xb4f   :  { %v9739_v19 = vmul.f32 0.5, %v9738_v44 }
 0xb51   :  { %10950 = vtanh.f32 %v9739_v19 }
 0xb57   :  { %v10951_v27 = vpop.eup %10950 }
 0xb58   :  { %v9741_v41 = vadd.f32 1.0, %v10951_v27 }
 0xb5a   :  { %v9742_v60 = vmul.f32 0.5, %v9741_v41 }
 0xb5c   :  { %10916 = vmatmul.msk.f32.vlgmr.msrb.gmra.mxu3 %vm8595_vm4, %v9742_v60  ;;  %10917 = vmatmul.msk.f32.vlgmr.msra.gmra.mxu0 %vm8595_vm4, %v9742_v60 }
 0xb5d   :  { %10920 = vmatmul.msk.f32.vlgmr.msrb.gmra.mxu1 %vm8595_vm4, %v9742_v60  ;;  %10924 = vmatmul.msk.f32.vlgmr.msrb.gmra.mxu2 %vm8595_vm4, %v9742_v60 }
 0xb5e   :  { %9881 = vmatpush.msrb.mxu3 %v9748_v2  ;;  %9901 = vmatpush.msra.mxu0 %v9749_v13 }
 0xb5f   :  { %10001 = vmatpush.msrb.mxu1 %v9754_v56  ;;  %10101 = vmatpush.msrb.mxu2 %v9759_v6 }
 0xb64   :  { %10918 = vmatmul.msk.f32.vlgmr.msra.gmra.mxu3 %vm8595_vm4, %v9742_v60  ;;  %10919 = vmatmul.msk.f32.vlgmr.msrb.gmra.mxu0 %vm8595_vm4, %v9742_v60 }
 0xb65   :  { %10923 = vmatmul.msk.f32.vlgmr.msra.gmra.mxu1 %vm8595_vm4, %v9742_v60  ;;  %10928 = vmatmul.msk.f32.vlgmr.msra.gmra.mxu2 %vm8595_vm4, %v9742_v60 }
 0xb66   :  { %9961 = vmatpush.msra.mxu3 %v9752_v23  ;;  %9981 = vmatpush.msrb.mxu0 %v9753_v37 }
 0xb67   :  { %10081 = vmatpush.msra.mxu1 %v9758_v58 }
 0xb6c   :  { %10921 = vmatmul.msk.f32.vlgmr.msrb.gmra.mxu3 %vm8595_vm4, %v9742_v60  ;;  %10922 = vmatmul.msk.f32.vlgmr.msra.gmra.mxu0 %vm8595_vm4, %v9742_v60 }
 0xb6d   :  { %10927 = vmatmul.msk.f32.vlgmr.msrb.gmra.mxu1 %vm8595_vm4, %v9742_v60  ;;  %10932 = vmatmul.msk.f32.vlgmr.msrb.gmra.mxu2 %vm8595_vm4, %v9742_v60 }
 0xb6e   :  { %10041 = vmatpush.msrb.mxu3 %v9756_v1  ;;  %10061 = vmatpush.msra.mxu0 %v9757_v17 }
 0xb6f   :  { %10161 = vmatpush.msrb.mxu1 %v9762_v4 }
 0xb74   :  { %10925 = vmatmul.msk.f32.vlgmr.msra.gmra.mxu3 %vm8595_vm4, %v9742_v60  ;;  %10926 = vmatmul.msk.f32.vlgmr.msrb.gmra.mxu0 %vm8595_vm4, %v9742_v60 }
 0xb75   :  { %10931 = vmatmul.msk.f32.vlgmr.msra.gmra.mxu1 %vm8595_vm4, %v9742_v60  ;;  %10121 = vmatpush.msra.mxu3 %v9760_v33 }
 0xb76   :  { %10141 = vmatpush.msrb.mxu0 %v9761_v39 }
 0xb7c   :  { %10929 = vmatmul.msk.f32.vlgmr.msrb.gmra.mxu3 %vm8595_vm4, %v9742_v60  ;;  %10930 = vmatmul.msk.f32.vlgmr.msra.gmra.mxu0 %vm8595_vm4, %v9742_v60 }
 0xb7d   :  { %10935 = vmatmul.msk.f32.vlgmr.msrb.gmra.mxu1 %vm8595_vm4, %v9742_v60 }
 0xb84   :  { %10933 = vmatmul.msk.f32.vlgmr.msra.gmra.mxu3 %vm8595_vm4, %v9742_v60  ;;  %10934 = vmatmul.msk.f32.vlgmr.msrb.gmra.mxu0 %vm8595_vm4, %v9742_v60 }
 0xbd9   :  { %v9803_v10 = vpop.f32.mrf.mxu0 }
 0xbda   :  { %10167 = vst [vmem:[%s16733_s6 + $0x8] sm:$0xff] %v9803_v10  ;;  %v9863_v18 = vpop.f32.mrf.mxu1 }
 0xbdb   :  { %10170 = vst [vmem:[%s16733_s6 + $0x20] sm:$0xff] %v9863_v18 }
 0xbdf   :  { %v9783_v47 = vpop.f32.mrf.mxu3 }
 0xbe0   :  { %10166 = vst [vmem:[%s16733_s6] sm:$0xff] %v9783_v47  ;;  %v9943_v15 = vpop.f32.mrf.mxu2 }
 0xbe1   :  { %10174 = vst [vmem:[%s16733_s6 + $0x40] sm:$0xff] %v9943_v15  ;;  %v9843_v32 = vpop.f32.mrf.mxu0 }
 0xbe2   :  { %10169 = vst [vmem:[%s16733_s6 + $0x18] sm:$0xff] %v9843_v32  ;;  %v9923_v11 = vpop.f32.mrf.mxu1 }
 0xbe3   :  { %10173 = vst [vmem:[%s16733_s6 + $0x38] sm:$0xff] %v9923_v11 }
 0xbe7   :  { %v9823_v36 = vpop.f32.mrf.mxu3 }
 0xbe8   :  { %10168 = vst [vmem:[%s16733_s6 + $0x10] sm:$0xff] %v9823_v36  ;;  %v10023_v48 = vpop.f32.mrf.mxu2 }
 0xbe9   :  { %10178 = vst [vmem:[%s16733_s6 + $0x60] sm:$0xff] %v10023_v48  ;;  %v9903_v59 = vpop.f32.mrf.mxu0 }
 0xbea   :  { %10172 = vst [vmem:[%s16733_s6 + $0x30] sm:$0xff] %v9903_v59  ;;  %v10003_v42 = vpop.f32.mrf.mxu1 }
 0xbeb   :  { %10177 = vst [vmem:[%s16733_s6 + $0x58] sm:$0xff] %v10003_v42 }
 0xbef   :  { %v9883_v61 = vpop.f32.mrf.mxu3 }
 0xbf0   :  { %10171 = vst [vmem:[%s16733_s6 + $0x28] sm:$0xff] %v9883_v61  ;;  %v10103_v31 = vpop.f32.mrf.mxu2 }
 0xbf1   :  { %10182 = vst [vmem:[%s16733_s6 + $0x80] sm:$0xff] %v10103_v31  ;;  %v9983_v45 = vpop.f32.mrf.mxu0 }
 0xbf2   :  { %10176 = vst [vmem:[%s16733_s6 + $0x50] sm:$0xff] %v9983_v45  ;;  %v10083_v24 = vpop.f32.mrf.mxu1 }
 0xbf3   :  { %10181 = vst [vmem:[%s16733_s6 + $0x78] sm:$0xff] %v10083_v24 }
 0xbf7   :  { %v9963_v63 = vpop.f32.mrf.mxu3 }
 0xbf8   :  { %10175 = vst [vmem:[%s16733_s6 + $0x48] sm:$0xff] %v9963_v63 }
 0xbf9   :  { %v10063_v16 = vpop.f32.mrf.mxu0 }
 0xbfa   :  { %10180 = vst [vmem:[%s16733_s6 + $0x70] sm:$0xff] %v10063_v16  ;;  %v10163_v14 = vpop.f32.mrf.mxu1 }
 0xbfb   :  { %10185 = vst [vmem:[%s16733_s6 + $0x98] sm:$0xff] %v10163_v14 }
 0xbff   :  { %v10043_v22 = vpop.f32.mrf.mxu3 }
 0xc00   :  { %10179 = vst [vmem:[%s16733_s6 + $0x68] sm:$0xff] %v10043_v22 }
 0xc01   :  { %v10143_v25 = vpop.f32.mrf.mxu0 }
 0xc02   :  { %10184 = vst [vmem:[%s16733_s6 + $0x90] sm:$0xff] %v10143_v25 }
 0xc07   :  { %v10123_v8 = vpop.f32.mrf.mxu3 }
 0xc08   :  { %10183 = vst [vmem:[%s16733_s6 + $0x88] sm:$0xff] %v10123_v8 }

</bundles_post_ra>
